<compile_context>
chip_gen: v5e
topology: v5e:2x2
jax: 0.10.0
libtpu: 0.0.40
codegen_flags: <defaults>
</compile_context>

<pallas_src>
import jax
import jax.numpy as jnp
from jax.experimental import pallas as pl
from jax.experimental.pallas import tpu as pltpu

NSAMPLE = 32
BN_EPS = 1e-5


# ----------------------------------------------------------------------------
# Pallas kernel: shared-MLP (3 x [1x1 conv -> folded-BN -> ReLU]) + max over
# the `nsample` axis of each group.
# ----------------------------------------------------------------------------
def _make_sa_mlp_kernel(cin, tm, S, c_out, compute_dtype):
    small_first = cin <= 8  # SA1: K=3 -> VPU broadcast-FMAs, keep MXU free
    R = tm * S

    def kernel(x_ref, w1_ref, b1_ref, w2_ref, b2_ref, w3_ref, b3_ref, o_ref):
        # (tm, S, Cin) block -> flatten rows so each layer is one 2-D MXU matmul
        x = x_ref[...].reshape(R, cin)

        if small_first:
            # y = sum_c x[:, c] (outer) w1[c]  — three broadcast FMAs on the VPU.
            w1 = w1_ref[...].astype(jnp.float32)
            y = x[:, 0:1].astype(jnp.float32) * w1[0]
            for c in range(1, cin):
                y = y + x[:, c:c + 1].astype(jnp.float32) * w1[c]
        else:
            y = jnp.dot(x, w1_ref[...], preferred_element_type=jnp.float32)
        h = jnp.maximum(y + b1_ref[0], 0.0).astype(compute_dtype)

        y = jnp.dot(h, w2_ref[...], preferred_element_type=jnp.float32)
        h = jnp.maximum(y + b2_ref[0], 0.0).astype(compute_dtype)

        y = jnp.dot(h, w3_ref[...], preferred_element_type=jnp.float32)
        h = jnp.maximum(y + b3_ref[0], 0.0)  # keep final layer in f32

        # max-pool over the nsample axis of each group
        o_ref[...] = jnp.max(h.reshape(tm, S, c_out), axis=1)

    return kernel


def sa_mlp_pallas(grouped, layer_params, tm_max=128, compute_dtype=jnp.bfloat16):
    """grouped: (M, S, Cin) float32; returns (M, C_out) float32."""
    M, S, Cin = grouped.shape
    (w1, b1), (w2, b2), (w3, b3) = layer_params
    c_out = w3.shape[1]

    # --- Pad Cin to a lane-dense multiple of 128 (zero channels + zero weight
    #     rows).  Skip tiny Cin (SA1's Cin=3) — padding there would 40x the DMA.
    if Cin > 8 and Cin % 128 != 0:
        cin_p = ((Cin + 127) // 128) * 128
        grouped = jnp.pad(grouped, ((0, 0), (0, 0), (0, cin_p - Cin)))
        w1 = jnp.pad(w1, ((0, cin_p - w1.shape[0]), (0, 0)))
        Cin = cin_p

    # --- Row tile: multiple of 8, grid length >= 2 when possible (v7x megacore),
    #     capped at tm_max; pad M up instead of asserting divisibility.
    half = max(8, (M // 2) // 8 * 8)
    tm = max(8, min(tm_max, half))
    Mp = ((M + tm - 1) // tm) * tm
    if Mp != M:
        grouped = jnp.pad(grouped, ((0, Mp - M), (0, 0), (0, 0)))

    # --- bf16 storage / MXU inputs, f32 accumulation + elementwise (v5e-safe).
    grouped = grouped.astype(compute_dtype)
    w1c, w2c, w3c = (w.astype(compute_dtype) for w in (w1, w2, w3))
    b1c, b2c, b3c = (b.astype(jnp.float32) for b in (b1, b2, b3))

    kernel = _make_sa_mlp_kernel(Cin, tm, S, c_out, compute_dtype)
    grid_spec = pltpu.PrefetchScalarGridSpec(
        num_scalar_prefetch=0,
        grid=(Mp // tm,),
        in_specs=[
            pl.BlockSpec((tm, S, Cin), lambda i: (i, 0, 0)),
            pl.BlockSpec(w1c.shape, lambda i: (0, 0)),
            pl.BlockSpec(b1c.shape, lambda i: (0, 0)),
            pl.BlockSpec(w2c.shape, lambda i: (0, 0)),
            pl.BlockSpec(b2c.shape, lambda i: (0, 0)),
            pl.BlockSpec(w3c.shape, lambda i: (0, 0)),
            pl.BlockSpec(b3c.shape, lambda i: (0, 0)),
        ],
        out_specs=pl.BlockSpec((tm, c_out), lambda i: (i, 0)),
    )
    out = pl.pallas_call(
        kernel,
        out_shape=jax.ShapeDtypeStruct((Mp, c_out), jnp.float32),
        grid_spec=grid_spec,
        compiler_params=pltpu.CompilerParams(
            dimension_semantics=("parallel",),
            vmem_limit_bytes=48 * 1024 * 1024,  # headroom for tm<=128, safe on v7x 64 MiB
        ),
    )(grouped, w1c, b1c, w2c, b2c, w3c, b3c)
    return out[:M]


# ----------------------------------------------------------------------------
# Plain-JAX glue: sampling, ball query, grouping (irregular gathers).
# ----------------------------------------------------------------------------
def ball_query(radius, nsample, xyz, new_xyz):
    """CUDA ball_query semantics: first `nsample` in-radius points (original
    order), remaining slots padded with the first in-radius index.  If no point
    is in radius the slots degenerate to index 0 (same as the CUDA reference).
    xyz: (B,N,3), new_xyz: (B,M,3) -> idx (B,M,nsample) int32."""
    B, N, _ = xyz.shape
    M = new_xyz.shape[1]
    d2 = jnp.sum((new_xyz[:, :, None, :] - xyz[:, None, :, :]) ** 2, axis=-1)  # (B,M,N)
    mask = d2 < radius * radius
    order_key = jnp.where(mask, jnp.arange(N)[None, None, :], N)
    order = jnp.argsort(order_key, axis=-1, stable=True)                        # (B,M,N)
    valid = jnp.take_along_axis(mask, order, axis=-1)
    if N < nsample:  # fewer candidate points than nsample: pad with first index
        pad = nsample - N
        order = jnp.concatenate(
            [order, jnp.broadcast_to(order[:, :, :1], (B, M, pad))], axis=-1)
        valid = jnp.concatenate(
            [valid, jnp.zeros((B, M, pad), dtype=bool)], axis=-1)
    else:
        order = order[:, :, :nsample]
        valid = valid[:, :, :nsample]
    first = order[:, :, :1]
    return jnp.where(valid, order, first).astype(jnp.int32)


def group_points(points, idx):
    """points: (B,N,C), idx: (B,M,S) -> (B,M,S,C)."""
    B, _, C = points.shape
    _, M, S = idx.shape
    flat = jnp.take_along_axis(points, idx.reshape(B, M * S, 1), axis=1)
    return flat.reshape(B, M, S, C)


def sa_module(xyz, features, npoint, radius, nsample, layer_params, normalize_xyz=False):
    """xyz: (B,N,3), features: (B,N,C) or None (channels-last internally).
    Returns new_xyz (B,npoint,3), new_features (B,npoint,C_out), sample_idxs (B,npoint)."""
    B, N, _ = xyz.shape
    # TODO(synk): use_fps=True path (furthest point sampling) not implemented;
    # deterministic first-npoint sampling used instead.
    sample_idxs = jnp.broadcast_to(jnp.arange(npoint, dtype=jnp.int32)[None, :], (B, npoint))
    new_xyz = jnp.take_along_axis(xyz, sample_idxs[..., None], axis=1)          # (B,M,3)

    idx = ball_query(radius, nsample, xyz, new_xyz)                             # (B,M,S)
    grouped_xyz = group_points(xyz, idx) - new_xyz[:, :, None, :]               # (B,M,S,3)
    if normalize_xyz:
        grouped_xyz = grouped_xyz / radius

    if features is not None:
        grouped_feat = group_points(features, idx)                              # (B,M,S,C)
        grouped = jnp.concatenate([grouped_xyz, grouped_feat], axis=-1)         # use_xyz=True
    else:
        grouped = grouped_xyz

    B_, M, S, Cin = grouped.shape
    pooled = sa_mlp_pallas(grouped.reshape(B_ * M, S, Cin).astype(jnp.float32), layer_params)
    new_features = pooled.reshape(B, M, -1)
    return new_xyz, new_features, sample_idxs


def pointnet2_forward(pointcloud, numpoints, params):
    """pointcloud: (B, N, 3 + input_channels).  Mirrors Pointnet2.forward.
    Returns (xyz (B,np3,3), features (B,256,np3) [PyTorch NCW layout], sample_idxs (B,np3))."""
    xyz = pointcloud[..., 0:3]
    features = pointcloud[..., 3:] if pointcloud.shape[-1] > 3 else None        # channels-last
    radii = (0.3, 0.5, 0.7)
    for i in range(3):
        xyz, features, sample_idxs = sa_module(
            xyz, features, numpoints[i], radii[i], NSAMPLE, params[i])
    return xyz, jnp.transpose(features, (0, 2, 1)), sample_idxs


# ----------------------------------------------------------------------------
# Deterministic parameter init (Conv2d 1x1 weights with eval-mode BN folded in:
# gamma=1, beta=0, running_mean=0, running_var=1 — PyTorch defaults).
# ----------------------------------------------------------------------------
def init_params(key, input_channels=0):
    mlps = [
        [input_channels + 3, 64, 64, 128],   # SA1 (use_xyz adds 3)
        [128 + 3, 128, 128, 256],            # SA2
        [256 + 3, 256, 256, 256],            # SA3
    ]
    params = []
    for mlp in mlps:
        layer = []
        for cin, cout in zip(mlp[:-1], mlp[1:]):
            key, wk = jax.random.split(key)
            w = jax.random.normal(wk, (cin, cout), jnp.float32) * (1.0 / jnp.sqrt(cin))
            scale = 1.0 / jnp.sqrt(1.0 + BN_EPS)       # gamma / sqrt(var + eps)
            w_eff = w * scale
            b_eff = jnp.zeros((1, cout), jnp.float32)  # beta - mean*scale = 0
            layer.append((w_eff, b_eff))
        params.append(tuple(layer))
    return params


# Pure-JAX reference of the kernel hot path (same bf16-input / f32-accumulate
# numerics as the Pallas kernel), for a correctness check.
def _sa_mlp_ref(grouped, layer_params):
    h = grouped.astype(jnp.bfloat16)
    for li, (w, b) in enumerate(layer_params):
        y = jnp.einsum('msc,cd->msd', h, w.astype(jnp.bfloat16),
                       preferred_element_type=jnp.float32)
        a = jnp.maximum(y + b[0], 0.0)
        h = a if li == len(layer_params) - 1 else a.astype(jnp.bfloat16)
    return jnp.max(h, axis=1)


if __name__ == "__main__":
    key = jax.random.PRNGKey(0)
    B, N, input_channels = 2, 64, 0
    numpoints = [32, 16, 8]

    pkey, ckey = jax.random.split(key)
    pointcloud = jax.random.uniform(ckey, (B, N, 3 + input_channels), jnp.float32)
    params = init_params(pkey, input_channels)

    run = jax.jit(lambda pc: pointnet2_forward(pc, numpoints, params))
    new_xyz, new_feat, sample_idxs = jax.block_until_ready(run(pointcloud))

    # sanity: full forward vs pure-JAX reference chain (same glue, ref MLP)
    xyz_c, feat_c = pointcloud[..., :3], None
    radii = (0.3, 0.5, 0.7)
    for i in range(3):
        M = numpoints[i]
        sidx = jnp.broadcast_to(jnp.arange(M, dtype=jnp.int32)[None, :], (B, M))
        nx = jnp.take_along_axis(xyz_c, sidx[..., None], axis=1)
        gidx = ball_query(radii[i], NSAMPLE, xyz_c, nx)
        gx = group_points(xyz_c, gidx) - nx[:, :, None, :]
        grouped = gx if feat_c is None else jnp.concatenate(
            [gx, group_points(feat_c, gidx)], axis=-1)
        flat = grouped.reshape(B * M, NSAMPLE, -1).astype(jnp.float32)
        ref = _sa_mlp_ref(flat, params[i]).reshape(B, M, -1)
        xyz_c, feat_c = nx, ref

    assert new_xyz.shape == (B, numpoints[-1], 3)
    assert new_feat.shape == (B, 256, numpoints[-1])
    assert sample_idxs.shape == (B, numpoints[-1])
    got = jnp.transpose(new_feat, (0, 2, 1))
    assert jnp.allclose(got, feat_c, atol=2e-2, rtol=2e-2), float(jnp.max(jnp.abs(got - feat_c)))
    print("KERNEL_OK")
</pallas_src>

<mosaic_0001>
module attributes {stable_mosaic.version = 11 : i64} {
  func.func @kernel(%arg0: i32, %arg1: memref<32x32x3xbf16, #tpu.memory_space<vmem>>, %arg2: memref<3x64xbf16, #tpu.memory_space<vmem>>, %arg3: memref<1x64xf32, #tpu.memory_space<vmem>>, %arg4: memref<64x64xbf16, #tpu.memory_space<vmem>>, %arg5: memref<1x64xf32, #tpu.memory_space<vmem>>, %arg6: memref<64x128xbf16, #tpu.memory_space<vmem>>, %arg7: memref<1x128xf32, #tpu.memory_space<vmem>>, %arg8: memref<32x128xf32, #tpu.memory_space<vmem>>) attributes {dimension_semantics = [#tpu.dimension_semantics<parallel>], iteration_bounds = array<i64: 2>, scalar_prefetch = 0 : i64, scratch_operands = 0 : i64, tpu.core_type = #tpu.core_type<tc>, window_params = [{transform_indices = @transform_0, window_bounds = array<i64: 32, 32, 3>}, {pipeline_mode = #tpu.pipeline_mode<synchronous>, transform_indices = @transform_1, window_bounds = array<i64: 3, 64>}, {pipeline_mode = #tpu.pipeline_mode<synchronous>, transform_indices = @transform_2, window_bounds = array<i64: 1, 64>}, {pipeline_mode = #tpu.pipeline_mode<synchronous>, transform_indices = @transform_3, window_bounds = array<i64: 64, 64>}, {pipeline_mode = #tpu.pipeline_mode<synchronous>, transform_indices = @transform_4, window_bounds = array<i64: 1, 64>}, {pipeline_mode = #tpu.pipeline_mode<synchronous>, transform_indices = @transform_5, window_bounds = array<i64: 64, 128>}, {pipeline_mode = #tpu.pipeline_mode<synchronous>, transform_indices = @transform_6, window_bounds = array<i64: 1, 128>}, {transform_indices = @transform_7, window_bounds = array<i64: 32, 128>}]} {
    %c0 = arith.constant 0 : index
    %c0_0 = arith.constant 0 : index
    %c0_1 = arith.constant 0 : index
    %0 = vector.load %arg1[%c0, %c0_0, %c0_1] : memref<32x32x3xbf16, #tpu.memory_space<vmem>>, vector<32x32x3xbf16>
    %1 = vector.shape_cast %0 : vector<32x32x3xbf16> to vector<1024x3xbf16>
    %c0_2 = arith.constant 0 : index
    %c0_3 = arith.constant 0 : index
    %2 = vector.load %arg2[%c0_2, %c0_3] : memref<3x64xbf16, #tpu.memory_space<vmem>>, vector<3x64xbf16>
    %3 = arith.extf %2 : vector<3x64xbf16> to vector<3x64xf32>
    %4 = vector.extract_strided_slice %1 {offsets = [0, 0], sizes = [1024, 1], strides = [1, 1]} : vector<1024x3xbf16> to vector<1024x1xbf16>
    %5 = arith.extf %4 : vector<1024x1xbf16> to vector<1024x1xf32>
    %6 = vector.extract_strided_slice %3 {offsets = [0, 0], sizes = [1, 64], strides = [1, 1]} : vector<3x64xf32> to vector<1x64xf32>
    %7 = vector.shape_cast %6 : vector<1x64xf32> to vector<64xf32>
    %8 = vector.shape_cast %7 : vector<64xf32> to vector<1x64xf32>
    %9 = vector.broadcast %5 : vector<1024x1xf32> to vector<1024x64xf32>
    %10 = vector.broadcast %8 : vector<1x64xf32> to vector<1024x64xf32>
    %11 = arith.mulf %9, %10 : vector<1024x64xf32>
    %12 = vector.extract_strided_slice %1 {offsets = [0, 1], sizes = [1024, 1], strides = [1, 1]} : vector<1024x3xbf16> to vector<1024x1xbf16>
    %13 = arith.extf %12 : vector<1024x1xbf16> to vector<1024x1xf32>
    %14 = vector.extract_strided_slice %3 {offsets = [1, 0], sizes = [1, 64], strides = [1, 1]} : vector<3x64xf32> to vector<1x64xf32>
    %15 = vector.shape_cast %14 : vector<1x64xf32> to vector<64xf32>
    %16 = vector.shape_cast %15 : vector<64xf32> to vector<1x64xf32>
    %17 = vector.broadcast %13 : vector<1024x1xf32> to vector<1024x64xf32>
    %18 = vector.broadcast %16 : vector<1x64xf32> to vector<1024x64xf32>
    %19 = arith.mulf %17, %18 : vector<1024x64xf32>
    %20 = arith.addf %11, %19 : vector<1024x64xf32>
    %21 = vector.extract_strided_slice %1 {offsets = [0, 2], sizes = [1024, 1], strides = [1, 1]} : vector<1024x3xbf16> to vector<1024x1xbf16>
    %22 = arith.extf %21 : vector<1024x1xbf16> to vector<1024x1xf32>
    %23 = vector.extract_strided_slice %3 {offsets = [2, 0], sizes = [1, 64], strides = [1, 1]} : vector<3x64xf32> to vector<1x64xf32>
    %24 = vector.shape_cast %23 : vector<1x64xf32> to vector<64xf32>
    %25 = vector.shape_cast %24 : vector<64xf32> to vector<1x64xf32>
    %26 = vector.broadcast %22 : vector<1024x1xf32> to vector<1024x64xf32>
    %27 = vector.broadcast %25 : vector<1x64xf32> to vector<1024x64xf32>
    %28 = arith.mulf %26, %27 : vector<1024x64xf32>
    %29 = arith.addf %20, %28 : vector<1024x64xf32>
    %c0_4 = arith.constant 0 : index
    %c0_5 = arith.constant 0 : index
    %30 = vector.load %arg3[%c0_4, %c0_5] : memref<1x64xf32, #tpu.memory_space<vmem>>, vector<1x64xf32>
    %31 = vector.shape_cast %30 : vector<1x64xf32> to vector<64xf32>
    %32 = vector.shape_cast %31 : vector<64xf32> to vector<1x64xf32>
    %33 = vector.broadcast %32 : vector<1x64xf32> to vector<1024x64xf32>
    %34 = arith.addf %29, %33 : vector<1024x64xf32>
    %cst = arith.constant 0.000000e+00 : f32
    %35 = vector.broadcast %cst : f32 to vector<1024x64xf32>
    %36 = arith.maximumf %34, %35 : vector<1024x64xf32>
    %37 = arith.truncf %36 : vector<1024x64xf32> to vector<1024x64xbf16>
    %c0_6 = arith.constant 0 : index
    %c0_7 = arith.constant 0 : index
    %38 = vector.load %arg4[%c0_6, %c0_7] : memref<64x64xbf16, #tpu.memory_space<vmem>>, vector<64x64xbf16>
    %cst_8 = arith.constant dense<0.000000e+00> : vector<1024x64xf32>
    %39 = tpu.matmul %37, %38, %cst_8 {dimension_numbers = #tpu.dot_dimension_numbers<[1], [0], [0], [1], [0, 0, 1, 1], [], []>} : vector<1024x64xbf16>, vector<64x64xbf16>, vector<1024x64xf32> -> vector<1024x64xf32>
    %c0_9 = arith.constant 0 : index
    %c0_10 = arith.constant 0 : index
    %40 = vector.load %arg5[%c0_9, %c0_10] : memref<1x64xf32, #tpu.memory_space<vmem>>, vector<1x64xf32>
    %41 = vector.shape_cast %40 : vector<1x64xf32> to vector<64xf32>
    %42 = vector.shape_cast %41 : vector<64xf32> to vector<1x64xf32>
    %43 = vector.broadcast %42 : vector<1x64xf32> to vector<1024x64xf32>
    %44 = arith.addf %39, %43 : vector<1024x64xf32>
    %cst_11 = arith.constant 0.000000e+00 : f32
    %45 = vector.broadcast %cst_11 : f32 to vector<1024x64xf32>
    %46 = arith.maximumf %44, %45 : vector<1024x64xf32>
    %47 = arith.truncf %46 : vector<1024x64xf32> to vector<1024x64xbf16>
    %c0_12 = arith.constant 0 : index
    %c0_13 = arith.constant 0 : index
    %48 = vector.load %arg6[%c0_12, %c0_13] : memref<64x128xbf16, #tpu.memory_space<vmem>>, vector<64x128xbf16>
    %cst_14 = arith.constant dense<0.000000e+00> : vector<1024x128xf32>
    %49 = tpu.matmul %47, %48, %cst_14 {dimension_numbers = #tpu.dot_dimension_numbers<[1], [0], [0], [1], [0, 0, 1, 1], [], []>} : vector<1024x64xbf16>, vector<64x128xbf16>, vector<1024x128xf32> -> vector<1024x128xf32>
    %c0_15 = arith.constant 0 : index
    %c0_16 = arith.constant 0 : index
    %50 = vector.load %arg7[%c0_15, %c0_16] : memref<1x128xf32, #tpu.memory_space<vmem>>, vector<1x128xf32>
    %51 = vector.shape_cast %50 : vector<1x128xf32> to vector<128xf32>
    %52 = vector.shape_cast %51 : vector<128xf32> to vector<1x128xf32>
    %53 = vector.broadcast %52 : vector<1x128xf32> to vector<1024x128xf32>
    %54 = arith.addf %49, %53 : vector<1024x128xf32>
    %cst_17 = arith.constant 0.000000e+00 : f32
    %55 = vector.broadcast %cst_17 : f32 to vector<1024x128xf32>
    %56 = arith.maximumf %54, %55 : vector<1024x128xf32>
    %57 = vector.shape_cast %56 : vector<1024x128xf32> to vector<32x32x128xf32>
    %cst_18 = arith.constant dense<0xFF800000> : vector<32x128xf32>
    %58 = vector.multi_reduction <maximumf>, %57, %cst_18 [1] : vector<32x32x128xf32> to vector<32x128xf32>
    %c0_19 = arith.constant 0 : index
    %c0_20 = arith.constant 0 : index
    %59 = vector.load %arg8[%c0_19, %c0_20] : memref<32x128xf32, #tpu.memory_space<vmem>>, vector<32x128xf32>
    tpu.vector_store %arg8[%c0_19, %c0_20], %58 {strides = array<i32>} : memref<32x128xf32, #tpu.memory_space<vmem>>, vector<32x128xf32>,
    return
  }
  func.func @transform_0(%arg0: i32) -> (i32, i32, i32) {
    %c0_i32 = arith.constant 0 : i32
    %c0_i32_0 = arith.constant 0 : i32
    %c0_i32_1 = arith.constant 0 : i32
    return %arg0, %c0_i32, %c0_i32_0 : i32, i32, i32
  }
  func.func @transform_1(%arg0: i32) -> (i32, i32) {
    %c0_i32 = arith.constant 0 : i32
    %c0_i32_0 = arith.constant 0 : i32
    %c0_i32_1 = arith.constant 0 : i32
    return %c0_i32, %c0_i32_0 : i32, i32
  }
  func.func @transform_2(%arg0: i32) -> (i32, i32) {
    %c0_i32 = arith.constant 0 : i32
    %c0_i32_0 = arith.constant 0 : i32
    %c0_i32_1 = arith.constant 0 : i32
    return %c0_i32, %c0_i32_0 : i32, i32
  }
  func.func @transform_3(%arg0: i32) -> (i32, i32) {
    %c0_i32 = arith.constant 0 : i32
    %c0_i32_0 = arith.constant 0 : i32
    %c0_i32_1 = arith.constant 0 : i32
    return %c0_i32, %c0_i32_0 : i32, i32
  }
  func.func @transform_4(%arg0: i32) -> (i32, i32) {
    %c0_i32 = arith.constant 0 : i32
    %c0_i32_0 = arith.constant 0 : i32
    %c0_i32_1 = arith.constant 0 : i32
    return %c0_i32, %c0_i32_0 : i32, i32
  }
  func.func @transform_5(%arg0: i32) -> (i32, i32) {
    %c0_i32 = arith.constant 0 : i32
    %c0_i32_0 = arith.constant 0 : i32
    %c0_i32_1 = arith.constant 0 : i32
    return %c0_i32, %c0_i32_0 : i32, i32
  }
  func.func @transform_6(%arg0: i32) -> (i32, i32) {
    %c0_i32 = arith.constant 0 : i32
    %c0_i32_0 = arith.constant 0 : i32
    %c0_i32_1 = arith.constant 0 : i32
    return %c0_i32, %c0_i32_0 : i32, i32
  }
  func.func @transform_7(%arg0: i32) -> (i32, i32) {
    %c0_i32 = arith.constant 0 : i32
    %c0_i32_0 = arith.constant 0 : i32
    return %arg0, %c0_i32 : i32, i32
  }
}

module attributes {stable_mosaic.version = 11 : i64} {
  func.func @kernel(%arg0: i32, %arg1: memref<16x32x256xbf16, #tpu.memory_space<vmem>>, %arg2: memref<256x128xbf16, #tpu.memory_space<vmem>>, %arg3: memref<1x128xf32, #tpu.memory_space<vmem>>, %arg4: memref<128x128xbf16, #tpu.memory_space<vmem>>, %arg5: memref<1x128xf32, #tpu.memory_space<vmem>>, %arg6: memref<128x256xbf16, #tpu.memory_space<vmem>>, %arg7: memref<1x256xf32, #tpu.memory_space<vmem>>, %arg8: memref<16x256xf32, #tpu.memory_space<vmem>>) attributes {dimension_semantics = [#tpu.dimension_semantics<parallel>], iteration_bounds = array<i64: 2>, scalar_prefetch = 0 : i64, scratch_operands = 0 : i64, tpu.core_type = #tpu.core_type<tc>, window_params = [{transform_indices = @transform_0, window_bounds = array<i64: 16, 32, 256>}, {pipeline_mode = #tpu.pipeline_mode<synchronous>, transform_indices = @transform_1, window_bounds = array<i64: 256, 128>}, {pipeline_mode = #tpu.pipeline_mode<synchronous>, transform_indices = @transform_2, window_bounds = array<i64: 1, 128>}, {pipeline_mode = #tpu.pipeline_mode<synchronous>, transform_indices = @transform_3, window_bounds = array<i64: 128, 128>}, {pipeline_mode = #tpu.pipeline_mode<synchronous>, transform_indices = @transform_4, window_bounds = array<i64: 1, 128>}, {pipeline_mode = #tpu.pipeline_mode<synchronous>, transform_indices = @transform_5, window_bounds = array<i64: 128, 256>}, {pipeline_mode = #tpu.pipeline_mode<synchronous>, transform_indices = @transform_6, window_bounds = array<i64: 1, 256>}, {transform_indices = @transform_7, window_bounds = array<i64: 16, 256>}]} {
    %c0 = arith.constant 0 : index
    %c0_0 = arith.constant 0 : index
    %c0_1 = arith.constant 0 : index
    %0 = vector.load %arg1[%c0, %c0_0, %c0_1] : memref<16x32x256xbf16, #tpu.memory_space<vmem>>, vector<16x32x256xbf16>
    %1 = vector.shape_cast %0 : vector<16x32x256xbf16> to vector<512x256xbf16>
    %c0_2 = arith.constant 0 : index
    %c0_3 = arith.constant 0 : index
    %2 = vector.load %arg2[%c0_2, %c0_3] : memref<256x128xbf16, #tpu.memory_space<vmem>>, vector<256x128xbf16>
    %cst = arith.constant dense<0.000000e+00> : vector<512x128xf32>
    %3 = tpu.matmul %1, %2, %cst {dimension_numbers = #tpu.dot_dimension_numbers<[1], [0], [0], [1], [0, 0, 1, 1], [], []>} : vector<512x256xbf16>, vector<256x128xbf16>, vector<512x128xf32> -> vector<512x128xf32>
    %c0_4 = arith.constant 0 : index
    %c0_5 = arith.constant 0 : index
    %4 = vector.load %arg3[%c0_4, %c0_5] : memref<1x128xf32, #tpu.memory_space<vmem>>, vector<1x128xf32>
    %5 = vector.shape_cast %4 : vector<1x128xf32> to vector<128xf32>
    %6 = vector.shape_cast %5 : vector<128xf32> to vector<1x128xf32>
    %7 = vector.broadcast %6 : vector<1x128xf32> to vector<512x128xf32>
    %8 = arith.addf %3, %7 : vector<512x128xf32>
    %cst_6 = arith.constant 0.000000e+00 : f32
    %9 = vector.broadcast %cst_6 : f32 to vector<512x128xf32>
    %10 = arith.maximumf %8, %9 : vector<512x128xf32>
    %11 = arith.truncf %10 : vector<512x128xf32> to vector<512x128xbf16>
    %c0_7 = arith.constant 0 : index
    %c0_8 = arith.constant 0 : index
    %12 = vector.load %arg4[%c0_7, %c0_8] : memref<128x128xbf16, #tpu.memory_space<vmem>>, vector<128x128xbf16>
    %cst_9 = arith.constant dense<0.000000e+00> : vector<512x128xf32>
    %13 = tpu.matmul %11, %12, %cst_9 {dimension_numbers = #tpu.dot_dimension_numbers<[1], [0], [0], [1], [0, 0, 1, 1], [], []>} : vector<512x128xbf16>, vector<128x128xbf16>, vector<512x128xf32> -> vector<512x128xf32>
    %c0_10 = arith.constant 0 : index
    %c0_11 = arith.constant 0 : index
    %14 = vector.load %arg5[%c0_10, %c0_11] : memref<1x128xf32, #tpu.memory_space<vmem>>, vector<1x128xf32>
    %15 = vector.shape_cast %14 : vector<1x128xf32> to vector<128xf32>
    %16 = vector.shape_cast %15 : vector<128xf32> to vector<1x128xf32>
    %17 = vector.broadcast %16 : vector<1x128xf32> to vector<512x128xf32>
    %18 = arith.addf %13, %17 : vector<512x128xf32>
    %cst_12 = arith.constant 0.000000e+00 : f32
    %19 = vector.broadcast %cst_12 : f32 to vector<512x128xf32>
    %20 = arith.maximumf %18, %19 : vector<512x128xf32>
    %21 = arith.truncf %20 : vector<512x128xf32> to vector<512x128xbf16>
    %c0_13 = arith.constant 0 : index
    %c0_14 = arith.constant 0 : index
    %22 = vector.load %arg6[%c0_13, %c0_14] : memref<128x256xbf16, #tpu.memory_space<vmem>>, vector<128x256xbf16>
    %cst_15 = arith.constant dense<0.000000e+00> : vector<512x256xf32>
    %23 = tpu.matmul %21, %22, %cst_15 {dimension_numbers = #tpu.dot_dimension_numbers<[1], [0], [0], [1], [0, 0, 1, 1], [], []>} : vector<512x128xbf16>, vector<128x256xbf16>, vector<512x256xf32> -> vector<512x256xf32>
    %c0_16 = arith.constant 0 : index
    %c0_17 = arith.constant 0 : index
    %24 = vector.load %arg7[%c0_16, %c0_17] : memref<1x256xf32, #tpu.memory_space<vmem>>, vector<1x256xf32>
    %25 = vector.shape_cast %24 : vector<1x256xf32> to vector<256xf32>
    %26 = vector.shape_cast %25 : vector<256xf32> to vector<1x256xf32>
    %27 = vector.broadcast %26 : vector<1x256xf32> to vector<512x256xf32>
    %28 = arith.addf %23, %27 : vector<512x256xf32>
    %cst_18 = arith.constant 0.000000e+00 : f32
    %29 = vector.broadcast %cst_18 : f32 to vector<512x256xf32>
    %30 = arith.maximumf %28, %29 : vector<512x256xf32>
    %31 = vector.shape_cast %30 : vector<512x256xf32> to vector<16x32x256xf32>
    %cst_19 = arith.constant dense<0xFF800000> : vector<16x256xf32>
    %32 = vector.multi_reduction <maximumf>, %31, %cst_19 [1] : vector<16x32x256xf32> to vector<16x256xf32>
    %c0_20 = arith.constant 0 : index
    %c0_21 = arith.constant 0 : index
    %33 = vector.load %arg8[%c0_20, %c0_21] : memref<16x256xf32, #tpu.memory_space<vmem>>, vector<16x256xf32>
    tpu.vector_store %arg8[%c0_20, %c0_21], %32 {strides = array<i32>} : memref<16x256xf32, #tpu.memory_space<vmem>>, vector<16x256xf32>,
    return
  }
  func.func @transform_0(%arg0: i32) -> (i32, i32, i32) {
    %c0_i32 = arith.constant 0 : i32
    %c0_i32_0 = arith.constant 0 : i32
    %c0_i32_1 = arith.constant 0 : i32
    return %arg0, %c0_i32, %c0_i32_0 : i32, i32, i32
  }
  func.func @transform_1(%arg0: i32) -> (i32, i32) {
    %c0_i32 = arith.constant 0 : i32
    %c0_i32_0 = arith.constant 0 : i32
    %c0_i32_1 = arith.constant 0 : i32
    return %c0_i32, %c0_i32_0 : i32, i32
  }
  func.func @transform_2(%arg0: i32) -> (i32, i32) {
    %c0_i32 = arith.constant 0 : i32
    %c0_i32_0 = arith.constant 0 : i32
    %c0_i32_1 = arith.constant 0 : i32
    return %c0_i32, %c0_i32_0 : i32, i32
  }
  func.func @transform_3(%arg0: i32) -> (i32, i32) {
    %c0_i32 = arith.constant 0 : i32
    %c0_i32_0 = arith.constant 0 : i32
    %c0_i32_1 = arith.constant 0 : i32
    return %c0_i32, %c0_i32_0 : i32, i32
  }
  func.func @transform_4(%arg0: i32) -> (i32, i32) {
    %c0_i32 = arith.constant 0 : i32
    %c0_i32_0 = arith.constant 0 : i32
    %c0_i32_1 = arith.constant 0 : i32
    return %c0_i32, %c0_i32_0 : i32, i32
  }
  func.func @transform_5(%arg0: i32) -> (i32, i32) {
    %c0_i32 = arith.constant 0 : i32
    %c0_i32_0 = arith.constant 0 : i32
    %c0_i32_1 = arith.constant 0 : i32
    return %c0_i32, %c0_i32_0 : i32, i32
  }
  func.func @transform_6(%arg0: i32) -> (i32, i32) {
    %c0_i32 = arith.constant 0 : i32
    %c0_i32_0 = arith.constant 0 : i32
    %c0_i32_1 = arith.constant 0 : i32
    return %c0_i32, %c0_i32_0 : i32, i32
  }
  func.func @transform_7(%arg0: i32) -> (i32, i32) {
    %c0_i32 = arith.constant 0 : i32
    %c0_i32_0 = arith.constant 0 : i32
    return %arg0, %c0_i32 : i32, i32
  }
}

module attributes {stable_mosaic.version = 11 : i64} {
  func.func @kernel(%arg0: i32, %arg1: memref<8x32x384xbf16, #tpu.memory_space<vmem>>, %arg2: memref<384x256xbf16, #tpu.memory_space<vmem>>, %arg3: memref<1x256xf32, #tpu.memory_space<vmem>>, %arg4: memref<256x256xbf16, #tpu.memory_space<vmem>>, %arg5: memref<1x256xf32, #tpu.memory_space<vmem>>, %arg6: memref<256x256xbf16, #tpu.memory_space<vmem>>, %arg7: memref<1x256xf32, #tpu.memory_space<vmem>>, %arg8: memref<8x256xf32, #tpu.memory_space<vmem>>) attributes {dimension_semantics = [#tpu.dimension_semantics<parallel>], iteration_bounds = array<i64: 2>, scalar_prefetch = 0 : i64, scratch_operands = 0 : i64, tpu.core_type = #tpu.core_type<tc>, window_params = [{transform_indices = @transform_0, window_bounds = array<i64: 8, 32, 384>}, {pipeline_mode = #tpu.pipeline_mode<synchronous>, transform_indices = @transform_1, window_bounds = array<i64: 384, 256>}, {pipeline_mode = #tpu.pipeline_mode<synchronous>, transform_indices = @transform_2, window_bounds = array<i64: 1, 256>}, {pipeline_mode = #tpu.pipeline_mode<synchronous>, transform_indices = @transform_3, window_bounds = array<i64: 256, 256>}, {pipeline_mode = #tpu.pipeline_mode<synchronous>, transform_indices = @transform_4, window_bounds = array<i64: 1, 256>}, {pipeline_mode = #tpu.pipeline_mode<synchronous>, transform_indices = @transform_5, window_bounds = array<i64: 256, 256>}, {pipeline_mode = #tpu.pipeline_mode<synchronous>, transform_indices = @transform_6, window_bounds = array<i64: 1, 256>}, {transform_indices = @transform_7, window_bounds = array<i64: 8, 256>}]} {
    %c0 = arith.constant 0 : index
    %c0_0 = arith.constant 0 : index
    %c0_1 = arith.constant 0 : index
    %0 = vector.load %arg1[%c0, %c0_0, %c0_1] : memref<8x32x384xbf16, #tpu.memory_space<vmem>>, vector<8x32x384xbf16>
    %1 = vector.shape_cast %0 : vector<8x32x384xbf16> to vector<256x384xbf16>
    %c0_2 = arith.constant 0 : index
    %c0_3 = arith.constant 0 : index
    %2 = vector.load %arg2[%c0_2, %c0_3] : memref<384x256xbf16, #tpu.memory_space<vmem>>, vector<384x256xbf16>
    %cst = arith.constant dense<0.000000e+00> : vector<256x256xf32>
    %3 = tpu.matmul %1, %2, %cst {dimension_numbers = #tpu.dot_dimension_numbers<[1], [0], [0], [1], [0, 0, 1, 1], [], []>} : vector<256x384xbf16>, vector<384x256xbf16>, vector<256x256xf32> -> vector<256x256xf32>
    %c0_4 = arith.constant 0 : index
    %c0_5 = arith.constant 0 : index
    %4 = vector.load %arg3[%c0_4, %c0_5] : memref<1x256xf32, #tpu.memory_space<vmem>>, vector<1x256xf32>
    %5 = vector.shape_cast %4 : vector<1x256xf32> to vector<256xf32>
    %6 = vector.shape_cast %5 : vector<256xf32> to vector<1x256xf32>
    %7 = vector.broadcast %6 : vector<1x256xf32> to vector<256x256xf32>
    %8 = arith.addf %3, %7 : vector<256x256xf32>
    %cst_6 = arith.constant 0.000000e+00 : f32
    %9 = vector.broadcast %cst_6 : f32 to vector<256x256xf32>
    %10 = arith.maximumf %8, %9 : vector<256x256xf32>
    %11 = arith.truncf %10 : vector<256x256xf32> to vector<256x256xbf16>
    %c0_7 = arith.constant 0 : index
    %c0_8 = arith.constant 0 : index
    %12 = vector.load %arg4[%c0_7, %c0_8] : memref<256x256xbf16, #tpu.memory_space<vmem>>, vector<256x256xbf16>
    %cst_9 = arith.constant dense<0.000000e+00> : vector<256x256xf32>
    %13 = tpu.matmul %11, %12, %cst_9 {dimension_numbers = #tpu.dot_dimension_numbers<[1], [0], [0], [1], [0, 0, 1, 1], [], []>} : vector<256x256xbf16>, vector<256x256xbf16>, vector<256x256xf32> -> vector<256x256xf32>
    %c0_10 = arith.constant 0 : index
    %c0_11 = arith.constant 0 : index
    %14 = vector.load %arg5[%c0_10, %c0_11] : memref<1x256xf32, #tpu.memory_space<vmem>>, vector<1x256xf32>
    %15 = vector.shape_cast %14 : vector<1x256xf32> to vector<256xf32>
    %16 = vector.shape_cast %15 : vector<256xf32> to vector<1x256xf32>
    %17 = vector.broadcast %16 : vector<1x256xf32> to vector<256x256xf32>
    %18 = arith.addf %13, %17 : vector<256x256xf32>
    %cst_12 = arith.constant 0.000000e+00 : f32
    %19 = vector.broadcast %cst_12 : f32 to vector<256x256xf32>
    %20 = arith.maximumf %18, %19 : vector<256x256xf32>
    %21 = arith.truncf %20 : vector<256x256xf32> to vector<256x256xbf16>
    %c0_13 = arith.constant 0 : index
    %c0_14 = arith.constant 0 : index
    %22 = vector.load %arg6[%c0_13, %c0_14] : memref<256x256xbf16, #tpu.memory_space<vmem>>, vector<256x256xbf16>
    %cst_15 = arith.constant dense<0.000000e+00> : vector<256x256xf32>
    %23 = tpu.matmul %21, %22, %cst_15 {dimension_numbers = #tpu.dot_dimension_numbers<[1], [0], [0], [1], [0, 0, 1, 1], [], []>} : vector<256x256xbf16>, vector<256x256xbf16>, vector<256x256xf32> -> vector<256x256xf32>
    %c0_16 = arith.constant 0 : index
    %c0_17 = arith.constant 0 : index
    %24 = vector.load %arg7[%c0_16, %c0_17] : memref<1x256xf32, #tpu.memory_space<vmem>>, vector<1x256xf32>
    %25 = vector.shape_cast %24 : vector<1x256xf32> to vector<256xf32>
    %26 = vector.shape_cast %25 : vector<256xf32> to vector<1x256xf32>
    %27 = vector.broadcast %26 : vector<1x256xf32> to vector<256x256xf32>
    %28 = arith.addf %23, %27 : vector<256x256xf32>
    %cst_18 = arith.constant 0.000000e+00 : f32
    %29 = vector.broadcast %cst_18 : f32 to vector<256x256xf32>
    %30 = arith.maximumf %28, %29 : vector<256x256xf32>
    %31 = vector.shape_cast %30 : vector<256x256xf32> to vector<8x32x256xf32>
    %cst_19 = arith.constant dense<0xFF800000> : vector<8x256xf32>
    %32 = vector.multi_reduction <maximumf>, %31, %cst_19 [1] : vector<8x32x256xf32> to vector<8x256xf32>
    %c0_20 = arith.constant 0 : index
    %c0_21 = arith.constant 0 : index
    %33 = vector.load %arg8[%c0_20, %c0_21] : memref<8x256xf32, #tpu.memory_space<vmem>>, vector<8x256xf32>
    tpu.vector_store %arg8[%c0_20, %c0_21], %32 {strides = array<i32>} : memref<8x256xf32, #tpu.memory_space<vmem>>, vector<8x256xf32>,
    return
  }
  func.func @transform_0(%arg0: i32) -> (i32, i32, i32) {
    %c0_i32 = arith.constant 0 : i32
    %c0_i32_0 = arith.constant 0 : i32
    %c0_i32_1 = arith.constant 0 : i32
    return %arg0, %c0_i32, %c0_i32_0 : i32, i32, i32
  }
  func.func @transform_1(%arg0: i32) -> (i32, i32) {
    %c0_i32 = arith.constant 0 : i32
    %c0_i32_0 = arith.constant 0 : i32
    %c0_i32_1 = arith.constant 0 : i32
    return %c0_i32, %c0_i32_0 : i32, i32
  }
  func.func @transform_2(%arg0: i32) -> (i32, i32) {
    %c0_i32 = arith.constant 0 : i32
    %c0_i32_0 = arith.constant 0 : i32
    %c0_i32_1 = arith.constant 0 : i32
    return %c0_i32, %c0_i32_0 : i32, i32
  }
  func.func @transform_3(%arg0: i32) -> (i32, i32) {
    %c0_i32 = arith.constant 0 : i32
    %c0_i32_0 = arith.constant 0 : i32
    %c0_i32_1 = arith.constant 0 : i32
    return %c0_i32, %c0_i32_0 : i32, i32
  }
  func.func @transform_4(%arg0: i32) -> (i32, i32) {
    %c0_i32 = arith.constant 0 : i32
    %c0_i32_0 = arith.constant 0 : i32
    %c0_i32_1 = arith.constant 0 : i32
    return %c0_i32, %c0_i32_0 : i32, i32
  }
  func.func @transform_5(%arg0: i32) -> (i32, i32) {
    %c0_i32 = arith.constant 0 : i32
    %c0_i32_0 = arith.constant 0 : i32
    %c0_i32_1 = arith.constant 0 : i32
    return %c0_i32, %c0_i32_0 : i32, i32
  }
  func.func @transform_6(%arg0: i32) -> (i32, i32) {
    %c0_i32 = arith.constant 0 : i32
    %c0_i32_0 = arith.constant 0 : i32
    %c0_i32_1 = arith.constant 0 : i32
    return %c0_i32, %c0_i32_0 : i32, i32
  }
  func.func @transform_7(%arg0: i32) -> (i32, i32) {
    %c0_i32 = arith.constant 0 : i32
    %c0_i32_0 = arith.constant 0 : i32
    return %arg0, %c0_i32 : i32, i32
  }
}

</mosaic_0001>

<bundles_post_ra>
// kernel: _lambda_.3
= control target key start
LH: loop header
LB: loop body
LE: loop exit
PB: predicated region body
PF: predicated region fallthrough
CT: control target
= control target key end

     0   :  { %s6580_s24 = smov 0   ;;  %s8947_s0 = inlined_call_operand.vmem [shape: bf16[64,32,3], index: 0, kind: input, shape index: {}]   ;;  %s8948_s1 = inlined_call_operand.vmem [shape: bf16[3,64], index: 1, kind: input, shape index: {}]   ;;  %s8949_s2 = inlined_call_operand.vmem [shape: f32[1,64], index: 2, kind: input, shape index: {}, may-alias: {2,4}]   ;;  %s8950_s3 = inlined_call_operand.vmem [shape: bf16[64,64], index: 3, kind: input, shape index: {}]   ;;  %s8951_s4 = inlined_call_operand.vmem [shape: f32[1,64], index: 4, kind: input, shape index: {}, may-alias: {2,4}]   ;;  %s8952_s5 = inlined_call_operand.vmem [shape: bf16[64,128], index: 5, kind: input, shape index: {}]   ;;  %s8953_s6 = inlined_call_operand.vmem [shape: f32[1,128], index: 6, kind: input, shape index: {}]   ;;  %s8954_s7 = inlined_call_operand.vmem [shape: f32[64,128], index: 7, kind: output, shape index: {}]  }
   0x1 LB: > { %s5029_s25 = sadd.s32 4294967295, %s6535_s24   ;;  %p5033_p0 = scmp.ge.s32.totalorder %s6535_s24, 1  ;;  %s6535_s24 = sphi %s6580_s24, %s17_s24  }
   0x2   : > { %p239_p1 = scmp.lt.s32.totalorder %s6535_s24, 3 }
   0x4   : > { %p240_p2 = pnand %p5033_p0, %p239_p1 }
   0x6   : > { %243 = sbr.rel (%p240_p2) target bundleno = 1274 (0x4fa), region = 48 }
   0xb   : > { %s5034_s26 = sshll.u32 %s5029_s25, 5  ;;  %v6537_v0 = vmov 0   ;;  %vm3211_vm0 = vcmask 523264   ;;  %vm4930_vm1 = vcmask 1041409   ;;  %vm4932_vm2 = vcmask 1042434   ;;  %s5037_s23 = sshll.u32 %s5029_s25, 2 }
   0xc   : > { %5570 = vset.pattern.permute.xlu2 %v6537_v0  ;;  %5559 = vset.pattern.permute.xlu1 %v6537_v0  ;;  %p273_p3 = scmp.lt.s32.totalorder %s5034_s26, 63  ;;  %vm4934_vm3 = vcmask 1043459   ;;  %vm4936_vm4 = vcmask 1044484   ;;  %vm4938_vm5 = vcmask 1045509   ;;  %vm4940_vm6 = vcmask 1046534   ;;  %p280_p4 = scmp.lt.s32.totalorder %s5037_s23, 7 }
   0xd   : > { %5548 = vset.pattern.permute.xlu0 %v6537_v0  ;;  %vm4942_vm7 = vcmask 1047559  }
   0xe   : > { %s9382_s26 = smov (!%p273_p3, %s5034_s26), 63  ;;  %s9384_s23 = smov (!%p280_p4, %s5037_s23), 7 }
   0xf   : > { %s5201_s27 = sshll.u32 %s9382_s26, 4  ;;  %s5038_s25 = sshll.u32 %s9384_s23, 3 }
  0x10   : > { %s6593_s30 = scalar_lea.vmem %s8947_s0, %s5201_s27 }
  0x11   : > { %v5469_v1 = vld [vmem:[%s6593_s30 + $0x20] sm:$0xff]   ;;  %v5467_v2 = vld [vmem:[%s6593_s30 + $0x10] sm:$0xff]   ;;  %v5470_v10 = vld [vmem:[%s6593_s30 + $0x28] sm:$0xff]  }
  0x12   : > { %v5211_v3 = vld [vmem:[%s6593_s30] sm:$0xff]   ;;  %v5228_v4 = vunpack.c.l.bf16 %v5469_v1  ;;  %v5229_v5 = vunpack.c.h.bf16 %v5469_v1  ;;  %v5220_v6 = vunpack.c.l.bf16 %v5467_v2  ;;  %v5221_v7 = vunpack.c.h.bf16 %v5467_v2  ;;  %v5468_v11 = vld [vmem:[%s6593_s30 + $0x18] sm:$0xff]   ;;  %v5466_v14 = vld [vmem:[%s6593_s30 + $0x8] sm:$0xff]  }
  0x13   : > { %v5212_v8 = vunpack.c.l.bf16 %v5211_v3  ;;  %v5213_v9 = vunpack.c.h.bf16 %v5211_v3  ;;  %v5232_v16 = vunpack.c.l.bf16 %v5470_v10  ;;  %v5233_v17 = vunpack.c.h.bf16 %v5470_v10  ;;  %v5473_v25 = vld [vmem:[%s6593_s30 + $0x40] sm:$0xff]   ;;  %v5472_v26 = vld [vmem:[%s6593_s30 + $0x38] sm:$0xff]   ;;  %v5471_v27 = vld [vmem:[%s6593_s30 + $0x30] sm:$0xff]  }
  0x14   : > { %v6600_v12 = vpack.i.bf16 %v5229_v5, %v5228_v4  ;;  %v6602_v13 = vpack.i.bf16 %v5221_v7, %v5220_v6  ;;  %v5224_v18 = vunpack.c.l.bf16 %v5468_v11  ;;  %v5225_v19 = vunpack.c.h.bf16 %v5468_v11  ;;  %v5476_v37 = vld [vmem:[%s6593_s30 + $0x58] sm:$0xff]   ;;  %v5475_v38 = vld [vmem:[%s6593_s30 + $0x50] sm:$0xff]   ;;  %v5474_v39 = vld [vmem:[%s6593_s30 + $0x48] sm:$0xff]  }
  0x15   : > { %v6605_v15 = vpack.i.bf16 %v5213_v9, %v5212_v8  ;;  %v5216_v20 = vunpack.c.l.bf16 %v5466_v14  ;;  %v5217_v21 = vunpack.c.h.bf16 %v5466_v14  ;;  %v6610_v22 = vpack.i.bf16 %v5233_v17, %v5232_v16  ;;  %v5479_v49 = vld [vmem:[%s6593_s30 + $0x70] sm:$0xff]   ;;  %v5478_v50 = vld [vmem:[%s6593_s30 + $0x68] sm:$0xff]   ;;  %v5477_v51 = vld [vmem:[%s6593_s30 + $0x60] sm:$0xff]  }
  0x16   : > { %5572 = vperm.xlu2 %5570, %v6600_v12   ;;  %5561 = vperm.xlu1 %5559, %v6602_v13   ;;  %v6612_v23 = vpack.i.bf16 %v5225_v19, %v5224_v18  ;;  %v5244_v28 = vunpack.c.l.bf16 %v5473_v25  ;;  %v5245_v29 = vunpack.c.h.bf16 %v5473_v25  ;;  %v5240_v30 = vunpack.c.l.bf16 %v5472_v26  ;;  %v5482_v61 = vld [vmem:[%s6593_s30 + $0x88] sm:$0xff]   ;;  %v5481_v62 = vld [vmem:[%s6593_s30 + $0x80] sm:$0xff]   ;;  %v5480_v63 = vld [vmem:[%s6593_s30 + $0x78] sm:$0xff]  }
  0x17   : > { %5550 = vperm.xlu0 %5548, %v6605_v15   ;;  %v6614_v24 = vpack.i.bf16 %v5217_v21, %v5216_v20  ;;  %v5241_v31 = vunpack.c.h.bf16 %v5472_v26  ;;  %v5236_v32 = vunpack.c.l.bf16 %v5471_v27  ;;  %v5237_v33 = vunpack.c.h.bf16 %v5471_v27  ;;  %v5485_v9 = vld [vmem:[%s6593_s30 + $0xa0] sm:$0xff]   ;;  %v5484_v10 = vld [vmem:[%s6593_s30 + $0x98] sm:$0xff]   ;;  %v5483_v11 = vld [vmem:[%s6593_s30 + $0x90] sm:$0xff]  }
  0x18   : > { %v6622_v34 = vpack.i.bf16 %v5245_v29, %v5244_v28  ;;  %v5256_v40 = vunpack.c.l.bf16 %v5476_v37  ;;  %v5257_v41 = vunpack.c.h.bf16 %v5476_v37  ;;  %v5252_v42 = vunpack.c.l.bf16 %v5475_v38  ;;  %v5488_v27 = vld [vmem:[%s6593_s30 + $0xb8] sm:$0xff]   ;;  %v5487_v28 = vld [vmem:[%s6593_s30 + $0xb0] sm:$0xff]   ;;  %v5486_v29 = vld [vmem:[%s6593_s30 + $0xa8] sm:$0xff]  }
  0x19   : > { %v6624_v35 = vpack.i.bf16 %v5241_v31, %v5240_v30  ;;  %v6626_v36 = vpack.i.bf16 %v5237_v33, %v5236_v32  ;;  %v5253_v43 = vunpack.c.h.bf16 %v5475_v38  ;;  %v5248_v44 = vunpack.c.l.bf16 %v5474_v39 }
  0x1a   : > { %v5249_v45 = vunpack.c.h.bf16 %v5474_v39  ;;  %v6634_v46 = vpack.i.bf16 %v5257_v41, %v5256_v40  ;;  %v5268_v52 = vunpack.c.l.bf16 %v5479_v49  ;;  %v5269_v53 = vunpack.c.h.bf16 %v5479_v49 }
  0x1b   : > { %v6636_v47 = vpack.i.bf16 %v5253_v43, %v5252_v42  ;;  %v5264_v54 = vunpack.c.l.bf16 %v5478_v50  ;;  %v5265_v55 = vunpack.c.h.bf16 %v5478_v50  ;;  %v5260_v56 = vunpack.c.l.bf16 %v5477_v51  ;;  %v5491_v42 = vld [vmem:[%s6593_s30 + $0xd0] sm:$0xff]   ;;  %v5490_v43 = vld [vmem:[%s6593_s30 + $0xc8] sm:$0xff]  }
  0x1c   : > { %v6638_v48 = vpack.i.bf16 %v5249_v45, %v5248_v44  ;;  %v5261_v57 = vunpack.c.h.bf16 %v5477_v51  ;;  %v6646_v58 = vpack.i.bf16 %v5269_v53, %v5268_v52  ;;  %v5280_v0 = vunpack.c.l.bf16 %v5482_v61  ;;  %v5489_v44 = vld [vmem:[%s6593_s30 + $0xc0] sm:$0xff]  }
  0x1d   : > { %v6648_v59 = vpack.i.bf16 %v5265_v55, %v5264_v54  ;;  %v5281_v1 = vunpack.c.h.bf16 %v5482_v61  ;;  %v5276_v2 = vunpack.c.l.bf16 %v5481_v62  ;;  %v5277_v3 = vunpack.c.h.bf16 %v5481_v62  ;;  %v5493_v61 = vld [vmem:[%s6593_s30 + $0xe0] sm:$0xff]   ;;  %v5492_v62 = vld [vmem:[%s6593_s30 + $0xd8] sm:$0xff]  }
  0x1e   : > { %5577 = vperm.xlu2 %5570, %v6610_v22   ;;  %5566 = vperm.xlu1 %5559, %v6612_v23   ;;  %v6650_v60 = vpack.i.bf16 %v5261_v57, %v5260_v56  ;;  %v5272_v4 = vunpack.c.l.bf16 %v5480_v63  ;;  %v5273_v5 = vunpack.c.h.bf16 %v5480_v63  ;;  %v5292_v14 = vunpack.c.l.bf16 %v5485_v9  ;;  %v5494_v57 = vld [vmem:[%s6593_s30 + $0xe8] sm:$0xff]  }
  0x1f   : > { %5555 = vperm.xlu0 %5548, %v6614_v24   ;;  %v6658_v6 = vpack.i.bf16 %v5281_v1, %v5280_v0  ;;  %v6660_v7 = vpack.i.bf16 %v5277_v3, %v5276_v2  ;;  %v5293_v16 = vunpack.c.h.bf16 %v5485_v9  ;;  %v5288_v17 = vunpack.c.l.bf16 %v5484_v10 }
  0x20   : > { %v6662_v8 = vpack.i.bf16 %v5273_v5, %v5272_v4  ;;  %v5289_v18 = vunpack.c.h.bf16 %v5484_v10  ;;  %v5284_v19 = vunpack.c.l.bf16 %v5483_v11  ;;  %v5285_v20 = vunpack.c.h.bf16 %v5483_v11  ;;  %v5497_v11 = vld [vmem:[%s6593_s30 + $0x100] sm:$0xff]  }
  0x21   : > { %v6670_v21 = vpack.i.bf16 %v5293_v16, %v5292_v14  ;;  %v5304_v30 = vunpack.c.l.bf16 %v5488_v27  ;;  %v5305_v31 = vunpack.c.h.bf16 %v5488_v27  ;;  %v5300_v32 = vunpack.c.l.bf16 %v5487_v28  ;;  %v5496_v14 = vld [vmem:[%s6593_s30 + $0xf8] sm:$0xff]   ;;  %v5495_v16 = vld [vmem:[%s6593_s30 + $0xf0] sm:$0xff]  }
  0x22   : > { %v6672_v25 = vpack.i.bf16 %v5289_v18, %v5288_v17  ;;  %v6674_v26 = vpack.i.bf16 %v5285_v20, %v5284_v19  ;;  %v5301_v33 = vunpack.c.h.bf16 %v5487_v28  ;;  %v5296_v37 = vunpack.c.l.bf16 %v5486_v29 }
  0x23   : > { %v5297_v38 = vunpack.c.h.bf16 %v5486_v29  ;;  %v6682_v39 = vpack.i.bf16 %v5305_v31, %v5304_v30  ;;  %v5316_v45 = vunpack.c.l.bf16 %v5491_v42  ;;  %v5317_v49 = vunpack.c.h.bf16 %v5491_v42 }
  0x24   : > { %9094 = vst [vmem:[#allocation2_spill] sm:$0xff] %v6672_v25  ;;  %v6684_v40 = vpack.i.bf16 %v5301_v33, %v5300_v32  ;;  %v5312_v50 = vunpack.c.l.bf16 %v5490_v43  ;;  %v5313_v51 = vunpack.c.h.bf16 %v5490_v43  ;;  %v5308_v52 = vunpack.c.l.bf16 %v5489_v44  ;;  %v5500_v32 = vld [vmem:[%s6593_s30 + $0x118] sm:$0xff]   ;;  %v5499_v33 = vld [vmem:[%s6593_s30 + $0x110] sm:$0xff]  }
  0x25   : > { %9095 = vst [vmem:[#allocation3_spill] sm:$0xff] %v6682_v39  ;;  %v6686_v41 = vpack.i.bf16 %v5297_v38, %v5296_v37  ;;  %v5309_v53 = vunpack.c.h.bf16 %v5489_v44  ;;  %v6694_v54 = vpack.i.bf16 %v5317_v49, %v5316_v45  ;;  %v5328_v63 = vunpack.c.l.bf16 %v5494_v57  ;;  %v5498_v37 = vld [vmem:[%s6593_s30 + $0x108] sm:$0xff]  }
  0x26   : > { %5592 = vperm.xlu2 %5570, %v6622_v34   ;;  %5587 = vperm.xlu1 %5559, %v6624_v35   ;;  %9096 = vst [vmem:[#allocation4_spill] sm:$0xff] %v6684_v40  ;;  %v6696_v55 = vpack.i.bf16 %v5313_v51, %v5312_v50  ;;  %v5329_v0 = vunpack.c.h.bf16 %v5494_v57  ;;  %v5324_v1 = vunpack.c.l.bf16 %v5493_v61  ;;  %v5325_v2 = vunpack.c.h.bf16 %v5493_v61  ;;  %v5502_v57 = vld [vmem:[%s6593_s30 + $0x128] sm:$0xff]   ;;  %v5501_v61 = vld [vmem:[%s6593_s30 + $0x120] sm:$0xff]  }
  0x27   : > { %5582 = vperm.xlu0 %5548, %v6626_v36   ;;  %9097 = vst [vmem:[#allocation5_spill] sm:$0xff] %v6686_v41  ;;  %v6698_v56 = vpack.i.bf16 %v5309_v53, %v5308_v52  ;;  %v5320_v3 = vunpack.c.l.bf16 %v5492_v62  ;;  %v5321_v4 = vunpack.c.h.bf16 %v5492_v62  ;;  %v5340_v17 = vunpack.c.l.bf16 %v5497_v11  ;;  %v5503_v53 = vld [vmem:[%s6593_s30 + $0x130] sm:$0xff]  }
  0x28   : > { %9098 = vst [vmem:[#allocation6_spill] sm:$0xff] %v6694_v54  ;;  %v6706_v5 = vpack.i.bf16 %v5329_v0, %v5328_v63  ;;  %v6708_v9 = vpack.i.bf16 %v5325_v2, %v5324_v1  ;;  %v5341_v18 = vunpack.c.h.bf16 %v5497_v11  ;;  %v5336_v19 = vunpack.c.l.bf16 %v5496_v14 }
  0x29   : > { %9099 = vst [vmem:[#allocation7_spill] sm:$0xff] %v6696_v55  ;;  %v6710_v10 = vpack.i.bf16 %v5321_v4, %v5320_v3  ;;  %v5337_v20 = vunpack.c.h.bf16 %v5496_v14  ;;  %v5332_v27 = vunpack.c.l.bf16 %v5495_v16  ;;  %v5333_v28 = vunpack.c.h.bf16 %v5495_v16 }
  0x2a   : > { %9100 = vst [vmem:[#allocation8_spill] sm:$0xff] %v6698_v56  ;;  %v6718_v29 = vpack.i.bf16 %v5341_v18, %v5340_v17  ;;  %v5352_v38 = vunpack.c.l.bf16 %v5500_v32  ;;  %v5353_v42 = vunpack.c.h.bf16 %v5500_v32  ;;  %v5348_v43 = vunpack.c.l.bf16 %v5499_v33  ;;  %v5506_v17 = vld [vmem:[%s6593_s30 + $0x148] sm:$0xff]   ;;  %v5505_v18 = vld [vmem:[%s6593_s30 + $0x140] sm:$0xff]  }
  0x2b   : > { %9101 = vst [vmem:[#allocation9_spill] sm:$0xff] %v6706_v5  ;;  %v6720_v30 = vpack.i.bf16 %v5337_v20, %v5336_v19  ;;  %v6722_v31 = vpack.i.bf16 %v5333_v28, %v5332_v27  ;;  %v5349_v44 = vunpack.c.h.bf16 %v5499_v33  ;;  %v5344_v45 = vunpack.c.l.bf16 %v5498_v37  ;;  %v5504_v19 = vld [vmem:[%s6593_s30 + $0x138] sm:$0xff]  }
  0x2c   : > { %9102 = vst [vmem:[#allocation10_spill] sm:$0xff] %v6708_v9  ;;  %v5345_v49 = vunpack.c.h.bf16 %v5498_v37  ;;  %v6730_v50 = vpack.i.bf16 %v5353_v42, %v5352_v38  ;;  %v5364_v62 = vunpack.c.l.bf16 %v5503_v53  ;;  %v5365_v63 = vunpack.c.h.bf16 %v5503_v53  ;;  %v5507_v53 = vld [vmem:[%s6593_s30 + $0x150] sm:$0xff]  }
  0x2d   : > { %9103 = vst [vmem:[#allocation11_spill] sm:$0xff] %v6710_v10  ;;  %v6732_v51 = vpack.i.bf16 %v5349_v44, %v5348_v43  ;;  %v5360_v0 = vunpack.c.l.bf16 %v5502_v57  ;;  %v5361_v1 = vunpack.c.h.bf16 %v5502_v57  ;;  %v5356_v2 = vunpack.c.l.bf16 %v5501_v61 }
  0x2e   : > { %5607 = vperm.xlu2 %5570, %v6634_v46   ;;  %5602 = vperm.xlu1 %5559, %v6636_v47   ;;  %9104 = vst [vmem:[#allocation12_spill] sm:$0xff] %v6720_v30  ;;  %v6734_v52 = vpack.i.bf16 %v5345_v49, %v5344_v45  ;;  %v5357_v3 = vunpack.c.h.bf16 %v5501_v61  ;;  %v6744_v11 = vpack.i.bf16 %v5365_v63, %v5364_v62  ;;  %v5376_v20 = vunpack.c.l.bf16 %v5506_v17  ;;  %v5509_v45 = vld [vmem:[%s6593_s30 + $0x160] sm:$0xff]   ;;  %v5508_v49 = vld [vmem:[%s6593_s30 + $0x158] sm:$0xff]  }
  0x2f   : > { %5597 = vperm.xlu0 %5548, %v6638_v48   ;;  %9105 = vst [vmem:[#allocation13_spill] sm:$0xff] %v6722_v31  ;;  %v6746_v14 = vpack.i.bf16 %v5361_v1, %v5360_v0  ;;  %v5377_v27 = vunpack.c.h.bf16 %v5506_v17  ;;  %v5372_v28 = vunpack.c.l.bf16 %v5505_v18  ;;  %v5373_v32 = vunpack.c.h.bf16 %v5505_v18 }
  0x30   : > { %v6748_v16 = vpack.i.bf16 %v5357_v3, %v5356_v2  ;;  %v5368_v33 = vunpack.c.l.bf16 %v5504_v19  ;;  %v5369_v37 = vunpack.c.h.bf16 %v5504_v19  ;;  %v5388_v57 = vunpack.c.l.bf16 %v5509_v45  ;;  %v5512_v19 = vld [vmem:[%s6593_s30 + $0x178] sm:$0xff]  }
  0x31   : > { %v6758_v42 = vpack.i.bf16 %v5377_v27, %v5376_v20  ;;  %v6760_v43 = vpack.i.bf16 %v5373_v32, %v5372_v28  ;;  %v5389_v61 = vunpack.c.h.bf16 %v5509_v45  ;;  %v5384_v62 = vunpack.c.l.bf16 %v5508_v49  ;;  %v5511_v20 = vld [vmem:[%s6593_s30 + $0x170] sm:$0xff]   ;;  %v5510_v27 = vld [vmem:[%s6593_s30 + $0x168] sm:$0xff]  }
  0x32   : > { %v6762_v44 = vpack.i.bf16 %v5369_v37, %v5368_v33  ;;  %v5385_v63 = vunpack.c.h.bf16 %v5508_v49  ;;  %v5380_v0 = vunpack.c.l.bf16 %v5507_v53  ;;  %v5381_v1 = vunpack.c.h.bf16 %v5507_v53 }
  0x33   : > { %v6772_v3 = vpack.i.bf16 %v5389_v61, %v5388_v57  ;;  %v5400_v28 = vunpack.c.l.bf16 %v5512_v19  ;;  %v5401_v32 = vunpack.c.h.bf16 %v5512_v19  ;;  %v5396_v33 = vunpack.c.l.bf16 %v5511_v20  ;;  %v5514_v19 = vld [vmem:[%s6593_s30 + $0x188] sm:$0xff]  }
  0x34   : > { %v6774_v17 = vpack.i.bf16 %v5385_v63, %v5384_v62  ;;  %v6776_v18 = vpack.i.bf16 %v5381_v1, %v5380_v0  ;;  %v5397_v37 = vunpack.c.h.bf16 %v5511_v20  ;;  %v5392_v45 = vunpack.c.l.bf16 %v5510_v27  ;;  %v5515_v1 = vld [vmem:[%s6593_s30 + $0x190] sm:$0xff]  }
  0x35   : > { %v5393_v49 = vunpack.c.h.bf16 %v5510_v27  ;;  %v6790_v62 = vpack.i.bf16 %v5401_v32, %v5400_v28  ;;  %v5412_v20 = vunpack.c.l.bf16 %v5515_v1  ;;  %v5413_v27 = vunpack.c.h.bf16 %v5515_v1  ;;  %v5517_v1 = vld [vmem:[%s6593_s30 + $0x1a0] sm:$0xff]  }
  0x36   : > { %5622 = vperm.xlu2 %5570, %v6646_v58   ;;  %5617 = vperm.xlu1 %5559, %v6648_v59   ;;  %v6792_v63 = vpack.i.bf16 %v5397_v37, %v5396_v33 }
  0x37   : > { %5612 = vperm.xlu0 %5548, %v6650_v60   ;;  %9112 = vst [vmem:[#allocation20_spill] sm:$0xff] %v6790_v62  ;;  %v6794_v0 = vpack.i.bf16 %v5393_v49, %v5392_v45  ;;  %v6808_v49 = vpack.i.bf16 %v5413_v27, %v5412_v20 }
  0x38   : > { %9113 = vst [vmem:[#allocation21_spill] sm:$0xff] %v6792_v63 }
  0x39   : > { %9117 = vst [vmem:[#allocation25_spill] sm:$0xff] %v6808_v49 }
  0x3e   : > { %5637 = vperm.xlu2 %5570, %v6658_v6   ;;  %5632 = vperm.xlu1 %5559, %v6660_v7  }
  0x3f   : > { %5627 = vperm.xlu0 %5548, %v6662_v8  }
  0x46   : > { %5652 = vperm.xlu2 %5570, %v6670_v21   ;;  %5647 = vperm.xlu1 %5559, %v6672_v25  }
  0x47   : > { %5642 = vperm.xlu0 %5548, %v6674_v26  }
  0x4e   : > { %5667 = vperm.xlu2 %5570, %v6682_v39   ;;  %5662 = vperm.xlu1 %5559, %v6684_v40  }
  0x4f   : > { %5657 = vperm.xlu0 %5548, %v6686_v41  }
  0x56   : > { %5682 = vperm.xlu2 %5570, %v6694_v54   ;;  %5677 = vperm.xlu1 %5559, %v6696_v55  }
  0x57   : > { %5672 = vperm.xlu0 %5548, %v6698_v56  }
  0x5e   : > { %5697 = vperm.xlu2 %5570, %v6706_v5   ;;  %5692 = vperm.xlu1 %5559, %v6708_v9  }
  0x5f   : > { %5687 = vperm.xlu0 %5548, %v6710_v10  }
  0x66   : > { %5712 = vperm.xlu2 %5570, %v6718_v29   ;;  %5707 = vperm.xlu1 %5559, %v6720_v30  }
  0x67   : > { %5702 = vperm.xlu0 %5548, %v6722_v31  }
  0x6e   : > { %5727 = vperm.xlu2 %5570, %v6730_v50   ;;  %5722 = vperm.xlu1 %5559, %v6732_v51  }
  0x6f   : > { %5717 = vperm.xlu0 %5548, %v6734_v52  }
  0x70   : > { %v6742_v4 = vpop.permute.xlu2 %5572 }
  0x71   : > { %9106 = vst [vmem:[#allocation14_spill] sm:$0xff] %v6742_v4 }
  0x76   : > { %5742 = vperm.xlu2 %5570, %v6744_v11   ;;  %5737 = vperm.xlu1 %5559, %v6746_v14  }
  0x77   : > { %5732 = vperm.xlu0 %5548, %v6748_v16  }
  0x78   : > { %v6756_v38 = vpop.permute.xlu2 %5577 }
  0x79   : > { %9107 = vst [vmem:[#allocation15_spill] sm:$0xff] %v6756_v38  ;;  %v5409_v38 = vunpack.c.h.bf16 %v5514_v19 }
  0x7e   : > { %5757 = vperm.xlu2 %5570, %v6758_v42   ;;  %5752 = vperm.xlu1 %5559, %v6760_v43  }
  0x7f   : > { %5747 = vperm.xlu0 %5548, %v6762_v44  }
  0x80   : > { %v6770_v2 = vpop.permute.xlu2 %5592 }
  0x81   : > { %9108 = vst [vmem:[#allocation16_spill] sm:$0xff] %v6770_v2  ;;  %v5513_v2 = vld [vmem:[%s6593_s30 + $0x180] sm:$0xff]  }
  0x82   : > { %v5404_v28 = vunpack.c.l.bf16 %v5513_v2  ;;  %v5405_v32 = vunpack.c.h.bf16 %v5513_v2 }
  0x86   : > { %5772 = vperm.xlu2 %5570, %v6772_v3   ;;  %5767 = vperm.xlu1 %5559, %v6774_v17  }
  0x87   : > { %5762 = vperm.xlu0 %5548, %v6776_v18  }
  0x88   : > { %v6784_v53 = vpop.permute.xlu2 %5607  ;;  %v6786_v57 = vpop.permute.xlu1 %5561 }
  0x89   : > { %9109 = vst [vmem:[#allocation17_spill] sm:$0xff] %v6784_v53  ;;  %v6788_v61 = vpop.permute.xlu0 %5550  ;;  %v5408_v53 = vunpack.c.l.bf16 %v5514_v19 }
  0x8a   : > { %9110 = vst [vmem:[#allocation18_spill] sm:$0xff] %v6786_v57  ;;  %v6812_v57 = vpack.i.bf16 %v5405_v32, %v5404_v28 }
  0x8b   : > { %9111 = vst [vmem:[#allocation19_spill] sm:$0xff] %v6788_v61  ;;  %v6810_v4 = vpack.i.bf16 %v5409_v38, %v5408_v53  ;;  %v5518_v61 = vld [vmem:[%s6593_s30 + $0x1a8] sm:$0xff]  }
  0x8c   : > { %9119 = vst [vmem:[#allocation27_spill] sm:$0xff] %v6812_v57  ;;  %v5424_v2 = vunpack.c.l.bf16 %v5518_v61  ;;  %v5425_v19 = vunpack.c.h.bf16 %v5518_v61  ;;  %v5520_v61 = vld [vmem:[%s6593_s30 + $0x1b8] sm:$0xff]  }
  0x8d   : > { %9118 = vst [vmem:[#allocation26_spill] sm:$0xff] %v6810_v4 }
  0x8e   : > { %5787 = vperm.xlu2 %5570, %v6790_v62   ;;  %5782 = vperm.xlu1 %5559, %v6792_v63   ;;  %v5516_v62 = vld [vmem:[%s6593_s30 + $0x198] sm:$0xff]   ;;  %v6826_v32 = vpack.i.bf16 %v5425_v19, %v5424_v2  ;;  %v5519_v63 = vld [vmem:[%s6593_s30 + $0x1b0] sm:$0xff]  }
  0x8f   : > { %5777 = vperm.xlu0 %5548, %v6794_v0   ;;  %v5416_v38 = vunpack.c.l.bf16 %v5516_v62  ;;  %v5417_v53 = vunpack.c.h.bf16 %v5516_v62 }
  0x90   : > { %v6802_v33 = vpop.permute.xlu2 %5622  ;;  %v6804_v37 = vpop.permute.xlu1 %5566  ;;  %9123 = vst [vmem:[#allocation31_spill] sm:$0xff] %v6826_v32 }
  0x91   : > { %9114 = vst [vmem:[#allocation22_spill] sm:$0xff] %v6802_v33  ;;  %v6806_v45 = vpop.permute.xlu0 %5555  ;;  %v5420_v33 = vunpack.c.l.bf16 %v5517_v1 }
  0x92   : > { %9115 = vst [vmem:[#allocation23_spill] sm:$0xff] %v6804_v37  ;;  %v5421_v37 = vunpack.c.h.bf16 %v5517_v1 }
  0x93   : > { %9116 = vst [vmem:[#allocation24_spill] sm:$0xff] %v6806_v45 }
  0x94   : > { %v6828_v45 = vpack.i.bf16 %v5421_v37, %v5420_v33  ;;  %v5428_v33 = vunpack.c.l.bf16 %v5519_v63  ;;  %v5429_v37 = vunpack.c.h.bf16 %v5519_v63 }
  0x96   : > { %5802 = vperm.xlu2 %5570, %v6808_v49   ;;  %5797 = vperm.xlu1 %5559, %v6810_v4   ;;  %9124 = vst [vmem:[#allocation32_spill] sm:$0xff] %v6828_v45  ;;  %v6830_v49 = vpack.i.bf16 %v5417_v53, %v5416_v38  ;;  %v5521_v4 = vld [vmem:[%s6593_s30 + $0x1c0] sm:$0xff]  }
  0x97   : > { %5792 = vperm.xlu0 %5548, %v6812_v57   ;;  %v5436_v62 = vunpack.c.l.bf16 %v5521_v4  ;;  %v5437_v1 = vunpack.c.h.bf16 %v5521_v4  ;;  %v5523_v4 = vld [vmem:[%s6593_s30 + $0x1d0] sm:$0xff]   ;;  %v5522_v57 = vld [vmem:[%s6593_s30 + $0x1c8] sm:$0xff]  }
  0x98   : > { %v6820_v20 = vpop.permute.xlu2 %5637  ;;  %v6822_v27 = vpop.permute.xlu1 %5587  ;;  %9125 = vst [vmem:[#allocation33_spill] sm:$0xff] %v6830_v49 }
  0x99   : > { %9120 = vst [vmem:[#allocation28_spill] sm:$0xff] %v6820_v20  ;;  %v6824_v28 = vpop.permute.xlu0 %5582  ;;  %v5432_v20 = vunpack.c.l.bf16 %v5520_v61  ;;  %v6844_v53 = vpack.i.bf16 %v5437_v1, %v5436_v62 }
  0x9a   : > { %9121 = vst [vmem:[#allocation29_spill] sm:$0xff] %v6822_v27 }
  0x9b   : > { %9122 = vst [vmem:[#allocation30_spill] sm:$0xff] %v6824_v28  ;;  %v5433_v28 = vunpack.c.h.bf16 %v5520_v61 }
  0x9c   : > { %9129 = vst [vmem:[#allocation37_spill] sm:$0xff] %v6844_v53 }
  0x9d   : > { %v6846_v27 = vpack.i.bf16 %v5433_v28, %v5432_v20  ;;  %v5440_v20 = vunpack.c.l.bf16 %v5522_v57  ;;  %v5441_v28 = vunpack.c.h.bf16 %v5522_v57 }
  0x9e   : > { %5817 = vperm.xlu2 %5570, %v6826_v32   ;;  %5812 = vperm.xlu1 %5559, %v6828_v45   ;;  %v6848_v32 = vpack.i.bf16 %v5429_v37, %v5428_v33  ;;  %v5524_v45 = vld [vmem:[%s6593_s30 + $0x1d8] sm:$0xff]  }
  0x9f   : > { %5807 = vperm.xlu0 %5548, %v6830_v49   ;;  %9130 = vst [vmem:[#allocation38_spill] sm:$0xff] %v6846_v27  ;;  %v5448_v63 = vunpack.c.l.bf16 %v5524_v45  ;;  %v5449_v61 = vunpack.c.h.bf16 %v5524_v45  ;;  %v5526_v45 = vld [vmem:[%s6593_s30 + $0x1e8] sm:$0xff]   ;;  %v5525_v49 = vld [vmem:[%s6593_s30 + $0x1e0] sm:$0xff]  }
  0xa0   : > { %v6838_v2 = vpop.permute.xlu2 %5652  ;;  %v6840_v19 = vpop.permute.xlu1 %5602 }
  0xa1   : > { %9126 = vst [vmem:[#allocation34_spill] sm:$0xff] %v6838_v2  ;;  %v6842_v38 = vpop.permute.xlu0 %5597  ;;  %v5444_v2 = vunpack.c.l.bf16 %v5523_v4  ;;  %v6862_v37 = vpack.i.bf16 %v5449_v61, %v5448_v63  ;;  %v5452_v63 = vunpack.c.l.bf16 %v5525_v49  ;;  %v5453_v61 = vunpack.c.h.bf16 %v5525_v49 }
  0xa2   : > { %9127 = vst [vmem:[#allocation35_spill] sm:$0xff] %v6840_v19 }
  0xa3   : > { %9128 = vst [vmem:[#allocation36_spill] sm:$0xff] %v6842_v38  ;;  %v5445_v38 = vunpack.c.h.bf16 %v5523_v4 }
  0xa4   : > { %9134 = vst [vmem:[#allocation42_spill] sm:$0xff] %v6862_v37 }
  0xa5   : > { %v6864_v19 = vpack.i.bf16 %v5445_v38, %v5444_v2 }
  0xa6   : > { %5832 = vperm.xlu2 %5570, %v6844_v53   ;;  %5827 = vperm.xlu1 %5559, %v6846_v27   ;;  %v6866_v53 = vpack.i.bf16 %v5441_v28, %v5440_v20  ;;  %v5527_v27 = vld [vmem:[%s6593_s30 + $0x1f0] sm:$0xff]  }
  0xa7   : > { %5822 = vperm.xlu0 %5548, %v6848_v32   ;;  %9135 = vst [vmem:[#allocation43_spill] sm:$0xff] %v6864_v19  ;;  %v5460_v57 = vunpack.c.l.bf16 %v5527_v27  ;;  %v5461_v4 = vunpack.c.h.bf16 %v5527_v27 }
  0xa8   : > { %v6856_v62 = vpop.permute.xlu2 %5667  ;;  %v6858_v1 = vpop.permute.xlu1 %5617 }
  0xa9   : > { %9131 = vst [vmem:[#allocation39_spill] sm:$0xff] %v6856_v62  ;;  %v6860_v33 = vpop.permute.xlu0 %5612  ;;  %v5456_v62 = vunpack.c.l.bf16 %v5526_v45  ;;  %v6880_v28 = vpack.i.bf16 %v5461_v4, %v5460_v57 }
  0xaa   : > { %9132 = vst [vmem:[#allocation40_spill] sm:$0xff] %v6858_v1  ;;  %v5457_v1 = vunpack.c.h.bf16 %v5526_v45 }
  0xab   : > { %9133 = vst [vmem:[#allocation41_spill] sm:$0xff] %v6860_v33 }
  0xac   : > { %9139 = vst [vmem:[#allocation47_spill] sm:$0xff] %v6880_v28  ;;  %v6882_v33 = vpack.i.bf16 %v5457_v1, %v5456_v62  ;;  %v8999_v62 = vmov 1  }
  0xae   : > { %5847 = vperm.xlu2 %5570, %v6862_v37   ;;  %5842 = vperm.xlu1 %5559, %v6864_v19   ;;  %9140 = vst [vmem:[#allocation48_spill] sm:$0xff] %v6882_v33  ;;  %v6884_v37 = vpack.i.bf16 %v5453_v61, %v5452_v63  ;;  %v5528_v19 = vld [vmem:[%s6593_s30 + $0x1f8] sm:$0xff]   ;;  %s8794_s30 = scalar_lea.vmem %s8954_s7, %s5038_s25 }
  0xaf   : > { %5837 = vperm.xlu0 %5548, %v6866_v53   ;;  %v5464_v49 = vunpack.c.l.bf16 %v5528_v19  ;;  %v5465_v27 = vunpack.c.h.bf16 %v5528_v19 }
  0xb0   : > { %v6874_v2 = vpop.permute.xlu2 %5682  ;;  %v6876_v38 = vpop.permute.xlu1 %5632  ;;  %9141 = vst [vmem:[#allocation49_spill] sm:$0xff] %v6884_v37 }
  0xb1   : > { %9136 = vst [vmem:[#allocation44_spill] sm:$0xff] %v6874_v2  ;;  %v6878_v20 = vpop.permute.xlu0 %5627  ;;  %v6896_v57 = vpack.i.bf16 %v5465_v27, %v5464_v49 }
  0xb2   : > { %9137 = vst [vmem:[#allocation45_spill] sm:$0xff] %v6876_v38 }
  0xb3   : > { %9138 = vst [vmem:[#allocation46_spill] sm:$0xff] %v6878_v20 }
  0xb4   : > { %9145 = vst [vmem:[#allocation53_spill] sm:$0xff] %v6896_v57 }
  0xb6   : > { %5862 = vperm.xlu2 %5570, %v6880_v28   ;;  %5857 = vperm.xlu1 %5559, %v6882_v33  }
  0xb7   : > { %5852 = vperm.xlu0 %5548, %v6884_v37  }
  0xb8   : > { %v6890_v45 = vpop.permute.xlu2 %5697  ;;  %v6892_v2 = vpop.permute.xlu1 %5647 }
  0xb9   : > { %9142 = vst [vmem:[#allocation50_spill] sm:$0xff] %v6890_v45  ;;  %v6894_v38 = vpop.permute.xlu0 %5642 }
  0xba   : > { %9143 = vst [vmem:[#allocation51_spill] sm:$0xff] %v6892_v2 }
  0xbb   : > { %9144 = vst [vmem:[#allocation52_spill] sm:$0xff] %v6894_v38 }
  0xbe   : > { %5877 = vset.pattern.permute.xlu2 %v8999_v62  ;;  %5871 = vset.pattern.permute.xlu1 %v8999_v62 }
  0xbf   : > { %5867 = vperm.xlu0 %5548, %v6896_v57   ;;  %5879 = vperm.xlu2 %5877, %v6614_v24  }
  0xc0   : > { %5873 = vperm.xlu1 %5871, %v6605_v15   ;;  %v6903_v19 = vpop.permute.xlu2 %5712  ;;  %v6905_v1 = vpop.permute.xlu1 %5662 }
  0xc1   : > { %9146 = vst [vmem:[#allocation54_spill] sm:$0xff] %v6905_v1  ;;  %v6907_v4 = vpop.permute.xlu0 %5657 }
  0xc2   : > { %9147 = vst [vmem:[#allocation55_spill] sm:$0xff] %v6907_v4 }
  0xc7   : > { %5883 = vset.pattern.permute.xlu0 %v8999_v62  ;;  %5895 = vperm.xlu2 %5877, %v6600_v12  }
  0xc8   : > { %5890 = vperm.xlu1 %5871, %v6612_v23   ;;  %5885 = vperm.xlu0 %5883, %v6602_v13   ;;  %v6913_v63 = vpop.permute.xlu2 %5727  ;;  %v6915_v61 = vpop.permute.xlu1 %5677 }
  0xc9   : > { %9148 = vst [vmem:[#allocation56_spill] sm:$0xff] %v6913_v63  ;;  %v6917_v49 = vpop.permute.xlu0 %5672 }
  0xca   : > { %9149 = vst [vmem:[#allocation57_spill] sm:$0xff] %v6915_v61 }
  0xcb   : > { %9150 = vst [vmem:[#allocation58_spill] sm:$0xff] %v6917_v49 }
  0xcf   : > { %5905 = vperm.xlu2 %5877, %v6626_v36  }
  0xd0   : > { %5900 = vperm.xlu1 %5871, %v6610_v22   ;;  %5910 = vperm.xlu0 %5883, %v6624_v35   ;;  %v6922_v27 = vpop.permute.xlu2 %5742  ;;  %v6924_v62 = vpop.permute.xlu1 %5692 }
  0xd1   : > { %9151 = vst [vmem:[#allocation59_spill] sm:$0xff] %v6922_v27  ;;  %v6926_v45 = vpop.permute.xlu0 %5687 }
  0xd2   : > { %9152 = vst [vmem:[#allocation60_spill] sm:$0xff] %v6924_v62 }
  0xd3   : > { %9153 = vst [vmem:[#allocation61_spill] sm:$0xff] %v6926_v45 }
  0xd7   : > { %5920 = vperm.xlu2 %5877, %v6638_v48  }
  0xd8   : > { %5915 = vperm.xlu1 %5871, %v6622_v34   ;;  %5925 = vperm.xlu0 %5883, %v6636_v47   ;;  %v6931_v61 = vpop.permute.xlu2 %5757  ;;  %v6933_v49 = vpop.permute.xlu1 %5707 }
  0xd9   : > { %9154 = vst [vmem:[#allocation62_spill] sm:$0xff] %v6931_v61  ;;  %v6935_v1 = vpop.permute.xlu0 %5702 }
  0xda   : > { %9155 = vst [vmem:[#allocation63_spill] sm:$0xff] %v6933_v49 }
  0xdb   : > { %9156 = vst [vmem:[#allocation64_spill] sm:$0xff] %v6935_v1 }
  0xdf   : > { %5935 = vperm.xlu2 %5877, %v6650_v60  }
  0xe0   : > { %5930 = vperm.xlu1 %5871, %v6634_v46   ;;  %5940 = vperm.xlu0 %5883, %v6648_v59   ;;  %v6940_v62 = vpop.permute.xlu2 %5772  ;;  %v6942_v45 = vpop.permute.xlu1 %5722 }
  0xe1   : > { %9157 = vst [vmem:[#allocation65_spill] sm:$0xff] %v6940_v62  ;;  %v6944_v4 = vpop.permute.xlu0 %5717 }
  0xe2   : > { %9158 = vst [vmem:[#allocation66_spill] sm:$0xff] %v6942_v45 }
  0xe3   : > { %9159 = vst [vmem:[#allocation67_spill] sm:$0xff] %v6944_v4 }
  0xe7   : > { %5950 = vperm.xlu2 %5877, %v6662_v8  }
  0xe8   : > { %5945 = vperm.xlu1 %5871, %v6646_v58   ;;  %5955 = vperm.xlu0 %5883, %v6660_v7   ;;  %v6949_v49 = vpop.permute.xlu2 %5787  ;;  %v6951_v1 = vpop.permute.xlu1 %5737 }
  0xe9   : > { %9160 = vst [vmem:[#allocation68_spill] sm:$0xff] %v6951_v1  ;;  %v6953_v2 = vpop.permute.xlu0 %5732 }
  0xea   : > { %9161 = vst [vmem:[#allocation69_spill] sm:$0xff] %v6953_v2 }
  0xef   : > { %5965 = vperm.xlu2 %5877, %v6674_v26  }
  0xf0   : > { %5960 = vperm.xlu1 %5871, %v6658_v6   ;;  %5970 = vperm.xlu0 %5883, %v6672_v25   ;;  %v6958_v38 = vpop.permute.xlu2 %5802  ;;  %v6960_v20 = vpop.permute.xlu1 %5752  ;;  %v9189_v25 = vld [vmem:[#allocation25_spill] sm:$0xff] }
  0xf1   : > { %9162 = vst [vmem:[#allocation70_spill] sm:$0xff] %v6960_v20  ;;  %v6962_v62 = vpop.permute.xlu0 %5747 }
  0xf2   : > { %9163 = vst [vmem:[#allocation71_spill] sm:$0xff] %v6962_v62 }
  0xf7   : > { %5980 = vperm.xlu2 %5877, %v6686_v41   ;;  %v9188_v41 = vld [vmem:[#allocation33_spill] sm:$0xff] }
  0xf8   : > { %5975 = vperm.xlu1 %5871, %v6670_v21   ;;  %5985 = vperm.xlu0 %5883, %v6684_v40   ;;  %v6967_v61 = vpop.permute.xlu2 %5817  ;;  %v6969_v27 = vpop.permute.xlu1 %5767  ;;  %v9183_v40 = vld [vmem:[#allocation20_spill] sm:$0xff] }
  0xf9   : > { %9164 = vst [vmem:[#allocation72_spill] sm:$0xff] %v6969_v27  ;;  %v6971_v1 = vpop.permute.xlu0 %5762 }
  0xff   : > { %5995 = vperm.xlu2 %5877, %v6698_v56   ;;  %v9182_v56 = vld [vmem:[#allocation27_spill] sm:$0xff] }
 0x100   : > { %5990 = vperm.xlu1 %5871, %v6682_v39   ;;  %6000 = vperm.xlu0 %5883, %v6696_v55   ;;  %v6976_v20 = vpop.permute.xlu2 %5832  ;;  %v6978_v62 = vpop.permute.xlu1 %5782 }
 0x101   : > { %9165 = vst [vmem:[#allocation73_spill] sm:$0xff] %v6976_v20  ;;  %v6980_v57 = vpop.permute.xlu0 %5777 }
 0x102   : > { %9166 = vst [vmem:[#allocation74_spill] sm:$0xff] %v6978_v62 }
 0x107   : > { %6010 = vperm.xlu2 %5877, %v6710_v10  }
 0x108   : > { %6005 = vperm.xlu1 %5871, %v6694_v54   ;;  %6015 = vperm.xlu0 %5883, %v6708_v9   ;;  %v6985_v27 = vpop.permute.xlu2 %5847  ;;  %v6987_v28 = vpop.permute.xlu1 %5797 }
 0x109   : > { %9167 = vst [vmem:[#allocation75_spill] sm:$0xff] %v6985_v27  ;;  %v6989_v2 = vpop.permute.xlu0 %5792 }
 0x10f   : > { %6025 = vperm.xlu2 %5877, %v6722_v31  }
 0x110   : > { %6020 = vperm.xlu1 %5871, %v6706_v5   ;;  %6030 = vperm.xlu0 %5883, %v6720_v30   ;;  %v6994_v62 = vpop.permute.xlu2 %5862  ;;  %v6996_v33 = vpop.permute.xlu1 %5812 }
 0x111   : > { %9168 = vst [vmem:[#allocation76_spill] sm:$0xff] %v6994_v62  ;;  %v6998_v10 = vpop.permute.xlu0 %5807 }
 0x117   : > { %6040 = vperm.xlu2 %5877, %v6734_v52  }
 0x118   : > { %6035 = vperm.xlu1 %5871, %v6718_v29   ;;  %6045 = vperm.xlu0 %5883, %v6732_v51   ;;  %v7003_v27 = vpop.permute.xlu1 %5827 }
 0x119   : > { %v7005_v9 = vpop.permute.xlu0 %5822  ;;  %v7007_v31 = vpop.permute.xlu2 %5879 }
 0x11a   : > { %9169 = vst [vmem:[#allocation77_spill] sm:$0xff] %v7007_v31 }
 0x11f   : > { %6055 = vperm.xlu2 %5877, %v6748_v16  }
 0x120   : > { %6050 = vperm.xlu1 %5871, %v6730_v50   ;;  %6060 = vperm.xlu0 %5883, %v6746_v14   ;;  %v7012_v62 = vpop.permute.xlu1 %5842 }
 0x121   : > { %9170 = vst [vmem:[#allocation78_spill] sm:$0xff] %v7012_v62  ;;  %v7014_v30 = vpop.permute.xlu0 %5837  ;;  %v7016_v5 = vpop.permute.xlu2 %5895 }
 0x122   : > { %9171 = vst [vmem:[#allocation79_spill] sm:$0xff] %v7016_v5 }
 0x127   : > { %6070 = vperm.xlu2 %5877, %v6762_v44  }
 0x128   : > { %6065 = vperm.xlu1 %5871, %v6744_v11   ;;  %6075 = vperm.xlu0 %5883, %v6760_v43   ;;  %v7021_v37 = vpop.permute.xlu1 %5857 }
 0x129   : > { %9172 = vst [vmem:[#allocation80_spill] sm:$0xff] %v7021_v37  ;;  %v7023_v54 = vpop.permute.xlu0 %5852  ;;  %v7025_v63 = vpop.permute.xlu2 %5905  ;;  %v9178_v37 = vld [vmem:[#allocation21_spill] sm:$0xff] }
 0x12a   : > { %9173 = vst [vmem:[#allocation81_spill] sm:$0xff] %v7023_v54 }
 0x12b   : > { %9174 = vst [vmem:[#allocation82_spill] sm:$0xff] %v7025_v63 }
 0x12f   : > { %6085 = vperm.xlu2 %5877, %v6776_v18  }
 0x130   : > { %6080 = vperm.xlu1 %5871, %v6758_v42   ;;  %6090 = vperm.xlu0 %5883, %v6774_v17  }
 0x131   : > { %v7030_v62 = vpop.permute.xlu0 %5867  ;;  %v7032_v5 = vpop.permute.xlu2 %5920 }
 0x132   : > { %9175 = vst [vmem:[#allocation83_spill] sm:$0xff] %v7030_v62  ;;  %v7034_v55 = vpop.permute.xlu1 %5873  ;;  %v9184_v62 = vld [vmem:[#allocation26_spill] sm:$0xff] }
 0x133   : > { %9176 = vst [vmem:[#allocation84_spill] sm:$0xff] %v7032_v5 }
 0x134   : > { %9177 = vst [vmem:[#allocation85_spill] sm:$0xff] %v7034_v55  ;;  %v9194_v55 = vld [vmem:[#allocation31_spill] sm:$0xff] }
 0x137   : > { %6100 = vperm.xlu2 %5877, %v6794_v0  }
 0x138   : > { %6095 = vperm.xlu1 %5871, %v6772_v3   ;;  %6105 = vperm.xlu0 %5883, %v9178_v37  }
 0x139   : > { %v7039_v54 = vpop.permute.xlu2 %5935 }
 0x13a   : > { %9179 = vst [vmem:[#allocation21_spill] sm:$0xff] %v7039_v54  ;;  %v7041_v63 = vpop.permute.xlu1 %5890  ;;  %v7043_v45 = vpop.permute.xlu0 %5885  ;;  %v9190_v54 = vld [vmem:[#allocation32_spill] sm:$0xff] }
 0x13b   : > { %9180 = vst [vmem:[#allocation86_spill] sm:$0xff] %v7041_v63 }
 0x13c   : > { %9181 = vst [vmem:[#allocation87_spill] sm:$0xff] %v7043_v45 }
 0x13f   : > { %6115 = vperm.xlu2 %5877, %v9182_v56  }
 0x140   : > { %6110 = vperm.xlu1 %5871, %v9183_v40   ;;  %6120 = vperm.xlu0 %5883, %v9184_v62  }
 0x141   : > { %v7048_v5 = vpop.permute.xlu2 %5950 }
 0x142   : > { %9185 = vst [vmem:[#allocation27_spill] sm:$0xff] %v7048_v5  ;;  %v7050_v31 = vpop.permute.xlu1 %5900  ;;  %v7052_v39 = vpop.permute.xlu0 %5910  ;;  %v9195_v5 = vld [vmem:[#allocation38_spill] sm:$0xff] }
 0x143   : > { %9186 = vst [vmem:[#allocation20_spill] sm:$0xff] %v7050_v31 }
 0x144   : > { %9187 = vst [vmem:[#allocation26_spill] sm:$0xff] %v7052_v39 }
 0x147   : > { %6130 = vperm.xlu2 %5877, %v9188_v41  }
 0x148   : > { %6125 = vperm.xlu1 %5871, %v9189_v25   ;;  %6135 = vperm.xlu0 %5883, %v9190_v54   ;;  %v9199_v54 = vld [vmem:[#allocation37_spill] sm:$0xff] }
 0x149   : > { %v7057_v63 = vpop.permute.xlu2 %5965 }
 0x14a   : > { %9191 = vst [vmem:[#allocation33_spill] sm:$0xff] %v7057_v63  ;;  %v7059_v45 = vpop.permute.xlu1 %5915  ;;  %v7061_v4 = vpop.permute.xlu0 %5925  ;;  %v6539_v63 = vmov 2  }
 0x14b   : > { %9192 = vst [vmem:[#allocation25_spill] sm:$0xff] %v7059_v45 }
 0x14c   : > { %9193 = vst [vmem:[#allocation88_spill] sm:$0xff] %v7061_v4 }
 0x14f   : > { %6145 = vperm.xlu2 %5877, %v6848_v32  }
 0x150   : > { %6140 = vperm.xlu1 %5871, %v9194_v55   ;;  %6150 = vperm.xlu0 %5883, %v9195_v5  }
 0x151   : > { %v7066_v31 = vpop.permute.xlu2 %5980 }
 0x152   : > { %9196 = vst [vmem:[#allocation38_spill] sm:$0xff] %v7066_v31  ;;  %v7068_v39 = vpop.permute.xlu1 %5930  ;;  %v7070_v20 = vpop.permute.xlu0 %5940 }
 0x153   : > { %9197 = vst [vmem:[#allocation89_spill] sm:$0xff] %v7068_v39 }
 0x154   : > { %9198 = vst [vmem:[#allocation90_spill] sm:$0xff] %v7070_v20 }
 0x157   : > { %6160 = vperm.xlu2 %5877, %v6866_v53  }
 0x158   : > { %6155 = vperm.xlu1 %5871, %v9199_v54   ;;  %6164 = vset.pattern.permute.xlu0 %v6539_v63 }
 0x159   : > { %6166 = vperm.xlu0 %6164, %v6718_v29   ;;  %v7075_v4 = vpop.permute.xlu2 %5995 }
 0x15a   : > { %9200 = vst [vmem:[#allocation37_spill] sm:$0xff] %v7075_v4  ;;  %v7077_v45 = vpop.permute.xlu1 %5945  ;;  %v7079_v55 = vpop.permute.xlu0 %5955  ;;  %v5780_v4 = vunpack.i.h.bf16 %v6980_v57 }
 0x15b   : > { %9201 = vst [vmem:[#allocation91_spill] sm:$0xff] %v7077_v45 }
 0x15c   : > { %9202 = vst [vmem:[#allocation92_spill] sm:$0xff] %v7079_v55 }
 0x15f   : > { %6176 = vset.pattern.permute.xlu2 %v6539_v63 }
 0x160   : > { %6170 = vset.pattern.permute.xlu1 %v6539_v63  ;;  %6178 = vperm.xlu2 %6176, %v6734_v52  }
 0x161   : > { %6172 = vperm.xlu1 %6170, %v6605_v15   ;;  %6193 = vperm.xlu0 %6164, %v6602_v13   ;;  %v7084_v31 = vpop.permute.xlu2 %6010 }
 0x162   : > { %9203 = vst [vmem:[#allocation93_spill] sm:$0xff] %v7084_v31  ;;  %v7086_v20 = vpop.permute.xlu1 %5960  ;;  %v7088_v39 = vpop.permute.xlu0 %5970 }
 0x163   : > { %9204 = vst [vmem:[#allocation94_spill] sm:$0xff] %v7086_v20 }
 0x164   : > { %9205 = vst [vmem:[#allocation95_spill] sm:$0xff] %v7088_v39 }
 0x168   : > { %6188 = vperm.xlu2 %6176, %v6732_v51  }
 0x169   : > { %6183 = vperm.xlu1 %6170, %v6614_v24   ;;  %6208 = vperm.xlu0 %6164, %v6748_v16   ;;  %v7093_v29 = vpop.permute.xlu2 %6025 }
 0x16a   : > { %9206 = vst [vmem:[#allocation96_spill] sm:$0xff] %v7093_v29  ;;  %v7095_v63 = vpop.permute.xlu1 %5975  ;;  %v7097_v52 = vpop.permute.xlu0 %5985  ;;  %v5765_v29 = vunpack.i.h.bf16 %v6971_v1 }
 0x16b   : > { %9207 = vst [vmem:[#allocation97_spill] sm:$0xff] %v7095_v63 }
 0x16c   : > { %9208 = vst [vmem:[#allocation98_spill] sm:$0xff] %v7097_v52  ;;  %v5840_v52 = vunpack.i.h.bf16 %v7014_v30 }
 0x170   : > { %6203 = vperm.xlu2 %6176, %v6612_v23  }
 0x171   : > { %6198 = vperm.xlu1 %6170, %v6730_v50   ;;  %6223 = vperm.xlu0 %6164, %v6610_v22   ;;  %v7102_v13 = vpop.permute.xlu2 %6040 }
 0x172   : > { %v7104_v15 = vpop.permute.xlu1 %5990  ;;  %v7106_v51 = vpop.permute.xlu0 %6000 }
 0x173   : > { %9209 = vst [vmem:[#allocation99_spill] sm:$0xff] %v7104_v15 }
 0x174   : > { %9210 = vst [vmem:[#allocation100_spill] sm:$0xff] %v7106_v51 }
 0x178   : > { %6218 = vperm.xlu2 %6176, %v6746_v14  }
 0x179   : > { %6213 = vperm.xlu1 %6170, %v6600_v12   ;;  %6238 = vperm.xlu0 %6164, %v6762_v44   ;;  %v7111_v24 = vpop.permute.xlu2 %6055  ;;  %v414_v12 = vld [vmem:[%s8948_s1] sm:$0x3] }
 0x17a   : > { %v7113_v16 = vpop.permute.xlu1 %6005  ;;  %v7115_v23 = vpop.permute.xlu0 %6015  ;;  %v7129_v44 = vunpack.c.l.bf16 %v414_v12 }
 0x17b   : > { %9211 = vst [vmem:[#allocation101_spill] sm:$0xff] %v7113_v16 }
 0x17c   : > { %9212 = vst [vmem:[#allocation102_spill] sm:$0xff] %v7115_v23 }
 0x180   : > { %6233 = vperm.xlu2 %6176, %v6626_v36   ;;  %v5764_v36 = vunpack.i.l.bf16 %v6971_v1 }
 0x181   : > { %6228 = vperm.xlu1 %6170, %v6744_v11   ;;  %6253 = vperm.xlu0 %6164, %v6622_v34   ;;  %v7120_v22 = vpop.permute.xlu2 %6070  ;;  %v7135_v34 = vperm.slane %v7129_v44, 0 }
 0x182   : > { %v7125_v50 = vpop.permute.xlu1 %6020  ;;  %v7127_v14 = vpop.permute.xlu0 %6030 }
 0x183   : > { %9213 = vst [vmem:[#allocation103_spill] sm:$0xff] %v7125_v50  ;;  %v7140_v50 = vperm.slane %v7129_v44, 1  ;;  %v1270_v1 = vmul.f32 %v5765_v29, %v7135_v34 }
 0x184   : > { %9214 = vst [vmem:[#allocation104_spill] sm:$0xff] %v7127_v14 }
 0x188   : > { %6248 = vperm.xlu2 %6176, %v6760_v43   ;;  %v1269_v43 = vmul.f32 %v5764_v36, %v7135_v34 }
 0x189   : > { %6243 = vperm.xlu1 %6170, %v6624_v35   ;;  %6268 = vperm.xlu0 %6164, %v6776_v18   ;;  %v6086_v11 = vpop.permute.xlu2 %6085 }
 0x18a   : > { %v6088_v14 = vunpack.i.h.bf16 %v6086_v11  ;;  %v6087_v12 = vunpack.i.l.bf16 %v6086_v11  ;;  %v7142_v23 = vpop.permute.xlu1 %6035  ;;  %v7144_v31 = vpop.permute.xlu0 %6045  ;;  %v5779_v11 = vunpack.i.l.bf16 %v6980_v57 }
 0x18c   : > { %v1911_v16 = vmul.f32 %v6088_v14, %v7140_v50  ;;  %v1910_v35 = vmul.f32 %v6087_v12, %v7140_v50 }
 0x18e   : > { %v7150_v51 = vadd.f32 %v1910_v35, %v1269_v43  ;;  %v7152_v18 = vadd.f32 %v1911_v16, %v1270_v1  ;;  %v1276_v16 = vmul.f32 %v5780_v4, %v7135_v34  ;;  %v1275_v1 = vmul.f32 %v5779_v11, %v7135_v34 }
 0x18f   : > { %v5794_v35 = vunpack.i.l.bf16 %v6989_v2 }
 0x190   : > { %6263 = vperm.xlu2 %6176, %v6638_v48  }
 0x191   : > { %6258 = vperm.xlu1 %6170, %v6758_v42   ;;  %6283 = vperm.xlu0 %6164, %v6634_v46   ;;  %v6101_v29 = vpop.permute.xlu2 %6100  ;;  %v5795_v46 = vunpack.i.h.bf16 %v6989_v2 }
 0x192   : > { %v6103_v36 = vunpack.i.h.bf16 %v6101_v29  ;;  %v6102_v15 = vunpack.i.l.bf16 %v6101_v29  ;;  %v7159_v14 = vpop.permute.xlu1 %6050  ;;  %v7161_v12 = vpop.permute.xlu0 %6060 }
 0x194   : > { %v1917_v43 = vmul.f32 %v6103_v36, %v7140_v50  ;;  %v1916_v57 = vmul.f32 %v6102_v15, %v7140_v50 }
 0x196   : > { %v7167_v48 = vadd.f32 %v1916_v57, %v1275_v1  ;;  %v7169_v42 = vadd.f32 %v1917_v43, %v1276_v16  ;;  %v1282_v16 = vmul.f32 %v5795_v46, %v7135_v34  ;;  %v1281_v1 = vmul.f32 %v5794_v35, %v7135_v34 }
 0x197   : > { %v5809_v57 = vunpack.i.l.bf16 %v6998_v10 }
 0x198   : > { %6278 = vperm.xlu2 %6176, %v6774_v17  }
 0x199   : > { %6273 = vperm.xlu1 %6170, %v6636_v47   ;;  %6298 = vperm.xlu0 %6164, %v6794_v0   ;;  %v6116_v4 = vpop.permute.xlu2 %6115  ;;  %v5810_v0 = vunpack.i.h.bf16 %v6998_v10 }
 0x19a   : > { %v6118_v11 = vunpack.i.h.bf16 %v6116_v4  ;;  %v6117_v29 = vunpack.i.l.bf16 %v6116_v4  ;;  %v7176_v36 = vpop.permute.xlu1 %6065  ;;  %v7178_v15 = vpop.permute.xlu0 %6075 }
 0x19c   : > { %v1923_v43 = vmul.f32 %v6118_v11, %v7140_v50  ;;  %v1922_v2 = vmul.f32 %v6117_v29, %v7140_v50 }
 0x19e   : > { %v7184_v17 = vadd.f32 %v1922_v2, %v1281_v1  ;;  %v7186_v47 = vadd.f32 %v1923_v43, %v1282_v16  ;;  %v1288_v16 = vmul.f32 %v5810_v0, %v7135_v34  ;;  %v1287_v1 = vmul.f32 %v5809_v57, %v7135_v34  ;;  %v5205_v2 = vld [vmem:[%s8950_s3 + $0x18] sm:$0xff] }
 0x19f   : > { %5529 = vmatpush.bf16.msra.mxu2 %v5205_v2  ;;  %3408 = vmatpush.bf16.msra.mxu0 %v5205_v2  ;;  %v5799_v2 = vunpack.i.l.bf16 %v6987_v28 }
 0x1a0   : > { %6293 = vperm.xlu2 %6176, %v6650_v60  }
 0x1a1   : > { %6288 = vperm.xlu1 %6170, %v6772_v3   ;;  %6313 = vperm.xlu0 %6164, %v6646_v58   ;;  %v6131_v46 = vpop.permute.xlu2 %6130  ;;  %v5825_v58 = vunpack.i.h.bf16 %v7005_v9 }
 0x1a2   : > { %v6133_v35 = vunpack.i.h.bf16 %v6131_v46  ;;  %v6132_v4 = vunpack.i.l.bf16 %v6131_v46  ;;  %v7193_v11 = vpop.permute.xlu1 %6080  ;;  %v7195_v29 = vpop.permute.xlu0 %6090  ;;  %v5824_v46 = vunpack.i.l.bf16 %v7005_v9  ;;  %v5800_v9 = vunpack.i.h.bf16 %v6987_v28 }
 0x1a3   : > { %v5805_v28 = vunpack.i.h.bf16 %v6958_v38 }
 0x1a4   : > { %v1929_v43 = vmul.f32 %v6133_v35, %v7140_v50  ;;  %v1928_v10 = vmul.f32 %v6132_v4, %v7140_v50 }
 0x1a6   : > { %v7201_v60 = vadd.f32 %v1928_v10, %v1287_v1  ;;  %v7203_v3 = vadd.f32 %v1929_v43, %v1288_v16  ;;  %v5790_v1 = vunpack.i.h.bf16 %v6949_v49  ;;  %v5789_v43 = vunpack.i.l.bf16 %v6949_v49 }
 0x1a7   : > { %v5839_v49 = vunpack.i.l.bf16 %v7014_v30  ;;  %v1284_v30 = vmul.f32 %v5800_v9, %v7135_v34 }
 0x1a8   : > { %9215 = vst [vmem:[#allocation105_spill] sm:$0xff] %v7201_v60  ;;  %6308 = vperm.xlu2 %6176, %v9178_v37   ;;  %v1294_v37 = vmul.f32 %v5825_v58, %v7135_v34  ;;  %v5203_v58 = vld [vmem:[%s8950_s3 + $0x8] sm:$0xff] }
 0x1a9   : > { %9216 = vst [vmem:[#allocation106_spill] sm:$0xff] %v7203_v3  ;;  %6303 = vperm.xlu1 %6170, %v6648_v59   ;;  %6328 = vperm.xlu0 %6164, %v9182_v56   ;;  %v6146_v0 = vpop.permute.xlu2 %6145  ;;  %v5204_v59 = vld [vmem:[%s8950_s3 + $0x10] sm:$0xff]  ;;  %v1293_v56 = vmul.f32 %v5824_v46, %v7135_v34  ;;  %v1280_v46 = vmul.f32 %v5790_v1, %v7135_v34  ;;  %v9293_v3 = vld [vmem:[#allocation26_spill] sm:$0xff] }
 0x1aa   : > { %v6148_v57 = vunpack.i.h.bf16 %v6146_v0  ;;  %v6147_v35 = vunpack.i.l.bf16 %v6146_v0  ;;  %v7213_v4 = vpop.permute.xlu1 %6095  ;;  %v7215_v16 = vpop.permute.xlu0 %6105  ;;  %5530 = vmatpush.bf16.msra.mxu2 %v5204_v59  ;;  %3409 = vmatpush.bf16.msra.mxu0 %v5204_v59 }
 0x1ab   : > { %9217 = vst [vmem:[#allocation107_spill] sm:$0xff] %v7213_v4 }
 0x1ac   : > { %9218 = vst [vmem:[#allocation108_spill] sm:$0xff] %v7215_v16  ;;  %v1935_v10 = vmul.f32 %v6148_v57, %v7140_v50  ;;  %v1934_v0 = vmul.f32 %v6147_v35, %v7140_v50  ;;  %v1279_v57 = vmul.f32 %v5789_v43, %v7135_v34  ;;  %v1283_v35 = vmul.f32 %v5799_v2, %v7135_v34 }
 0x1ae   : > { %v7230_v63 = vadd.f32 %v1934_v0, %v1293_v56  ;;  %v7232_v39 = vadd.f32 %v1935_v10, %v1294_v37  ;;  %v1300_v37 = vmul.f32 %v5840_v52, %v7135_v34  ;;  %v1299_v56 = vmul.f32 %v5839_v49, %v7135_v34  ;;  %5531 = vmatpush.bf16.msra.mxu2 %v5203_v58 }
 0x1af   : > { %3410 = vmatpush.bf16.msra.mxu0 %v5203_v58 }
 0x1b0   : > { %9219 = vst [vmem:[#allocation109_spill] sm:$0xff] %v7230_v63  ;;  %6323 = vperm.xlu2 %6176, %v6662_v8   ;;  %v9239_v63 = vld [vmem:[#allocation5_spill] sm:$0xff] }
 0x1b1   : > { %9220 = vst [vmem:[#allocation110_spill] sm:$0xff] %v7232_v39  ;;  %6318 = vperm.xlu1 %6170, %v9183_v40   ;;  %6343 = vperm.xlu0 %6164, %v6658_v6   ;;  %v6161_v59 = vpop.permute.xlu2 %6160  ;;  %v5202_v6 = vld [vmem:[%s8950_s3] sm:$0xff] }
 0x1b2   : > { %v6163_v1 = vunpack.i.h.bf16 %v6161_v59  ;;  %v6162_v10 = vunpack.i.l.bf16 %v6161_v59  ;;  %v6111_v43 = vpop.permute.xlu1 %6110  ;;  %v6121_v0 = vpop.permute.xlu0 %6120  ;;  %5532 = vmatpush.bf16.msra.mxu2 %v5202_v6 }
 0x1b3   : > { %v6113_v8 = vunpack.i.h.bf16 %v6111_v43  ;;  %v6112_v20 = vunpack.i.l.bf16 %v6111_v43  ;;  %v6123_v9 = vunpack.i.h.bf16 %v6121_v0  ;;  %v6122_v55 = vunpack.i.l.bf16 %v6121_v0  ;;  %3411 = vmatpush.bf16.msra.mxu0 %v5202_v6 }
 0x1b4   : > { %v1941_v2 = vmul.f32 %v6163_v1, %v7140_v50  ;;  %v1940_v52 = vmul.f32 %v6162_v10, %v7140_v50  ;;  %v5804_v43 = vunpack.i.l.bf16 %v6958_v38  ;;  %v5815_v0 = vunpack.i.h.bf16 %v6996_v33 }
 0x1b5   : > { %v1921_v40 = vmul.f32 %v6113_v8, %v7140_v50  ;;  %v1920_v49 = vmul.f32 %v6112_v20, %v7140_v50  ;;  %v1925_v59 = vmul.f32 %v6123_v9, %v7140_v50  ;;  %v1924_v58 = vmul.f32 %v6122_v55, %v7140_v50 }
 0x1b6   : > { %v7258_v45 = vadd.f32 %v1940_v52, %v1299_v56  ;;  %v7260_v1 = vadd.f32 %v1941_v2, %v1300_v37  ;;  %v5814_v55 = vunpack.i.l.bf16 %v6996_v33  ;;  %v1286_v38 = vmul.f32 %v5805_v28, %v7135_v34 }
 0x1b7   : > { %v7262_v10 = vadd.f32 %v1921_v40, %v1280_v46  ;;  %v7264_v16 = vadd.f32 %v1920_v49, %v1279_v57  ;;  %v7266_v8 = vadd.f32 %v1925_v59, %v1284_v30  ;;  %v7268_v20 = vadd.f32 %v1924_v58, %v1283_v35 }
 0x1b8   : > { %9221 = vst [vmem:[#allocation111_spill] sm:$0xff] %v7258_v45  ;;  %6338 = vperm.xlu2 %6176, %v9184_v62   ;;  %v1285_v37 = vmul.f32 %v5804_v43, %v7135_v34  ;;  %v1290_v46 = vmul.f32 %v5815_v0, %v7135_v34  ;;  %v1289_v33 = vmul.f32 %v5814_v55, %v7135_v34  ;;  %v5820_v52 = vunpack.i.h.bf16 %v6967_v61 }
 0x1b9   : > { %9222 = vst [vmem:[#allocation112_spill] sm:$0xff] %v7260_v1  ;;  %6333 = vperm.xlu1 %6170, %v6660_v7   ;;  %6358 = vperm.xlu0 %6164, %v9188_v41   ;;  %v5819_v6 = vunpack.i.l.bf16 %v6967_v61  ;;  %v5830_v40 = vunpack.i.h.bf16 %v7003_v27  ;;  %v5829_v0 = vunpack.i.l.bf16 %v7003_v27  ;;  %v5715_v55 = vunpack.i.h.bf16 %v6903_v19  ;;  %v9235_v1 = vld [vmem:[#allocation67_spill] sm:$0xff] }
 0x1ba   : > { %v6126_v57 = vpop.permute.xlu1 %6125  ;;  %v6136_v56 = vpop.permute.xlu0 %6135  ;;  %v1292_v61 = vmul.f32 %v5820_v52, %v7135_v34  ;;  %v6038_v52 = vunpack.i.h.bf16 %v7142_v23 }
 0x1bb   : > { %v6128_v30 = vunpack.i.h.bf16 %v6126_v57  ;;  %v6127_v9 = vunpack.i.l.bf16 %v6126_v57  ;;  %v6138_v35 = vunpack.i.h.bf16 %v6136_v56  ;;  %v6137_v2 = vunpack.i.l.bf16 %v6136_v56 }
 0x1bc   : > { %v5714_v57 = vunpack.i.l.bf16 %v6903_v19  ;;  %v1296_v56 = vmul.f32 %v5830_v40, %v7135_v34  ;;  %v1295_v19 = vmul.f32 %v5829_v0, %v7135_v34 }
 0x1bd   : > { %v1927_v62 = vmul.f32 %v6128_v30, %v7140_v50  ;;  %v1926_v7 = vmul.f32 %v6127_v9, %v7140_v50  ;;  %v1931_v41 = vmul.f32 %v6138_v35, %v7140_v50  ;;  %v1930_v28 = vmul.f32 %v6137_v2, %v7140_v50 }
 0x1be   : > { %v1249_v4 = vmul.f32 %v5714_v57, %v7135_v34 }
 0x1bf   : > { %v7285_v49 = vadd.f32 %v1927_v62, %v1286_v38  ;;  %v7287_v59 = vadd.f32 %v1926_v7, %v1285_v37  ;;  %v7289_v58 = vadd.f32 %v1931_v41, %v1290_v46  ;;  %v7291_v43 = vadd.f32 %v1930_v28, %v1289_v33  ;;  %v9227_v37 = vld [vmem:[#allocation73_spill] sm:$0xff] }
 0x1c0   : > { %6353 = vperm.xlu2 %6176, %v6674_v26   ;;  %v1291_v38 = vmul.f32 %v5819_v6, %v7135_v34  ;;  %v5835_v46 = vunpack.i.h.bf16 %v9227_v37  ;;  %v5834_v7 = vunpack.i.l.bf16 %v9227_v37  ;;  %v9228_v41 = vld [vmem:[#allocation85_spill] sm:$0xff]  ;;  %v6037_v6 = vunpack.i.l.bf16 %v7142_v23 }
 0x1c1   : > { %9223 = vst [vmem:[#allocation113_spill] sm:$0xff] %v7285_v49  ;;  %6348 = vperm.xlu1 %6170, %v9189_v25   ;;  %6373 = vperm.xlu0 %6164, %v6670_v21   ;;  %v5876_v28 = vunpack.i.h.bf16 %v9228_v41  ;;  %v5719_v23 = vunpack.i.l.bf16 %v9235_v1  ;;  %v5875_v57 = vunpack.i.l.bf16 %v9228_v41  ;;  %v5913_v49 = vunpack.i.h.bf16 %v9293_v3 }
 0x1c2   : > { %9224 = vst [vmem:[#allocation114_spill] sm:$0xff] %v7287_v59  ;;  %v6141_v30 = vpop.permute.xlu1 %6140  ;;  %v6151_v27 = vpop.permute.xlu0 %6150 }
 0x1c3   : > { %9225 = vst [vmem:[#allocation115_spill] sm:$0xff] %v7289_v58  ;;  %v6143_v9 = vunpack.i.h.bf16 %v6141_v30  ;;  %v6142_v26 = vunpack.i.l.bf16 %v6141_v30  ;;  %v6153_v35 = vunpack.i.h.bf16 %v6151_v27  ;;  %v6152_v2 = vunpack.i.l.bf16 %v6151_v27 }
 0x1c4   : > { %9226 = vst [vmem:[#allocation116_spill] sm:$0xff] %v7291_v43  ;;  %v1826_v41 = vmul.f32 %v5875_v57, %v7140_v50  ;;  %v6073_v58 = vunpack.i.h.bf16 %v7120_v22 }
 0x1c5   : > { %v1933_v25 = vmul.f32 %v6143_v9, %v7140_v50  ;;  %v1932_v21 = vmul.f32 %v6142_v26, %v7140_v50  ;;  %v1937_v33 = vmul.f32 %v6153_v35, %v7140_v50  ;;  %v1936_v62 = vmul.f32 %v6152_v2, %v7140_v50  ;;  %v9233_v9 = vld [vmem:[#allocation19_spill] sm:$0xff]  ;;  %v9234_v35 = vld [vmem:[#allocation32_spill] sm:$0xff] }
 0x1c6   : > { %v5553_v26 = vunpack.i.h.bf16 %v9233_v9  ;;  %v5552_v37 = vunpack.i.l.bf16 %v9233_v9  ;;  %v1250_v2 = vmul.f32 %v5715_v55, %v7135_v34  ;;  %v1827_v55 = vmul.f32 %v5876_v28, %v7140_v50 }
 0x1c7   : > { %v7312_v40 = vadd.f32 %v1933_v25, %v1292_v61  ;;  %v7314_v30 = vadd.f32 %v1932_v21, %v1291_v38  ;;  %v7316_v0 = vadd.f32 %v1937_v33, %v1296_v56  ;;  %v7318_v27 = vadd.f32 %v1936_v62, %v1295_v19  ;;  %v9236_v61 = vld [vmem:[#allocation2_spill] sm:$0xff]  ;;  %v6179_v21 = vpop.permute.xlu2 %6178 }
 0x1c8   : > { %6368 = vperm.xlu2 %6176, %v9234_v35   ;;  %v1298_v38 = vmul.f32 %v5835_v46, %v7135_v34  ;;  %v1297_v56 = vmul.f32 %v5834_v7, %v7135_v34  ;;  %v1891_v19 = vmul.f32 %v6038_v52, %v7140_v50  ;;  %v1890_v25 = vmul.f32 %v6037_v6, %v7140_v50 }
 0x1c9   : > { %9229 = vst [vmem:[#allocation73_spill] sm:$0xff] %v7312_v40  ;;  %6363 = vperm.xlu1 %6170, %v9236_v61   ;;  %6388 = vperm.xlu0 %6164, %v6848_v32   ;;  %v7335_v61 = vperm.slane %v7129_v44, 2 }
 0x1ca   : > { %9230 = vst [vmem:[#allocation85_spill] sm:$0xff] %v7314_v30  ;;  %v6156_v33 = vpop.permute.xlu1 %6155  ;;  %v2019_v45 = vadd.f32 %v1891_v19, %v1250_v2  ;;  %v2018_v6 = vadd.f32 %v1890_v25, %v1249_v4  ;;  %v7352_v4 = vld [vmem:[%s8949_s2] ss:$0 sm:$0xff]  ;;  %v1186_v2 = vmul.f32 %v5553_v26, %v7135_v34  ;;  %v1185_v19 = vmul.f32 %v5552_v37, %v7135_v34 }
 0x1cb   : > { %9231 = vst [vmem:[#allocation117_spill] sm:$0xff] %v7316_v0  ;;  %v6158_v62 = vunpack.i.h.bf16 %v6156_v33  ;;  %v6157_v9 = vunpack.i.l.bf16 %v6156_v33  ;;  %v6167_v35 = vpop.permute.xlu0 %6166  ;;  %v6043_v33 = vunpack.i.h.bf16 %v7102_v13  ;;  %v9240_v25 = vld [vmem:[#allocation31_spill] sm:$0xff]  ;;  %v6181_v26 = vunpack.i.h.bf16 %v6179_v21  ;;  %v9266_v0 = vld [vmem:[#allocation53_spill] sm:$0xff] }
 0x1cc   : > { %9232 = vst [vmem:[#allocation118_spill] sm:$0xff] %v7318_v27  ;;  %v6169_v32 = vunpack.i.h.bf16 %v6167_v35  ;;  %v6168_v46 = vunpack.i.l.bf16 %v6167_v35  ;;  %v6042_v35 = vunpack.i.l.bf16 %v7102_v13  ;;  %v1954_v57 = vadd.f32 %v1826_v41, %v1185_v19 }
 0x1cd   : > { %v1939_v7 = vmul.f32 %v6158_v62, %v7140_v50  ;;  %v1938_v52 = vmul.f32 %v6157_v9, %v7140_v50  ;;  %v1955_v9 = vadd.f32 %v1827_v55, %v1186_v2  ;;  %v2662_v41 = vmul.f32 %v6181_v26, %v7335_v61 }
 0x1ce   : > { %v2660_v39 = vmul.f32 %v6169_v32, %v7335_v61  ;;  %v2659_v28 = vmul.f32 %v6168_v46, %v7335_v61  ;;  %v1893_v32 = vmul.f32 %v6043_v33, %v7140_v50  ;;  %v1892_v37 = vmul.f32 %v6042_v35, %v7140_v50  ;;  %v9242_v35 = vld [vmem:[#allocation77_spill] sm:$0xff] }
 0x1cf   : > { %v7343_v40 = vadd.f32 %v1939_v7, %v1298_v38  ;;  %v7345_v44 = vadd.f32 %v1938_v52, %v1297_v56  ;;  %v5720_v38 = vunpack.i.h.bf16 %v9235_v1  ;;  %v9241_v56 = vld [vmem:[#allocation3_spill] sm:$0xff]  ;;  %v7364_v1 = vpop.permute.xlu2 %6188  ;;  %v5882_v2 = vunpack.i.h.bf16 %v9242_v35 }
 0x1d0   : > { %v2788_v30 = vadd.f32 %v2660_v39, %v2019_v45  ;;  %v2787_v62 = vadd.f32 %v2659_v28, %v2018_v6  ;;  %6383 = vperm.xlu2 %6176, %v9239_v63   ;;  %v1251_v39 = vmul.f32 %v5719_v23, %v7135_v34  ;;  %v6180_v45 = vunpack.i.l.bf16 %v6179_v21 }
 0x1d1   : > { %9237 = vst [vmem:[#allocation19_spill] sm:$0xff] %v7343_v40  ;;  %6378 = vperm.xlu1 %6170, %v9240_v25   ;;  %6403 = vperm.xlu0 %6164, %v9241_v56   ;;  %v1252_v21 = vmul.f32 %v5720_v38, %v7135_v34 }
 0x1d2   : > { %9238 = vst [vmem:[#allocation32_spill] sm:$0xff] %v7345_v44  ;;  %v2919_v63 = vadd.f32 %v7352_v4, %v2787_v62  ;;  %v2920_v13 = vadd.f32 %v7352_v4, %v2788_v30  ;;  %v2661_v62 = vmul.f32 %v6180_v45, %v7335_v61  ;;  %v2020_v19 = vadd.f32 %v1892_v37, %v1251_v39  ;;  %v9265_v44 = vld [vmem:[#allocation9_spill] sm:$0xff] }
 0x1d3   : > { %v6173_v46 = vpop.permute.xlu1 %6172  ;;  %v7366_v6 = vpop.permute.xlu0 %6193  ;;  %v5881_v45 = vunpack.i.l.bf16 %v9242_v35  ;;  %v1829_v37 = vmul.f32 %v5882_v2, %v7140_v50 }
 0x1d4   : > { %v6175_v7 = vunpack.i.h.bf16 %v6173_v46  ;;  %v6174_v52 = vunpack.i.l.bf16 %v6173_v46  ;;  %v3047_v23 = vmax.f32 %v2919_v63, 0.0  ;;  %v3048_v28 = vmax.f32 %v2920_v13, 0.0  ;;  %v9243_v63 = vld [vmem:[#allocation24_spill] sm:$0xff] }
 0x1d5   : > { %v5558_v13 = vunpack.i.h.bf16 %v9243_v63  ;;  %v2021_v46 = vadd.f32 %v1893_v32, %v1252_v21  ;;  %v5557_v38 = vunpack.i.l.bf16 %v9243_v63  ;;  %v2789_v26 = vadd.f32 %v2661_v62, %v2020_v19  ;;  %v9245_v63 = vld [vmem:[#allocation8_spill] sm:$0xff] }
 0x1d6   : > { %v2596_v30 = vmul.f32 %v6175_v7, %v7335_v61  ;;  %v2595_v55 = vmul.f32 %v6174_v52, %v7335_v61  ;;  %v3143_v33 = vpack.c.bf16 %v3048_v28, %v3047_v23  ;;  %v9244_v7 = vld [vmem:[#allocation4_spill] sm:$0xff]  ;;  %v1828_v28 = vmul.f32 %v5881_v45, %v7140_v50 }
 0x1d7   : > { %v1188_v62 = vmul.f32 %v5558_v13, %v7135_v34  ;;  %v7389_v21 = vpop.permute.xlu2 %6203  ;;  %v9246_v13 = vld [vmem:[#allocation66_spill] sm:$0xff] }
 0x1d8   : > { %v2723_v25 = vadd.f32 %v2595_v55, %v1954_v57  ;;  %v2724_v56 = vadd.f32 %v2596_v30, %v1955_v9  ;;  %6398 = vperm.xlu2 %6176, %v9195_v5   ;;  %5087 = vmatmul.msk.bf16.vlgmr.msra.gmra.mxu2 %vm3211_vm0, %v3143_v33  ;;  %v2790_v9 = vadd.f32 %v2662_v41, %v2021_v46  ;;  %v5725_v45 = vunpack.i.h.bf16 %v9246_v13 }
 0x1d9   : > { %6393 = vperm.xlu1 %6170, %v9244_v7   ;;  %6418 = vperm.xlu0 %6164, %v6866_v53   ;;  %v1187_v53 = vmul.f32 %v5557_v38, %v7135_v34  ;;  %v2921_v33 = vadd.f32 %v7352_v4, %v2789_v26  ;;  %v5724_v46 = vunpack.i.l.bf16 %v9246_v13  ;;  %v1957_v38 = vadd.f32 %v1829_v37, %v1188_v62  ;;  %v9250_v13 = vld [vmem:[#allocation87_spill] sm:$0xff] }
 0x1da   : > { %v2855_v39 = vadd.f32 %v7352_v4, %v2723_v25  ;;  %v2856_v57 = vadd.f32 %v7352_v4, %v2724_v56  ;;  %v2922_v19 = vadd.f32 %v7352_v4, %v2790_v9  ;;  %v6048_v25 = vunpack.i.h.bf16 %v7144_v31 }
 0x1db   : > { %v6184_v5 = vpop.permute.xlu1 %6183  ;;  %v7384_v32 = vpop.permute.xlu0 %6208  ;;  %v6047_v56 = vunpack.i.l.bf16 %v7144_v31  ;;  %v1956_v7 = vadd.f32 %v1828_v28, %v1187_v53  ;;  %v6191_v26 = vunpack.i.h.bf16 %v7364_v1  ;;  %v1254_v37 = vmul.f32 %v5725_v45, %v7135_v34 }
 0x1dc   : > { %v6186_v52 = vunpack.i.h.bf16 %v6184_v5  ;;  %v6185_v23 = vunpack.i.l.bf16 %v6184_v5  ;;  %v2983_v30 = vmax.f32 %v2855_v39, 0.0  ;;  %v2984_v55 = vmax.f32 %v2856_v57, 0.0  ;;  %v9247_v57 = vld [vmem:[#allocation43_spill] sm:$0xff] }
 0x1dd   : > { %v6190_v39 = vunpack.i.l.bf16 %v7364_v1  ;;  %v3049_v5 = vmax.f32 %v2921_v33, 0.0  ;;  %v1253_v28 = vmul.f32 %v5724_v46, %v7135_v34  ;;  %v5888_v45 = vunpack.i.h.bf16 %v9250_v13 }
 0x1de   : > { %v2598_v41 = vmul.f32 %v6186_v52, %v7335_v61  ;;  %v2597_v35 = vmul.f32 %v6185_v23, %v7335_v61  ;;  %v3111_v2 = vpack.c.bf16 %v2984_v55, %v2983_v30  ;;  %v3050_v52 = vmax.f32 %v2922_v19, 0.0 }
 0x1df   : > { %v1895_v23 = vmul.f32 %v6048_v25, %v7140_v50  ;;  %v1894_v30 = vmul.f32 %v6047_v56, %v7140_v50  ;;  %v2663_v55 = vmul.f32 %v6190_v39, %v7335_v61  ;;  %v9248_v25 = vmov 1   ;;  %v9249_v56 = vld [vmem:[#allocation18_spill] sm:$0xff] }
 0x1e0   : > { %6413 = vperm.xlu2 %6176, %v9245_v63   ;;  %5055 = vmatmul.msk.bf16.vlgmr.msra.gmra.mxu0 %vm3211_vm0, %v3111_v2  ;;  %v2725_v9 = vadd.f32 %v2597_v35, %v1956_v7  ;;  %v2726_v31 = vadd.f32 %v2598_v41, %v1957_v38  ;;  %v3144_v1 = vpack.c.bf16 %v3050_v52, %v3049_v5  ;;  %v7415_v2 = vpop.permute.xlu2 %6218  ;;  %v5564_v63 = vunpack.i.h.bf16 %v9249_v56  ;;  %v9251_v7 = vld [vmem:[#allocation7_spill] sm:$0xff] }
 0x1e1   : > { %6408 = vperm.xlu1 %6170, %v9199_v54   ;;  %6434 = vperm.xlu0 %6164, %v9247_v57   ;;  %v2664_v54 = vmul.f32 %v6191_v26, %v7335_v61  ;;  %v2023_v41 = vadd.f32 %v1895_v23, %v1254_v37  ;;  %v2022_v35 = vadd.f32 %v1894_v30, %v1253_v28  ;;  %v5887_v46 = vunpack.i.l.bf16 %v9250_v13 }
 0x1e2   : > { %v2857_v53 = vadd.f32 %v7352_v4, %v2725_v9  ;;  %v2858_v33 = vadd.f32 %v7352_v4, %v2726_v31  ;;  %v5563_v38 = vunpack.i.l.bf16 %v9249_v56  ;;  %v9252_v9 = vld [vmem:[#allocation42_spill] sm:$0xff]  ;;  %v6196_v31 = vunpack.i.h.bf16 %v7366_v6 }
 0x1e3   : > { %v7411_v62 = vpop.permute.xlu0 %6223  ;;  %v6199_v19 = vpop.permute.xlu1 %6198  ;;  %v2791_v26 = vadd.f32 %v2663_v55, %v2022_v35  ;;  %v2792_v39 = vadd.f32 %v2664_v54, %v2023_v41  ;;  %v6195_v5 = vunpack.i.l.bf16 %v7366_v6  ;;  %v1190_v30 = vmul.f32 %v5564_v63, %v7135_v34  ;;  %v9253_v6 = vld [vmem:[#allocation56_spill] sm:$0xff] }
 0x1e4   : > { %v2985_v52 = vmax.f32 %v2857_v53, 0.0  ;;  %v2986_v23 = vmax.f32 %v2858_v33, 0.0  ;;  %v1831_v37 = vmul.f32 %v5888_v45, %v7140_v50  ;;  %v1830_v28 = vmul.f32 %v5887_v46, %v7140_v50  ;;  %v9254_v46 = vld [vmem:[#allocation6_spill] sm:$0xff] }
 0x1e5   : > { %v2924_v54 = vadd.f32 %v7352_v4, %v2792_v39  ;;  %v1189_v55 = vmul.f32 %v5563_v38, %v7135_v34  ;;  %v2599_v41 = vmul.f32 %v6195_v5, %v7335_v61  ;;  %v5730_v53 = vunpack.i.h.bf16 %v9253_v6 }
 0x1e6   : > { %v3112_v35 = vpack.c.bf16 %v2986_v23, %v2985_v52  ;;  %v5729_v33 = vunpack.i.l.bf16 %v9253_v6  ;;  %v1959_v56 = vadd.f32 %v1831_v37, %v1190_v30  ;;  %v6053_v13 = vunpack.i.h.bf16 %v7159_v14 }
 0x1e7   : > { %v1958_v63 = vadd.f32 %v1830_v28, %v1189_v55  ;;  %v6052_v45 = vunpack.i.l.bf16 %v7159_v14  ;;  %v6201_v23 = vunpack.i.h.bf16 %v6199_v19  ;;  %v6200_v30 = vunpack.i.l.bf16 %v6199_v19  ;;  %v9256_v28 = vld [vmem:[#allocation86_spill] sm:$0xff] }
 0x1e8   : > { %6427 = vset.pattern.permute.xlu2 %v9248_v25  ;;  %5088 = vmatmul.msk.bf16.gmra.mxu2 %vm3211_vm0, %v3144_v1  ;;  %v2923_v1 = vadd.f32 %v7352_v4, %v2791_v26  ;;  %v9255_v26 = vld [vmem:[#allocation49_spill] sm:$0xff]  ;;  %v1256_v14 = vmul.f32 %v5730_v53, %v7135_v34  ;;  %v1255_v37 = vmul.f32 %v5729_v33, %v7135_v34  ;;  %v5893_v55 = vunpack.i.h.bf16 %v9256_v28 }
 0x1e9   : > { %6423 = vperm.xlu1 %6170, %v9251_v7   ;;  %6449 = vperm.xlu0 %6164, %v9252_v9   ;;  %v7444_v7 = vpop.permute.xlu2 %6233  ;;  %v2727_v5 = vadd.f32 %v2599_v41, %v1958_v63  ;;  %v1896_v6 = vmul.f32 %v6052_v45, %v7140_v50  ;;  %v6206_v63 = vunpack.i.h.bf16 %v7389_v21  ;;  %v9258_v45 = vld [vmem:[#allocation11_spill] sm:$0xff] }
 0x1ea   : > { %6429 = vperm.xlu2 %6427, %v9247_v57   ;;  %v2600_v57 = vmul.f32 %v6196_v31, %v7335_v61  ;;  %v3051_v39 = vmax.f32 %v2923_v1, 0.0  ;;  %v3052_v31 = vmax.f32 %v2924_v54, 0.0  ;;  %v2665_v1 = vmul.f32 %v6200_v30, %v7335_v61 }
 0x1eb   : > { %v7438_v25 = vpop.permute.xlu0 %6238  ;;  %v7446_v38 = vpop.permute.xlu1 %6213  ;;  %v2859_v54 = vadd.f32 %v7352_v4, %v2727_v5 }
 0x1ec   : > { %v2728_v52 = vadd.f32 %v2600_v57, %v1959_v56  ;;  %v3145_v40 = vpack.c.bf16 %v3052_v31, %v3051_v39  ;;  %v9257_v57 = vld [vmem:[#allocation23_spill] sm:$0xff]  ;;  %v2024_v56 = vadd.f32 %v1896_v6, %v1255_v37  ;;  %v1833_v39 = vmul.f32 %v5893_v55, %v7140_v50 }
 0x1ed   : > { %v5569_v41 = vunpack.i.h.bf16 %v9257_v57  ;;  %v5568_v53 = vunpack.i.l.bf16 %v9257_v57 }
 0x1ee   : > { %v2860_v19 = vadd.f32 %v7352_v4, %v2728_v52  ;;  %v9259_v52 = vld [vmem:[#allocation48_spill] sm:$0xff] }
 0x1ef   : > { %v1191_v55 = vmul.f32 %v5568_v53, %v7135_v34 }
 0x1f0   : > { %5056 = vmatmul.msk.bf16.gmra.mxu0 %vm3211_vm0, %v3112_v35  ;;  %v1897_v35 = vmul.f32 %v6053_v13, %v7140_v50  ;;  %v6205_v13 = vunpack.i.l.bf16 %v7389_v21  ;;  %v2988_v37 = vmax.f32 %v2860_v19, 0.0  ;;  %v1192_v21 = vmul.f32 %v5569_v41, %v7135_v34  ;;  %v9260_v19 = vld [vmem:[#allocation69_spill] sm:$0xff] }
 0x1f1   : > { %6439 = vperm.xlu1 %6170, %v9254_v46   ;;  %6464 = vperm.xlu0 %6164, %v9255_v26   ;;  %v5892_v46 = vunpack.i.l.bf16 %v9256_v28  ;;  %v7473_v28 = vpop.permute.xlu2 %6248  ;;  %v5735_v41 = vunpack.i.h.bf16 %v9260_v19 }
 0x1f2   : > { %6444 = vperm.xlu2 %6427, %v9252_v9   ;;  %v2666_v9 = vmul.f32 %v6201_v23, %v7335_v61  ;;  %v2025_v33 = vadd.f32 %v1897_v35, %v1256_v14  ;;  %v2793_v23 = vadd.f32 %v2665_v1, %v2024_v56  ;;  %v2987_v14 = vmax.f32 %v2859_v54, 0.0 }
 0x1f3   : > { %v1832_v31 = vmul.f32 %v5892_v46, %v7140_v50  ;;  %v7468_v5 = vpop.permute.xlu0 %6253  ;;  %v2602_v35 = vmul.f32 %v6206_v63, %v7335_v61  ;;  %v2601_v6 = vmul.f32 %v6205_v13, %v7335_v61  ;;  %v1961_v46 = vadd.f32 %v1833_v39, %v1192_v21  ;;  %v9261_v63 = vld [vmem:[#allocation10_spill] sm:$0xff] }
 0x1f4   : > { %v2794_v30 = vadd.f32 %v2666_v9, %v2025_v33  ;;  %v6058_v1 = vunpack.i.h.bf16 %v7111_v24  ;;  %v6057_v54 = vunpack.i.l.bf16 %v7111_v24  ;;  %v5734_v33 = vunpack.i.l.bf16 %v9260_v19 }
 0x1f5   : > { %v1960_v57 = vadd.f32 %v1832_v31, %v1191_v55  ;;  %v2730_v56 = vadd.f32 %v2602_v35, %v1961_v46  ;;  %v6211_v13 = vunpack.i.h.bf16 %v7384_v32  ;;  %v6210_v39 = vunpack.i.l.bf16 %v7384_v32  ;;  %v9262_v31 = vld [vmem:[#allocation47_spill] sm:$0xff] }
 0x1f6   : > { %v2926_v9 = vadd.f32 %v7352_v4, %v2794_v30  ;;  %v1899_v30 = vmul.f32 %v6058_v1, %v7140_v50  ;;  %v1258_v21 = vmul.f32 %v5735_v41, %v7135_v34  ;;  %v1257_v55 = vmul.f32 %v5734_v33, %v7135_v34  ;;  %v9264_v33 = vld [vmem:[#allocation79_spill] sm:$0xff] }
 0x1f7   : > { %v2729_v53 = vadd.f32 %v2601_v6, %v1960_v57  ;;  %v2862_v6 = vadd.f32 %v7352_v4, %v2730_v56  ;;  %v2668_v32 = vmul.f32 %v6211_v13, %v7335_v61  ;;  %v2667_v46 = vmul.f32 %v6210_v39, %v7335_v61 }
 0x1f8   : > { %5089 = vmatmul.msk.bf16.gmra.mxu2 %vm3211_vm0, %v3145_v40  ;;  %v7475_v40 = vpop.permute.xlu1 %6228  ;;  %v3054_v24 = vmax.f32 %v2926_v9, 0.0  ;;  %v9263_v9 = vld [vmem:[#allocation14_spill] sm:$0xff]  ;;  %v2027_v19 = vadd.f32 %v1899_v30, %v1258_v21  ;;  %v5897_v56 = vunpack.i.l.bf16 %v9264_v33  ;;  %v6215_v30 = vunpack.i.l.bf16 %v7446_v38 }
 0x1f9   : > { %6454 = vperm.xlu1 %6170, %v9258_v45   ;;  %6479 = vperm.xlu0 %6164, %v9259_v52   ;;  %v3113_v45 = vpack.c.bf16 %v2988_v37, %v2987_v14  ;;  %v1898_v14 = vmul.f32 %v6057_v54, %v7140_v50  ;;  %v2861_v35 = vadd.f32 %v7352_v4, %v2729_v53  ;;  %v5575_v1 = vunpack.i.h.bf16 %v9263_v9 }
 0x1fa   : > { %6459 = vperm.xlu2 %6427, %v9255_v26   ;;  %v2925_v26 = vadd.f32 %v7352_v4, %v2793_v23  ;;  %v5574_v41 = vunpack.i.l.bf16 %v9263_v9  ;;  %v5898_v53 = vunpack.i.h.bf16 %v9264_v33  ;;  %v2796_v39 = vadd.f32 %v2668_v32, %v2027_v19 }
 0x1fb   : > { %v6269_v37 = vpop.permute.xlu0 %6268  ;;  %v2026_v54 = vadd.f32 %v1898_v14, %v1257_v55  ;;  %v6216_v14 = vunpack.i.h.bf16 %v7446_v38  ;;  %v6063_v9 = vunpack.i.h.bf16 %v7161_v12 }
 0x1fc   : > { %v3053_v23 = vmax.f32 %v2925_v26, 0.0  ;;  %v1193_v55 = vmul.f32 %v5574_v41, %v7135_v34  ;;  %v1835_v32 = vmul.f32 %v5898_v53, %v7140_v50  ;;  %v9267_v41 = vld [vmem:[#allocation68_spill] sm:$0xff] }
 0x1fd   : > { %v2795_v13 = vadd.f32 %v2667_v46, %v2026_v54  ;;  %v2604_v38 = vmul.f32 %v6216_v14, %v7335_v61  ;;  %v5740_v33 = vunpack.i.h.bf16 %v9267_v41 }
 0x1fe   : > { %v3146_v26 = vpack.c.bf16 %v3054_v24, %v3053_v23  ;;  %v2989_v23 = vmax.f32 %v2861_v35, 0.0  ;;  %v2990_v24 = vmax.f32 %v2862_v6, 0.0 }
 0x1ff   : > { %v2927_v6 = vadd.f32 %v7352_v4, %v2795_v13 }
 0x200   : > { %5057 = vmatmul.msk.bf16.gmra.mxu0 %vm3211_vm0, %v3113_v45  ;;  %v7502_v57 = vpop.permute.xlu1 %6243  ;;  %v6270_v45 = vunpack.i.l.bf16 %v6269_v37  ;;  %v3114_v35 = vpack.c.bf16 %v2990_v24, %v2989_v23  ;;  %v9269_v23 = vld [vmem:[#allocation13_spill] sm:$0xff] }
 0x201   : > { %6469 = vperm.xlu1 %6170, %v9261_v63   ;;  %6494 = vperm.xlu0 %6164, %v9262_v31   ;;  %v6271_v63 = vunpack.i.h.bf16 %v6269_v37  ;;  %v1194_v37 = vmul.f32 %v5575_v1, %v7135_v34  ;;  %v6062_v1 = vunpack.i.l.bf16 %v7161_v12  ;;  %v6220_v12 = vunpack.i.l.bf16 %v7415_v2 }
 0x202   : > { %6474 = vperm.xlu2 %6427, %v9259_v52   ;;  %v7500_v52 = vpop.permute.xlu2 %6263  ;;  %v2679_v21 = vmul.f32 %v6270_v45, %v7335_v61  ;;  %v2603_v45 = vmul.f32 %v6215_v30, %v7335_v61  ;;  %v3055_v24 = vmax.f32 %v2927_v6, 0.0  ;;  %v6246_v60 = vunpack.i.h.bf16 %v7502_v57 }
 0x203   : > { %v2680_v46 = vmul.f32 %v6271_v63, %v7335_v61  ;;  %v1963_v53 = vadd.f32 %v1835_v32, %v1194_v37  ;;  %v7533_v13 = vpop.permute.xlu0 %6283  ;;  %v1901_v37 = vmul.f32 %v6063_v9, %v7140_v50  ;;  %v1260_v32 = vmul.f32 %v5740_v33, %v7135_v34  ;;  %v9270_v9 = vld [vmem:[#allocation15_spill] sm:$0xff] }
 0x204   : > { %9268 = vst [vmem:[#allocation67_spill] sm:$0xff] %v7533_v13 }
 0x205   : > { %v2808_v63 = vadd.f32 %v2680_v46, %v7152_v18  ;;  %v2732_v14 = vadd.f32 %v2604_v38, %v1963_v53 }
 0x208   : > { %5090 = vmatmul.msk.bf16.gmra.mxu2 %vm3211_vm0, %v3146_v26  ;;  %v2928_v26 = vadd.f32 %v7352_v4, %v2796_v39  ;;  %v7529_v19 = vpop.permute.xlu1 %6258  ;;  %v6221_v39 = vunpack.i.h.bf16 %v7415_v2 }
 0x209   : > { %6484 = vperm.xlu1 %6170, %v9265_v44   ;;  %6509 = vperm.xlu0 %6164, %v9266_v0   ;;  %v1834_v44 = vmul.f32 %v5897_v56, %v7140_v50 }
 0x20a   : > { %6489 = vperm.xlu2 %6427, %v9262_v31   ;;  %v2807_v31 = vadd.f32 %v2679_v21, %v7150_v51  ;;  %v7527_v54 = vpop.permute.xlu2 %6278  ;;  %v5739_v51 = vunpack.i.l.bf16 %v9267_v41  ;;  %v3056_v21 = vmax.f32 %v2928_v26, 0.0  ;;  %v2670_v46 = vmul.f32 %v6221_v39, %v7335_v61  ;;  %v9271_v41 = vld [vmem:[#allocation20_spill] sm:$0xff] }
 0x20b   : > { %v1962_v56 = vadd.f32 %v1834_v44, %v1193_v55  ;;  %v1900_v55 = vmul.f32 %v6062_v1, %v7140_v50  ;;  %v2940_v44 = vadd.f32 %v7352_v4, %v2808_v63  ;;  %v2864_v26 = vadd.f32 %v7352_v4, %v2732_v14  ;;  %v9274_v14 = vld [vmem:[#allocation12_spill] sm:$0xff] }
 0x20c   : > { %v2939_v18 = vadd.f32 %v7352_v4, %v2807_v31  ;;  %v1259_v2 = vmul.f32 %v5739_v51, %v7135_v34  ;;  %v3147_v6 = vpack.c.bf16 %v3056_v21, %v3055_v24  ;;  %v5580_v1 = vunpack.i.h.bf16 %v9270_v9  ;;  %v7563_v21 = vpop.permute.xlu0 %6298 }
 0x20d   : > { %v2731_v30 = vadd.f32 %v2603_v45, %v1962_v56  ;;  %v2029_v45 = vadd.f32 %v1901_v37, %v1260_v32  ;;  %v5903_v33 = vunpack.i.h.bf16 %v9271_v41  ;;  %v5902_v53 = vunpack.i.l.bf16 %v9271_v41 }
 0x20e   : > { %v3067_v38 = vmax.f32 %v2939_v18, 0.0  ;;  %v2028_v31 = vadd.f32 %v1900_v55, %v1259_v2  ;;  %v3068_v56 = vmax.f32 %v2940_v44, 0.0  ;;  %v5579_v63 = vunpack.i.l.bf16 %v9270_v9 }
 0x20f   : > { %v2798_v39 = vadd.f32 %v2670_v46, %v2029_v45  ;;  %v2992_v37 = vmax.f32 %v2864_v26, 0.0  ;;  %v1837_v32 = vmul.f32 %v5903_v33, %v7140_v50  ;;  %v1836_v44 = vmul.f32 %v5902_v53, %v7140_v50  ;;  %v9276_v26 = vld [vmem:[#allocation16_spill] sm:$0xff]  ;;  %v9277_v53 = vld [vmem:[#allocation59_spill] sm:$0xff] }
 0x210   : > { %5058 = vmatmul.msk.bf16.gmra.mxu0 %vm3211_vm0, %v3114_v35  ;;  %v2669_v35 = vmul.f32 %v6220_v12, %v7335_v61  ;;  %v6226_v12 = vunpack.i.h.bf16 %v7411_v62  ;;  %v7559_v24 = vpop.permute.xlu1 %6273  ;;  %v7565_v55 = vpack.c.bf16 %v3068_v56, %v3067_v38  ;;  %v1196_v2 = vmul.f32 %v5580_v1, %v7135_v34 }
 0x211   : > { %6499 = vperm.xlu1 %6170, %v9269_v23   ;;  %9273 = vst [vmem:[#allocation5_spill] sm:$0xff] %v7559_v24  ;;  %v5595_v38 = vunpack.i.h.bf16 %v9276_v26  ;;  %v6068_v33 = vunpack.i.h.bf16 %v7176_v36  ;;  %v6067_v1 = vunpack.i.l.bf16 %v7176_v36  ;;  %v5745_v56 = vunpack.i.h.bf16 %v9277_v53 }
 0x212   : > { %6504 = vperm.xlu2 %6427, %v9266_v0   ;;  %v2863_v0 = vadd.f32 %v7352_v4, %v2731_v30  ;;  %v2797_v51 = vadd.f32 %v2669_v35, %v2028_v31  ;;  %v7557_v23 = vpop.permute.xlu2 %6293  ;;  %v6225_v30 = vunpack.i.l.bf16 %v7411_v62  ;;  %9275 = vst [vmem:[#allocation31_spill] sm:$0xff] %v7565_v55  ;;  %v2930_v35 = vadd.f32 %v7352_v4, %v2798_v39 }
 0x213   : > { %9272 = vst [vmem:[#allocation2_spill] sm:$0xff] %v7557_v23  ;;  %v2606_v62 = vmul.f32 %v6226_v12, %v7335_v61  ;;  %v5594_v31 = vunpack.i.l.bf16 %v9276_v26  ;;  %v1965_v9 = vadd.f32 %v1837_v32, %v1196_v2  ;;  %v7589_v36 = vmul.f32 %v5595_v38, %v7135_v34 }
 0x214   : > { %v2991_v18 = vmax.f32 %v2863_v0, 0.0  ;;  %v2929_v46 = vadd.f32 %v7352_v4, %v2797_v51  ;;  %v2605_v45 = vmul.f32 %v6225_v30, %v7335_v61  ;;  %v3058_v39 = vmax.f32 %v2930_v35, 0.0  ;;  %v7596_v35 = vpop.permute.xlu0 %6313 }
 0x215   : > { %v2734_v12 = vadd.f32 %v2606_v62, %v1965_v9  ;;  %v6231_v30 = vunpack.i.h.bf16 %v7475_v40  ;;  %v1903_v2 = vmul.f32 %v6068_v33, %v7140_v50  ;;  %9280 = vst [vmem:[#allocation24_spill] sm:$0xff] %v7596_v35  ;;  %v9282_v33 = vld [vmem:[#allocation30_spill] sm:$0xff]  ;;  %v6235_v23 = vunpack.i.l.bf16 %v7444_v7 }
 0x216   : > { %v3115_v0 = vpack.c.bf16 %v2992_v37, %v2991_v18  ;;  %v3057_v51 = vmax.f32 %v2929_v46, 0.0  ;;  %v6230_v18 = vunpack.i.l.bf16 %v7475_v40  ;;  %v1902_v46 = vmul.f32 %v6067_v1, %v7140_v50 }
 0x217   : > { %v1262_v40 = vmul.f32 %v5745_v56, %v7135_v34  ;;  %v2672_v26 = vmul.f32 %v6231_v30, %v7335_v61  ;;  %v2866_v9 = vadd.f32 %v7352_v4, %v2734_v12  ;;  %v5585_v1 = vunpack.i.h.bf16 %v9282_v33 }
 0x218   : > { %5091 = vmatmul.msk.bf16.gmra.mxu2 %vm3211_vm0, %v3147_v6  ;;  %v1195_v6 = vmul.f32 %v5579_v63, %v7135_v34  ;;  %v5744_v63 = vunpack.i.l.bf16 %v9277_v53  ;;  %v7586_v32 = vpop.permute.xlu1 %6288  ;;  %v2671_v38 = vmul.f32 %v6230_v18, %v7335_v61  ;;  %v9283_v53 = vld [vmem:[#allocation82_spill] sm:$0xff]  ;;  %v5584_v56 = vunpack.i.l.bf16 %v9282_v33  ;;  %v9285_v18 = vld [vmem:[#allocation36_spill] sm:$0xff] }
 0x219   : > { %6514 = vperm.xlu1 %6170, %v9274_v14   ;;  %9279 = vst [vmem:[#allocation77_spill] sm:$0xff] %v7586_v32  ;;  %v5908_v35 = vunpack.i.h.bf16 %v9283_v53  ;;  %v5600_v12 = vunpack.i.h.bf16 %v9285_v18 }
 0x21a   : > { %v1964_v41 = vadd.f32 %v1836_v44, %v1195_v6  ;;  %v7584_v37 = vpop.permute.xlu2 %6308  ;;  %v7592_v44 = vmul.f32 %v5594_v31, %v7135_v34  ;;  %v9281_v6 = vld [vmem:[#allocation29_spill] sm:$0xff] }
 0x21b   : > { %9278 = vst [vmem:[#allocation3_spill] sm:$0xff] %v7584_v37  ;;  %v5590_v62 = vunpack.i.h.bf16 %v9281_v6  ;;  %v5907_v37 = vunpack.i.l.bf16 %v9283_v53  ;;  %v2994_v53 = vmax.f32 %v2866_v9, 0.0 }
 0x21c   : > { %v2733_v14 = vadd.f32 %v2605_v45, %v1964_v41  ;;  %v1261_v45 = vmul.f32 %v5744_v63, %v7135_v34  ;;  %v5589_v41 = vunpack.i.l.bf16 %v9281_v6  ;;  %v9284_v63 = vld [vmem:[#allocation35_spill] sm:$0xff]  ;;  %v6236_v6 = vunpack.i.h.bf16 %v7444_v7 }
 0x21d   : > { %v7617_v33 = vmul.f32 %v5590_v62, %v7135_v34  ;;  %v7634_v62 = vmul.f32 %v5600_v12, %v7135_v34  ;;  %v6072_v12 = vunpack.i.l.bf16 %v7120_v22 }
 0x21e   : > { %v2865_v31 = vadd.f32 %v7352_v4, %v2733_v14  ;;  %v2030_v30 = vadd.f32 %v1902_v46, %v1261_v45  ;;  %v5604_v14 = vunpack.i.l.bf16 %v9284_v63  ;;  %v1839_v46 = vmul.f32 %v5908_v35, %v7140_v50 }
 0x21f   : > { %v1198_v45 = vmul.f32 %v5585_v1, %v7135_v34  ;;  %v2607_v35 = vmul.f32 %v6235_v23, %v7335_v61 }
 0x220   : > { %5059 = vmatmul.msk.bf16.gmra.mxu0 %vm3211_vm0, %v3115_v0  ;;  %v3148_v0 = vpack.c.bf16 %v3058_v39, %v3057_v51  ;;  %v5605_v51 = vunpack.i.h.bf16 %v9284_v63  ;;  %v2031_v39 = vadd.f32 %v1903_v2, %v1262_v40  ;;  %v2799_v32 = vadd.f32 %v2671_v38, %v2030_v30  ;;  %v7640_v9 = vpop.permute.xlu1 %6303 }
 0x221   : > { %v2993_v13 = vmax.f32 %v2865_v31, 0.0  ;;  %v7620_v2 = vmul.f32 %v5589_v41, %v7135_v34  ;;  %v1838_v40 = vmul.f32 %v5907_v37, %v7140_v50  ;;  %v7631_v38 = vmul.f32 %v5604_v14, %v7135_v34  ;;  %9287 = vst [vmem:[#allocation8_spill] sm:$0xff] %v7640_v9  ;;  %v9288_v41 = vld [vmem:[#allocation62_spill] sm:$0xff]  ;;  %v9290_v9 = vld [vmem:[#allocation71_spill] sm:$0xff] }
 0x222   : > { %v2800_v55 = vadd.f32 %v2672_v26, %v2031_v39  ;;  %v7627_v7 = vmul.f32 %v5605_v51, %v7135_v34  ;;  %v5599_v26 = vunpack.i.l.bf16 %v9285_v18  ;;  %v2608_v31 = vmul.f32 %v6236_v6, %v7335_v61  ;;  %v7638_v37 = vpop.permute.xlu2 %6323  ;;  %v9289_v6 = vld [vmem:[#allocation70_spill] sm:$0xff] }
 0x223   : > { %9286 = vst [vmem:[#allocation4_spill] sm:$0xff] %v7638_v37  ;;  %v5760_v1 = vunpack.i.h.bf16 %v9288_v41  ;;  %v3116_v63 = vpack.c.bf16 %v2994_v53, %v2993_v13  ;;  %v2931_v51 = vadd.f32 %v7352_v4, %v2799_v32  ;;  %v5759_v30 = vunpack.i.l.bf16 %v9288_v41  ;;  %v9291_v41 = vld [vmem:[#allocation84_spill] sm:$0xff] }
 0x224   : > { %v2932_v39 = vadd.f32 %v7352_v4, %v2800_v55  ;;  %v1967_v18 = vadd.f32 %v1839_v46, %v1198_v45  ;;  %v1203_v23 = vmul.f32 %v5599_v26, %v7135_v34  ;;  %v5755_v37 = vunpack.i.h.bf16 %v9289_v6 }
 0x225   : > { %v5750_v27 = vunpack.i.h.bf16 %v9290_v9  ;;  %v5749_v13 = vunpack.i.l.bf16 %v9290_v9  ;;  %v6240_v53 = vunpack.i.l.bf16 %v7438_v25  ;;  %v7657_v46 = vmul.f32 %v5760_v1, %v7135_v34  ;;  %v9292_v1 = vld [vmem:[#allocation72_spill] sm:$0xff] }
 0x226   : > { %v2736_v55 = vadd.f32 %v2608_v31, %v1967_v18  ;;  %v3059_v45 = vmax.f32 %v2931_v51, 0.0  ;;  %v7661_v26 = vmul.f32 %v5759_v30, %v7135_v34  ;;  %v5754_v22 = vunpack.i.l.bf16 %v9289_v6 }
 0x227   : > { %v1904_v9 = vmul.f32 %v6072_v12, %v7140_v50  ;;  %v7667_v31 = vmul.f32 %v5755_v37, %v7135_v34  ;;  %v1263_v51 = vmul.f32 %v5749_v13, %v7135_v34  ;;  %v5769_v6 = vunpack.i.l.bf16 %v9292_v1 }
 0x228   : > { %5092 = vmatmul.msk.bf16.gmra.mxu2 %vm3211_vm0, %v3148_v0  ;;  %v1197_v0 = vmul.f32 %v5584_v56, %v7135_v34  ;;  %v7643_v56 = vpop.permute.xlu0 %6328  ;;  %v2868_v18 = vadd.f32 %v7352_v4, %v2736_v55  ;;  %v5923_v12 = vunpack.i.h.bf16 %v9291_v41 }
 0x229   : > { %v2032_v13 = vadd.f32 %v1904_v9, %v1263_v51  ;;  %v7698_v51 = vmul.f32 %v5769_v6, %v7135_v34  ;;  %v6301_v6 = vunpack.i.h.bf16 %v7563_v21 }
 0x22a   : > { %v1966_v14 = vadd.f32 %v1838_v40, %v1197_v0  ;;  %v6241_v40 = vunpack.i.h.bf16 %v7438_v25  ;;  %v3060_v0 = vmax.f32 %v2932_v39, 0.0  ;;  %v1905_v25 = vmul.f32 %v6073_v58, %v7140_v50  ;;  %v7682_v59 = vpop.permute.xlu2 %6338 }
 0x22b   : > { %v2673_v39 = vmul.f32 %v6240_v53, %v7335_v61  ;;  %v5912_v58 = vunpack.i.l.bf16 %v9293_v3  ;;  %v7684_v53 = vpop.permute.xlu1 %6318  ;;  %v7703_v24 = vmul.f32 %v5923_v12, %v7140_v50 }
 0x22c   : > { %v2735_v32 = vadd.f32 %v2607_v35, %v1966_v14  ;;  %v1264_v35 = vmul.f32 %v5750_v27, %v7135_v34  ;;  %v5770_v14 = vunpack.i.h.bf16 %v9292_v1  ;;  %v2674_v37 = vmul.f32 %v6241_v40, %v7335_v61 }
 0x22d   : > { %v3149_v43 = vpack.c.bf16 %v3060_v0, %v3059_v45  ;;  %v2996_v1 = vmax.f32 %v2868_v18, 0.0 }
 0x22e   : > { %v2867_v30 = vadd.f32 %v7352_v4, %v2735_v32  ;;  %v7687_v32 = vmul.f32 %v5754_v22, %v7135_v34  ;;  %v7690_v55 = vmul.f32 %v5770_v14, %v7135_v34  ;;  %v2033_v45 = vadd.f32 %v1905_v25, %v1264_v35 }
 0x22f   : > { %v6245_v14 = vunpack.i.l.bf16 %v7502_v57  ;;  %v1840_v25 = vmul.f32 %v5912_v58, %v7140_v50  ;;  %v5209_v57 = vld [vmem:[%s8952_s5 + $0x18] sm:$0xff]  ;;  %v9297_v58 = vld [vmem:[#allocation17_spill] sm:$0xff] }
 0x230   : > { %5060 = vmatmul.msk.bf16.gmra.mxu0 %vm3211_vm0, %v3116_v63  ;;  %v5922_v63 = vunpack.i.l.bf16 %v9291_v41  ;;  %v9294_v41 = vld [vmem:[#allocation25_spill] sm:$0xff]  ;;  %v7693_v0 = vpop.permute.xlu0 %6343  ;;  %v2995_v9 = vmax.f32 %v2867_v30, 0.0  ;;  %v2802_v22 = vadd.f32 %v2674_v37, %v2033_v45  ;;  %v6300_v37 = vunpack.i.l.bf16 %v7563_v21  ;;  %5533 = vmatpush.bf16.msra.mxu3 %v5209_v57 }
 0x231   : > { %v5918_v40 = vunpack.i.h.bf16 %v9294_v41  ;;  %9295 = vst [vmem:[#allocation66_spill] sm:$0xff] %v7693_v0  ;;  %v5917_v3 = vunpack.i.l.bf16 %v9294_v41  ;;  %v2610_v41 = vmul.f32 %v6246_v60, %v7335_v61  ;;  %v2609_v45 = vmul.f32 %v6245_v14, %v7335_v61  ;;  %4157 = vmatpush.bf16.msra.mxu1 %v5209_v57 }
 0x232   : > { %v1844_v27 = vmul.f32 %v5922_v63, %v7140_v50  ;;  %v2801_v63 = vadd.f32 %v2673_v39, %v2032_v13  ;;  %v9296_v39 = vld [vmem:[#allocation88_spill] sm:$0xff]  ;;  %v5610_v13 = vunpack.i.h.bf16 %v9297_v58  ;;  %v1968_v0 = vadd.f32 %v1840_v25, %v7620_v2  ;;  %v7744_v14 = vpop.permute.xlu2 %6353 }
 0x233   : > { %v5928_v30 = vunpack.i.h.bf16 %v9296_v39  ;;  %v5927_v18 = vunpack.i.l.bf16 %v9296_v39  ;;  %v1843_v12 = vmul.f32 %v5918_v40, %v7140_v50  ;;  %v2934_v39 = vadd.f32 %v7352_v4, %v2802_v22 }
 0x234   : > { %v7705_v35 = vadd.f32 %v1844_v27, %v1203_v23  ;;  %v1842_v23 = vmul.f32 %v5917_v3, %v7140_v50  ;;  %v3117_v27 = vpack.c.bf16 %v2996_v1, %v2995_v9  ;;  %v6078_v40 = vunpack.i.h.bf16 %v7178_v15 }
 0x235   : > { %v6077_v3 = vunpack.i.l.bf16 %v7178_v15  ;;  %v6250_v9 = vunpack.i.l.bf16 %v7473_v28  ;;  %v2686_v60 = vmul.f32 %v6301_v6, %v7335_v61  ;;  %v2685_v1 = vmul.f32 %v6300_v37, %v7335_v61 }
 0x236   : > { %v7733_v22 = vadd.f32 %v1843_v12, %v7589_v36  ;;  %v7739_v2 = vmul.f32 %v5928_v30, %v7140_v50  ;;  %v7742_v15 = vmul.f32 %v5927_v18, %v7140_v50  ;;  %v3062_v36 = vmax.f32 %v2934_v39, 0.0 }
 0x237   : > { %v1907_v57 = vmul.f32 %v6078_v40, %v7140_v50  ;;  %v6321_v30 = vunpack.i.h.bf16 %v7684_v53  ;;  %v6320_v12 = vunpack.i.l.bf16 %v7684_v53  ;;  %v6331_v39 = vunpack.i.h.bf16 %v7643_v56 }
 0x238   : > { %5093 = vmatmul.msk.bf16.gmra.mxu2 %vm3211_vm0, %v3149_v43  ;;  %v1841_v43 = vmul.f32 %v5913_v49, %v7140_v50  ;;  %v2933_v49 = vadd.f32 %v7352_v4, %v2801_v63  ;;  %v6251_v63 = vunpack.i.h.bf16 %v7473_v28  ;;  %v7746_v28 = vpop.permute.xlu1 %6333  ;;  %v7748_v6 = vpop.permute.xlu0 %6358  ;;  %v6330_v53 = vunpack.i.l.bf16 %v7643_v56 }
 0x239   : > { %v2689_v56 = vmul.f32 %v6320_v12, %v7335_v61 }
 0x23a   : > { %v1969_v21 = vadd.f32 %v1841_v43, %v7617_v33  ;;  %v7736_v33 = vadd.f32 %v1842_v23, %v7592_v44  ;;  %v2737_v43 = vadd.f32 %v2609_v45, %v1968_v0  ;;  %v3061_v37 = vmax.f32 %v2933_v49, 0.0  ;;  %v5208_v49 = vld [vmem:[%s8952_s5 + $0x10] sm:$0xff] }
 0x23b   : > { %v1906_v44 = vmul.f32 %v6077_v3, %v7140_v50  ;;  %v2676_v18 = vmul.f32 %v6251_v63, %v7335_v61  ;;  %v2675_v23 = vmul.f32 %v6250_v9, %v7335_v61  ;;  %v2814_v0 = vadd.f32 %v2686_v60, %v7169_v42  ;;  %5534 = vmatpush.bf16.msra.mxu3 %v5208_v49  ;;  %v5207_v42 = vld [vmem:[%s8952_s5 + $0x8] sm:$0xff] }
 0x23c   : > { %v2738_v25 = vadd.f32 %v2610_v41, %v1969_v21  ;;  %v6341_v41 = vunpack.i.h.bf16 %v7682_v59  ;;  %v6340_v45 = vunpack.i.l.bf16 %v7682_v59  ;;  %v5609_v21 = vunpack.i.l.bf16 %v9297_v58  ;;  %4158 = vmatpush.bf16.msra.mxu1 %v5208_v49 }
 0x23d   : > { %v3150_v40 = vpack.c.bf16 %v3062_v36, %v3061_v37  ;;  %v2869_v3 = vadd.f32 %v7352_v4, %v2737_v43  ;;  %v2035_v63 = vadd.f32 %v1907_v57, %v7667_v31  ;;  %v2034_v59 = vadd.f32 %v1906_v44, %v7687_v32 }
 0x23e   : > { %v2690_v9 = vmul.f32 %v6321_v30, %v7335_v61  ;;  %v6256_v60 = vunpack.i.h.bf16 %v7468_v5  ;;  %v2694_v37 = vmul.f32 %v6341_v41, %v7335_v61  ;;  %v2693_v31 = vmul.f32 %v6340_v45, %v7335_v61 }
 0x23f   : > { %v2692_v32 = vmul.f32 %v6331_v39, %v7335_v61  ;;  %v2691_v36 = vmul.f32 %v6330_v53, %v7335_v61  ;;  %v2803_v57 = vadd.f32 %v2675_v23, %v2034_v59  ;;  %v2804_v44 = vadd.f32 %v2676_v18, %v2035_v63  ;;  %5535 = vmatpush.bf16.msra.mxu3 %v5207_v42  ;;  %v7807_v63 = vld [vmem:[%s8949_s2] ss:$0 sm:$0xff] }
 0x240   : > { %5061 = vmatmul.msk.bf16.gmra.mxu0 %vm3211_vm0, %v3117_v27  ;;  %v2813_v27 = vadd.f32 %v2685_v1, %v7167_v48  ;;  %v2870_v48 = vadd.f32 %v7352_v4, %v2738_v25  ;;  %v6255_v1 = vunpack.i.l.bf16 %v7468_v5  ;;  %v2946_v25 = vadd.f32 %v7352_v4, %v2814_v0  ;;  %4159 = vmatpush.bf16.msra.mxu1 %v5207_v42  ;;  %v7790_v41 = vpop.permute.xlu1 %6348  ;;  %v7794_v53 = vpop.permute.xlu0 %6373 }
 0x241   : > { %v2997_v30 = vmax.f32 %v2869_v3, 0.0  ;;  %v6083_v5 = vunpack.i.h.bf16 %v7193_v11  ;;  %v2817_v0 = vadd.f32 %v2689_v56, %v7264_v16  ;;  %v2818_v49 = vadd.f32 %v2690_v9, %v7262_v10 }
 0x242   : > { %v2945_v43 = vadd.f32 %v7352_v4, %v2813_v27  ;;  %v2998_v12 = vmax.f32 %v2870_v48, 0.0  ;;  %v6082_v4 = vunpack.i.l.bf16 %v7193_v11  ;;  %v7786_v27 = vpop.permute.xlu2 %6368  ;;  %v2612_v45 = vmul.f32 %v6256_v60, %v7335_v61  ;;  %v5206_v11 = vld [vmem:[%s8952_s5] sm:$0xff] }
 0x243   : > { %v2611_v18 = vmul.f32 %v6255_v1, %v7335_v61  ;;  %v3074_v39 = vmax.f32 %v2946_v25, 0.0  ;;  %v2822_v16 = vadd.f32 %v2694_v37, %v7266_v8  ;;  %v2819_v10 = vadd.f32 %v2691_v36, %v7184_v17  ;;  %5536 = vmatpush.bf16.msra.mxu3 %v5206_v11 }
 0x244   : > { %v3073_v23 = vmax.f32 %v2945_v43, 0.0  ;;  %v2820_v3 = vadd.f32 %v2692_v32, %v7186_v47  ;;  %v6093_v48 = vunpack.i.h.bf16 %v7195_v29  ;;  %v3118_v42 = vpack.c.bf16 %v2998_v12, %v2997_v30  ;;  %4160 = vmatpush.bf16.msra.mxu1 %v5206_v11 }
 0x245   : > { %v2935_v59 = vadd.f32 %v7807_v63, %v2803_v57  ;;  %v2936_v9 = vadd.f32 %v7807_v63, %v2804_v44  ;;  %v6261_v8 = vunpack.i.h.bf16 %v7529_v19  ;;  %v6260_v17 = vunpack.i.l.bf16 %v7529_v19 }
 0x246   : > { %v2949_v47 = vadd.f32 %v7807_v63, %v2817_v0  ;;  %v1909_v56 = vmul.f32 %v6083_v5, %v7140_v50  ;;  %v1908_v60 = vmul.f32 %v6082_v4, %v7140_v50  ;;  %v6265_v1 = vunpack.i.l.bf16 %v7500_v52 }
 0x247   : > { %v7819_v43 = vpack.c.bf16 %v3074_v39, %v3073_v23  ;;  %v2954_v37 = vadd.f32 %v7807_v63, %v2822_v16  ;;  %v2951_v19 = vadd.f32 %v7807_v63, %v2819_v10  ;;  %v2740_v32 = vadd.f32 %v2612_v45, %v7733_v22 }
 0x248   : > { %5094 = vmatmul.msk.bf16.gmra.mxu2 %vm3211_vm0, %v3150_v40  ;;  %v2821_v40 = vadd.f32 %v2693_v31, %v7268_v20  ;;  %v2950_v20 = vadd.f32 %v7807_v63, %v2818_v49  ;;  %v2952_v31 = vadd.f32 %v7807_v63, %v2820_v3  ;;  %v2739_v36 = vadd.f32 %v2611_v18, %v7736_v33  ;;  %v7838_v10 = vpop.permute.xlu0 %6388 }
 0x249   : > { %v3063_v57 = vmax.f32 %v2935_v59, 0.0  ;;  %v3064_v44 = vmax.f32 %v2936_v9, 0.0  ;;  %v2678_v30 = vmul.f32 %v6261_v8, %v7335_v61  ;;  %v2677_v12 = vmul.f32 %v6260_v17, %v7335_v61 }
 0x24a   : > { %v2953_v25 = vadd.f32 %v7807_v63, %v2821_v40  ;;  %v3077_v5 = vmax.f32 %v2949_v47, 0.0  ;;  %v3078_v4 = vmax.f32 %v2950_v20, 0.0  ;;  %v2037_v0 = vadd.f32 %v1909_v56, %v7657_v46  ;;  %v7833_v18 = vpop.permute.xlu2 %6383  ;;  %v7835_v40 = vpop.permute.xlu1 %6363 }
 0x24b   : > { %v2036_v49 = vadd.f32 %v1908_v60, %v7661_v26  ;;  %v6092_v23 = vunpack.i.l.bf16 %v7195_v29  ;;  %v6266_v39 = vunpack.i.h.bf16 %v7500_v52  ;;  %v3082_v22 = vmax.f32 %v2954_v37, 0.0 }
 0x24c   : > { %v3081_v11 = vmax.f32 %v2953_v25, 0.0  ;;  %v3079_v45 = vmax.f32 %v2951_v19, 0.0  ;;  %v3080_v33 = vmax.f32 %v2952_v31, 0.0  ;;  %v2613_v16 = vmul.f32 %v6265_v1, %v7335_v61  ;;  %v9298_v19 = vld [vmem:[#allocation89_spill] sm:$0xff] }
 0x24d   : > { %v3151_v3 = vpack.c.bf16 %v3064_v44, %v3063_v57  ;;  %v2871_v46 = vadd.f32 %v7807_v63, %v2739_v36  ;;  %v2872_v26 = vadd.f32 %v7807_v63, %v2740_v32  ;;  %v1913_v29 = vmul.f32 %v6093_v48, %v7140_v50 }
 0x24e   : > { %v2805_v52 = vadd.f32 %v2677_v12, %v2036_v49  ;;  %v7843_v59 = vpack.c.bf16 %v3078_v4, %v3077_v5  ;;  %v1912_v9 = vmul.f32 %v6092_v23, %v7140_v50  ;;  %v2614_v8 = vmul.f32 %v6266_v39, %v7335_v61 }
 0x24f   : > { %v6281_v17 = vunpack.i.h.bf16 %v7527_v54  ;;  %v6280_v47 = vunpack.i.l.bf16 %v7527_v54  ;;  %v1973_v20 = vadd.f32 %v7703_v24, %v7634_v62  ;;  %v7854_v48 = vadd.f32 %v7739_v2, %v7627_v7 }
 0x250   : > { %5062 = vmatmul.msk.bf16.gmra.mxu0 %vm3211_vm0, %v3118_v42  ;;  %v2806_v42 = vadd.f32 %v2678_v30, %v2037_v0  ;;  %v7856_v56 = vpack.c.bf16 %v3080_v33, %v3079_v45  ;;  %v7858_v60 = vpack.c.bf16 %v3082_v22, %v3081_v11  ;;  %v7862_v1 = vadd.f32 %v7742_v15, %v7631_v38  ;;  %v9299_v15 = vld [vmem:[#allocation5_spill] sm:$0xff]  ;;  %v7886_v22 = vld [vmem:[%s8951_s4] ss:$0 sm:$0xff] }
 0x251   : > { %v2741_v25 = vadd.f32 %v2613_v16, %v7705_v35  ;;  %v2999_v54 = vmax.f32 %v2871_v46, 0.0  ;;  %v3000_v37 = vmax.f32 %v2872_v26, 0.0  ;;  %v5933_v31 = vunpack.i.h.bf16 %v9298_v19 }
 0x252   : > { %v2041_v24 = vadd.f32 %v1913_v29, %v7690_v55  ;;  %v2937_v7 = vadd.f32 %v7807_v63, %v2805_v52  ;;  %v2938_v2 = vadd.f32 %v7807_v63, %v2806_v42  ;;  %v2040_v32 = vadd.f32 %v1912_v9, %v7698_v51  ;;  %v6399_v39 = vpop.permute.xlu2 %6398  ;;  %v6379_v11 = vpop.permute.xlu1 %6378 }
 0x253   : > { %v2742_v36 = vadd.f32 %v2614_v8, %v1973_v20  ;;  %v2682_v57 = vmul.f32 %v6281_v17, %v7335_v61  ;;  %v2681_v38 = vmul.f32 %v6280_v47, %v7335_v61  ;;  %v6276_v35 = vunpack.i.h.bf16 %v9299_v15 }
 0x254   : > { %v6360_v44 = vunpack.i.l.bf16 %v7748_v6  ;;  %v6351_v30 = vunpack.i.h.bf16 %v7790_v41  ;;  %v6350_v55 = vunpack.i.l.bf16 %v7790_v41  ;;  %v6275_v5 = vunpack.i.l.bf16 %v9299_v15 }
 0x255   : > { %v6361_v4 = vunpack.i.h.bf16 %v7748_v6  ;;  %v3119_v0 = vpack.c.bf16 %v3000_v37, %v2999_v54  ;;  %v7879_v51 = vadd.f32 %v7807_v63, %v2741_v25  ;;  %v5932_v49 = vunpack.i.l.bf16 %v9298_v19 }
 0x256   : > { %v6371_v23 = vunpack.i.h.bf16 %v7786_v27  ;;  %v3065_v41 = vmax.f32 %v2937_v7, 0.0  ;;  %v3066_v45 = vmax.f32 %v2938_v2, 0.0  ;;  %v7888_v33 = vadd.f32 %v2681_v38, %v2040_v32  ;;  %v9301_v38 = vld [vmem:[#allocation114_spill] sm:$0xff] }
 0x257   : > { %v7890_v6 = vadd.f32 %v2682_v57, %v2041_v24  ;;  %v6370_v16 = vunpack.i.l.bf16 %v7786_v27  ;;  %v7897_v46 = vadd.f32 %v7807_v63, %v2742_v36  ;;  %v2616_v26 = vmul.f32 %v6276_v35, %v7335_v61  ;;  %v9300_v36 = vld [vmem:[#allocation105_spill] sm:$0xff] }
 0x258   : > { %5095 = vmatmul.msk.bf16.gmra.mxu2 %vm3211_vm0, %v3151_v3  ;;  %v7893_v3 = vpop.permute.xlu0 %6403  ;;  %v2697_v29 = vmul.f32 %v6360_v44, %v7335_v61  ;;  %v2696_v52 = vmul.f32 %v6351_v30, %v7335_v61  ;;  %v2695_v42 = vmul.f32 %v6350_v55, %v7335_v61  ;;  %v2615_v9 = vmul.f32 %v6275_v5, %v7335_v61  ;;  %v9302_v35 = vld [vmem:[#allocation113_spill] sm:$0xff]  ;;  %v9303_v5 = vld [vmem:[#allocation106_spill] sm:$0xff] }
 0x259   : > { %v2698_v8 = vmul.f32 %v6361_v4, %v7335_v61  ;;  %v6401_v27 = vunpack.i.h.bf16 %v6399_v39  ;;  %v3001_v17 = vmax.f32 %v7879_v51, 0.0  ;;  %v2700_v47 = vmul.f32 %v6371_v23, %v7335_v61 }
 0x25a   : > { %v6400_v20 = vunpack.i.l.bf16 %v6399_v39  ;;  %v3152_v37 = vpack.c.bf16 %v3066_v45, %v3065_v41  ;;  %v2699_v24 = vmul.f32 %v6370_v16, %v7335_v61  ;;  %v6390_v7 = vunpack.i.l.bf16 %v7838_v10 }
 0x25b   : > { %v3573_v62 = vpop.f32.mrf.mxu2  ;;  %v6380_v2 = vunpack.i.l.bf16 %v6379_v11  ;;  %v2825_v57 = vadd.f32 %v2697_v29, %v9300_v36  ;;  %v2823_v15 = vadd.f32 %v2695_v42, %v9301_v38  ;;  %v2824_v44 = vadd.f32 %v2696_v52, %v9302_v35 }
 0x25c   : > { %v3574_v25 = vadd.f32 %v7886_v22, %v3573_v62  ;;  %v2826_v62 = vadd.f32 %v2698_v8, %v9303_v5  ;;  %v2706_v4 = vmul.f32 %v6401_v27, %v7335_v61  ;;  %v2705_v23 = vmul.f32 %v6400_v20, %v7335_v61  ;;  %v7926_v27 = vpop.permute.xlu1 %6393 }
 0x25d   : > { %v3413_v12 = vpop.f32.mrf.mxu0  ;;  %v2703_v45 = vmul.f32 %v6390_v7, %v7335_v61  ;;  %v2701_v16 = vmul.f32 %v6380_v2, %v7335_v61  ;;  %v2743_v42 = vadd.f32 %v2615_v9, %v7862_v1  ;;  %v2956_v8 = vadd.f32 %v7807_v63, %v2824_v44  ;;  %v9306_v1 = vld [vmem:[#allocation118_spill] sm:$0xff] }
 0x25e   : > { %v3414_v32 = vadd.f32 %v7886_v22, %v3413_v12  ;;  %v6391_v12 = vunpack.i.h.bf16 %v7838_v10  ;;  %v3797_v39 = vmax.f32 %v3574_v25, 0.0  ;;  %v9304_v10 = vld [vmem:[#allocation116_spill] sm:$0xff]  ;;  %v3002_v2 = vmax.f32 %v7897_v46, 0.0 }
 0x25f   : > { %v2827_v25 = vadd.f32 %v2699_v24, %v9304_v10  ;;  %v2833_v9 = vadd.f32 %v2705_v23, %v9306_v1  ;;  %v2958_v44 = vadd.f32 %v7807_v63, %v2826_v62  ;;  %v9307_v24 = vld [vmem:[#allocation117_spill] sm:$0xff]  ;;  %v9312_v10 = vld [vmem:[#allocation110_spill] sm:$0xff]  ;;  %v2942_v58 = vadd.f32 %v7807_v63, %v7890_v6 }
 0x260   : > { %5063 = vmatmul.msk.bf16.gmra.mxu0 %vm3211_vm0, %v3119_v0  ;;  %v6381_v0 = vunpack.i.h.bf16 %v6379_v11  ;;  %v3733_v29 = vmax.f32 %v3414_v32, 0.0  ;;  %v2955_v11 = vadd.f32 %v7807_v63, %v2823_v15  ;;  %v6419_v7 = vpop.permute.xlu0 %6418  ;;  %v9305_v32 = vld [vmem:[#allocation115_spill] sm:$0xff]  ;;  %v2704_v15 = vmul.f32 %v6391_v12, %v7335_v61 }
 0x261   : > { %v2828_v38 = vadd.f32 %v2700_v47, %v9305_v32  ;;  %v3084_v47 = vmax.f32 %v2956_v8, 0.0  ;;  %v2744_v12 = vadd.f32 %v2616_v26, %v7854_v48  ;;  %v3120_v62 = vpack.c.bf16 %v3002_v2, %v3001_v17 }
 0x262   : > { %v3083_v46 = vmax.f32 %v2955_v11, 0.0  ;;  %v3086_v26 = vmax.f32 %v2958_v44, 0.0 }
 0x263   : > { %v3575_v54 = vpop.f32.mrf.mxu2 }
 0x264   : > { %v3576_v30 = vadd.f32 %v7886_v22, %v3575_v54  ;;  %v2702_v54 = vmul.f32 %v6381_v0, %v7335_v61  ;;  %v9309_v0 = vld [vmem:[#allocation85_spill] sm:$0xff] }
 0x265   : > { %v3415_v55 = vpop.f32.mrf.mxu0 }
 0x266   : > { %v3416_v51 = vadd.f32 %v7886_v22, %v3415_v55  ;;  %v3798_v41 = vmax.f32 %v3576_v30, 0.0  ;;  %v2834_v30 = vadd.f32 %v2706_v4, %v9307_v24  ;;  %v9308_v55 = vld [vmem:[#allocation109_spill] sm:$0xff]  ;;  %v6409_v24 = vpop.permute.xlu1 %6408 }
 0x267   : > { %v2831_v5 = vadd.f32 %v2703_v45, %v9308_v55  ;;  %v2960_v45 = vadd.f32 %v7807_v63, %v2828_v38  ;;  %v2875_v38 = vadd.f32 %v7807_v63, %v2743_v42 }
 0x268   : > { %v3734_v52 = vmax.f32 %v3416_v51, 0.0  ;;  %5096 = vmatmul.msk.bf16.gmra.mxu2 %vm3211_vm0, %v3152_v37  ;;  %v3893_v20 = vpack.c.bf16 %v3798_v41, %v3797_v39  ;;  %v2957_v37 = vadd.f32 %v7807_v63, %v2825_v57  ;;  %v2829_v51 = vadd.f32 %v2701_v16, %v9309_v0 }
 0x269   : > { %v6421_v57 = vunpack.i.h.bf16 %v6419_v7  ;;  %v6420_v39 = vunpack.i.l.bf16 %v6419_v7  ;;  %v2959_v41 = vadd.f32 %v7807_v63, %v2827_v25  ;;  %v2965_v16 = vadd.f32 %v7807_v63, %v2833_v9 }
 0x26a   : > { %v3861_v36 = vpack.c.bf16 %v3734_v52, %v3733_v29  ;;  %5167 = vmatmul.msk.bf16.vlgmr.msra.gmra.mxu3 %vm3211_vm0, %v3893_v20  ;;  %v9310_v29 = vld [vmem:[#allocation73_spill] sm:$0xff]  ;;  %v9311_v20 = vld [vmem:[#allocation67_spill] sm:$0xff]  ;;  %v3085_v11 = vmax.f32 %v2957_v37, 0.0  ;;  %v2966_v8 = vadd.f32 %v7807_v63, %v2834_v30  ;;  %v2963_v7 = vadd.f32 %v7807_v63, %v2831_v5 }
 0x26b   : > { %v3578_v35 = vpop.f32.mrf.mxu2  ;;  %v2830_v52 = vadd.f32 %v2702_v54, %v9310_v29  ;;  %v6286_v4 = vunpack.i.h.bf16 %v9311_v20  ;;  %v2961_v48 = vadd.f32 %v7807_v63, %v2829_v51  ;;  %v2710_v17 = vmul.f32 %v6421_v57, %v7335_v61  ;;  %v9314_v57 = vld [vmem:[#allocation112_spill] sm:$0xff] }
 0x26c   : > { %5135 = vmatmul.msk.bf16.vlgmr.msra.gmra.mxu1 %vm3211_vm0, %v3861_v36  ;;  %v2832_v36 = vadd.f32 %v2704_v15, %v9312_v10  ;;  %v2709_v25 = vmul.f32 %v6420_v39, %v7335_v61  ;;  %v7954_v54 = vpack.c.bf16 %v3084_v47, %v3083_v46  ;;  %v3087_v2 = vmax.f32 %v2959_v41, 0.0  ;;  %v9313_v46 = vld [vmem:[#allocation111_spill] sm:$0xff] }
 0x26d   : > { %v3418_v23 = vpop.f32.mrf.mxu0  ;;  %v2962_v32 = vadd.f32 %v7807_v63, %v2830_v52  ;;  %v2876_v37 = vadd.f32 %v7807_v63, %v2744_v12  ;;  %v3088_v1 = vmax.f32 %v2960_v45, 0.0  ;;  %v3093_v9 = vmax.f32 %v2965_v16, 0.0 }
 0x26e   : > { %v2964_v15 = vadd.f32 %v7807_v63, %v2832_v36  ;;  %v3579_v44 = vadd.f32 %v7886_v22, %v3578_v35  ;;  %v3094_v55 = vmax.f32 %v2966_v8, 0.0  ;;  %v3091_v5 = vmax.f32 %v2963_v7, 0.0 }
 0x26f   : > { %v3089_v0 = vmax.f32 %v2961_v48, 0.0  ;;  %v3419_v51 = vadd.f32 %v7886_v22, %v3418_v23  ;;  %v2837_v47 = vadd.f32 %v2709_v25, %v9313_v46  ;;  %v2838_v39 = vadd.f32 %v2710_v17, %v9314_v57  ;;  %v9315_v48 = vld [vmem:[#allocation31_spill] sm:$0xff] }
 0x270   : > { %5064 = vmatmul.msk.bf16.gmra.mxu0 %vm3211_vm0, %v3120_v62  ;;  %v7965_v41 = vpack.c.bf16 %v3086_v26, %v3085_v11  ;;  %v3090_v29 = vmax.f32 %v2962_v32, 0.0  ;;  %v6411_v52 = vunpack.i.h.bf16 %v6409_v24  ;;  %v6410_v62 = vunpack.i.l.bf16 %v6409_v24 }
 0x271   : > { %v3092_v45 = vmax.f32 %v2964_v15, 0.0  ;;  %v3799_v16 = vmax.f32 %v3579_v44, 0.0  ;;  %v7968_v36 = vpack.c.bf16 %v3088_v1, %v3087_v2  ;;  %v6285_v23 = vunpack.i.l.bf16 %v9311_v20 }
 0x272   : > { %v3735_v8 = vmax.f32 %v3419_v51, 0.0  ;;  %v3003_v17 = vmax.f32 %v2875_v38, 0.0  ;;  %v2969_v11 = vadd.f32 %v7807_v63, %v2837_v47  ;;  %v2970_v26 = vadd.f32 %v7807_v63, %v2838_v39  ;;  %v9317_v39 = vld [vmem:[#allocation32_spill] sm:$0xff] }
 0x273   : > { %v3580_v30 = vpop.f32.mrf.mxu2  ;;  %v3004_v32 = vmax.f32 %v2876_v37, 0.0  ;;  %v2708_v15 = vmul.f32 %v6411_v52, %v7335_v61  ;;  %v2707_v24 = vmul.f32 %v6410_v62, %v7335_v61  ;;  %v7977_v1 = vpack.c.bf16 %v3090_v29, %v3089_v0  ;;  %v9316_v0 = vld [vmem:[#allocation41_spill] sm:$0xff]  ;;  %v9320_v52 = vld [vmem:[#allocation107_spill] sm:$0xff] }
 0x274   : > { %v3581_v42 = vadd.f32 %v7886_v22, %v3580_v30  ;;  %v1208_v20 = vmul.f32 %v5610_v13, %v7135_v34  ;;  %v1848_v38 = vmul.f32 %v5932_v49, %v7140_v50  ;;  %v7986_v44 = vpack.c.bf16 %v3092_v45, %v3091_v5 }
 0x275   : > { %v3420_v12 = vpop.f32.mrf.mxu0  ;;  %v7988_v37 = vpack.c.bf16 %v3094_v55, %v3093_v9  ;;  %v1207_v30 = vmul.f32 %v5609_v21, %v7135_v34  ;;  %v5615_v51 = vunpack.i.h.bf16 %v9316_v0  ;;  %v1849_v13 = vmul.f32 %v5933_v31, %v7140_v50  ;;  %v9318_v31 = vld [vmem:[#allocation19_spill] sm:$0xff] }
 0x276   : > { %v3421_v35 = vadd.f32 %v7886_v22, %v3420_v12  ;;  %v3800_v10 = vmax.f32 %v3581_v42, 0.0  ;;  %v2618_v46 = vmul.f32 %v6286_v4, %v7335_v61  ;;  %v2617_v49 = vmul.f32 %v6285_v23, %v7335_v61  ;;  %v9319_v4 = vld [vmem:[#allocation65_spill] sm:$0xff] }
 0x277   : > { %v3121_v9 = vpack.c.bf16 %v3004_v32, %v3003_v17  ;;  %v2941_v55 = vadd.f32 %v7807_v63, %v7888_v33  ;;  %v3097_v21 = vmax.f32 %v2969_v11, 0.0  ;;  %v3098_v57 = vmax.f32 %v2970_v26, 0.0 }
 0x278   : > { %v3736_v7 = vmax.f32 %v3421_v35, 0.0  ;;  %5097 = vmatmul.msk.bf16.gmra.mxu2 %vm3211_vm0, %v9315_v48  ;;  %v3894_v25 = vpack.c.bf16 %v3800_v10, %v3799_v16  ;;  %v2835_v19 = vadd.f32 %v2707_v24, %v9317_v39  ;;  %v2836_v42 = vadd.f32 %v2708_v15, %v9318_v31  ;;  %v9321_v10 = vld [vmem:[#allocation77_spill] sm:$0xff] }
 0x279   : > { %v5775_v12 = vunpack.i.h.bf16 %v9319_v4  ;;  %v1976_v29 = vadd.f32 %v1848_v38, %v1207_v30  ;;  %v6098_v62 = vunpack.i.h.bf16 %v9320_v52  ;;  %v6097_v35 = vunpack.i.l.bf16 %v9320_v52  ;;  %v9322_v38 = vld [vmem:[#allocation21_spill] sm:$0xff]  ;;  %v9323_v52 = vld [vmem:[#allocation2_spill] sm:$0xff] }
 0x27a   : > { %v3862_v2 = vpack.c.bf16 %v3736_v7, %v3735_v8  ;;  %5168 = vmatmul.msk.bf16.gmra.mxu3 %vm3211_vm0, %v3894_v25  ;;  %v5614_v45 = vunpack.i.l.bf16 %v9316_v0  ;;  %v5774_v33 = vunpack.i.l.bf16 %v9319_v4  ;;  %v1977_v16 = vadd.f32 %v1849_v13, %v1208_v20 }
 0x27b   : > { %v3583_v47 = vpop.f32.mrf.mxu2  ;;  %v6291_v6 = vunpack.i.h.bf16 %v9321_v10  ;;  %v2745_v23 = vadd.f32 %v2617_v49, %v1976_v29  ;;  %v6290_v8 = vunpack.i.l.bf16 %v9321_v10  ;;  %v3069_v7 = vmax.f32 %v2941_v55, 0.0 }
 0x27c   : > { %5136 = vmatmul.msk.bf16.gmra.mxu1 %vm3211_vm0, %v3862_v2  ;;  %v3070_v48 = vmax.f32 %v2942_v58, 0.0  ;;  %v2746_v17 = vadd.f32 %v2618_v46, %v1977_v16  ;;  %v2967_v11 = vadd.f32 %v7807_v63, %v2835_v19  ;;  %v2968_v26 = vadd.f32 %v7807_v63, %v2836_v42 }
 0x27d   : > { %v3423_v5 = vpop.f32.mrf.mxu0  ;;  %v8016_v25 = vpack.c.bf16 %v3098_v57, %v3097_v21  ;;  %v1274_v32 = vmul.f32 %v5775_v12, %v7135_v34  ;;  %v1915_v15 = vmul.f32 %v6098_v62, %v7140_v50  ;;  %v1914_v24 = vmul.f32 %v6097_v35, %v7140_v50 }
 0x27e   : > { %v3584_v2 = vadd.f32 %v7886_v22, %v3583_v47  ;;  %v1273_v20 = vmul.f32 %v5774_v33, %v7135_v34  ;;  %v5937_v30 = vunpack.i.l.bf16 %v9322_v38  ;;  %v2684_v13 = vmul.f32 %v6291_v6, %v7335_v61 }
 0x27f   : > { %v3424_v46 = vadd.f32 %v7886_v22, %v3423_v5  ;;  %v3154_v21 = vpack.c.bf16 %v3070_v48, %v3069_v7  ;;  %v2877_v57 = vadd.f32 %v7807_v63, %v2745_v23  ;;  %v3095_v39 = vmax.f32 %v2967_v11, 0.0 }
 0x280   : > { %5065 = vmatmul.msk.bf16.gmra.mxu0 %vm3211_vm0, %v3121_v9  ;;  %v2683_v9 = vmul.f32 %v6290_v8, %v7335_v61  ;;  %v3096_v19 = vmax.f32 %v2968_v26, 0.0  ;;  %v2878_v31 = vadd.f32 %v7807_v63, %v2746_v17  ;;  %v2043_v42 = vadd.f32 %v1915_v15, %v1274_v32 }
 0x281   : > { %v2042_v4 = vadd.f32 %v1914_v24, %v1273_v20  ;;  %v3801_v12 = vmax.f32 %v3584_v2, 0.0  ;;  %v5938_v5 = vunpack.i.h.bf16 %v9322_v38  ;;  %v6296_v62 = vunpack.i.h.bf16 %v9323_v52 }
 0x282   : > { %v3737_v35 = vmax.f32 %v3424_v46, 0.0  ;;  %v6295_v16 = vunpack.i.l.bf16 %v9323_v52  ;;  %v2812_v6 = vadd.f32 %v2684_v13, %v2043_v42  ;;  %v3005_v7 = vmax.f32 %v2877_v57, 0.0 }
 0x283   : > { %v3585_v49 = vpop.f32.mrf.mxu2  ;;  %v2811_v10 = vadd.f32 %v2683_v9, %v2042_v4  ;;  %v3006_v48 = vmax.f32 %v2878_v31, 0.0  ;;  %v8035_v17 = vpack.c.bf16 %v3096_v19, %v3095_v39  ;;  %v1850_v11 = vmul.f32 %v5937_v30, %v7140_v50 }
 0x284   : > { %v3586_v55 = vadd.f32 %v7886_v22, %v3585_v49  ;;  %v1851_v26 = vmul.f32 %v5938_v5, %v7140_v50  ;;  %v1210_v15 = vmul.f32 %v5615_v51, %v7135_v34  ;;  %v1209_v24 = vmul.f32 %v5614_v45, %v7135_v34  ;;  %v9324_v5 = vld [vmem:[#allocation90_spill] sm:$0xff] }
 0x285   : > { %v3425_v58 = vpop.f32.mrf.mxu0  ;;  %v2619_v2 = vmul.f32 %v6295_v16, %v7335_v61  ;;  %v2620_v38 = vmul.f32 %v6296_v62, %v7335_v61  ;;  %v2943_v30 = vadd.f32 %v7807_v63, %v2811_v10  ;;  %v2944_v13 = vadd.f32 %v7807_v63, %v2812_v6  ;;  %v9325_v16 = vld [vmem:[#allocation40_spill] sm:$0xff] }
 0x286   : > { %v3426_v47 = vadd.f32 %v7886_v22, %v3425_v58  ;;  %v3802_v29 = vmax.f32 %v3586_v55, 0.0  ;;  %v3122_v46 = vpack.c.bf16 %v3006_v48, %v3005_v7  ;;  %v1978_v49 = vadd.f32 %v1850_v11, %v1209_v24  ;;  %v9326_v48 = vld [vmem:[#allocation8_spill] sm:$0xff] }
 0x287   : > { %v1979_v9 = vadd.f32 %v1851_v26, %v1210_v15  ;;  %v3071_v0 = vmax.f32 %v2943_v30, 0.0  ;;  %v3072_v51 = vmax.f32 %v2944_v13, 0.0  ;;  %v5943_v52 = vunpack.i.h.bf16 %v9324_v5 }
 0x288   : > { %v3738_v33 = vmax.f32 %v3426_v47, 0.0  ;;  %5098 = vmatmul.msk.bf16.gmra.mxu2 %vm3211_vm0, %v3154_v21  ;;  %v3895_v23 = vpack.c.bf16 %v3802_v29, %v3801_v12  ;;  %v2747_v55 = vadd.f32 %v2619_v2, %v1978_v49  ;;  %v5942_v62 = vunpack.i.l.bf16 %v9324_v5  ;;  %v9330_v5 = vld [vmem:[#allocation22_spill] sm:$0xff] }
 0x289   : > { %v2748_v58 = vadd.f32 %v2620_v38, %v1979_v9  ;;  %v3155_v4 = vpack.c.bf16 %v3072_v51, %v3071_v0  ;;  %v5620_v10 = vunpack.i.h.bf16 %v9325_v16  ;;  %v5619_v6 = vunpack.i.l.bf16 %v9325_v16  ;;  %v9327_v9 = vld [vmem:[#allocation108_spill] sm:$0xff]  ;;  %v9328_v0 = vld [vmem:[#allocation74_spill] sm:$0xff] }
 0x28a   : > { %v3863_v8 = vpack.c.bf16 %v3738_v33, %v3737_v35  ;;  %5169 = vmatmul.msk.bf16.gmra.mxu3 %vm3211_vm0, %v3895_v23  ;;  %v2879_v39 = vadd.f32 %v7807_v63, %v2747_v55  ;;  %v6306_v11 = vunpack.i.h.bf16 %v9326_v48  ;;  %v6305_v26 = vunpack.i.l.bf16 %v9326_v48 }
 0x28b   : > { %v3588_v32 = vpop.f32.mrf.mxu2  ;;  %v2880_v31 = vadd.f32 %v7807_v63, %v2748_v58  ;;  %v1853_v15 = vmul.f32 %v5943_v52, %v7140_v50  ;;  %v1852_v24 = vmul.f32 %v5942_v62, %v7140_v50  ;;  %v1211_v30 = vmul.f32 %v5619_v6, %v7135_v34 }
 0x28c   : > { %5137 = vmatmul.msk.bf16.gmra.mxu1 %vm3211_vm0, %v3863_v8  ;;  %v3589_v45 = vadd.f32 %v7886_v22, %v3588_v32  ;;  %v3007_v23 = vmax.f32 %v2879_v39, 0.0  ;;  %v2622_v13 = vmul.f32 %v6306_v11, %v7335_v61  ;;  %v6108_v55 = vunpack.i.h.bf16 %v9327_v9  ;;  %v9329_v39 = vld [vmem:[#allocation3_spill] sm:$0xff] }
 0x28d   : > { %v3428_v20 = vpop.f32.mrf.mxu0  ;;  %v3008_v7 = vmax.f32 %v2880_v31, 0.0  ;;  %v6107_v58 = vunpack.i.l.bf16 %v9327_v9  ;;  %v5785_v51 = vunpack.i.h.bf16 %v9328_v0  ;;  %v5625_v52 = vunpack.i.h.bf16 %v9330_v5 }
 0x28e   : > { %v3429_v21 = vadd.f32 %v7886_v22, %v3428_v20  ;;  %v3803_v12 = vmax.f32 %v3589_v45, 0.0  ;;  %v1212_v20 = vmul.f32 %v5620_v10, %v7135_v34 }
 0x28f   : > { %v3123_v49 = vpack.c.bf16 %v3008_v7, %v3007_v23  ;;  %v1278_v62 = vmul.f32 %v5785_v51, %v7135_v34  ;;  %v5624_v7 = vunpack.i.l.bf16 %v9330_v5 }
 0x290   : > { %5066 = vmatmul.msk.bf16.gmra.mxu0 %vm3211_vm0, %v3122_v46  ;;  %v3739_v35 = vmax.f32 %v3429_v21, 0.0  ;;  %v2621_v46 = vmul.f32 %v6305_v26, %v7335_v61  ;;  %v1981_v45 = vadd.f32 %v1853_v15, %v1212_v20  ;;  %v1980_v21 = vadd.f32 %v1852_v24, %v1211_v30  ;;  %v9331_v20 = vld [vmem:[#allocation91_spill] sm:$0xff] }
 0x291   : > { %v5947_v30 = vunpack.i.l.bf16 %v9331_v20 }
 0x292   : > { %v2749_v31 = vadd.f32 %v2621_v46, %v1980_v21 }
 0x293   : > { %v3590_v57 = vpop.f32.mrf.mxu2 }
 0x294   : > { %v3591_v19 = vadd.f32 %v7886_v22, %v3590_v57  ;;  %v5784_v57 = vunpack.i.l.bf16 %v9328_v0  ;;  %v2881_v48 = vadd.f32 %v7807_v63, %v2749_v31  ;;  %v1213_v31 = vmul.f32 %v5624_v7, %v7135_v34 }
 0x295   : > { %v3430_v47 = vpop.f32.mrf.mxu0 }
 0x296   : > { %v3431_v42 = vadd.f32 %v7886_v22, %v3430_v47  ;;  %v3804_v29 = vmax.f32 %v3591_v19, 0.0  ;;  %v6311_v19 = vunpack.i.h.bf16 %v9329_v39  ;;  %v6310_v47 = vunpack.i.l.bf16 %v9329_v39 }
 0x297   : > { %v1277_v16 = vmul.f32 %v5784_v57, %v7135_v34 }
 0x298   : > { %v3740_v33 = vmax.f32 %v3431_v42, 0.0  ;;  %5099 = vmatmul.msk.bf16.gmra.mxu2 %vm3211_vm0, %v3155_v4  ;;  %v3896_v8 = vpack.c.bf16 %v3804_v29, %v3803_v12  ;;  %v2750_v42 = vadd.f32 %v2622_v13, %v1981_v45  ;;  %v1919_v4 = vmul.f32 %v6108_v55, %v7140_v50  ;;  %v9332_v55 = vld [vmem:[#allocation24_spill] sm:$0xff] }
 0x299   : > { %v1918_v12 = vmul.f32 %v6107_v58, %v7140_v50  ;;  %v2688_v10 = vmul.f32 %v6311_v19, %v7335_v61  ;;  %v2687_v6 = vmul.f32 %v6310_v47, %v7335_v61  ;;  %v6316_v58 = vunpack.i.h.bf16 %v9332_v55 }
 0x29a   : > { %v3864_v32 = vpack.c.bf16 %v3740_v33, %v3739_v35  ;;  %5170 = vmatmul.msk.bf16.gmra.mxu3 %vm3211_vm0, %v3896_v8  ;;  %v2882_v11 = vadd.f32 %v7807_v63, %v2750_v42  ;;  %v6315_v51 = vunpack.i.l.bf16 %v9332_v55  ;;  %v3009_v45 = vmax.f32 %v2881_v48, 0.0 }
 0x29b   : > { %v3593_v2 = vpop.f32.mrf.mxu2  ;;  %v2046_v15 = vadd.f32 %v1918_v12, %v1277_v16  ;;  %v1854_v19 = vmul.f32 %v5947_v30, %v7140_v50 }
 0x29c   : > { %5138 = vmatmul.msk.bf16.gmra.mxu1 %vm3211_vm0, %v3864_v32  ;;  %v3594_v29 = vadd.f32 %v7886_v22, %v3593_v2  ;;  %v2047_v32 = vadd.f32 %v1919_v4, %v1278_v62  ;;  %v3010_v21 = vmax.f32 %v2882_v11, 0.0  ;;  %v2623_v5 = vmul.f32 %v6315_v51, %v7335_v61 }
 0x29d   : > { %v3433_v38 = vpop.f32.mrf.mxu0 }
 0x29e   : > { %v3434_v35 = vadd.f32 %v7886_v22, %v3433_v38  ;;  %v3805_v24 = vmax.f32 %v3594_v29, 0.0  ;;  %v5948_v38 = vunpack.i.h.bf16 %v9331_v20  ;;  %v2816_v9 = vadd.f32 %v2688_v10, %v2047_v32 }
 0x29f   : > { %v2624_v29 = vmul.f32 %v6316_v58, %v7335_v61  ;;  %v3124_v62 = vpack.c.bf16 %v3010_v21, %v3009_v45 }
 0x2a0   : > { %5067 = vmatmul.msk.bf16.gmra.mxu0 %vm3211_vm0, %v3123_v49  ;;  %v3741_v13 = vmax.f32 %v3434_v35, 0.0  ;;  %v2815_v49 = vadd.f32 %v2687_v6, %v2046_v15  ;;  %v1855_v39 = vmul.f32 %v5948_v38, %v7140_v50  ;;  %v2948_v12 = vadd.f32 %v7807_v63, %v2816_v9  ;;  %v9334_v9 = vld [vmem:[#allocation46_spill] sm:$0xff] }
 0x2a1   : > { %v5630_v55 = vunpack.i.h.bf16 %v9334_v9  ;;  %v5629_v58 = vunpack.i.l.bf16 %v9334_v9 }
 0x2a2   : > { %v2947_v42 = vadd.f32 %v7807_v63, %v2815_v49  ;;  %v3076_v10 = vmax.f32 %v2948_v12, 0.0 }
 0x2a3   : > { %v3595_v33 = vpop.f32.mrf.mxu2 }
 0x2a4   : > { %v3596_v23 = vadd.f32 %v7886_v22, %v3595_v33  ;;  %v1982_v33 = vadd.f32 %v1854_v19, %v1213_v31  ;;  %v3075_v16 = vmax.f32 %v2947_v42, 0.0  ;;  %v1215_v42 = vmul.f32 %v5629_v58, %v7135_v34 }
 0x2a5   : > { %v3435_v8 = vpop.f32.mrf.mxu0 }
 0x2a6   : > { %v3436_v26 = vadd.f32 %v7886_v22, %v3435_v8  ;;  %v3806_v2 = vmax.f32 %v3596_v23, 0.0 }
 0x2a8   : > { %v3742_v46 = vmax.f32 %v3436_v26, 0.0  ;;  %5100 = vmatmul.msk.bf16.gmra.mxu2 %vm3211_vm0, %v7819_v43  ;;  %v3897_v0 = vpack.c.bf16 %v3806_v2, %v3805_v24  ;;  %v1214_v43 = vmul.f32 %v5625_v52, %v7135_v34  ;;  %v2751_v52 = vadd.f32 %v2623_v5, %v1982_v33  ;;  %v9333_v2 = vld [vmem:[#allocation27_spill] sm:$0xff] }
 0x2a9   : > { %v3157_v24 = vpack.c.bf16 %v3076_v10, %v3075_v16  ;;  %v5952_v20 = vunpack.i.l.bf16 %v9333_v2 }
 0x2aa   : > { %v3865_v57 = vpack.c.bf16 %v3742_v46, %v3741_v13  ;;  %5171 = vmatmul.msk.bf16.gmra.mxu3 %vm3211_vm0, %v3897_v0  ;;  %v1983_v35 = vadd.f32 %v1855_v39, %v1214_v43  ;;  %v2883_v32 = vadd.f32 %v7807_v63, %v2751_v52  ;;  %v5953_v13 = vunpack.i.h.bf16 %v9333_v2  ;;  %v9335_v0 = vld [vmem:[#allocation4_spill] sm:$0xff] }
 0x2ab   : > { %v3598_v47 = vpop.f32.mrf.mxu2  ;;  %v6325_v51 = vunpack.i.l.bf16 %v9335_v0  ;;  %v6326_v21 = vunpack.i.h.bf16 %v9335_v0  ;;  %v6336_v0 = vunpack.i.h.bf16 %v7746_v28 }
 0x2ac   : > { %5139 = vmatmul.msk.bf16.gmra.mxu1 %vm3211_vm0, %v3865_v57  ;;  %v2752_v6 = vadd.f32 %v2624_v29, %v1983_v35  ;;  %v3599_v23 = vadd.f32 %v7886_v22, %v3598_v47  ;;  %v3011_v39 = vmax.f32 %v2883_v32, 0.0  ;;  %v1856_v47 = vmul.f32 %v5952_v20, %v7140_v50 }
 0x2ad   : > { %v3438_v4 = vpop.f32.mrf.mxu0  ;;  %v1857_v43 = vmul.f32 %v5953_v13, %v7140_v50  ;;  %v1216_v29 = vmul.f32 %v5630_v55, %v7135_v34  ;;  %v2626_v5 = vmul.f32 %v6326_v21, %v7335_v61  ;;  %v9337_v13 = vld [vmem:[#allocation45_spill] sm:$0xff] }
 0x2ae   : > { %v3439_v8 = vadd.f32 %v7886_v22, %v3438_v4  ;;  %v2884_v26 = vadd.f32 %v7807_v63, %v2752_v6  ;;  %v3807_v38 = vmax.f32 %v3599_v23, 0.0  ;;  %v2625_v4 = vmul.f32 %v6325_v51, %v7335_v61 }
 0x2af   : > { %v1984_v35 = vadd.f32 %v1856_v47, %v1215_v42  ;;  %v1985_v33 = vadd.f32 %v1857_v43, %v1216_v29  ;;  %v6335_v51 = vunpack.i.l.bf16 %v7746_v28  ;;  %v2628_v43 = vmul.f32 %v6336_v0, %v7335_v61 }
 0x2b0   : > { %5068 = vmatmul.msk.bf16.gmra.mxu0 %vm3211_vm0, %v3124_v62  ;;  %v3743_v46 = vmax.f32 %v3439_v8, 0.0  ;;  %v3012_v57 = vmax.f32 %v2884_v26, 0.0 }
 0x2b1   : > { %v2753_v16 = vadd.f32 %v2625_v4, %v1984_v35  ;;  %v2754_v10 = vadd.f32 %v2626_v5, %v1985_v33 }
 0x2b2   : > { %v3125_v62 = vpack.c.bf16 %v3012_v57, %v3011_v39 }
 0x2b3   : > { %v3600_v7 = vpop.f32.mrf.mxu2  ;;  %v2885_v8 = vadd.f32 %v7807_v63, %v2753_v16 }
 0x2b4   : > { %v3601_v48 = vadd.f32 %v7886_v22, %v3600_v7 }
 0x2b5   : > { %v3440_v11 = vpop.f32.mrf.mxu0  ;;  %v3013_v9 = vmax.f32 %v2885_v8, 0.0 }
 0x2b6   : > { %v3441_v15 = vadd.f32 %v7886_v22, %v3440_v11  ;;  %v3808_v30 = vmax.f32 %v3601_v48, 0.0  ;;  %v2886_v11 = vadd.f32 %v7807_v63, %v2754_v10 }
 0x2b8   : > { %v3744_v49 = vmax.f32 %v3441_v15, 0.0  ;;  %5101 = vmatmul.msk.bf16.gmra.mxu2 %vm3211_vm0, %v3157_v24  ;;  %v3898_v45 = vpack.c.bf16 %v3808_v30, %v3807_v38  ;;  %v9336_v24 = vld [vmem:[#allocation92_spill] sm:$0xff]  ;;  %v3014_v58 = vmax.f32 %v2886_v11, 0.0 }
 0x2b9   : > { %v5958_v2 = vunpack.i.h.bf16 %v9336_v24  ;;  %v5957_v20 = vunpack.i.l.bf16 %v9336_v24 }
 0x2ba   : > { %v3866_v19 = vpack.c.bf16 %v3744_v49, %v3743_v46  ;;  %5172 = vmatmul.msk.bf16.gmra.mxu3 %vm3211_vm0, %v3898_v45  ;;  %v5635_v46 = vunpack.i.h.bf16 %v9337_v13  ;;  %v5634_v49 = vunpack.i.l.bf16 %v9337_v13  ;;  %v3126_v28 = vpack.c.bf16 %v3014_v58, %v3013_v9 }
 0x2bb   : > { %v3603_v31 = vpop.f32.mrf.mxu2  ;;  %v1859_v21 = vmul.f32 %v5958_v2, %v7140_v50  ;;  %v1858_v57 = vmul.f32 %v5957_v20, %v7140_v50  ;;  %v9340_v20 = vld [vmem:[#allocation66_spill] sm:$0xff] }
 0x2bc   : > { %5140 = vmatmul.msk.bf16.gmra.mxu1 %vm3211_vm0, %v3866_v19  ;;  %v3604_v6 = vadd.f32 %v7886_v22, %v3603_v31  ;;  %v1217_v47 = vmul.f32 %v5634_v49, %v7135_v34  ;;  %v2627_v31 = vmul.f32 %v6335_v51, %v7335_v61 }
 0x2bd   : > { %v3443_v12 = vpop.f32.mrf.mxu0 }
 0x2be   : > { %v3444_v52 = vadd.f32 %v7886_v22, %v3443_v12  ;;  %v3809_v32 = vmax.f32 %v3604_v6, 0.0  ;;  %v1986_v4 = vadd.f32 %v1858_v57, %v1217_v47 }
 0x2c0   : > { %5069 = vmatmul.msk.bf16.gmra.mxu0 %vm3211_vm0, %v3125_v62  ;;  %v3745_v38 = vmax.f32 %v3444_v52, 0.0  ;;  %v2755_v12 = vadd.f32 %v2627_v31, %v1986_v4 }
 0x2c2   : > { %v2887_v10 = vadd.f32 %v7807_v63, %v2755_v12  ;;  %v9341_v12 = vld [vmem:[#allocation33_spill] sm:$0xff] }
 0x2c3   : > { %v3605_v23 = vpop.f32.mrf.mxu2 }
 0x2c4   : > { %v3606_v7 = vadd.f32 %v7886_v22, %v3605_v23  ;;  %v3015_v13 = vmax.f32 %v2887_v10, 0.0 }
 0x2c5   : > { %v3445_v48 = vpop.f32.mrf.mxu0 }
 0x2c6   : > { %v3446_v26 = vadd.f32 %v7886_v22, %v3445_v48  ;;  %v3810_v15 = vmax.f32 %v3606_v7, 0.0  ;;  %v9338_v7 = vld [vmem:[#allocation94_spill] sm:$0xff] }
 0x2c7   : > { %v5963_v48 = vunpack.i.h.bf16 %v9338_v7  ;;  %v5962_v11 = vunpack.i.l.bf16 %v9338_v7 }
 0x2c8   : > { %v3746_v30 = vmax.f32 %v3446_v26, 0.0  ;;  %5102 = vmatmul.msk.bf16.gmra.mxu2 %vm3211_vm0, %v7843_v59  ;;  %v3899_v55 = vpack.c.bf16 %v3810_v15, %v3809_v32  ;;  %v1218_v59 = vmul.f32 %v5635_v46, %v7135_v34  ;;  %v9339_v15 = vld [vmem:[#allocation28_spill] sm:$0xff] }
 0x2c9   : > { %v5640_v24 = vunpack.i.h.bf16 %v9339_v15  ;;  %v5639_v2 = vunpack.i.l.bf16 %v9339_v15  ;;  %v1861_v9 = vmul.f32 %v5963_v48, %v7140_v50 }
 0x2ca   : > { %v3867_v45 = vpack.c.bf16 %v3746_v30, %v3745_v38  ;;  %5173 = vmatmul.msk.bf16.gmra.mxu3 %vm3211_vm0, %v3899_v55  ;;  %v1987_v42 = vadd.f32 %v1859_v21, %v1218_v59  ;;  %v6346_v38 = vunpack.i.h.bf16 %v9340_v20  ;;  %v6345_v30 = vunpack.i.l.bf16 %v9340_v20 }
 0x2cb   : > { %v3608_v39 = vpop.f32.mrf.mxu2  ;;  %v1860_v55 = vmul.f32 %v5962_v11, %v7140_v50  ;;  %v1219_v51 = vmul.f32 %v5639_v2, %v7135_v34 }
 0x2cc   : > { %5141 = vmatmul.msk.bf16.gmra.mxu1 %vm3211_vm0, %v3867_v45  ;;  %v2756_v29 = vadd.f32 %v2628_v43, %v1987_v42  ;;  %v3609_v5 = vadd.f32 %v7886_v22, %v3608_v39  ;;  %v2630_v45 = vmul.f32 %v6346_v38, %v7335_v61  ;;  %v2629_v21 = vmul.f32 %v6345_v30, %v7335_v61 }
 0x2cd   : > { %v3448_v19 = vpop.f32.mrf.mxu0  ;;  %v1988_v59 = vadd.f32 %v1860_v55, %v1219_v51 }
 0x2ce   : > { %v3449_v62 = vadd.f32 %v7886_v22, %v3448_v19  ;;  %v2888_v6 = vadd.f32 %v7807_v63, %v2756_v29  ;;  %v3811_v23 = vmax.f32 %v3609_v5, 0.0  ;;  %v5967_v29 = vunpack.i.l.bf16 %v9341_v12  ;;  %v8184_v5 = vld [vmem:[%s8949_s2] ss:$0 sm:$0xff] }
 0x2cf   : > { %v2757_v47 = vadd.f32 %v2629_v21, %v1988_v59 }
 0x2d0   : > { %5070 = vmatmul.msk.bf16.gmra.mxu0 %vm3211_vm0, %v3126_v28  ;;  %v3747_v26 = vmax.f32 %v3449_v62, 0.0  ;;  %v3016_v46 = vmax.f32 %v2888_v6, 0.0 }
 0x2d2   : > { %v3127_v57 = vpack.c.bf16 %v3016_v46, %v3015_v13 }
 0x2d3   : > { %v3610_v35 = vpop.f32.mrf.mxu2 }
 0x2d4   : > { %v3611_v33 = vadd.f32 %v7886_v22, %v3610_v35  ;;  %v2889_v35 = vadd.f32 %v8184_v5, %v2757_v47 }
 0x2d5   : > { %v3450_v16 = vpop.f32.mrf.mxu0 }
 0x2d6   : > { %v3451_v52 = vadd.f32 %v7886_v22, %v3450_v16  ;;  %v3812_v8 = vmax.f32 %v3611_v33, 0.0  ;;  %v5968_v16 = vunpack.i.h.bf16 %v9341_v12  ;;  %v3017_v20 = vmax.f32 %v2889_v35, 0.0 }
 0x2d8   : > { %v3748_v32 = vmax.f32 %v3451_v52, 0.0  ;;  %5103 = vmatmul.msk.bf16.gmra.mxu2 %vm3211_vm0, %v7856_v56  ;;  %v3900_v63 = vpack.c.bf16 %v3812_v8, %v3811_v23  ;;  %v1220_v56 = vmul.f32 %v5640_v24, %v7135_v34  ;;  %v9342_v52 = vld [vmem:[#allocation52_spill] sm:$0xff]  ;;  %v6355_v8 = vunpack.i.l.bf16 %v7744_v14 }
 0x2d9   : > { %v5644_v23 = vunpack.i.l.bf16 %v9342_v52  ;;  %v5645_v11 = vunpack.i.h.bf16 %v9342_v52  ;;  %v1862_v24 = vmul.f32 %v5967_v29, %v7140_v50  ;;  %v9344_v52 = vld [vmem:[#allocation95_spill] sm:$0xff] }
 0x2da   : > { %v3868_v49 = vpack.c.bf16 %v3748_v32, %v3747_v26  ;;  %5174 = vmatmul.msk.bf16.gmra.mxu3 %vm3211_vm0, %v3900_v63  ;;  %v1989_v39 = vadd.f32 %v1861_v9, %v1220_v56  ;;  %v6356_v26 = vunpack.i.h.bf16 %v7744_v14  ;;  %v1863_v63 = vmul.f32 %v5968_v16, %v7140_v50 }
 0x2db   : > { %v3613_v58 = vpop.f32.mrf.mxu2  ;;  %v1221_v30 = vmul.f32 %v5644_v23, %v7135_v34  ;;  %v2631_v13 = vmul.f32 %v6355_v8, %v7335_v61  ;;  %v1222_v46 = vmul.f32 %v5645_v11, %v7135_v34  ;;  %v5973_v23 = vunpack.i.h.bf16 %v9344_v52 }
 0x2dc   : > { %5142 = vmatmul.msk.bf16.gmra.mxu1 %vm3211_vm0, %v3868_v49  ;;  %v2758_v19 = vadd.f32 %v2630_v45, %v1989_v39  ;;  %v3614_v43 = vadd.f32 %v7886_v22, %v3613_v58  ;;  %v2632_v49 = vmul.f32 %v6356_v26, %v7335_v61  ;;  %v5972_v11 = vunpack.i.l.bf16 %v9344_v52 }
 0x2dd   : > { %v3453_v0 = vpop.f32.mrf.mxu0  ;;  %v1990_v55 = vadd.f32 %v1862_v24, %v1221_v30  ;;  %v6365_v30 = vunpack.i.l.bf16 %v7835_v40 }
 0x2de   : > { %v3454_v31 = vadd.f32 %v7886_v22, %v3453_v0  ;;  %v2890_v62 = vadd.f32 %v8184_v5, %v2758_v19  ;;  %v3813_v10 = vmax.f32 %v3614_v43, 0.0  ;;  %v1991_v0 = vadd.f32 %v1863_v63, %v1222_v46 }
 0x2df   : > { %v2759_v51 = vadd.f32 %v2631_v13, %v1990_v55  ;;  %v6366_v63 = vunpack.i.h.bf16 %v7835_v40 }
 0x2e0   : > { %5071 = vmatmul.msk.bf16.gmra.mxu0 %vm3211_vm0, %v3127_v57  ;;  %v3749_v7 = vmax.f32 %v3454_v31, 0.0  ;;  %v3018_v2 = vmax.f32 %v2890_v62, 0.0  ;;  %v2760_v21 = vadd.f32 %v2632_v49, %v1991_v0  ;;  %v9343_v62 = vld [vmem:[#allocation51_spill] sm:$0xff]  ;;  %v1865_v49 = vmul.f32 %v5973_v23, %v7140_v50 }
 0x2e1   : > { %v2891_v19 = vadd.f32 %v8184_v5, %v2759_v51  ;;  %v5650_v35 = vunpack.i.h.bf16 %v9343_v62  ;;  %v2634_v40 = vmul.f32 %v6366_v63, %v7335_v61  ;;  %v2633_v51 = vmul.f32 %v6365_v30, %v7335_v61 }
 0x2e2   : > { %v3128_v56 = vpack.c.bf16 %v3018_v2, %v3017_v20  ;;  %v6376_v30 = vunpack.i.h.bf16 %v7794_v53 }
 0x2e3   : > { %v3615_v28 = vpop.f32.mrf.mxu2  ;;  %v3019_v26 = vmax.f32 %v2891_v19, 0.0 }
 0x2e4   : > { %v3616_v42 = vadd.f32 %v7886_v22, %v3615_v28 }
 0x2e5   : > { %v3455_v4 = vpop.f32.mrf.mxu0 }
 0x2e6   : > { %v3456_v33 = vadd.f32 %v7886_v22, %v3455_v4  ;;  %v3814_v6 = vmax.f32 %v3616_v42, 0.0  ;;  %v2892_v42 = vadd.f32 %v8184_v5, %v2760_v21 }
 0x2e8   : > { %v3750_v48 = vmax.f32 %v3456_v33, 0.0  ;;  %5104 = vmatmul.msk.bf16.gmra.mxu2 %vm3211_vm0, %v7858_v60  ;;  %v3901_v15 = vpack.c.bf16 %v3814_v6, %v3813_v10  ;;  %v8204_v60 = vld [vmem:[%s8953_s6] ss:$0 sm:$0xff]  ;;  %v5649_v33 = vunpack.i.l.bf16 %v9343_v62  ;;  %v3020_v24 = vmax.f32 %v2892_v42, 0.0 }
 0x2e9   : > { %v4162_v32 = vpop.f32.mrf.mxu1 }
 0x2ea   : > { %v3869_v38 = vpack.c.bf16 %v3750_v48, %v3749_v7  ;;  %5175 = vmatmul.msk.bf16.gmra.mxu3 %vm3211_vm0, %v3901_v15  ;;  %v4163_v45 = vadd.f32 %v8204_v60, %v4162_v32 }
 0x2eb   : > { %v3618_v14 = vpop.f32.mrf.mxu2 }
 0x2ec   : > { %5143 = vmatmul.msk.bf16.gmra.mxu1 %vm3211_vm0, %v3869_v38  ;;  %v3619_v59 = vadd.f32 %v7886_v22, %v3618_v14  ;;  %v4482_v47 = vmax.f32 %v4163_v45, 0.0 }
 0x2ed   : > { %v3458_v9 = vpop.f32.mrf.mxu0  ;;  %v4322_v58 = vpop.f32.mrf.mxu3 }
 0x2ee   : > { %v3459_v43 = vadd.f32 %v7886_v22, %v3458_v9  ;;  %v4323_v4 = vadd.f32 %v8204_v60, %v4322_v58  ;;  %v3815_v8 = vmax.f32 %v3619_v59, 0.0  ;;  %v1864_v9 = vmul.f32 %v5972_v11, %v7140_v50 }
 0x2ef   : > { %v1224_v58 = vmul.f32 %v5650_v35, %v7135_v34 }
 0x2f0   : > { %5072 = vmatmul.msk.bf16.gmra.mxu0 %vm3211_vm0, %v3128_v56  ;;  %v3751_v32 = vmax.f32 %v3459_v43, 0.0  ;;  %v4546_v2 = vmax.f32 %v4323_v4, 0.0  ;;  %v1223_v56 = vmul.f32 %v5649_v33, %v7135_v34  ;;  %v8243_v4 = vld [vmem:[%s8951_s4] ss:$0 sm:$0xff] }
 0x2f1   : > { %v4164_v57 = vpop.f32.mrf.mxu1  ;;  %v1993_v59 = vadd.f32 %v1865_v49, %v1224_v58  ;;  %v6375_v49 = vunpack.i.l.bf16 %v7794_v53  ;;  %v2636_v53 = vmul.f32 %v6376_v30, %v7335_v61 }
 0x2f2   : > { %v4165_v39 = vadd.f32 %v8204_v60, %v4164_v57  ;;  %v3129_v57 = vpack.c.bf16 %v3020_v24, %v3019_v26  ;;  %v1992_v19 = vadd.f32 %v1864_v9, %v1223_v56  ;;  %v9346_v24 = vld [vmem:[#allocation97_spill] sm:$0xff] }
 0x2f3   : > { %v3620_v28 = vpop.f32.mrf.mxu2 }
 0x2f4   : > { %v4483_v31 = vmax.f32 %v4165_v39, 0.0  ;;  %v3621_v12 = vadd.f32 %v7886_v22, %v3620_v28  ;;  %v2762_v28 = vadd.f32 %v2634_v40, %v1993_v59 }
 0x2f5   : > { %v3460_v29 = vpop.f32.mrf.mxu0  ;;  %v4324_v6 = vpop.f32.mrf.mxu3 }
 0x2f6   : > { %v4610_v16 = vmax.f32 %v4482_v47, %v4483_v31  ;;  %v3461_v10 = vadd.f32 %v7886_v22, %v3460_v29  ;;  %v3816_v7 = vmax.f32 %v3621_v12, 0.0  ;;  %v4325_v48 = vadd.f32 %v8204_v60, %v4324_v6 }
 0x2f7   : > { %v2761_v31 = vadd.f32 %v2633_v51, %v1992_v19  ;;  %v2894_v52 = vadd.f32 %v8184_v5, %v2762_v28 }
 0x2f8   : > { %v3752_v15 = vmax.f32 %v3461_v10, 0.0  ;;  %5105 = vmatmul.msk.bf16.gmra.mxu2 %vm3211_vm0, %v7954_v54  ;;  %v4547_v20 = vmax.f32 %v4325_v48, 0.0  ;;  %v3902_v22 = vpack.c.bf16 %v3816_v7, %v3815_v8  ;;  %v9345_v48 = vld [vmem:[#allocation34_spill] sm:$0xff] }
 0x2f9   : > { %v4167_v38 = vpop.f32.mrf.mxu1  ;;  %v2893_v6 = vadd.f32 %v8184_v5, %v2761_v31  ;;  %v5655_v11 = vunpack.i.h.bf16 %v9345_v48  ;;  %v5654_v63 = vunpack.i.l.bf16 %v9345_v48 }
 0x2fa   : > { %v4168_v13 = vadd.f32 %v8204_v60, %v4167_v38  ;;  %v3870_v14 = vpack.c.bf16 %v3752_v15, %v3751_v32  ;;  %v4754_v46 = vmax.f32 %v4546_v2, %v4547_v20  ;;  %5176 = vmatmul.msk.bf16.gmra.mxu3 %vm3211_vm0, %v3902_v22  ;;  %v5978_v2 = vunpack.i.h.bf16 %v9346_v24 }
 0x2fb   : > { %v3623_v55 = vpop.f32.mrf.mxu2  ;;  %v5977_v20 = vunpack.i.l.bf16 %v9346_v24  ;;  %v3021_v9 = vmax.f32 %v2893_v6, 0.0  ;;  %v1226_v40 = vmul.f32 %v5655_v11, %v7135_v34 }
 0x2fc   : > { %v4484_v54 = vmax.f32 %v4168_v13, 0.0  ;;  %5144 = vmatmul.msk.bf16.gmra.mxu1 %vm3211_vm0, %v3870_v14  ;;  %v3624_v12 = vadd.f32 %v8243_v4, %v3623_v55  ;;  %v1867_v56 = vmul.f32 %v5978_v2, %v7140_v50 }
 0x2fd   : > { %v3463_v0 = vpop.f32.mrf.mxu0  ;;  %v4327_v21 = vpop.f32.mrf.mxu3 }
 0x2fe   : > { %v4611_v45 = vmax.f32 %v4610_v16, %v4484_v54  ;;  %v4328_v39 = vadd.f32 %v8204_v60, %v4327_v21  ;;  %v3464_v62 = vadd.f32 %v8243_v4, %v3463_v0  ;;  %v3817_v26 = vmax.f32 %v3624_v12, 0.0  ;;  %v9347_v12 = vld [vmem:[#allocation55_spill] sm:$0xff] }
 0x2ff   : > { %v3022_v54 = vmax.f32 %v2894_v52, 0.0  ;;  %v2635_v21 = vmul.f32 %v6375_v49, %v7335_v61  ;;  %v1995_v59 = vadd.f32 %v1867_v56, %v1226_v40 }
 0x300   : > { %5073 = vmatmul.msk.bf16.gmra.mxu0 %vm3211_vm0, %v3129_v57  ;;  %v4548_v47 = vmax.f32 %v4328_v39, 0.0  ;;  %v3753_v38 = vmax.f32 %v3464_v62, 0.0 }
 0x301   : > { %v4169_v43 = vpop.f32.mrf.mxu1  ;;  %v3130_v39 = vpack.c.bf16 %v3022_v54, %v3021_v9  ;;  %v2764_v31 = vadd.f32 %v2636_v53, %v1995_v59 }
 0x302   : > { %v4170_v42 = vadd.f32 %v8204_v60, %v4169_v43  ;;  %v4755_v29 = vmax.f32 %v4754_v46, %v4548_v47 }
 0x303   : > { %v3625_v33 = vpop.f32.mrf.mxu2 }
 0x304   : > { %v4485_v35 = vmax.f32 %v4170_v42, 0.0  ;;  %v3626_v16 = vadd.f32 %v8243_v4, %v3625_v33 }
 0x305   : > { %v3465_v10 = vpop.f32.mrf.mxu0  ;;  %v4329_v7 = vpop.f32.mrf.mxu3 }
 0x306   : > { %v8250_v23 = vmax.f32 %v4611_v45, %v4485_v35  ;;  %v3466_v8 = vadd.f32 %v8243_v4, %v3465_v10  ;;  %v3818_v32 = vmax.f32 %v3626_v16, 0.0  ;;  %v4330_v15 = vadd.f32 %v8204_v60, %v4329_v7  ;;  %v9348_v35 = vld [vmem:[#allocation38_spill] sm:$0xff] }
 0x307   : > { %v1225_v45 = vmul.f32 %v5654_v63, %v7135_v34  ;;  %v5983_v33 = vunpack.i.h.bf16 %v9348_v35  ;;  %v5982_v7 = vunpack.i.l.bf16 %v9348_v35 }
 0x308   : > { %v3754_v22 = vmax.f32 %v3466_v8, 0.0  ;;  %5106 = vmatmul.msk.bf16.gmra.mxu2 %vm3211_vm0, %v7965_v41  ;;  %v4549_v13 = vmax.f32 %v4330_v15, 0.0  ;;  %v3903_v46 = vpack.c.bf16 %v3818_v32, %v3817_v26  ;;  %v1866_v41 = vmul.f32 %v5977_v20, %v7140_v50 }
 0x309   : > { %v4172_v14 = vpop.f32.mrf.mxu1  ;;  %v5659_v8 = vunpack.i.l.bf16 %v9347_v12  ;;  %v2896_v32 = vadd.f32 %v8184_v5, %v2764_v31  ;;  %v1868_v9 = vmul.f32 %v5982_v7, %v7140_v50  ;;  %v4613_v31 = vrot.slane %v8250_v23, 4 }
 0x30a   : > { %v3871_v55 = vpack.c.bf16 %v3754_v22, %v3753_v38  ;;  %v8262_v58 = vmax.f32 %v4755_v29, %v4549_v13  ;;  %5177 = vmatmul.msk.bf16.gmra.mxu3 %vm3211_vm0, %v3903_v46  ;;  %v1994_v19 = vadd.f32 %v1866_v41, %v1225_v45  ;;  %v4173_v47 = vadd.f32 %v8204_v60, %v4172_v14 }
 0x30b   : > { %v3628_v0 = vpop.f32.mrf.mxu2  ;;  %v5660_v29 = vunpack.i.h.bf16 %v9347_v12  ;;  %v6385_v38 = vunpack.i.l.bf16 %v7833_v18  ;;  %v1869_v13 = vmul.f32 %v5983_v33, %v7140_v50  ;;  %v6386_v14 = vunpack.i.h.bf16 %v7833_v18 }
 0x30c   : > { %5145 = vmatmul.msk.bf16.gmra.mxu1 %vm3211_vm0, %v3871_v55  ;;  %v2763_v28 = vadd.f32 %v2635_v21, %v1994_v19  ;;  %v3629_v62 = vadd.f32 %v8243_v4, %v3628_v0  ;;  %v4486_v16 = vmax.f32 %v4173_v47, 0.0  ;;  %v3024_v0 = vmax.f32 %v2896_v32, 0.0 }
 0x30d   : > { %v3468_v51 = vpop.f32.mrf.mxu0  ;;  %v4332_v57 = vpop.f32.mrf.mxu3  ;;  %v1227_v53 = vmul.f32 %v5659_v8, %v7135_v34  ;;  %v2637_v18 = vmul.f32 %v6385_v38, %v7335_v61 }
 0x30e   : > { %v3469_v10 = vadd.f32 %v8243_v4, %v3468_v51  ;;  %v4333_v48 = vadd.f32 %v8204_v60, %v4332_v57  ;;  %v2895_v15 = vadd.f32 %v8184_v5, %v2763_v28  ;;  %v3819_v22 = vmax.f32 %v3629_v62, 0.0 }
 0x30f   : > { %v2638_v57 = vmul.f32 %v6386_v14, %v7335_v61  ;;  %v1996_v19 = vadd.f32 %v1868_v9, %v1227_v53  ;;  %v6396_v53 = vunpack.i.h.bf16 %v7926_v27 }
 0x310   : > { %5074 = vmatmul.msk.bf16.gmra.mxu0 %vm3211_vm0, %v3130_v39  ;;  %v3755_v46 = vmax.f32 %v3469_v10, 0.0  ;;  %v4550_v54 = vmax.f32 %v4333_v48, 0.0  ;;  %v3023_v40 = vmax.f32 %v2895_v15, 0.0  ;;  %v4614_v10 = vmax.f32 %v8250_v23, %v4613_v31  ;;  %v9350_v23 = vld [vmem:[#allocation98_spill] sm:$0xff] }
 0x311   : > { %v4174_v43 = vpop.f32.mrf.mxu1  ;;  %v2765_v62 = vadd.f32 %v2637_v18, %v1996_v19  ;;  %v5988_v38 = vunpack.i.h.bf16 %v9350_v23 }
 0x312   : > { %v4175_v42 = vadd.f32 %v8204_v60, %v4174_v43  ;;  %v3131_v12 = vpack.c.bf16 %v3024_v0, %v3023_v40 }
 0x313   : > { %v3630_v52 = vpop.f32.mrf.mxu2  ;;  %v2897_v8 = vadd.f32 %v8184_v5, %v2765_v62 }
 0x314   : > { %v4487_v6 = vmax.f32 %v4175_v42, 0.0  ;;  %v3631_v11 = vadd.f32 %v8243_v4, %v3630_v52 }
 0x315   : > { %v3470_v26 = vpop.f32.mrf.mxu0  ;;  %v4334_v20 = vpop.f32.mrf.mxu3 }
 0x316   : > { %v4619_v24 = vmax.f32 %v4486_v16, %v4487_v6  ;;  %v3471_v2 = vadd.f32 %v8243_v4, %v3470_v26  ;;  %v3820_v63 = vmax.f32 %v3631_v11, 0.0  ;;  %v4335_v30 = vadd.f32 %v8204_v60, %v4334_v20  ;;  %v9349_v11 = vld [vmem:[#allocation54_spill] sm:$0xff] }
 0x317   : > { %v4757_v6 = vrot.slane %v8262_v58, 4  ;;  %v5665_v26 = vunpack.i.h.bf16 %v9349_v11  ;;  %v5664_v20 = vunpack.i.l.bf16 %v9349_v11  ;;  %v9351_v11 = vld [vmem:[#allocation39_spill] sm:$0xff] }
 0x318   : > { %v3756_v49 = vmax.f32 %v3471_v2, 0.0  ;;  %5107 = vmatmul.msk.bf16.gmra.mxu2 %vm3211_vm0, %v7968_v36  ;;  %v4551_v55 = vmax.f32 %v4335_v30, 0.0  ;;  %v3904_v41 = vpack.c.bf16 %v3820_v63, %v3819_v22  ;;  %v1228_v36 = vmul.f32 %v5660_v29, %v7135_v34 }
 0x319   : > { %v4177_v56 = vpop.f32.mrf.mxu1  ;;  %v5987_v22 = vunpack.i.l.bf16 %v9350_v23  ;;  %v4758_v14 = vmax.f32 %v8262_v58, %v4757_v6  ;;  %v6395_v58 = vunpack.i.l.bf16 %v7926_v27  ;;  %v1229_v27 = vmul.f32 %v5664_v20, %v7135_v34 }
 0x31a   : > { %v4178_v51 = vadd.f32 %v8204_v60, %v4177_v56  ;;  %v3872_v45 = vpack.c.bf16 %v3756_v49, %v3755_v46  ;;  %v4763_v21 = vmax.f32 %v4550_v54, %v4551_v55  ;;  %5178 = vmatmul.msk.bf16.gmra.mxu3 %vm3211_vm0, %v3904_v41  ;;  %v1997_v43 = vadd.f32 %v1869_v13, %v1228_v36 }
 0x31b   : > { %v3633_v59 = vpop.f32.mrf.mxu2  ;;  %v4615_v13 = vrot.slane %v4614_v10, 2  ;;  %v3025_v54 = vmax.f32 %v2897_v8, 0.0  ;;  %v2639_v62 = vmul.f32 %v6395_v58, %v7335_v61 }
 0x31c   : > { %v4488_v39 = vmax.f32 %v4178_v51, 0.0  ;;  %5146 = vmatmul.msk.bf16.gmra.mxu1 %vm3211_vm0, %v3872_v45  ;;  %v2766_v33 = vadd.f32 %v2638_v57, %v1997_v43  ;;  %v3634_v7 = vadd.f32 %v8243_v4, %v3633_v59  ;;  %v1870_v43 = vmul.f32 %v5987_v22, %v7140_v50 }
 0x31d   : > { %v3473_v47 = vpop.f32.mrf.mxu0  ;;  %v4337_v42 = vpop.f32.mrf.mxu3  ;;  %v4616_v57 = vmax.f32 %v4614_v10, %v4615_v13 }
 0x31e   : > { %v4620_v28 = vmax.f32 %v4619_v24, %v4488_v39  ;;  %v4338_v35 = vadd.f32 %v8204_v60, %v4337_v42  ;;  %v2898_v32 = vadd.f32 %v8184_v5, %v2766_v33  ;;  %v3474_v15 = vadd.f32 %v8243_v4, %v3473_v47 }
 0x31f   : > { %v3821_v55 = vmax.f32 %v3634_v7, 0.0  ;;  %v4759_v39 = vrot.slane %v4758_v14, 2  ;;  %v1871_v47 = vmul.f32 %v5988_v38, %v7140_v50  ;;  %v1998_v7 = vadd.f32 %v1870_v43, %v1229_v27 }
 0x320   : > { %5075 = vmatmul.msk.bf16.gmra.mxu0 %vm3211_vm0, %v3131_v12  ;;  %v4552_v29 = vmax.f32 %v4338_v35, 0.0  ;;  %v3026_v0 = vmax.f32 %v2898_v32, 0.0  ;;  %v3757_v40 = vmax.f32 %v3474_v15, 0.0  ;;  %v2640_v12 = vmul.f32 %v6396_v53, %v7335_v61 }
 0x321   : > { %v4179_v16 = vpop.f32.mrf.mxu1  ;;  %v5669_v32 = vunpack.i.l.bf16 %v9351_v11 }
 0x322   : > { %v4180_v52 = vadd.f32 %v8204_v60, %v4179_v16  ;;  %v4764_v48 = vmax.f32 %v4763_v21, %v4552_v29  ;;  %v4617_v29 = vrot.slane %v4616_v57, 1  ;;  %v4760_v16 = vmax.f32 %v4758_v14, %v4759_v39  ;;  %v9352_v14 = vld [vmem:[#allocation99_spill] sm:$0xff] }
 0x323   : > { %v3635_v2 = vpop.f32.mrf.mxu2 }
 0x324   : > { %v4489_v24 = vmax.f32 %v4180_v52, 0.0  ;;  %v3636_v63 = vadd.f32 %v8243_v4, %v3635_v2  ;;  %v3132_v52 = vpack.c.bf16 %v3026_v0, %v3025_v54  ;;  %v2767_v2 = vadd.f32 %v2639_v62, %v1998_v7  ;;  %v9353_v7 = vld [vmem:[#allocation44_spill] sm:$0xff] }
 0x325   : > { %v3475_v30 = vpop.f32.mrf.mxu0  ;;  %v4339_v9 = vpop.f32.mrf.mxu3  ;;  %v4618_v22 = vmax.f32 %v4616_v57, %v4617_v29 }
 0x326   : > { %v4621_v46 = vmax.f32 %v4620_v28, %v4489_v24  ;;  %v3476_v49 = vadd.f32 %v8243_v4, %v3475_v30  ;;  %v3822_v56 = vmax.f32 %v3636_v63, 0.0  ;;  %v4340_v41 = vadd.f32 %v8204_v60, %v4339_v9 }
 0x327   : > { %v4761_v63 = vrot.slane %v4760_v16, 1 }
 0x328   : > { %v4622_v51 = vrot.slane %v4621_v46, 4  ;;  %v3758_v45 = vmax.f32 %v3476_v49, 0.0  ;;  %5108 = vmatmul.msk.bf16.gmra.mxu2 %vm3211_vm0, %v7977_v1  ;;  %v3905_v18 = vpack.c.bf16 %v3822_v56, %v3821_v55  ;;  %v4553_v21 = vmax.f32 %v4340_v41, 0.0 }
 0x329   : > { %v4182_v36 = vpop.f32.mrf.mxu1  ;;  %v1230_v1 = vmul.f32 %v5665_v26, %v7135_v34  ;;  %v5670_v26 = vunpack.i.h.bf16 %v9351_v11  ;;  %v5992_v49 = vunpack.i.l.bf16 %v9352_v14 }
 0x32a   : > { %v4623_v59 = vmax.f32 %v4621_v46, %v4622_v51  ;;  %v3873_v19 = vpack.c.bf16 %v3758_v45, %v3757_v40  ;;  %v4765_v31 = vmax.f32 %v4764_v48, %v4553_v21  ;;  %5179 = vmatmul.msk.bf16.gmra.mxu3 %vm3211_vm0, %v3905_v18  ;;  %v4183_v24 = vadd.f32 %v8204_v60, %v4182_v36 }
 0x32b   : > { %v3638_v42 = vpop.f32.mrf.mxu2  ;;  %v1999_v8 = vadd.f32 %v1871_v47, %v1230_v1  ;;  %v5993_v46 = vunpack.i.h.bf16 %v9352_v14  ;;  %v2899_v51 = vadd.f32 %v8184_v5, %v2767_v2  ;;  %v4762_v36 = vmax.f32 %v4760_v16, %v4761_v63 }
 0x32c   : > { %v4624_v28 = vrot.slane %v4623_v59, 2  ;;  %5147 = vmatmul.msk.bf16.gmra.mxu1 %vm3211_vm0, %v3873_v19  ;;  %v4766_v35 = vrot.slane %v4765_v31, 4  ;;  %v3639_v54 = vadd.f32 %v8243_v4, %v3638_v42  ;;  %v4490_v56 = vmax.f32 %v4183_v24, 0.0 }
 0x32d   : > { %v3478_v33 = vpop.f32.mrf.mxu0  ;;  %v4342_v6 = vpop.f32.mrf.mxu3  ;;  %v2768_v20 = vadd.f32 %v2640_v12, %v1999_v8  ;;  %v6406_v1 = vunpack.i.h.bf16 %v7893_v3  ;;  %v3027_v16 = vmax.f32 %v2899_v51, 0.0  ;;  %v1232_v8 = vmul.f32 %v5670_v26, %v7135_v34 }
 0x32e   : > { %v4625_v10 = vmax.f32 %v4623_v59, %v4624_v28  ;;  %v4767_v48 = vmax.f32 %v4765_v31, %v4766_v35  ;;  %v3479_v41 = vadd.f32 %v8243_v4, %v3478_v33  ;;  %v4343_v53 = vadd.f32 %v8204_v60, %v4342_v6 }
 0x32f   : > { %v2900_v21 = vadd.f32 %v8184_v5, %v2768_v20  ;;  %v3823_v47 = vmax.f32 %v3639_v54, 0.0  ;;  %v6405_v28 = vunpack.i.l.bf16 %v7893_v3  ;;  %v1231_v3 = vmul.f32 %v5669_v32, %v7135_v34  ;;  %v9355_v32 = vld [vmem:[#allocation57_spill] sm:$0xff]  ;;  %v9356_v54 = vld [vmem:[#allocation58_spill] sm:$0xff] }
 0x330   : > { %v4626_v15 = vrot.slane %v4625_v10, 1  ;;  %5076 = vmatmul.msk.bf16.gmra.mxu0 %vm3211_vm0, %v3132_v52  ;;  %v4768_v23 = vrot.slane %v4767_v48, 2  ;;  %v3759_v42 = vmax.f32 %v3479_v41, 0.0  ;;  %v4554_v62 = vmax.f32 %v4343_v53, 0.0 }
 0x331   : > { %v4184_v38 = vpop.f32.mrf.mxu1  ;;  %v1872_v24 = vmul.f32 %v5992_v49, %v7140_v50  ;;  %v5679_v63 = vunpack.i.l.bf16 %v9355_v32  ;;  %v2641_v14 = vmul.f32 %v6405_v28, %v7335_v61  ;;  %v5674_v41 = vunpack.i.l.bf16 %v9356_v54 }
 0x332   : > { %v4627_v30 = vmax.f32 %v4625_v10, %v4626_v15  ;;  %v4185_v13 = vadd.f32 %v8204_v60, %v4184_v38  ;;  %v4769_v9 = vmax.f32 %v4767_v48, %v4768_v23  ;;  %v3028_v10 = vmax.f32 %v2900_v21, 0.0  ;;  %v9354_v23 = vld [vmem:[#allocation50_spill] sm:$0xff] }
 0x333   : > { %v3640_v40 = vpop.f32.mrf.mxu2  ;;  %v5685_v48 = vunpack.i.h.bf16 %v9353_v7  ;;  %v1873_v15 = vmul.f32 %v5993_v46, %v7140_v50  ;;  %v5700_v38 = vunpack.i.h.bf16 %v9354_v23  ;;  %v5699_v26 = vunpack.i.l.bf16 %v9354_v23 }
 0x334   : > { %v8339_v55 = vsel %vm4930_vm1, %v4627_v30, %v4618_v22  ;;  %v4491_v0 = vmax.f32 %v4185_v13, 0.0  ;;  %v4770_v45 = vrot.slane %v4769_v9, 1  ;;  %v3641_v58 = vadd.f32 %v8243_v4, %v3640_v40 }
 0x335   : > { %v3480_v18 = vpop.f32.mrf.mxu0  ;;  %v4344_v59 = vpop.f32.mrf.mxu3  ;;  %v5680_v22 = vunpack.i.h.bf16 %v9355_v32  ;;  %v2642_v13 = vmul.f32 %v6406_v1, %v7335_v61  ;;  %v3133_v49 = vpack.c.bf16 %v3028_v10, %v3027_v16  ;;  %v8374_v40 = vmul.f32 %v5685_v48, %v7135_v34  ;;  %v9358_v10 = vld [vmem:[#allocation61_spill] sm:$0xff] }
 0x336   : > { %v4628_v57 = vmax.f32 %v4490_v56, %v4491_v0  ;;  %v3481_v39 = vadd.f32 %v8243_v4, %v3480_v18  ;;  %v4771_v19 = vmax.f32 %v4769_v9, %v4770_v45  ;;  %v3824_v43 = vmax.f32 %v3641_v58, 0.0 }
 0x337   : > { %v4345_v31 = vadd.f32 %v8204_v60, %v4344_v59  ;;  %v5675_v56 = vunpack.i.h.bf16 %v9356_v54  ;;  %v2001_v45 = vadd.f32 %v1873_v15, %v1232_v8  ;;  %v2000_v53 = vadd.f32 %v1872_v24, %v1231_v3  ;;  %v9359_v8 = vld [vmem:[#allocation37_spill] sm:$0xff] }
 0x338   : > { %v3760_v27 = vmax.f32 %v3481_v39, 0.0  ;;  %5109 = vmatmul.msk.bf16.gmra.mxu2 %vm3211_vm0, %v7986_v44  ;;  %v8353_v12 = vsel %vm4930_vm1, %v4771_v19, %v4762_v36  ;;  %v3906_v35 = vpack.c.bf16 %v3824_v43, %v3823_v47  ;;  %v5684_v44 = vunpack.i.l.bf16 %v9353_v7 }
 0x339   : > { %v4555_v33 = vmax.f32 %v4345_v31, 0.0  ;;  %v4187_v29 = vpop.f32.mrf.mxu1  ;;  %v8381_v58 = vmul.f32 %v5700_v38, %v7135_v34  ;;  %v8384_v18 = vmul.f32 %v5699_v26, %v7135_v34  ;;  %v8387_v21 = vmul.f32 %v5680_v22, %v7135_v34 }
 0x33a   : > { %v3874_v6 = vpack.c.bf16 %v3760_v27, %v3759_v42  ;;  %v4188_v52 = vadd.f32 %v8204_v60, %v4187_v29  ;;  %5180 = vmatmul.msk.bf16.gmra.mxu3 %vm3211_vm0, %v3906_v35  ;;  %v8377_v51 = vmul.f32 %v5684_v44, %v7135_v34  ;;  %v8390_v39 = vmul.f32 %v5679_v63, %v7135_v34  ;;  %v9357_v42 = vld [vmem:[#allocation60_spill] sm:$0xff]  ;;  %v6414_v35 = vpop.permute.xlu2 %6413 }
 0x33b   : > { %v4772_v11 = vmax.f32 %v4554_v62, %v4555_v33  ;;  %v3643_v20 = vpop.f32.mrf.mxu2  ;;  %v2770_v59 = vadd.f32 %v2642_v13, %v2001_v45  ;;  %v2769_v19 = vadd.f32 %v2641_v14, %v2000_v53  ;;  %v8394_v43 = vmul.f32 %v5675_v56, %v7135_v34 }
 0x33c   : > { %v4492_v2 = vmax.f32 %v4188_v52, 0.0  ;;  %5148 = vmatmul.msk.bf16.gmra.mxu1 %vm3211_vm0, %v3874_v6  ;;  %v1233_v31 = vmul.f32 %v5674_v41, %v7135_v34  ;;  %v3644_v1 = vadd.f32 %v8243_v4, %v3643_v20  ;;  %v5695_v27 = vunpack.i.h.bf16 %v9357_v42 }
 0x33d   : > { %v3483_v30 = vpop.f32.mrf.mxu0  ;;  %v4347_v9 = vpop.f32.mrf.mxu3  ;;  %v5694_v62 = vunpack.i.l.bf16 %v9357_v42  ;;  %v5690_v6 = vunpack.i.h.bf16 %v9358_v10  ;;  %v5689_v52 = vunpack.i.l.bf16 %v9358_v10  ;;  %v5997_v3 = vunpack.i.l.bf16 %v9359_v8  ;;  %v9360_v42 = vld [vmem:[#allocation75_spill] sm:$0xff] }
 0x33e   : > { %v4629_v46 = vmax.f32 %v4628_v57, %v4492_v2  ;;  %v4348_v0 = vadd.f32 %v8204_v60, %v4347_v9  ;;  %v3484_v33 = vadd.f32 %v8243_v4, %v3483_v30  ;;  %v2901_v44 = vadd.f32 %v8184_v5, %v2769_v19 }
 0x33f   : > { %v6415_v20 = vunpack.i.l.bf16 %v6414_v35  ;;  %v3825_v23 = vmax.f32 %v3644_v1, 0.0  ;;  %v5998_v32 = vunpack.i.h.bf16 %v9359_v8  ;;  %v1874_v13 = vmul.f32 %v5997_v3, %v7140_v50 }
 0x340   : > { %5077 = vmatmul.msk.bf16.gmra.mxu0 %vm3211_vm0, %v3133_v49  ;;  %v4556_v36 = vmax.f32 %v4348_v0, 0.0  ;;  %v3761_v22 = vmax.f32 %v3484_v33, 0.0  ;;  %v6416_v14 = vunpack.i.h.bf16 %v6414_v35  ;;  %v3029_v56 = vmax.f32 %v2901_v44, 0.0 }
 0x341   : > { %v4189_v57 = vpop.f32.mrf.mxu1  ;;  %v8414_v45 = vmul.f32 %v5695_v27, %v7135_v34  ;;  %v8417_v53 = vmul.f32 %v5694_v62, %v7135_v34  ;;  %v1875_v19 = vmul.f32 %v5998_v32, %v7140_v50  ;;  %v5850_v27 = vunpack.i.h.bf16 %v9360_v42  ;;  %v9363_v32 = vld [vmem:[#allocation78_spill] sm:$0xff] }
 0x342   : > { %v4190_v47 = vadd.f32 %v8204_v60, %v4189_v57  ;;  %v4773_v28 = vmax.f32 %v4772_v11, %v4556_v36  ;;  %v2902_v11 = vadd.f32 %v8184_v5, %v2770_v59  ;;  %v2643_v36 = vmul.f32 %v6415_v20, %v7335_v61 }
 0x343   : > { %v3645_v16 = vpop.f32.mrf.mxu2  ;;  %v8425_v59 = vmul.f32 %v5689_v52, %v7135_v34  ;;  %v5849_v62 = vunpack.i.l.bf16 %v9360_v42  ;;  %v2002_v35 = vadd.f32 %v1874_v13, %v1233_v31  ;;  %v2644_v10 = vmul.f32 %v6416_v14, %v7335_v61 }
 0x344   : > { %v4493_v29 = vmax.f32 %v4190_v47, 0.0  ;;  %v3646_v7 = vadd.f32 %v8243_v4, %v3645_v16  ;;  %v3030_v54 = vmax.f32 %v2902_v11, 0.0  ;;  %v8440_v20 = vmul.f32 %v5850_v27, %v7135_v34 }
 0x345   : > { %v3485_v48 = vpop.f32.mrf.mxu0  ;;  %v4349_v2 = vpop.f32.mrf.mxu3  ;;  %v2771_v11 = vadd.f32 %v2643_v36, %v2002_v35  ;;  %v5844_v13 = vunpack.i.l.bf16 %v9363_v32  ;;  %v9364_v36 = vld [vmem:[#allocation100_spill] sm:$0xff] }
 0x346   : > { %v4630_v15 = vmax.f32 %v4629_v46, %v4493_v29  ;;  %v3486_v24 = vadd.f32 %v8243_v4, %v3485_v48  ;;  %v3826_v38 = vmax.f32 %v3646_v7, 0.0  ;;  %v4350_v26 = vadd.f32 %v8204_v60, %v4349_v2  ;;  %v9361_v29 = vld [vmem:[#allocation63_spill] sm:$0xff]  ;;  %v9362_v7 = vld [vmem:[#allocation64_spill] sm:$0xff] }
 0x347   : > { %v3134_v8 = vpack.c.bf16 %v3030_v54, %v3029_v56  ;;  %v2903_v14 = vadd.f32 %v8184_v5, %v2771_v11 }
 0x348   : > { %v4631_v63 = vrot.slane %v4630_v15, 4  ;;  %v3762_v30 = vmax.f32 %v3486_v24, 0.0  ;;  %5110 = vmatmul.msk.bf16.gmra.mxu2 %vm3211_vm0, %v7988_v37  ;;  %v3907_v46 = vpack.c.bf16 %v3826_v38, %v3825_v23  ;;  %v4557_v9 = vmax.f32 %v4350_v26, 0.0 }
 0x349   : > { %v4192_v49 = vpop.f32.mrf.mxu1  ;;  %v8422_v37 = vmul.f32 %v5690_v6, %v7135_v34  ;;  %v2003_v24 = vadd.f32 %v1875_v19, %v8394_v43  ;;  %v8443_v23 = vmul.f32 %v5849_v62, %v7135_v34  ;;  %v6424_v19 = vpop.permute.xlu1 %6423 }
 0x34a   : > { %v4632_v41 = vmax.f32 %v4630_v15, %v4631_v63  ;;  %v3875_v0 = vpack.c.bf16 %v3762_v30, %v3761_v22  ;;  %v4774_v57 = vmax.f32 %v4773_v28, %v4557_v9  ;;  %5181 = vmatmul.msk.bf16.gmra.mxu3 %vm3211_vm0, %v3907_v46  ;;  %v4193_v2 = vadd.f32 %v8204_v60, %v4192_v49 }
 0x34b   : > { %v3648_v1 = vpop.f32.mrf.mxu2  ;;  %v5845_v22 = vunpack.i.h.bf16 %v9363_v32  ;;  %v2772_v63 = vadd.f32 %v2644_v10, %v2003_v24  ;;  %v6430_v24 = vpop.permute.xlu2 %6429 }
 0x34c   : > { %v4633_v47 = vrot.slane %v4632_v41, 2  ;;  %5149 = vmatmul.msk.bf16.gmra.mxu1 %vm3211_vm0, %v3875_v0  ;;  %v4775_v28 = vrot.slane %v4774_v57, 4  ;;  %v3649_v9 = vadd.f32 %v8243_v4, %v3648_v1  ;;  %v4494_v54 = vmax.f32 %v4193_v2, 0.0 }
 0x34d   : > { %v3488_v33 = vpop.f32.mrf.mxu0  ;;  %v4352_v52 = vpop.f32.mrf.mxu3  ;;  %v6002_v1 = vunpack.i.l.bf16 %v9364_v36  ;;  %v2904_v35 = vadd.f32 %v8184_v5, %v2772_v63 }
 0x34e   : > { %v4634_v6 = vmax.f32 %v4632_v41, %v4633_v47  ;;  %v4776_v44 = vmax.f32 %v4774_v57, %v4775_v28  ;;  %v3489_v56 = vadd.f32 %v8243_v4, %v3488_v33  ;;  %v6003_v57 = vunpack.i.h.bf16 %v9364_v36 }
 0x34f   : > { %v4353_v42 = vadd.f32 %v8204_v60, %v4352_v52  ;;  %v6431_v36 = vunpack.i.l.bf16 %v6430_v24 }
 0x350   : > { %v4635_v31 = vrot.slane %v4634_v6, 1  ;;  %5078 = vmatmul.msk.bf16.gmra.mxu0 %vm3211_vm0, %v3134_v8  ;;  %v4777_v38 = vrot.slane %v4776_v44, 2  ;;  %v3763_v52 = vmax.f32 %v3489_v56, 0.0  ;;  %v1876_v56 = vmul.f32 %v6002_v1, %v7140_v50  ;;  %v6435_v1 = vpop.permute.xlu0 %6434 }
 0x351   : > { %v4194_v26 = vpop.f32.mrf.mxu1 }
 0x352   : > { %v4636_v30 = vmax.f32 %v4634_v6, %v4635_v31  ;;  %v4195_v43 = vadd.f32 %v8204_v60, %v4194_v26  ;;  %v4778_v46 = vmax.f32 %v4776_v44, %v4777_v38  ;;  %v3827_v6 = vmax.f32 %v3649_v9, 0.0  ;;  %v9365_v9 = vld [vmem:[#allocation76_spill] sm:$0xff] }
 0x353   : > { %v3650_v0 = vpop.f32.mrf.mxu2  ;;  %v3031_v44 = vmax.f32 %v2903_v14, 0.0  ;;  %v6425_v31 = vunpack.i.l.bf16 %v6424_v19  ;;  %v4558_v38 = vmax.f32 %v4353_v42, 0.0 }
 0x354   : > { %v8452_v49 = vsel %vm4932_vm2, %v4636_v30, %v8339_v55  ;;  %v4495_v41 = vmax.f32 %v4195_v43, 0.0  ;;  %v4779_v47 = vrot.slane %v4778_v46, 1  ;;  %v3651_v27 = vadd.f32 %v8243_v4, %v3650_v0 }
 0x355   : > { %v3490_v62 = vpop.f32.mrf.mxu0  ;;  %v4354_v10 = vpop.f32.mrf.mxu3  ;;  %v3032_v30 = vmax.f32 %v2904_v35, 0.0  ;;  %v6426_v43 = vunpack.i.h.bf16 %v6424_v19  ;;  %v1301_v19 = vmul.f32 %v5844_v13, %v7135_v34 }
 0x356   : > { %v4637_v55 = vmax.f32 %v4494_v54, %v4495_v41  ;;  %v3491_v28 = vadd.f32 %v8243_v4, %v3490_v62  ;;  %v4780_v33 = vmax.f32 %v4778_v46, %v4779_v47  ;;  %v3828_v8 = vmax.f32 %v3651_v27, 0.0  ;;  %v9366_v27 = vld [vmem:[#allocation80_spill] sm:$0xff] }
 0x357   : > { %v4355_v11 = vadd.f32 %v8204_v60, %v4354_v10  ;;  %v6432_v41 = vunpack.i.h.bf16 %v6430_v24  ;;  %v5860_v62 = vunpack.i.h.bf16 %v9366_v27  ;;  %v5859_v35 = vunpack.i.l.bf16 %v9366_v27 }
 0x358   : > { %v3764_v2 = vmax.f32 %v3491_v28, 0.0  ;;  %5111 = vmatmul.msk.bf16.gmra.mxu2 %vm3211_vm0, %v8035_v17  ;;  %v8466_v5 = vsel %vm4932_vm2, %v4780_v33, %v8353_v12  ;;  %v3908_v26 = vpack.c.bf16 %v3828_v8, %v3827_v6  ;;  %v1302_v17 = vmul.f32 %v5845_v22, %v7135_v34  ;;  %v9367_v33 = vld [vmem:[#allocation81_spill] sm:$0xff] }
 0x359   : > { %v4559_v32 = vmax.f32 %v4355_v11, 0.0  ;;  %v4197_v63 = vpop.f32.mrf.mxu1  ;;  %v1877_v12 = vmul.f32 %v6003_v57, %v7140_v50  ;;  %v2645_v28 = vmul.f32 %v6425_v31, %v7335_v61  ;;  %v5855_v6 = vunpack.i.h.bf16 %v9367_v33 }
 0x35a   : > { %v3876_v46 = vpack.c.bf16 %v3764_v2, %v3763_v52  ;;  %v4198_v14 = vadd.f32 %v8204_v60, %v4197_v63  ;;  %5182 = vmatmul.msk.bf16.gmra.mxu3 %vm3211_vm0, %v3908_v26  ;;  %v2646_v22 = vmul.f32 %v6426_v43, %v7335_v61  ;;  %v3135_v11 = vpack.c.bf16 %v3032_v30, %v3031_v44  ;;  %v9368_v52 = vld [vmem:[#allocation101_spill] sm:$0xff] }
 0x35b   : > { %v4781_v0 = vmax.f32 %v4558_v38, %v4559_v32  ;;  %v3653_v42 = vpop.f32.mrf.mxu2  ;;  %v2004_v24 = vadd.f32 %v1876_v56, %v8390_v39  ;;  %v6007_v2 = vunpack.i.l.bf16 %v9368_v52  ;;  %v1943_v13 = vmul.f32 %v6432_v41, %v7140_v50  ;;  %v6445_v41 = vpop.permute.xlu2 %6444 }
 0x35c   : > { %v4496_v47 = vmax.f32 %v4198_v14, 0.0  ;;  %5150 = vmatmul.msk.bf16.gmra.mxu1 %vm3211_vm0, %v3876_v46  ;;  %v2005_v31 = vadd.f32 %v1877_v12, %v8387_v21  ;;  %v1942_v32 = vmul.f32 %v6431_v36, %v7140_v50  ;;  %v6437_v63 = vunpack.i.h.bf16 %v6435_v1  ;;  %v9369_v46 = vld [vmem:[#allocation93_spill] sm:$0xff] }
 0x35d   : > { %v3493_v10 = vpop.f32.mrf.mxu0  ;;  %v4357_v8 = vpop.f32.mrf.mxu3  ;;  %v6436_v44 = vunpack.i.l.bf16 %v6435_v1  ;;  %v2773_v39 = vadd.f32 %v2645_v28, %v2004_v24  ;;  %v6013_v14 = vunpack.i.h.bf16 %v9369_v46  ;;  %v6008_v56 = vunpack.i.h.bf16 %v9368_v52 }
 0x35e   : > { %v4638_v57 = vmax.f32 %v4637_v55, %v4496_v47  ;;  %v4358_v38 = vadd.f32 %v8204_v60, %v4357_v8  ;;  %v8490_v55 = vmul.f32 %v5860_v62, %v7135_v34  ;;  %v2774_v47 = vadd.f32 %v2646_v22, %v2005_v31  ;;  %v6440_v28 = vpop.permute.xlu1 %6439  ;;  %v8503_v22 = vld [vmem:[%s8949_s2] ss:$0 sm:$0xff] }
 0x35f   : > { %v1878_v12 = vmul.f32 %v6007_v2, %v7140_v50  ;;  %v2071_v36 = vadd.f32 %v1943_v13, %v1302_v17  ;;  %v3654_v8 = vadd.f32 %v8243_v4, %v3653_v42  ;;  %v2070_v62 = vadd.f32 %v1942_v32, %v1301_v19 }
 0x360   : > { %5079 = vmatmul.msk.bf16.gmra.mxu0 %vm3211_vm0, %v3135_v11  ;;  %v4560_v30 = vmax.f32 %v4358_v38, 0.0  ;;  %v2712_v1 = vmul.f32 %v6437_v63, %v7335_v61  ;;  %v3494_v24 = vadd.f32 %v8243_v4, %v3493_v10  ;;  %v6447_v16 = vunpack.i.h.bf16 %v6445_v41 }
 0x361   : > { %v4199_v43 = vpop.f32.mrf.mxu1  ;;  %v2711_v52 = vmul.f32 %v6436_v44, %v7335_v61  ;;  %v2905_v17 = vadd.f32 %v8503_v22, %v2773_v39  ;;  %v6446_v19 = vunpack.i.l.bf16 %v6445_v41  ;;  %v2906_v2 = vadd.f32 %v8503_v22, %v2774_v47 }
 0x362   : > { %v4200_v21 = vadd.f32 %v8204_v60, %v4199_v43  ;;  %v4782_v11 = vmax.f32 %v4781_v0, %v4560_v30  ;;  %v6441_v32 = vunpack.i.l.bf16 %v6440_v28  ;;  %v3829_v63 = vmax.f32 %v3654_v8, 0.0 }
 0x363   : > { %v3655_v3 = vpop.f32.mrf.mxu2  ;;  %v2840_v43 = vadd.f32 %v2712_v1, %v2071_v36  ;;  %v3765_v54 = vmax.f32 %v3494_v24, 0.0  ;;  %v3033_v41 = vmax.f32 %v2905_v17, 0.0  ;;  %v6442_v48 = vunpack.i.h.bf16 %v6440_v28 }
 0x364   : > { %v4497_v38 = vmax.f32 %v4200_v21, 0.0  ;;  %v3656_v0 = vadd.f32 %v8243_v4, %v3655_v3  ;;  %v6450_v21 = vpop.permute.xlu0 %6449  ;;  %v2839_v3 = vadd.f32 %v2711_v52, %v2070_v62  ;;  %v2647_v36 = vmul.f32 %v6441_v32, %v7335_v61 }
 0x365   : > { %v3495_v42 = vpop.f32.mrf.mxu0  ;;  %v4359_v31 = vpop.f32.mrf.mxu3  ;;  %v6012_v24 = vunpack.i.l.bf16 %v9369_v46  ;;  %v1944_v62 = vmul.f32 %v6446_v19, %v7140_v50 }
 0x366   : > { %v4639_v13 = vmax.f32 %v4638_v57, %v4497_v38  ;;  %v3496_v10 = vadd.f32 %v8243_v4, %v3495_v42  ;;  %v3830_v44 = vmax.f32 %v3656_v0, 0.0  ;;  %v4360_v30 = vadd.f32 %v8204_v60, %v4359_v31 }
 0x367   : > { %v3034_v42 = vmax.f32 %v2906_v2, 0.0  ;;  %v1879_v0 = vmul.f32 %v6008_v56, %v7140_v50  ;;  %v6452_v60 = vunpack.i.h.bf16 %v6450_v21  ;;  %v6451_v56 = vunpack.i.l.bf16 %v6450_v21 }
 0x368   : > { %v4640_v15 = vrot.slane %v4639_v13, 4  ;;  %v3766_v39 = vmax.f32 %v3496_v10, 0.0  ;;  %5112 = vmatmul.msk.bf16.gmra.mxu2 %vm3211_vm0, %v8016_v25  ;;  %v3909_v47 = vpack.c.bf16 %v3830_v44, %v3829_v63  ;;  %v4561_v57 = vmax.f32 %v4360_v30, 0.0 }
 0x369   : > { %v4202_v38 = vpop.f32.mrf.mxu1  ;;  %v1945_v25 = vmul.f32 %v6447_v16, %v7140_v50  ;;  %v3136_v16 = vpack.c.bf16 %v3034_v42, %v3033_v41  ;;  %v2007_v19 = vadd.f32 %v1879_v0, %v8374_v40  ;;  %v2714_v32 = vmul.f32 %v6452_v60, %v7335_v61 }
 0x36a   : > { %v4641_v26 = vmax.f32 %v4639_v13, %v4640_v15  ;;  %v3877_v8 = vpack.c.bf16 %v3766_v39, %v3765_v54  ;;  %v4783_v1 = vmax.f32 %v4782_v11, %v4561_v57  ;;  %5183 = vmatmul.msk.bf16.gmra.mxu3 %vm3211_vm0, %v3909_v47  ;;  %v2006_v15 = vadd.f32 %v1878_v12, %v8377_v51 }
 0x36b   : > { %v3658_v17 = vpop.f32.mrf.mxu2  ;;  %v2972_v54 = vadd.f32 %v8503_v22, %v2840_v43  ;;  %v2971_v11 = vadd.f32 %v8503_v22, %v2839_v3  ;;  %v2648_v13 = vmul.f32 %v6442_v48, %v7335_v61  ;;  %v2073_v51 = vadd.f32 %v1945_v25, %v8440_v20  ;;  %v8530_v43 = vld [vmem:[%s8953_s6] ss:$0 sm:$0xff] }
 0x36c   : > { %v4642_v52 = vrot.slane %v4641_v26, 2  ;;  %5151 = vmatmul.msk.bf16.gmra.mxu1 %vm3211_vm0, %v3877_v8  ;;  %v4784_v28 = vrot.slane %v4783_v1, 4  ;;  %v2775_v63 = vadd.f32 %v2647_v36, %v2006_v15  ;;  %v2072_v12 = vadd.f32 %v1944_v62, %v8443_v23  ;;  %v6455_v62 = vpop.permute.xlu1 %6454 }
 0x36d   : > { %v3498_v2 = vpop.f32.mrf.mxu0  ;;  %v4362_v31 = vpop.f32.mrf.mxu3  ;;  %v4203_v48 = vadd.f32 %v8530_v43, %v4202_v38  ;;  %v2713_v40 = vmul.f32 %v6451_v56, %v7335_v61  ;;  %v3099_v3 = vmax.f32 %v2971_v11, 0.0  ;;  %v2776_v20 = vadd.f32 %v2648_v13, %v2007_v19 }
 0x36e   : > { %v4643_v10 = vmax.f32 %v4641_v26, %v4642_v52  ;;  %v4785_v44 = vmax.f32 %v4783_v1, %v4784_v28  ;;  %v3100_v26 = vmax.f32 %v2972_v54, 0.0  ;;  %v2842_v47 = vadd.f32 %v2714_v32, %v2073_v51 }
 0x36f   : > { %v2907_v57 = vadd.f32 %v8503_v22, %v2775_v63  ;;  %v3659_v8 = vadd.f32 %v8243_v4, %v3658_v17  ;;  %v4498_v0 = vmax.f32 %v4203_v48, 0.0  ;;  %v3499_v60 = vadd.f32 %v8243_v4, %v3498_v2 }
 0x370   : > { %v4644_v30 = vrot.slane %v4643_v10, 1  ;;  %5080 = vmatmul.msk.bf16.gmra.mxu0 %vm3211_vm0, %v3136_v16  ;;  %v4786_v21 = vrot.slane %v4785_v44, 2  ;;  %v2841_v25 = vadd.f32 %v2713_v40, %v2072_v12  ;;  %v4363_v15 = vadd.f32 %v8530_v43, %v4362_v31 }
 0x371   : > { %v4204_v39 = vpop.f32.mrf.mxu1  ;;  %v2908_v28 = vadd.f32 %v8503_v22, %v2776_v20  ;;  %v3169_v13 = vpack.c.bf16 %v3100_v26, %v3099_v3  ;;  %v3831_v2 = vmax.f32 %v3659_v8, 0.0  ;;  %v3035_v63 = vmax.f32 %v2907_v57, 0.0  ;;  %v9370_v8 = vld [vmem:[#allocation102_spill] sm:$0xff] }
 0x372   : > { %v4645_v41 = vmax.f32 %v4643_v10, %v4644_v30  ;;  %v4205_v23 = vadd.f32 %v8530_v43, %v4204_v39  ;;  %v4787_v42 = vmax.f32 %v4785_v44, %v4786_v21  ;;  %v6460_v10 = vpop.permute.xlu2 %6459  ;;  %v6456_v44 = vunpack.i.l.bf16 %v6455_v62 }
 0x373   : > { %v3660_v1 = vpop.f32.mrf.mxu2  ;;  %v3767_v51 = vmax.f32 %v3499_v60, 0.0  ;;  %v4562_v30 = vmax.f32 %v4363_v15, 0.0  ;;  %v3036_v40 = vmax.f32 %v2908_v28, 0.0  ;;  %v6457_v21 = vunpack.i.h.bf16 %v6455_v62 }
 0x374   : > { %v8540_v38 = vsel %vm4934_vm3, %v4645_v41, %v8452_v49  ;;  %v4499_v36 = vmax.f32 %v4205_v23, 0.0  ;;  %v4788_v52 = vrot.slane %v4787_v42, 1  ;;  %v3661_v54 = vadd.f32 %v8243_v4, %v3660_v1 }
 0x375   : > { %v3500_v56 = vpop.f32.mrf.mxu0  ;;  %v4364_v49 = vpop.f32.mrf.mxu3  ;;  %v1880_v20 = vmul.f32 %v6012_v24, %v7140_v50  ;;  %v6462_v41 = vunpack.i.h.bf16 %v6460_v10  ;;  %v6461_v23 = vunpack.i.l.bf16 %v6460_v10  ;;  %v1306_v24 = vmul.f32 %v5855_v6, %v7135_v34 }
 0x376   : > { %v4646_v17 = vmax.f32 %v4498_v0, %v4499_v36  ;;  %v3501_v11 = vadd.f32 %v8243_v4, %v3500_v56  ;;  %v4789_v16 = vmax.f32 %v4787_v42, %v4788_v52  ;;  %v3832_v19 = vmax.f32 %v3661_v54, 0.0 }
 0x377   : > { %v4365_v32 = vadd.f32 %v8530_v43, %v4364_v49  ;;  %v1881_v42 = vmul.f32 %v6013_v14, %v7140_v50  ;;  %v6018_v0 = vunpack.i.h.bf16 %v9370_v8  ;;  %v6017_v1 = vunpack.i.l.bf16 %v9370_v8 }
 0x378   : > { %v3768_v31 = vmax.f32 %v3501_v11, 0.0  ;;  %5113 = vmatmul.msk.bf16.gmra.mxu2 %vm3211_vm0, %v3169_v13  ;;  %v8551_v12 = vsel %vm4934_vm3, %v4789_v16, %v8466_v5  ;;  %v3910_v4 = vpack.c.bf16 %v3832_v19, %v3831_v2  ;;  %v8561_v5 = vmul.f32 %v5859_v35, %v7135_v34  ;;  %v6465_v35 = vpop.permute.xlu0 %6464 }
 0x379   : > { %v4563_v48 = vmax.f32 %v4365_v32, 0.0  ;;  %v4207_v26 = vpop.f32.mrf.mxu1  ;;  %v2974_v27 = vadd.f32 %v8503_v22, %v2842_v47  ;;  %v2649_v62 = vmul.f32 %v6456_v44, %v7335_v61  ;;  %v2973_v46 = vadd.f32 %v8503_v22, %v2841_v25 }
 0x37a   : > { %v3878_v39 = vpack.c.bf16 %v3768_v31, %v3767_v51  ;;  %v4208_v3 = vadd.f32 %v8530_v43, %v4207_v26  ;;  %5184 = vmatmul.msk.bf16.gmra.mxu3 %vm3211_vm0, %v3910_v4  ;;  %v2650_v14 = vmul.f32 %v6457_v21, %v7335_v61  ;;  %v3137_v56 = vpack.c.bf16 %v3036_v40, %v3035_v63 }
 0x37b   : > { %v4790_v57 = vmax.f32 %v4562_v30, %v4563_v48  ;;  %v3663_v36 = vpop.f32.mrf.mxu2  ;;  %v2008_v28 = vadd.f32 %v1880_v20, %v8425_v59  ;;  %v1947_v11 = vmul.f32 %v6462_v41, %v7140_v50  ;;  %v1946_v6 = vmul.f32 %v6461_v23, %v7140_v50  ;;  %v6475_v59 = vpop.permute.xlu2 %6474 }
 0x37c   : > { %v4500_v60 = vmax.f32 %v4208_v3, 0.0  ;;  %5152 = vmatmul.msk.bf16.gmra.mxu1 %vm3211_vm0, %v3878_v39  ;;  %v9371_v47 = vunpack.i.l.bf16 %v9367_v33  ;;  %v2009_v10 = vadd.f32 %v1881_v42, %v8422_v37  ;;  %v1883_v25 = vmul.f32 %v6018_v0, %v7140_v50  ;;  %v8591_v37 = vld [vmem:[%s8951_s4] ss:$0 sm:$0xff]  ;;  %v6470_v39 = vpop.permute.xlu1 %6469 }
 0x37d   : > { %v3503_v52 = vpop.f32.mrf.mxu0  ;;  %v4367_v54 = vpop.f32.mrf.mxu3  ;;  %v6466_v16 = vunpack.i.l.bf16 %v6465_v35  ;;  %v6467_v2 = vunpack.i.h.bf16 %v6465_v35  ;;  %v2777_v19 = vadd.f32 %v2649_v62, %v2008_v28  ;;  %v3102_v44 = vmax.f32 %v2974_v27, 0.0 }
 0x37e   : > { %v4647_v15 = vmax.f32 %v4646_v17, %v4500_v60  ;;  %v4368_v49 = vadd.f32 %v8530_v43, %v4367_v54  ;;  %v1305_v13 = vmul.f32 %v9371_v47, %v7135_v34  ;;  %v1882_v17 = vmul.f32 %v6017_v1, %v7140_v50 }
 0x37f   : > { %v3101_v51 = vmax.f32 %v2973_v46, 0.0  ;;  %v2778_v31 = vadd.f32 %v2650_v14, %v2009_v10  ;;  %v2075_v4 = vadd.f32 %v1947_v11, %v1306_v24  ;;  %v3664_v48 = vadd.f32 %v8591_v37, %v3663_v36 }
 0x380   : > { %5081 = vmatmul.msk.bf16.gmra.mxu0 %vm3211_vm0, %v3137_v56  ;;  %v4564_v32 = vmax.f32 %v4368_v49, 0.0  ;;  %v2074_v30 = vadd.f32 %v1946_v6, %v1305_v13  ;;  %v6477_v40 = vunpack.i.h.bf16 %v6475_v59  ;;  %v2715_v21 = vmul.f32 %v6466_v16, %v7335_v61  ;;  %v6480_v54 = vpop.permute.xlu0 %6479 }
 0x381   : > { %v4209_v63 = vpop.f32.mrf.mxu1  ;;  %v3504_v3 = vadd.f32 %v8591_v37, %v3503_v52  ;;  %v6476_v23 = vunpack.i.l.bf16 %v6475_v59  ;;  %v2716_v42 = vmul.f32 %v6467_v2, %v7335_v61  ;;  %v2909_v8 = vadd.f32 %v8503_v22, %v2777_v19 }
 0x382   : > { %v4210_v33 = vadd.f32 %v8530_v43, %v4209_v63  ;;  %v4791_v26 = vmax.f32 %v4790_v57, %v4564_v32  ;;  %v2910_v24 = vadd.f32 %v8503_v22, %v2778_v31  ;;  %v3170_v27 = vpack.c.bf16 %v3102_v44, %v3101_v51 }
 0x383   : > { %v3665_v41 = vpop.f32.mrf.mxu2  ;;  %v6471_v35 = vunpack.i.l.bf16 %v6470_v39  ;;  %v3833_v62 = vmax.f32 %v3664_v48, 0.0  ;;  %v2843_v14 = vadd.f32 %v2715_v21, %v2074_v30  ;;  %v3769_v56 = vmax.f32 %v3504_v3, 0.0  ;;  %v9372_v48 = vld [vmem:[#allocation103_spill] sm:$0xff] }
 0x384   : > { %v4501_v20 = vmax.f32 %v4210_v33, 0.0  ;;  %v3666_v0 = vadd.f32 %v8591_v37, %v3665_v41  ;;  %v2844_v6 = vadd.f32 %v2716_v42, %v2075_v4  ;;  %v3037_v49 = vmax.f32 %v2909_v8, 0.0 }
 0x385   : > { %v3505_v60 = vpop.f32.mrf.mxu0  ;;  %v4369_v1 = vpop.f32.mrf.mxu3  ;;  %v3038_v10 = vmax.f32 %v2910_v24, 0.0  ;;  %v6472_v16 = vunpack.i.h.bf16 %v6470_v39  ;;  %v2011_v19 = vadd.f32 %v1883_v25, %v8414_v45  ;;  %v6482_v32 = vunpack.i.h.bf16 %v6480_v54 }
 0x386   : > { %v4648_v36 = vmax.f32 %v4647_v15, %v4501_v20  ;;  %v3506_v57 = vadd.f32 %v8591_v37, %v3505_v60  ;;  %v3834_v52 = vmax.f32 %v3666_v0, 0.0  ;;  %v4370_v46 = vadd.f32 %v8530_v43, %v4369_v1 }
 0x387   : > { %v2651_v63 = vmul.f32 %v6471_v35, %v7335_v61  ;;  %v2010_v51 = vadd.f32 %v1882_v17, %v8417_v53  ;;  %v1949_v31 = vmul.f32 %v6477_v40, %v7140_v50  ;;  %v1948_v33 = vmul.f32 %v6476_v23, %v7140_v50 }
 0x388   : > { %v4649_v28 = vrot.slane %v4648_v36, 4  ;;  %v3770_v11 = vmax.f32 %v3506_v57, 0.0  ;;  %5114 = vmatmul.msk.bf16.gmra.mxu2 %vm3211_vm0, %v3170_v27  ;;  %v3911_v47 = vpack.c.bf16 %v3834_v52, %v3833_v62  ;;  %v4565_v15 = vmax.f32 %v4370_v46, 0.0 }
 0x389   : > { %v4212_v13 = vpop.f32.mrf.mxu1  ;;  %v6023_v21 = vunpack.i.h.bf16 %v9372_v48  ;;  %v2975_v45 = vadd.f32 %v8503_v22, %v2843_v14  ;;  %v6481_v25 = vunpack.i.l.bf16 %v6480_v54  ;;  %v2652_v20 = vmul.f32 %v6472_v16, %v7335_v61 }
 0x38a   : > { %v4650_v59 = vmax.f32 %v4648_v36, %v4649_v28  ;;  %v3879_v2 = vpack.c.bf16 %v3770_v11, %v3769_v56  ;;  %v4792_v44 = vmax.f32 %v4791_v26, %v4565_v15  ;;  %5185 = vmatmul.msk.bf16.gmra.mxu3 %vm3211_vm0, %v3911_v47  ;;  %v2976_v26 = vadd.f32 %v8503_v22, %v2844_v6 }
 0x38b   : > { %v3668_v4 = vpop.f32.mrf.mxu2  ;;  %v3138_v40 = vpack.c.bf16 %v3038_v10, %v3037_v49  ;;  %v6022_v41 = vunpack.i.l.bf16 %v9372_v48  ;;  %v2718_v23 = vmul.f32 %v6482_v32, %v7335_v61  ;;  %v2779_v42 = vadd.f32 %v2651_v63, %v2010_v51 }
 0x38c   : > { %v4651_v30 = vrot.slane %v4650_v59, 2  ;;  %5153 = vmatmul.msk.bf16.gmra.mxu1 %vm3211_vm0, %v3879_v2  ;;  %v4793_v39 = vrot.slane %v4792_v44, 4  ;;  %v2077_v0 = vadd.f32 %v1949_v31, %v8490_v55  ;;  %v2076_v60 = vadd.f32 %v1948_v33, %v8561_v5 }
 0x38d   : > { %v3508_v3 = vpop.f32.mrf.mxu0  ;;  %v4372_v17 = vpop.f32.mrf.mxu3  ;;  %v4213_v36 = vadd.f32 %v8530_v43, %v4212_v13  ;;  %v3103_v57 = vmax.f32 %v2975_v45, 0.0  ;;  %v2717_v1 = vmul.f32 %v6481_v25, %v7335_v61  ;;  %v3104_v62 = vmax.f32 %v2976_v26, 0.0 }
 0x38e   : > { %v4652_v53 = vmax.f32 %v4650_v59, %v4651_v30  ;;  %v4794_v8 = vmax.f32 %v4792_v44, %v4793_v39  ;;  %v2780_v52 = vadd.f32 %v2652_v20, %v2011_v19  ;;  %v2846_v54 = vadd.f32 %v2718_v23, %v2077_v0  ;;  %v6485_v13 = vpop.permute.xlu1 %6484 }
 0x38f   : > { %v2911_v55 = vadd.f32 %v8503_v22, %v2779_v42  ;;  %v3669_v56 = vadd.f32 %v8591_v37, %v3668_v4  ;;  %v4502_v11 = vmax.f32 %v4213_v36, 0.0  ;;  %v3509_v6 = vadd.f32 %v8591_v37, %v3508_v3  ;;  %v6490_v3 = vpop.permute.xlu2 %6489 }
 0x390   : > { %v4653_v24 = vrot.slane %v4652_v53, 1  ;;  %5082 = vmatmul.msk.bf16.gmra.mxu0 %vm3211_vm0, %v3138_v40  ;;  %v4795_v27 = vrot.slane %v4794_v8, 2  ;;  %v2845_v15 = vadd.f32 %v2717_v1, %v2076_v60  ;;  %v4373_v16 = vadd.f32 %v8530_v43, %v4372_v17 }
 0x391   : > { %v4214_v35 = vpop.f32.mrf.mxu1  ;;  %v2912_v19 = vadd.f32 %v8503_v22, %v2780_v52  ;;  %v3171_v44 = vpack.c.bf16 %v3104_v62, %v3103_v57  ;;  %v3835_v31 = vmax.f32 %v3669_v56, 0.0  ;;  %v3039_v4 = vmax.f32 %v2911_v55, 0.0  ;;  %v6495_v52 = vpop.permute.xlu0 %6494 }
 0x392   : > { %v4654_v46 = vmax.f32 %v4652_v53, %v4653_v24  ;;  %v4215_v14 = vadd.f32 %v8530_v43, %v4214_v35  ;;  %v4796_v5 = vmax.f32 %v4794_v8, %v4795_v27  ;;  %v6486_v45 = vunpack.i.l.bf16 %v6485_v13 }
 0x393   : > { %v3670_v47 = vpop.f32.mrf.mxu2  ;;  %v3771_v25 = vmax.f32 %v3509_v6, 0.0  ;;  %v4566_v20 = vmax.f32 %v4373_v16, 0.0  ;;  %v3040_v23 = vmax.f32 %v2912_v19, 0.0  ;;  %v6487_v42 = vunpack.i.h.bf16 %v6485_v13 }
 0x394   : > { %v8626_v28 = vsel %vm4936_vm4, %v4654_v46, %v8540_v38  ;;  %v4503_v49 = vmax.f32 %v4215_v14, 0.0  ;;  %v4797_v10 = vrot.slane %v4796_v5, 1  ;;  %v3671_v59 = vadd.f32 %v8591_v37, %v3670_v47 }
 0x395   : > { %v3510_v2 = vpop.f32.mrf.mxu0  ;;  %v4374_v38 = vpop.f32.mrf.mxu3  ;;  %v9373_v60 = vunpack.i.h.bf16 %v9362_v7  ;;  %v5864_v36 = vunpack.i.l.bf16 %v9365_v9  ;;  %v1884_v57 = vmul.f32 %v6022_v41, %v7140_v50  ;;  %v9374_v1 = vunpack.i.l.bf16 %v9362_v7 }
 0x396   : > { %v4655_v32 = vmax.f32 %v4502_v11, %v4503_v49  ;;  %v3511_v63 = vadd.f32 %v8591_v37, %v3510_v2  ;;  %v4798_v51 = vmax.f32 %v4796_v5, %v4797_v10  ;;  %v3836_v33 = vmax.f32 %v3671_v59, 0.0  ;;  %v9376_v59 = vld [vmem:[#allocation83_spill] sm:$0xff] }
 0x397   : > { %v4375_v30 = vadd.f32 %v8530_v43, %v4374_v38  ;;  %v8643_v24 = vmul.f32 %v9373_v60, %v7135_v34  ;;  %v8651_v27 = vmul.f32 %v9374_v1, %v7135_v34  ;;  %v1885_v35 = vmul.f32 %v6023_v21, %v7140_v50 }
 0x398   : > { %v3772_v39 = vmax.f32 %v3511_v63, 0.0  ;;  %5115 = vmatmul.msk.bf16.gmra.mxu2 %vm3211_vm0, %v3171_v44  ;;  %v8637_v26 = vsel %vm4936_vm4, %v4798_v51, %v8551_v12  ;;  %v3912_v53 = vpack.c.bf16 %v3836_v33, %v3835_v31  ;;  %v6492_v62 = vunpack.i.h.bf16 %v6490_v3 }
 0x399   : > { %v4567_v17 = vmax.f32 %v4375_v30, 0.0  ;;  %v4217_v40 = vpop.f32.mrf.mxu1  ;;  %v9375_v41 = vunpack.i.h.bf16 %v9365_v9  ;;  %v6491_v5 = vunpack.i.l.bf16 %v6490_v3  ;;  %v2978_v56 = vadd.f32 %v8503_v22, %v2846_v54  ;;  %v9377_v54 = vld [vmem:[#allocation96_spill] sm:$0xff] }
 0x39a   : > { %v3880_v8 = vpack.c.bf16 %v3772_v39, %v3771_v25  ;;  %v4218_v0 = vadd.f32 %v8530_v43, %v4217_v40  ;;  %5186 = vmatmul.msk.bf16.gmra.mxu3 %vm3211_vm0, %v3912_v53  ;;  %v2653_v7 = vmul.f32 %v6486_v45, %v7335_v61  ;;  %v2977_v6 = vadd.f32 %v8503_v22, %v2845_v15 }
 0x39b   : > { %v4799_v12 = vmax.f32 %v4566_v20, %v4567_v17  ;;  %v3673_v14 = vpop.f32.mrf.mxu2  ;;  %v1310_v55 = vmul.f32 %v9375_v41, %v7135_v34  ;;  %v2654_v48 = vmul.f32 %v6487_v42, %v7335_v61  ;;  %v3139_v47 = vpack.c.bf16 %v3040_v23, %v3039_v4 }
 0x39c   : > { %v4504_v46 = vmax.f32 %v4218_v0, 0.0  ;;  %5154 = vmatmul.msk.bf16.gmra.mxu1 %vm3211_vm0, %v3880_v8  ;;  %v1309_v13 = vmul.f32 %v5864_v36, %v7135_v34  ;;  %v2012_v10 = vadd.f32 %v1884_v57, %v8384_v18  ;;  %v6497_v16 = vunpack.i.h.bf16 %v6495_v52  ;;  %v6500_v0 = vpop.permute.xlu1 %6499 }
 0x39d   : > { %v3513_v11 = vpop.f32.mrf.mxu0  ;;  %v4377_v49 = vpop.f32.mrf.mxu3  ;;  %v5870_v2 = vunpack.i.h.bf16 %v9376_v59  ;;  %v6027_v19 = vunpack.i.l.bf16 %v9377_v54  ;;  %v2013_v63 = vadd.f32 %v1885_v35, %v8381_v58  ;;  %v1951_v15 = vmul.f32 %v6492_v62, %v7140_v50 }
 0x39e   : > { %v4656_v21 = vmax.f32 %v4655_v32, %v4504_v46  ;;  %v4378_v9 = vadd.f32 %v8530_v43, %v4377_v49  ;;  %v1950_v32 = vmul.f32 %v6491_v5, %v7140_v50  ;;  %v6496_v38 = vunpack.i.l.bf16 %v6495_v52 }
 0x39f   : > { %v2781_v44 = vadd.f32 %v2653_v7, %v2012_v10  ;;  %v3106_v18 = vmax.f32 %v2978_v56, 0.0  ;;  %v3105_v33 = vmax.f32 %v2977_v6, 0.0  ;;  %v2782_v30 = vadd.f32 %v2654_v48, %v2013_v63 }
 0x3a0   : > { %5083 = vmatmul.msk.bf16.gmra.mxu0 %vm3211_vm0, %v3139_v47  ;;  %v4568_v51 = vmax.f32 %v4378_v9, 0.0  ;;  %v6028_v45 = vunpack.i.h.bf16 %v9377_v54  ;;  %v2720_v25 = vmul.f32 %v6497_v16, %v7335_v61  ;;  %v3674_v58 = vadd.f32 %v8591_v37, %v3673_v14 }
 0x3a1   : > { %v4219_v31 = vpop.f32.mrf.mxu1  ;;  %v1886_v3 = vmul.f32 %v6027_v19, %v7140_v50  ;;  %v2079_v20 = vadd.f32 %v1951_v15, %v1310_v55  ;;  %v3514_v53 = vadd.f32 %v8591_v37, %v3513_v11  ;;  %v2078_v23 = vadd.f32 %v1950_v32, %v1309_v13  ;;  %v6505_v55 = vpop.permute.xlu2 %6504 }
 0x3a2   : > { %v4220_v4 = vadd.f32 %v8530_v43, %v4219_v31  ;;  %v4800_v39 = vmax.f32 %v4799_v12, %v4568_v51  ;;  %v2719_v42 = vmul.f32 %v6496_v38, %v7335_v61  ;;  %v2913_v8 = vadd.f32 %v8503_v22, %v2781_v44  ;;  %v6510_v15 = vpop.permute.xlu0 %6509 }
 0x3a3   : > { %v3675_v40 = vpop.f32.mrf.mxu2  ;;  %v2914_v57 = vadd.f32 %v8503_v22, %v2782_v30  ;;  %v3172_v62 = vpack.c.bf16 %v3106_v18, %v3105_v33  ;;  %v2848_v52 = vadd.f32 %v2720_v25, %v2079_v20  ;;  %v3837_v46 = vmax.f32 %v3674_v58, 0.0 }
 0x3a4   : > { %v4505_v17 = vmax.f32 %v4220_v4, 0.0  ;;  %v3676_v60 = vadd.f32 %v8591_v37, %v3675_v40  ;;  %v6501_v5 = vunpack.i.l.bf16 %v6500_v0  ;;  %v3773_v56 = vmax.f32 %v3514_v53, 0.0  ;;  %v9378_v40 = vld [vmem:[#allocation104_spill] sm:$0xff] }
 0x3a5   : > { %v3515_v36 = vpop.f32.mrf.mxu0  ;;  %v4379_v35 = vpop.f32.mrf.mxu3  ;;  %v2847_v6 = vadd.f32 %v2719_v42, %v2078_v23  ;;  %v3041_v48 = vmax.f32 %v2913_v8, 0.0  ;;  %v3042_v13 = vmax.f32 %v2914_v57, 0.0  ;;  %v6502_v10 = vunpack.i.h.bf16 %v6500_v0 }
 0x3a6   : > { %v4657_v1 = vmax.f32 %v4656_v21, %v4505_v17  ;;  %v3516_v12 = vadd.f32 %v8591_v37, %v3515_v36  ;;  %v3838_v14 = vmax.f32 %v3676_v60, 0.0  ;;  %v4380_v41 = vadd.f32 %v8530_v43, %v4379_v35 }
 0x3a7   : > { %v5869_v54 = vunpack.i.l.bf16 %v9376_v59  ;;  %v1887_v19 = vmul.f32 %v6028_v45, %v7140_v50  ;;  %v6506_v63 = vunpack.i.l.bf16 %v6505_v55  ;;  %v1312_v38 = vmul.f32 %v5870_v2, %v7135_v34 }
 0x3a8   : > { %v4658_v7 = vrot.slane %v4657_v1, 4  ;;  %v3774_v11 = vmax.f32 %v3516_v12, 0.0  ;;  %5116 = vmatmul.msk.bf16.gmra.mxu2 %vm3211_vm0, %v3172_v62  ;;  %v3913_v49 = vpack.c.bf16 %v3838_v14, %v3837_v46  ;;  %v4569_v21 = vmax.f32 %v4380_v41, 0.0 }
 0x3a9   : > { %v8686_v47 = vpop.f32.mrf.mxu1  ;;  %v2014_v44 = vadd.f32 %v1886_v3, %v8651_v27  ;;  %v2655_v51 = vmul.f32 %v6501_v5, %v7335_v61  ;;  %v6507_v33 = vunpack.i.h.bf16 %v6505_v55  ;;  %v2980_v59 = vadd.f32 %v8503_v22, %v2848_v52 }
 0x3aa   : > { %v4659_v16 = vmax.f32 %v4657_v1, %v4658_v7  ;;  %v3881_v9 = vpack.c.bf16 %v3774_v11, %v3773_v56  ;;  %v4801_v32 = vmax.f32 %v4800_v39, %v4569_v21  ;;  %5187 = vmatmul.msk.bf16.gmra.mxu3 %vm3211_vm0, %v3913_v49  ;;  %v2979_v30 = vadd.f32 %v8503_v22, %v2847_v6 }
 0x3ab   : > { %v3678_v18 = vpop.f32.mrf.mxu2  ;;  %v6511_v25 = vunpack.i.l.bf16 %v6510_v15  ;;  %v2656_v58 = vmul.f32 %v6502_v10, %v7335_v61  ;;  %v3140_v20 = vpack.c.bf16 %v3042_v13, %v3041_v48  ;;  %v1311_v27 = vmul.f32 %v5869_v54, %v7135_v34 }
 0x3ac   : > { %v4660_v31 = vrot.slane %v4659_v16, 2  ;;  %5155 = vmatmul.msk.bf16.gmra.mxu1 %vm3211_vm0, %v3881_v9  ;;  %v4802_v4 = vrot.slane %v4801_v32, 4  ;;  %v2015_v3 = vadd.f32 %v1887_v19, %v8643_v24  ;;  %v1952_v53 = vmul.f32 %v6506_v63, %v7140_v50  ;;  %v6515_v63 = vpop.permute.xlu1 %6514 }
 0x3ad   : > { %v3518_v45 = vpop.f32.mrf.mxu0  ;;  %v4382_v2 = vpop.f32.mrf.mxu3  ;;  %v6033_v23 = vunpack.i.h.bf16 %v9378_v40  ;;  %v6512_v42 = vunpack.i.h.bf16 %v6510_v15  ;;  %v2783_v8 = vadd.f32 %v2655_v51, %v2014_v44  ;;  %v1953_v60 = vmul.f32 %v6507_v33, %v7140_v50 }
 0x3ae   : > { %v4661_v39 = vmax.f32 %v4659_v16, %v4660_v31  ;;  %v4803_v17 = vmax.f32 %v4801_v32, %v4802_v4  ;;  %v3108_v36 = vmax.f32 %v2980_v59, 0.0  ;;  %v3107_v12 = vmax.f32 %v2979_v30, 0.0 }
 0x3af   : > { %v2721_v24 = vmul.f32 %v6511_v25, %v7335_v61  ;;  %v2784_v35 = vadd.f32 %v2656_v58, %v2015_v3  ;;  %v6032_v52 = vunpack.i.l.bf16 %v9378_v40  ;;  %v2080_v46 = vadd.f32 %v1952_v53, %v1311_v27 }
 0x3b0   : > { %v4662_v0 = vrot.slane %v4661_v39, 1  ;;  %5084 = vmatmul.msk.bf16.gmra.mxu0 %vm3211_vm0, %v3140_v20  ;;  %v4804_v57 = vrot.slane %v4803_v17, 2  ;;  %v3679_v41 = vadd.f32 %v8591_v37, %v3678_v18  ;;  %v2722_v55 = vmul.f32 %v6512_v42, %v7335_v61 }
 0x3b1   : > { %v8704_v1 = vpop.f32.mrf.mxu1  ;;  %v2915_v5 = vadd.f32 %v8503_v22, %v2783_v8  ;;  %v3519_v7 = vadd.f32 %v8591_v37, %v3518_v45  ;;  %v2081_v6 = vadd.f32 %v1953_v60, %v1312_v38  ;;  %v4383_v49 = vadd.f32 %v8530_v43, %v4382_v2 }
 0x3b2   : > { %v4663_v62 = vmax.f32 %v4661_v39, %v4662_v0  ;;  %v4805_v14 = vmax.f32 %v4803_v17, %v4804_v57  ;;  %v2849_v10 = vadd.f32 %v2721_v24, %v2080_v46  ;;  %v2916_v16 = vadd.f32 %v8503_v22, %v2784_v35 }
 0x3b3   : > { %v3680_v11 = vpop.f32.mrf.mxu2  ;;  %v3173_v19 = vpack.c.bf16 %v3108_v36, %v3107_v12  ;;  %v3839_v15 = vmax.f32 %v3679_v41, 0.0  ;;  %v2850_v38 = vadd.f32 %v2722_v55, %v2081_v6  ;;  %v3043_v51 = vmax.f32 %v2915_v5, 0.0 }
 0x3b4   : > { %v8713_v56 = vsel %vm4938_vm5, %v4663_v62, %v8626_v28  ;;  %v4806_v48 = vrot.slane %v4805_v14, 1  ;;  %v3681_v21 = vadd.f32 %v8591_v37, %v3680_v11  ;;  %v3775_v31 = vmax.f32 %v3519_v7, 0.0 }
 0x3b5   : > { %v3520_v13 = vpop.f32.mrf.mxu0  ;;  %v4384_v54 = vpop.f32.mrf.mxu3  ;;  %v4570_v59 = vmax.f32 %v4383_v49, 0.0  ;;  %v3044_v25 = vmax.f32 %v2916_v16, 0.0  ;;  %v6517_v58 = vunpack.i.h.bf16 %v6515_v63  ;;  %v6516_v39 = vunpack.i.l.bf16 %v6515_v63 }
 0x3b6   : > { %v3521_v9 = vadd.f32 %v8591_v37, %v3520_v13  ;;  %v4807_v28 = vmax.f32 %v4805_v14, %v4806_v48  ;;  %v3840_v32 = vmax.f32 %v3681_v21, 0.0  ;;  %v4385_v44 = vadd.f32 %v8530_v43, %v4384_v54 }
 0x3b7   : > { %v1889_v27 = vmul.f32 %v6033_v23, %v7140_v50  ;;  %v1888_v3 = vmul.f32 %v6032_v52, %v7140_v50  ;;  %v9380_v40 = vunpack.i.l.bf16 %v9361_v29  ;;  %v2981_v8 = vadd.f32 %v8503_v22, %v2849_v10 }
 0x3b8   : > { %v3776_v18 = vmax.f32 %v3521_v9, 0.0  ;;  %5117 = vmatmul.msk.bf16.gmra.mxu2 %vm3211_vm0, %v3173_v19  ;;  %v8724_v33 = vsel %vm4938_vm5, %v4807_v28, %v8637_v26  ;;  %v3914_v30 = vpack.c.bf16 %v3840_v32, %v3839_v15  ;;  %v4571_v4 = vmax.f32 %v4385_v44, 0.0 }
 0x3b9   : > { %v4227_v45 = vpop.f32.mrf.mxu1  ;;  %v9379_v26 = vunpack.i.h.bf16 %v9361_v29  ;;  %v1247_v42 = vmul.f32 %v9380_v40, %v7135_v34  ;;  %v2982_v60 = vadd.f32 %v8503_v22, %v2850_v38  ;;  %v2658_v23 = vmul.f32 %v6517_v58, %v7335_v61 }
 0x3ba   : > { %v3882_v2 = vpack.c.bf16 %v3776_v18, %v3775_v31  ;;  %v4808_v20 = vmax.f32 %v4570_v59, %v4571_v4  ;;  %5188 = vmatmul.msk.bf16.gmra.mxu3 %vm3211_vm0, %v3914_v30  ;;  %v2657_v50 = vmul.f32 %v6516_v39, %v7335_v61  ;;  %v3141_v57 = vpack.c.bf16 %v3044_v25, %v3043_v51 }
 0x3bb   : > { %v3683_v53 = vpop.f32.mrf.mxu2  ;;  %v1248_v17 = vmul.f32 %v9379_v26, %v7135_v34  ;;  %v2016_v35 = vadd.f32 %v1888_v3, %v1247_v42  ;;  %v3109_v34 = vmax.f32 %v2981_v8, 0.0  ;;  %v3110_v52 = vmax.f32 %v2982_v60, 0.0 }
 0x3bc   : > { %5156 = vmatmul.msk.bf16.gmra.mxu1 %vm3211_vm0, %v3882_v2  ;;  %v3684_v41 = vadd.f32 %v8591_v37, %v3683_v53  ;;  %v4223_v31 = vadd.f32 %v8530_v43, %v8686_v47  ;;  %v4228_v18 = vadd.f32 %v8530_v43, %v4227_v45 }
 0x3bd   : > { %v3523_v0 = vpop.f32.mrf.mxu0  ;;  %v4387_v36 = vpop.f32.mrf.mxu3  ;;  %v2017_v24 = vadd.f32 %v1889_v27, %v1248_v17  ;;  %v2785_v46 = vadd.f32 %v2657_v50, %v2016_v35  ;;  %v3174_v13 = vpack.c.bf16 %v3110_v52, %v3109_v34 }
 0x3be   : > { %v4388_v12 = vadd.f32 %v8530_v43, %v4387_v36  ;;  %v3524_v5 = vadd.f32 %v8591_v37, %v3523_v0  ;;  %v3841_v10 = vmax.f32 %v3684_v41, 0.0  ;;  %v4508_v27 = vmax.f32 %v4228_v18, 0.0 }
 0x3bf   : > { %v2786_v14 = vadd.f32 %v2658_v23, %v2017_v24  ;;  %v2917_v6 = vadd.f32 %v8503_v22, %v2785_v46 }
 0x3c0   : > { %5085 = vmatmul.msk.bf16.gmra.mxu0 %vm3211_vm0, %v3141_v57  ;;  %v4572_v62 = vmax.f32 %v4388_v12, 0.0  ;;  %v3777_v54 = vmax.f32 %v3524_v5, 0.0 }
 0x3c1   : > { %v4229_v29 = vpop.f32.mrf.mxu1  ;;  %v2918_v48 = vadd.f32 %v8503_v22, %v2786_v14  ;;  %v3045_v32 = vmax.f32 %v2917_v6, 0.0  ;;  %v4225_v22 = vadd.f32 %v8530_v43, %v8704_v1 }
 0x3c2   : > { %v4809_v55 = vmax.f32 %v4808_v20, %v4572_v62  ;;  %v4230_v58 = vadd.f32 %v8530_v43, %v4229_v29  ;;  %v4506_v20 = vmax.f32 %v4223_v31, 0.0 }
 0x3c3   : > { %v3685_v61 = vpop.f32.mrf.mxu2  ;;  %v3046_v44 = vmax.f32 %v2918_v48, 0.0  ;;  %v4507_v25 = vmax.f32 %v4225_v22, 0.0 }
 0x3c4   : > { %v3686_v7 = vadd.f32 %v8591_v37, %v3685_v61  ;;  %v4509_v26 = vmax.f32 %v4230_v58, 0.0 }
 0x3c5   : > { %v3525_v11 = vpop.f32.mrf.mxu0  ;;  %v4389_v21 = vpop.f32.mrf.mxu3  ;;  %v3142_v2 = vpack.c.bf16 %v3046_v44, %v3045_v32  ;;  %v4664_v47 = vmax.f32 %v4506_v20, %v4507_v25 }
 0x3c6   : > { %v3526_v49 = vadd.f32 %v8591_v37, %v3525_v11  ;;  %v3842_v16 = vmax.f32 %v3686_v7, 0.0  ;;  %v4390_v9 = vadd.f32 %v8530_v43, %v4389_v21 }
 0x3c7   : > { %v4665_v40 = vmax.f32 %v4664_v47, %v4508_v27 }
 0x3c8   : > { %v3778_v19 = vmax.f32 %v3526_v49, 0.0  ;;  %5118 = vmatmul.msk.bf16.gmra.mxu2 %vm3211_vm0, %v3174_v13  ;;  %v3915_v63 = vpack.c.bf16 %v3842_v16, %v3841_v10  ;;  %v4573_v28 = vmax.f32 %v4390_v9, 0.0 }
 0x3c9   : > { %v4232_v15 = vpop.f32.mrf.mxu1  ;;  %v4666_v36 = vmax.f32 %v4665_v40, %v4509_v26 }
 0x3ca   : > { %v3883_v38 = vpack.c.bf16 %v3778_v19, %v3777_v54  ;;  %v4810_v51 = vmax.f32 %v4809_v55, %v4573_v28  ;;  %5189 = vmatmul.msk.bf16.gmra.mxu3 %vm3211_vm0, %v3915_v63  ;;  %v4233_v48 = vadd.f32 %v8530_v43, %v4232_v15 }
 0x3cb   : > { %v3688_v59 = vpop.f32.mrf.mxu2  ;;  %v4667_v11 = vrot.slane %v4666_v36, 4 }
 0x3cc   : > { %5157 = vmatmul.msk.bf16.gmra.mxu1 %vm3211_vm0, %v3883_v38  ;;  %v4811_v30 = vrot.slane %v4810_v51, 4  ;;  %v3689_v17 = vadd.f32 %v8591_v37, %v3688_v59  ;;  %v4510_v54 = vmax.f32 %v4233_v48, 0.0 }
 0x3cd   : > { %v3528_v4 = vpop.f32.mrf.mxu0  ;;  %v4392_v39 = vpop.f32.mrf.mxu3  ;;  %v4668_v16 = vmax.f32 %v4666_v36, %v4667_v11 }
 0x3ce   : > { %v4812_v1 = vmax.f32 %v4810_v51, %v4811_v30  ;;  %v3529_v42 = vadd.f32 %v8591_v37, %v3528_v4  ;;  %v4393_v60 = vadd.f32 %v8530_v43, %v4392_v39  ;;  %v3843_v35 = vmax.f32 %v3689_v17, 0.0 }
 0x3cf   : > { %v4669_v15 = vrot.slane %v4668_v16, 2 }
 0x3d0   : > { %5086 = vmatmul.msk.bf16.gmra.mxu0 %vm3211_vm0, %v3142_v2  ;;  %v4813_v3 = vrot.slane %v4812_v1, 2  ;;  %v3779_v34 = vmax.f32 %v3529_v42, 0.0  ;;  %v4574_v14 = vmax.f32 %v4393_v60, 0.0 }
 0x3d1   : > { %v4234_v53 = vpop.f32.mrf.mxu1  ;;  %v4670_v2 = vmax.f32 %v4668_v16, %v4669_v15 }
 0x3d2   : > { %v4814_v45 = vmax.f32 %v4812_v1, %v4813_v3  ;;  %v4235_v61 = vadd.f32 %v8530_v43, %v4234_v53 }
 0x3d3   : > { %v3690_v8 = vpop.f32.mrf.mxu2 }
 0x3d4   : > { %v4815_v0 = vrot.slane %v4814_v45, 1  ;;  %v3691_v23 = vadd.f32 %v8591_v37, %v3690_v8  ;;  %v4511_v13 = vmax.f32 %v4235_v61, 0.0  ;;  %v4671_v8 = vrot.slane %v4670_v2, 1 }
 0x3d5   : > { %v3530_v50 = vpop.f32.mrf.mxu0  ;;  %v4394_v12 = vpop.f32.mrf.mxu3 }
 0x3d6   : > { %v3531_v57 = vadd.f32 %v8591_v37, %v3530_v50  ;;  %v4816_v24 = vmax.f32 %v4814_v45, %v4815_v0  ;;  %v3844_v62 = vmax.f32 %v3691_v23, 0.0  ;;  %v4395_v29 = vadd.f32 %v8530_v43, %v4394_v12 }
 0x3d7   : > { %v4673_v32 = vmax.f32 %v4510_v54, %v4511_v13  ;;  %v4672_v12 = vmax.f32 %v4670_v2, %v4671_v8 }
 0x3d8   : > { %v3780_v52 = vmax.f32 %v3531_v57, 0.0  ;;  %v8767_v46 = vsel %vm4940_vm6, %v4816_v24, %v8724_v33  ;;  %v3916_v41 = vpack.c.bf16 %v3844_v62, %v3843_v35  ;;  %v4575_v55 = vmax.f32 %v4395_v29, 0.0  ;;  %v8788_v62 = vld [vmem:[%s8953_s6] ss:$0 sm:$0xff] }
 0x3d9   : > { %v4237_v5 = vpop.f32.mrf.mxu1 }
 0x3da   : > { %v3884_v7 = vpack.c.bf16 %v3780_v52, %v3779_v34  ;;  %v4817_v6 = vmax.f32 %v4574_v14, %v4575_v55  ;;  %5190 = vmatmul.msk.bf16.gmra.mxu3 %vm3211_vm0, %v3916_v41  ;;  %v4238_v49 = vadd.f32 %v8530_v43, %v4237_v5  ;;  %v4941_v55 = vsel %vm4940_vm6, %v4672_v12, %v8713_v56 }
 0x3db   : > { %v3693_v21 = vpop.f32.mrf.mxu2 }
 0x3dc   : > { %5158 = vmatmul.msk.bf16.gmra.mxu1 %vm3211_vm0, %v3884_v7  ;;  %v4512_v19 = vmax.f32 %v4238_v49, 0.0  ;;  %v3694_v22 = vadd.f32 %v8591_v37, %v3693_v21 }
 0x3dd   : > { %v3533_v33 = vpop.f32.mrf.mxu0  ;;  %v4397_v10 = vpop.f32.mrf.mxu3 }
 0x3de   : > { %v4398_v9 = vadd.f32 %v8530_v43, %v4397_v10  ;;  %v4674_v51 = vmax.f32 %v4673_v32, %v4512_v19  ;;  %v3534_v31 = vadd.f32 %v8591_v37, %v3533_v33  ;;  %v3845_v1 = vmax.f32 %v3694_v22, 0.0 }
 0x3e0   : > { %v4576_v63 = vmax.f32 %v4398_v9, 0.0  ;;  %v3781_v3 = vmax.f32 %v3534_v31, 0.0 }
 0x3e1   : > { %v4239_v28 = vpop.f32.mrf.mxu1 }
 0x3e2   : > { %v4240_v44 = vadd.f32 %v8530_v43, %v4239_v28  ;;  %v4818_v38 = vmax.f32 %v4817_v6, %v4576_v63 }
 0x3e3   : > { %v3695_v59 = vpop.f32.mrf.mxu2 }
 0x3e4   : > { %v4513_v18 = vmax.f32 %v4240_v44, 0.0  ;;  %v3696_v30 = vadd.f32 %v8591_v37, %v3695_v59 }
 0x3e5   : > { %v3535_v4 = vpop.f32.mrf.mxu0  ;;  %v4399_v39 = vpop.f32.mrf.mxu3 }
 0x3e6   : > { %v4675_v25 = vmax.f32 %v4674_v51, %v4513_v18  ;;  %v3536_v58 = vadd.f32 %v8591_v37, %v3535_v4  ;;  %v3846_v20 = vmax.f32 %v3696_v30, 0.0  ;;  %v4400_v27 = vadd.f32 %v8530_v43, %v4399_v39 }
 0x3e8   : > { %v4676_v53 = vrot.slane %v4675_v25, 4  ;;  %v3782_v47 = vmax.f32 %v3536_v58, 0.0  ;;  %v3917_v26 = vpack.c.bf16 %v3846_v20, %v3845_v1  ;;  %v4577_v45 = vmax.f32 %v4400_v27, 0.0 }
 0x3e9   : > { %v4242_v17 = vpop.f32.mrf.mxu1 }
 0x3ea   : > { %v4677_v40 = vmax.f32 %v4675_v25, %v4676_v53  ;;  %v3885_v42 = vpack.c.bf16 %v3782_v47, %v3781_v3  ;;  %v4819_v0 = vmax.f32 %v4818_v38, %v4577_v45  ;;  %5191 = vmatmul.msk.bf16.gmra.mxu3 %vm3211_vm0, %v3917_v26  ;;  %v4243_v29 = vadd.f32 %v8788_v62, %v4242_v17 }
 0x3eb   : > { %v3698_v23 = vpop.f32.mrf.mxu2 }
 0x3ec   : > { %v4678_v60 = vrot.slane %v4677_v40, 2  ;;  %5159 = vmatmul.msk.bf16.gmra.mxu1 %vm3211_vm0, %v3885_v42  ;;  %v4820_v50 = vrot.slane %v4819_v0, 4  ;;  %v3699_v61 = vadd.f32 %v8591_v37, %v3698_v23  ;;  %v4514_v11 = vmax.f32 %v4243_v29, 0.0 }
 0x3ed   : > { %v3538_v36 = vpop.f32.mrf.mxu0  ;;  %v4402_v57 = vpop.f32.mrf.mxu3 }
 0x3ee   : > { %v4679_v43 = vmax.f32 %v4677_v40, %v4678_v60  ;;  %v4821_v24 = vmax.f32 %v4819_v0, %v4820_v50  ;;  %v3539_v6 = vadd.f32 %v8591_v37, %v3538_v36  ;;  %v4403_v33 = vadd.f32 %v8788_v62, %v4402_v57 }
 0x3ef   : > { %v3847_v19 = vmax.f32 %v3699_v61, 0.0 }
 0x3f0   : > { %v4680_v35 = vrot.slane %v4679_v43, 1  ;;  %v4822_v34 = vrot.slane %v4821_v24, 2  ;;  %v3783_v32 = vmax.f32 %v3539_v6, 0.0  ;;  %v4578_v22 = vmax.f32 %v4403_v33, 0.0 }
 0x3f1   : > { %v4244_v52 = vpop.f32.mrf.mxu1 }
 0x3f2   : > { %v4681_v14 = vmax.f32 %v4679_v43, %v4680_v35  ;;  %v4245_v41 = vadd.f32 %v8788_v62, %v4244_v52  ;;  %v4823_v5 = vmax.f32 %v4821_v24, %v4822_v34 }
 0x3f3   : > { %v3700_v49 = vpop.f32.mrf.mxu2 }
 0x3f4   : > { %v4943_v7 = vsel %vm4942_vm7, %v4681_v14, %v4941_v55  ;;  %v4515_v48 = vmax.f32 %v4245_v41, 0.0  ;;  %v4824_v21 = vrot.slane %v4823_v5, 1  ;;  %v3701_v13 = vadd.f32 %v8591_v37, %v3700_v49 }
 0x3f5   : > { %4969 = vst [vmem:[%s8794_s30] sm:$0xff] %v4943_v7  ;;  %v3540_v10 = vpop.f32.mrf.mxu0  ;;  %v4404_v9 = vpop.f32.mrf.mxu3 }
 0x3f6   : > { %v4682_v16 = vmax.f32 %v4514_v11, %v4515_v48  ;;  %v3541_v56 = vadd.f32 %v8591_v37, %v3540_v10  ;;  %v4825_v54 = vmax.f32 %v4823_v5, %v4824_v21  ;;  %v3848_v63 = vmax.f32 %v3701_v13, 0.0 }
 0x3f7   : > { %v4405_v28 = vadd.f32 %v8788_v62, %v4404_v9 }
 0x3f8   : > { %v3784_v44 = vmax.f32 %v3541_v56, 0.0  ;;  %v8809_v15 = vsel %vm4942_vm7, %v4825_v54, %v8767_v46  ;;  %v3918_v38 = vpack.c.bf16 %v3848_v63, %v3847_v19 }
 0x3f9   : > { %v4579_v51 = vmax.f32 %v4405_v28, 0.0  ;;  %v4247_v31 = vpop.f32.mrf.mxu1  ;;  %4971 = vst [vmem:[%s8794_s30 + $0x10] sm:$0xff] %v8809_v15 }
 0x3fa   : > { %v3886_v18 = vpack.c.bf16 %v3784_v44, %v3783_v32  ;;  %v4248_v59 = vadd.f32 %v8788_v62, %v4247_v31  ;;  %5192 = vmatmul.msk.bf16.gmra.mxu3 %vm3211_vm0, %v3918_v38 }
 0x3fb   : > { %v4826_v30 = vmax.f32 %v4578_v22, %v4579_v51  ;;  %v3703_v25 = vpop.f32.mrf.mxu2 }
 0x3fc   : > { %v4516_v4 = vmax.f32 %v4248_v59, 0.0  ;;  %5160 = vmatmul.msk.bf16.gmra.mxu1 %vm3211_vm0, %v3886_v18  ;;  %v3704_v3 = vadd.f32 %v8591_v37, %v3703_v25 }
 0x3fd   : > { %v3543_v58 = vpop.f32.mrf.mxu0  ;;  %v4407_v2 = vpop.f32.mrf.mxu3 }
 0x3fe   : > { %v4683_v39 = vmax.f32 %v4682_v16, %v4516_v4  ;;  %v4408_v46 = vadd.f32 %v8788_v62, %v4407_v2  ;;  %v3544_v47 = vadd.f32 %v8591_v37, %v3543_v58  ;;  %v3849_v60 = vmax.f32 %v3704_v3, 0.0 }
 0x400   : > { %v4580_v1 = vmax.f32 %v4408_v46, 0.0  ;;  %v3785_v36 = vmax.f32 %v3544_v47, 0.0 }
 0x401   : > { %v4249_v20 = vpop.f32.mrf.mxu1 }
 0x402   : > { %v4250_v27 = vadd.f32 %v8788_v62, %v4249_v20  ;;  %v4827_v53 = vmax.f32 %v4826_v30, %v4580_v1 }
 0x403   : > { %v3705_v45 = vpop.f32.mrf.mxu2 }
 0x404   : > { %v4517_v26 = vmax.f32 %v4250_v27, 0.0  ;;  %v3706_v17 = vadd.f32 %v8591_v37, %v3705_v45  ;;  %v8839_v27 = vld [vmem:[%s8951_s4] ss:$0 sm:$0xff] }
 0x405   : > { %v3545_v40 = vpop.f32.mrf.mxu0  ;;  %v4409_v0 = vpop.f32.mrf.mxu3 }
 0x406   : > { %v4684_v42 = vmax.f32 %v4683_v39, %v4517_v26  ;;  %v3546_v8 = vadd.f32 %v8591_v37, %v3545_v40  ;;  %v3850_v23 = vmax.f32 %v3706_v17, 0.0  ;;  %v4410_v50 = vadd.f32 %v8788_v62, %v4409_v0 }
 0x408   : > { %v3786_v43 = vmax.f32 %v3546_v8, 0.0  ;;  %v3919_v57 = vpack.c.bf16 %v3850_v23, %v3849_v60  ;;  %v4581_v12 = vmax.f32 %v4410_v50, 0.0  ;;  %v4685_v30 = vrot.slane %v4684_v42, 4 }
 0x409   : > { %v4252_v24 = vpop.f32.mrf.mxu1 }
 0x40a   : > { %v3887_v35 = vpack.c.bf16 %v3786_v43, %v3785_v36  ;;  %v4828_v29 = vmax.f32 %v4827_v53, %v4581_v12  ;;  %5193 = vmatmul.msk.bf16.gmra.mxu3 %vm3211_vm0, %v3919_v57  ;;  %v4253_v41 = vadd.f32 %v8788_v62, %v4252_v24  ;;  %v4686_v46 = vmax.f32 %v4684_v42, %v4685_v30 }
 0x40b   : > { %v3708_v34 = vpop.f32.mrf.mxu2 }
 0x40c   : > { %5161 = vmatmul.msk.bf16.gmra.mxu1 %vm3211_vm0, %v3887_v35  ;;  %v3709_v61 = vadd.f32 %v8591_v37, %v3708_v34  ;;  %v4518_v7 = vmax.f32 %v4253_v41, 0.0  ;;  %v4829_v1 = vrot.slane %v4828_v29, 4  ;;  %v4687_v8 = vrot.slane %v4686_v46, 2 }
 0x40d   : > { %v3548_v52 = vpop.f32.mrf.mxu0  ;;  %v4412_v14 = vpop.f32.mrf.mxu3 }
 0x40e   : > { %v3549_v11 = vadd.f32 %v8591_v37, %v3548_v52  ;;  %v4413_v49 = vadd.f32 %v8788_v62, %v4412_v14  ;;  %v3851_v56 = vmax.f32 %v3709_v61, 0.0  ;;  %v4830_v42 = vmax.f32 %v4828_v29, %v4829_v1 }
 0x40f   : > { %v4688_v14 = vmax.f32 %v4686_v46, %v4687_v8 }
 0x410   : > { %v3787_v19 = vmax.f32 %v3549_v11, 0.0  ;;  %v4582_v28 = vmax.f32 %v4413_v49, 0.0  ;;  %v4831_v41 = vrot.slane %v4830_v42, 2 }
 0x411   : > { %v4254_v55 = vpop.f32.mrf.mxu1 }
 0x412   : > { %v4255_v5 = vadd.f32 %v8788_v62, %v4254_v55  ;;  %v4832_v49 = vmax.f32 %v4830_v42, %v4831_v41 }
 0x413   : > { %v3710_v48 = vpop.f32.mrf.mxu2 }
 0x414   : > { %v4519_v6 = vmax.f32 %v4255_v5, 0.0  ;;  %v3711_v21 = vadd.f32 %v8591_v37, %v3710_v48  ;;  %v4689_v48 = vrot.slane %v4688_v14, 1 }
 0x415   : > { %v3550_v33 = vpop.f32.mrf.mxu0  ;;  %v4414_v16 = vpop.f32.mrf.mxu3 }
 0x416   : > { %v4691_v13 = vmax.f32 %v4518_v7, %v4519_v6  ;;  %v3551_v10 = vadd.f32 %v8591_v37, %v3550_v33  ;;  %v3852_v9 = vmax.f32 %v3711_v21, 0.0  ;;  %v4415_v54 = vadd.f32 %v8788_v62, %v4414_v16 }
 0x418   : > { %v3788_v63 = vmax.f32 %v3551_v10, 0.0  ;;  %v3920_v32 = vpack.c.bf16 %v3852_v9, %v3851_v56  ;;  %v4583_v44 = vmax.f32 %v4415_v54, 0.0  ;;  %v4690_v54 = vmax.f32 %v4688_v14, %v4689_v48 }
 0x419   : > { %v4257_v22 = vpop.f32.mrf.mxu1 }
 0x41a   : > { %v3888_v38 = vpack.c.bf16 %v3788_v63, %v3787_v19  ;;  %v4258_v51 = vadd.f32 %v8788_v62, %v4257_v22  ;;  %v4835_v31 = vmax.f32 %v4582_v28, %v4583_v44  ;;  %5194 = vmatmul.msk.bf16.gmra.mxu3 %vm3211_vm0, %v3920_v32  ;;  %v4833_v19 = vrot.slane %v4832_v49, 1 }
 0x41b   : > { %v3713_v59 = vpop.f32.mrf.mxu2 }
 0x41c   : > { %v4520_v18 = vmax.f32 %v4258_v51, 0.0  ;;  %5162 = vmatmul.msk.bf16.gmra.mxu1 %vm3211_vm0, %v3888_v38  ;;  %v3714_v3 = vadd.f32 %v8839_v27, %v3713_v59 }
 0x41d   : > { %v3553_v37 = vpop.f32.mrf.mxu0  ;;  %v4417_v25 = vpop.f32.mrf.mxu3 }
 0x41e   : > { %v4692_v4 = vmax.f32 %v4691_v13, %v4520_v18  ;;  %v4418_v58 = vadd.f32 %v8788_v62, %v4417_v25  ;;  %v3554_v47 = vadd.f32 %v8839_v27, %v3553_v37  ;;  %v3853_v50 = vmax.f32 %v3714_v3, 0.0 }
 0x41f   : > { %v4834_v25 = vmax.f32 %v4832_v49, %v4833_v19 }
 0x420   : > { %v4584_v39 = vmax.f32 %v4418_v58, 0.0  ;;  %v3789_v57 = vmax.f32 %v3554_v47, 0.0 }
 0x421   : > { %v4259_v2 = vpop.f32.mrf.mxu1 }
 0x422   : > { %v4260_v20 = vadd.f32 %v8788_v62, %v4259_v2  ;;  %v4836_v53 = vmax.f32 %v4835_v31, %v4584_v39 }
 0x423   : > { %v3715_v45 = vpop.f32.mrf.mxu2 }
 0x424   : > { %v4521_v26 = vmax.f32 %v4260_v20, 0.0  ;;  %v3716_v17 = vadd.f32 %v8839_v27, %v3715_v45 }
 0x425   : > { %v3555_v40 = vpop.f32.mrf.mxu0  ;;  %v4419_v23 = vpop.f32.mrf.mxu3 }
 0x426   : > { %v4693_v0 = vmax.f32 %v4692_v4, %v4521_v26  ;;  %v3556_v60 = vadd.f32 %v8839_v27, %v3555_v40  ;;  %v3854_v36 = vmax.f32 %v3716_v17, 0.0  ;;  %v4420_v43 = vadd.f32 %v8788_v62, %v4419_v23 }
 0x428   : > { %v4694_v12 = vrot.slane %v4693_v0, 4  ;;  %v3790_v24 = vmax.f32 %v3556_v60, 0.0  ;;  %v3921_v35 = vpack.c.bf16 %v3854_v36, %v3853_v50  ;;  %v4585_v34 = vmax.f32 %v4420_v43, 0.0 }
 0x429   : > { %v4262_v52 = vpop.f32.mrf.mxu1 }
 0x42a   : > { %v4695_v55 = vmax.f32 %v4693_v0, %v4694_v12  ;;  %v3889_v5 = vpack.c.bf16 %v3790_v24, %v3789_v57  ;;  %v4837_v61 = vmax.f32 %v4836_v53, %v4585_v34  ;;  %5195 = vmatmul.msk.bf16.gmra.mxu3 %vm3211_vm0, %v3921_v35  ;;  %v4263_v16 = vadd.f32 %v8788_v62, %v4262_v52 }
 0x42b   : > { %v3718_v7 = vpop.f32.mrf.mxu2 }
 0x42c   : > { %v4696_v29 = vrot.slane %v4695_v55, 2  ;;  %5163 = vmatmul.msk.bf16.gmra.mxu1 %vm3211_vm0, %v3889_v5  ;;  %v4838_v11 = vrot.slane %v4837_v61, 4  ;;  %v3719_v44 = vadd.f32 %v8839_v27, %v3718_v7  ;;  %v4522_v38 = vmax.f32 %v4263_v16, 0.0 }
 0x42d   : > { %v3558_v6 = vpop.f32.mrf.mxu0  ;;  %v4422_v33 = vpop.f32.mrf.mxu3 }
 0x42e   : > { %v4697_v21 = vmax.f32 %v4695_v55, %v4696_v29  ;;  %v4839_v13 = vmax.f32 %v4837_v61, %v4838_v11  ;;  %v3559_v51 = vadd.f32 %v8839_v27, %v3558_v6  ;;  %v4423_v37 = vadd.f32 %v8788_v62, %v4422_v33 }
 0x42f   : > { %v3855_v1 = vmax.f32 %v3719_v44, 0.0 }
 0x430   : > { %v4698_v10 = vrot.slane %v4697_v21, 1  ;;  %v4840_v56 = vrot.slane %v4839_v13, 2  ;;  %v3791_v53 = vmax.f32 %v3559_v51, 0.0  ;;  %v4586_v45 = vmax.f32 %v4423_v37, 0.0 }
 0x431   : > { %v4264_v9 = vpop.f32.mrf.mxu1 }
 0x432   : > { %v4699_v63 = vmax.f32 %v4697_v21, %v4698_v10  ;;  %v4265_v28 = vadd.f32 %v8788_v62, %v4264_v9  ;;  %v4841_v32 = vmax.f32 %v4839_v13, %v4840_v56 }
 0x433   : > { %v3720_v18 = vpop.f32.mrf.mxu2 }
 0x434   : > { %v8852_v22 = vsel %vm4930_vm1, %v4699_v63, %v4690_v54  ;;  %v4523_v31 = vmax.f32 %v4265_v28, 0.0  ;;  %v4842_v59 = vrot.slane %v4841_v32, 1  ;;  %v3721_v30 = vadd.f32 %v8839_v27, %v3720_v18 }
 0x435   : > { %v3560_v4 = vpop.f32.mrf.mxu0  ;;  %v4424_v2 = vpop.f32.mrf.mxu3 }
 0x436   : > { %v4700_v58 = vmax.f32 %v4522_v38, %v4523_v31  ;;  %v3561_v39 = vadd.f32 %v8839_v27, %v3560_v4  ;;  %v4843_v46 = vmax.f32 %v4841_v32, %v4842_v59  ;;  %v3856_v20 = vmax.f32 %v3721_v30, 0.0 }
 0x437   : > { %v4425_v3 = vadd.f32 %v8788_v62, %v4424_v2 }
 0x438   : > { %v3792_v47 = vmax.f32 %v3561_v39, 0.0  ;;  %v8860_v26 = vsel %vm4930_vm1, %v4843_v46, %v4834_v25  ;;  %v3922_v17 = vpack.c.bf16 %v3856_v20, %v3855_v1 }
 0x439   : > { %v4587_v40 = vmax.f32 %v4425_v3, 0.0  ;;  %v4267_v8 = vpop.f32.mrf.mxu1 }
 0x43a   : > { %v3890_v42 = vpack.c.bf16 %v3792_v47, %v3791_v53  ;;  %v4268_v0 = vadd.f32 %v8788_v62, %v4267_v8  ;;  %5196 = vmatmul.msk.bf16.gmra.mxu3 %vm3211_vm0, %v3922_v17 }
 0x43b   : > { %v4844_v60 = vmax.f32 %v4586_v45, %v4587_v40  ;;  %v3723_v50 = vpop.f32.mrf.mxu2 }
 0x43c   : > { %v4524_v23 = vmax.f32 %v4268_v0, 0.0  ;;  %5164 = vmatmul.msk.bf16.gmra.mxu1 %vm3211_vm0, %v3890_v42  ;;  %v3724_v52 = vadd.f32 %v8839_v27, %v3723_v50 }
 0x43d   : > { %v3563_v36 = vpop.f32.mrf.mxu0  ;;  %v4427_v57 = vpop.f32.mrf.mxu3 }
 0x43e   : > { %v4701_v43 = vmax.f32 %v4700_v58, %v4524_v23  ;;  %v4428_v12 = vadd.f32 %v8788_v62, %v4427_v57  ;;  %v3564_v41 = vadd.f32 %v8839_v27, %v3563_v36  ;;  %v3857_v48 = vmax.f32 %v3724_v52, 0.0 }
 0x440   : > { %v4588_v24 = vmax.f32 %v4428_v12, 0.0  ;;  %v3793_v33 = vmax.f32 %v3564_v41, 0.0 }
 0x441   : > { %v4269_v35 = vpop.f32.mrf.mxu1 }
 0x442   : > { %v4270_v34 = vadd.f32 %v8788_v62, %v4269_v35  ;;  %v4845_v14 = vmax.f32 %v4844_v60, %v4588_v24 }
 0x443   : > { %v3725_v5 = vpop.f32.mrf.mxu2 }
 0x444   : > { %v4525_v55 = vmax.f32 %v4270_v34, 0.0  ;;  %v3726_v61 = vadd.f32 %v8839_v27, %v3725_v5 }
 0x445   : > { %v3565_v29 = vpop.f32.mrf.mxu0  ;;  %v4429_v6 = vpop.f32.mrf.mxu3 }
 0x446   : > { %v4702_v7 = vmax.f32 %v4701_v43, %v4525_v55  ;;  %v3566_v11 = vadd.f32 %v8839_v27, %v3565_v29  ;;  %v3858_v49 = vmax.f32 %v3726_v61, 0.0  ;;  %v4430_v21 = vadd.f32 %v8788_v62, %v4429_v6 }
 0x448   : > { %v4703_v13 = vrot.slane %v4702_v7, 4  ;;  %v3794_v10 = vmax.f32 %v3566_v11, 0.0  ;;  %v3923_v16 = vpack.c.bf16 %v3858_v49, %v3857_v48  ;;  %v4589_v56 = vmax.f32 %v4430_v21, 0.0 }
 0x449   : > { %v4272_v9 = vpop.f32.mrf.mxu1 }
 0x44a   : > { %v4704_v54 = vmax.f32 %v4702_v7, %v4703_v13  ;;  %v3891_v19 = vpack.c.bf16 %v3794_v10, %v3793_v33  ;;  %v4846_v63 = vmax.f32 %v4845_v14, %v4589_v56  ;;  %5197 = vmatmul.msk.bf16.gmra.mxu3 %vm3211_vm0, %v3923_v16  ;;  %v4273_v37 = vadd.f32 %v8788_v62, %v4272_v9 }
 0x44b   : > { %v3728_v32 = vpop.f32.mrf.mxu2 }
 0x44c   : > { %v4705_v28 = vrot.slane %v4704_v54, 2  ;;  %5165 = vmatmul.msk.bf16.gmra.mxu1 %vm3211_vm0, %v3891_v19  ;;  %v4847_v44 = vrot.slane %v4846_v63, 4  ;;  %v3729_v2 = vadd.f32 %v8839_v27, %v3728_v32  ;;  %v4526_v1 = vmax.f32 %v4273_v37, 0.0 }
 0x44d   : > { %v3568_v38 = vpop.f32.mrf.mxu0  ;;  %v4432_v31 = vpop.f32.mrf.mxu3 }
 0x44e   : > { %v4706_v51 = vmax.f32 %v4704_v54, %v4705_v28  ;;  %v4848_v18 = vmax.f32 %v4846_v63, %v4847_v44  ;;  %v3569_v20 = vadd.f32 %v8839_v27, %v3568_v38  ;;  %v4433_v45 = vadd.f32 %v8788_v62, %v4432_v31 }
 0x44f   : > { %v3859_v23 = vmax.f32 %v3729_v2, 0.0 }
 0x450   : > { %v4707_v59 = vrot.slane %v4706_v51, 1  ;;  %v4849_v30 = vrot.slane %v4848_v18, 2  ;;  %v3795_v36 = vmax.f32 %v3569_v20, 0.0  ;;  %v4590_v12 = vmax.f32 %v4433_v45, 0.0 }
 0x451   : > { %v4274_v4 = vpop.f32.mrf.mxu1 }
 0x452   : > { %v4708_v25 = vmax.f32 %v4706_v51, %v4707_v59  ;;  %v4275_v58 = vadd.f32 %v8788_v62, %v4274_v4  ;;  %v4850_v39 = vmax.f32 %v4848_v18, %v4849_v30 }
 0x453   : > { %v3730_v53 = vpop.f32.mrf.mxu2 }
 0x454   : > { %v4945_v46 = vsel %vm4932_vm2, %v4708_v25, %v8852_v22  ;;  %v4527_v3 = vmax.f32 %v4275_v58, 0.0  ;;  %v4851_v47 = vrot.slane %v4850_v39, 1  ;;  %v3731_v17 = vadd.f32 %v8839_v27, %v3730_v53 }
 0x455   : > { %v3570_v40 = vpop.f32.mrf.mxu0  ;;  %v4434_v0 = vpop.f32.mrf.mxu3 }
 0x456   : > { %v4709_v8 = vmax.f32 %v4526_v1, %v4527_v3  ;;  %v3571_v42 = vadd.f32 %v8839_v27, %v3570_v40  ;;  %v4852_v60 = vmax.f32 %v4850_v39, %v4851_v47  ;;  %v3860_v50 = vmax.f32 %v3731_v17, 0.0 }
 0x457   : > { %v4435_v22 = vadd.f32 %v8788_v62, %v4434_v0 }
 0x458   : > { %v3796_v43 = vmax.f32 %v3571_v42, 0.0  ;;  %v4959_v57 = vsel %vm4932_vm2, %v4852_v60, %v8860_v26  ;;  %v3924_v24 = vpack.c.bf16 %v3860_v50, %v3859_v23 }
 0x459   : > { %v4591_v35 = vmax.f32 %v4435_v22, 0.0  ;;  %v4277_v34 = vpop.f32.mrf.mxu1 }
 0x45a   : > { %v3892_v52 = vpack.c.bf16 %v3796_v43, %v3795_v36  ;;  %v4278_v14 = vadd.f32 %v8788_v62, %v4277_v34  ;;  %5198 = vmatmul.msk.bf16.gmra.mxu3 %vm3211_vm0, %v3924_v24 }
 0x45b   : > { %v4853_v41 = vmax.f32 %v4590_v12, %v4591_v35 }
 0x45c   : > { %v4528_v27 = vmax.f32 %v4278_v14, 0.0  ;;  %5166 = vmatmul.msk.bf16.gmra.mxu1 %vm3211_vm0, %v3892_v52 }
 0x45d   : > { %v4437_v5 = vpop.f32.mrf.mxu3 }
 0x45e   : > { %v4710_v55 = vmax.f32 %v4709_v8, %v4528_v27  ;;  %v4438_v61 = vadd.f32 %v8788_v62, %v4437_v5 }
 0x460   : > { %v4592_v29 = vmax.f32 %v4438_v61, 0.0 }
 0x461   : > { %v4279_v7 = vpop.f32.mrf.mxu1 }
 0x462   : > { %v4280_v26 = vadd.f32 %v8788_v62, %v4279_v7  ;;  %v4854_v11 = vmax.f32 %v4853_v41, %v4592_v29 }
 0x464   : > { %v4529_v6 = vmax.f32 %v4280_v26, 0.0 }
 0x465   : > { %v4439_v49 = vpop.f32.mrf.mxu3 }
 0x466   : > { %v4711_v48 = vmax.f32 %v4710_v55, %v4529_v6  ;;  %v4440_v21 = vadd.f32 %v8788_v62, %v4439_v49 }
 0x468   : > { %v4712_v33 = vrot.slane %v4711_v48, 4  ;;  %v4593_v13 = vmax.f32 %v4440_v21, 0.0 }
 0x469   : > { %v4282_v10 = vpop.f32.mrf.mxu1 }
 0x46a   : > { %v4713_v16 = vmax.f32 %v4711_v48, %v4712_v33  ;;  %v4855_v56 = vmax.f32 %v4854_v11, %v4593_v13  ;;  %v4283_v44 = vadd.f32 %v8788_v62, %v4282_v10 }
 0x46c   : > { %v4714_v9 = vrot.slane %v4713_v16, 2  ;;  %v4856_v54 = vrot.slane %v4855_v56, 4  ;;  %v4530_v30 = vmax.f32 %v4283_v44, 0.0 }
 0x46d   : > { %v4442_v63 = vpop.f32.mrf.mxu3 }
 0x46e   : > { %v4715_v19 = vmax.f32 %v4713_v16, %v4714_v9  ;;  %v4857_v28 = vmax.f32 %v4855_v56, %v4856_v54  ;;  %v4443_v58 = vadd.f32 %v8788_v62, %v4442_v63 }
 0x470   : > { %v4716_v32 = vrot.slane %v4715_v19, 1  ;;  %v4858_v38 = vrot.slane %v4857_v28, 2  ;;  %v4594_v53 = vmax.f32 %v4443_v58, 0.0 }
 0x471   : > { %v4284_v51 = vpop.f32.mrf.mxu1 }
 0x472   : > { %v4717_v31 = vmax.f32 %v4715_v19, %v4716_v32  ;;  %v4285_v18 = vadd.f32 %v8788_v62, %v4284_v51  ;;  %v4859_v59 = vmax.f32 %v4857_v28, %v4858_v38 }
 0x474   : > { %v4946_v37 = vsel %vm4934_vm3, %v4717_v31, %v4945_v46  ;;  %v4531_v4 = vmax.f32 %v4285_v18, 0.0  ;;  %v4860_v25 = vrot.slane %v4859_v59, 1 }
 0x475   : > { %v4444_v2 = vpop.f32.mrf.mxu3 }
 0x476   : > { %v4718_v39 = vmax.f32 %v4530_v30, %v4531_v4  ;;  %v4861_v1 = vmax.f32 %v4859_v59, %v4860_v25  ;;  %v4445_v20 = vadd.f32 %v8788_v62, %v4444_v2 }
 0x478   : > { %v4960_v3 = vsel %vm4934_vm3, %v4861_v1, %v4959_v57  ;;  %v4595_v47 = vmax.f32 %v4445_v20, 0.0 }
 0x479   : > { %v4287_v45 = vpop.f32.mrf.mxu1 }
 0x47a   : > { %v4288_v17 = vadd.f32 %v8788_v62, %v4287_v45  ;;  %v4862_v40 = vmax.f32 %v4594_v53, %v4595_v47 }
 0x47c   : > { %v4532_v8 = vmax.f32 %v4288_v17, 0.0 }
 0x47d   : > { %v4447_v42 = vpop.f32.mrf.mxu3 }
 0x47e   : > { %v4719_v46 = vmax.f32 %v4718_v39, %v4532_v8  ;;  %v4448_v0 = vadd.f32 %v8788_v62, %v4447_v42 }
 0x480   : > { %v4596_v60 = vmax.f32 %v4448_v0, 0.0 }
 0x481   : > { %v4289_v23 = vpop.f32.mrf.mxu1 }
 0x482   : > { %v4290_v50 = vadd.f32 %v8788_v62, %v4289_v23  ;;  %v4863_v22 = vmax.f32 %v4862_v40, %v4596_v60 }
 0x484   : > { %v4533_v36 = vmax.f32 %v4290_v50, 0.0 }
 0x485   : > { %v4449_v12 = vpop.f32.mrf.mxu3 }
 0x486   : > { %v4720_v43 = vmax.f32 %v4719_v46, %v4533_v36  ;;  %v4450_v57 = vadd.f32 %v8788_v62, %v4449_v12 }
 0x488   : > { %v4721_v24 = vrot.slane %v4720_v43, 4  ;;  %v4597_v35 = vmax.f32 %v4450_v57, 0.0 }
 0x489   : > { %v4292_v34 = vpop.f32.mrf.mxu1 }
 0x48a   : > { %v4722_v52 = vmax.f32 %v4720_v43, %v4721_v24  ;;  %v4864_v14 = vmax.f32 %v4863_v22, %v4597_v35  ;;  %v4293_v7 = vadd.f32 %v8788_v62, %v4292_v34 }
 0x48c   : > { %v4723_v41 = vrot.slane %v4722_v52, 2  ;;  %v4865_v27 = vrot.slane %v4864_v14, 4  ;;  %v4534_v33 = vmax.f32 %v4293_v7, 0.0 }
 0x48d   : > { %v4452_v5 = vpop.f32.mrf.mxu3 }
 0x48e   : > { %v4724_v55 = vmax.f32 %v4722_v52, %v4723_v41  ;;  %v4866_v61 = vmax.f32 %v4864_v14, %v4865_v27  ;;  %v4453_v16 = vadd.f32 %v8788_v62, %v4452_v5 }
 0x490   : > { %v4725_v29 = vrot.slane %v4724_v55, 1  ;;  %v4867_v26 = vrot.slane %v4866_v61, 2  ;;  %v4598_v28 = vmax.f32 %v4453_v16, 0.0 }
 0x491   : > { %v4294_v11 = vpop.f32.mrf.mxu1 }
 0x492   : > { %v4726_v6 = vmax.f32 %v4724_v55, %v4725_v29  ;;  %v4295_v48 = vadd.f32 %v8788_v62, %v4294_v11  ;;  %v4868_v49 = vmax.f32 %v4866_v61, %v4867_v26 }
 0x494   : > { %v4947_v21 = vsel %vm4936_vm4, %v4726_v6, %v4946_v37  ;;  %v4535_v13 = vmax.f32 %v4295_v48, 0.0  ;;  %v4869_v10 = vrot.slane %v4868_v49, 1 }
 0x495   : > { %v4454_v9 = vpop.f32.mrf.mxu3 }
 0x496   : > { %v4727_v56 = vmax.f32 %v4534_v33, %v4535_v13  ;;  %v4870_v54 = vmax.f32 %v4868_v49, %v4869_v10  ;;  %v4455_v19 = vadd.f32 %v8788_v62, %v4454_v9 }
 0x498   : > { %v4961_v63 = vsel %vm4936_vm4, %v4870_v54, %v4960_v3  ;;  %v4599_v32 = vmax.f32 %v4455_v19, 0.0 }
 0x499   : > { %v4297_v44 = vpop.f32.mrf.mxu1 }
 0x49a   : > { %v4298_v38 = vadd.f32 %v8788_v62, %v4297_v44  ;;  %v4871_v51 = vmax.f32 %v4598_v28, %v4599_v32 }
 0x49c   : > { %v4536_v31 = vmax.f32 %v4298_v38, 0.0 }
 0x49d   : > { %v4457_v59 = vpop.f32.mrf.mxu3 }
 0x49e   : > { %v4728_v18 = vmax.f32 %v4727_v56, %v4536_v31  ;;  %v4458_v37 = vadd.f32 %v8788_v62, %v4457_v59 }
 0x4a0   : > { %v4600_v30 = vmax.f32 %v4458_v37, 0.0 }
 0x4a1   : > { %v4299_v4 = vpop.f32.mrf.mxu1 }
 0x4a2   : > { %v4300_v25 = vadd.f32 %v8788_v62, %v4299_v4  ;;  %v4872_v58 = vmax.f32 %v4871_v51, %v4600_v30 }
 0x4a4   : > { %v4537_v39 = vmax.f32 %v4300_v25, 0.0 }
 0x4a5   : > { %v4459_v1 = vpop.f32.mrf.mxu3 }
 0x4a6   : > { %v4729_v2 = vmax.f32 %v4728_v18, %v4537_v39  ;;  %v4460_v20 = vadd.f32 %v8788_v62, %v4459_v1 }
 0x4a8   : > { %v4730_v3 = vrot.slane %v4729_v2, 4  ;;  %v4601_v53 = vmax.f32 %v4460_v20, 0.0 }
 0x4a9   : > { %v4302_v47 = vpop.f32.mrf.mxu1 }
 0x4aa   : > { %v4731_v45 = vmax.f32 %v4729_v2, %v4730_v3  ;;  %v4873_v17 = vmax.f32 %v4872_v58, %v4601_v53  ;;  %v4303_v5 = vadd.f32 %v8788_v62, %v4302_v47 }
 0x4ac   : > { %v4732_v40 = vrot.slane %v4731_v45, 2  ;;  %v4874_v8 = vrot.slane %v4873_v17, 4  ;;  %v4538_v6 = vmax.f32 %v4303_v5, 0.0 }
 0x4ad   : > { %v4462_v42 = vpop.f32.mrf.mxu3 }
 0x4ae   : > { %v4733_v46 = vmax.f32 %v4731_v45, %v4732_v40  ;;  %v4875_v0 = vmax.f32 %v4873_v17, %v4874_v8 }
 0x4b0   : > { %v4734_v60 = vrot.slane %v4733_v46, 1  ;;  %v4876_v23 = vrot.slane %v4875_v0, 2 }
 0x4b1   : > { %v4304_v50 = vpop.f32.mrf.mxu1 }
 0x4b2   : > { %v4735_v22 = vmax.f32 %v4733_v46, %v4734_v60  ;;  %v4877_v36 = vmax.f32 %v4875_v0, %v4876_v23  ;;  %v4305_v55 = vadd.f32 %v8788_v62, %v4304_v50 }
 0x4b4   : > { %v8913_v43 = vsel %vm4938_vm5, %v4735_v22, %v4947_v21  ;;  %v4878_v12 = vrot.slane %v4877_v36, 1  ;;  %v4539_v7 = vmax.f32 %v4305_v55, 0.0  ;;  %v4463_v21 = vadd.f32 %v8788_v62, %v4462_v42 }
 0x4b5   : > { %v4464_v57 = vpop.f32.mrf.mxu3 }
 0x4b6   : > { %v4879_v24 = vmax.f32 %v4877_v36, %v4878_v12  ;;  %v4465_v11 = vadd.f32 %v8788_v62, %v4464_v57  ;;  %v4736_v13 = vmax.f32 %v4538_v6, %v4539_v7  ;;  %v4602_v54 = vmax.f32 %v4463_v21, 0.0 }
 0x4b8   : > { %v8916_v35 = vsel %vm4938_vm5, %v4879_v24, %v4961_v63  ;;  %v4603_v16 = vmax.f32 %v4465_v11, 0.0 }
 0x4b9   : > { %v4307_v34 = vpop.f32.mrf.mxu1 }
 0x4ba   : > { %v4308_v61 = vadd.f32 %v8788_v62, %v4307_v34  ;;  %v4880_v32 = vmax.f32 %v4602_v54, %v4603_v16 }
 0x4bc   : > { %v4540_v48 = vmax.f32 %v4308_v61, 0.0 }
 0x4bd   : > { %v4467_v52 = vpop.f32.mrf.mxu3 }
 0x4be   : > { %v4468_v33 = vadd.f32 %v8788_v62, %v4467_v52  ;;  %v4737_v9 = vmax.f32 %v4736_v13, %v4540_v48 }
 0x4c0   : > { %v4604_v19 = vmax.f32 %v4468_v33, 0.0 }
 0x4c1   : > { %v4309_v14 = vpop.f32.mrf.mxu1 }
 0x4c2   : > { %v4310_v26 = vadd.f32 %v8788_v62, %v4309_v14  ;;  %v4881_v51 = vmax.f32 %v4880_v32, %v4604_v19 }
 0x4c4   : > { %v4541_v10 = vmax.f32 %v4310_v26, 0.0 }
 0x4c5   : > { %v4469_v41 = vpop.f32.mrf.mxu3 }
 0x4c6   : > { %v4470_v56 = vadd.f32 %v8788_v62, %v4469_v41  ;;  %v4738_v28 = vmax.f32 %v4737_v9, %v4541_v10 }
 0x4c8   : > { %v4605_v44 = vmax.f32 %v4470_v56, 0.0  ;;  %v4739_v18 = vrot.slane %v4738_v28, 4 }
 0x4c9   : > { %v4312_v27 = vpop.f32.mrf.mxu1 }
 0x4ca   : > { %v4882_v59 = vmax.f32 %v4881_v51, %v4605_v44  ;;  %v4313_v37 = vadd.f32 %v8788_v62, %v4312_v27  ;;  %v4740_v58 = vmax.f32 %v4738_v28, %v4739_v18 }
 0x4cc   : > { %v4883_v2 = vrot.slane %v4882_v59, 4  ;;  %v4542_v1 = vmax.f32 %v4313_v37, 0.0  ;;  %v4741_v40 = vrot.slane %v4740_v58, 2 }
 0x4cd   : > { %v4472_v29 = vpop.f32.mrf.mxu3 }
 0x4ce   : > { %v4473_v3 = vadd.f32 %v8788_v62, %v4472_v29  ;;  %v4884_v46 = vmax.f32 %v4882_v59, %v4883_v2  ;;  %v4742_v36 = vmax.f32 %v4740_v58, %v4741_v40 }
 0x4d0   : > { %v4606_v60 = vmax.f32 %v4473_v3, 0.0  ;;  %v4885_v24 = vrot.slane %v4884_v46, 2  ;;  %v4743_v27 = vrot.slane %v4742_v36, 1 }
 0x4d1   : > { %v4314_v49 = vpop.f32.mrf.mxu1 }
 0x4d2   : > { %v4315_v31 = vadd.f32 %v8788_v62, %v4314_v49  ;;  %v4886_v5 = vmax.f32 %v4884_v46, %v4885_v24  ;;  %v4744_v26 = vmax.f32 %v4742_v36, %v4743_v27 }
 0x4d4   : > { %v4543_v4 = vmax.f32 %v4315_v31, 0.0  ;;  %v4887_v6 = vrot.slane %v4886_v5, 1  ;;  %v4949_v21 = vsel %vm4940_vm6, %v4744_v26, %v8913_v43 }
 0x4d5   : > { %v4474_v63 = vpop.f32.mrf.mxu3 }
 0x4d6   : > { %v4475_v39 = vadd.f32 %v8788_v62, %v4474_v63  ;;  %v4745_v45 = vmax.f32 %v4542_v1, %v4543_v4  ;;  %v4888_v13 = vmax.f32 %v4886_v5, %v4887_v6 }
 0x4d8   : > { %v4607_v8 = vmax.f32 %v4475_v39, 0.0  ;;  %v4963_v9 = vsel %vm4940_vm6, %v4888_v13, %v8916_v35 }
 0x4d9   : > { %v4317_v38 = vpop.f32.mrf.mxu1 }
 0x4da   : > { %v4318_v30 = vadd.f32 %v8788_v62, %v4317_v38  ;;  %v4889_v12 = vmax.f32 %v4606_v60, %v4607_v8 }
 0x4dc   : > { %v4544_v20 = vmax.f32 %v4318_v30, 0.0 }
 0x4dd   : > { %v4477_v25 = vpop.f32.mrf.mxu3 }
 0x4de   : > { %v4478_v53 = vadd.f32 %v8788_v62, %v4477_v25  ;;  %v4746_v42 = vmax.f32 %v4745_v45, %v4544_v20 }
 0x4e0   : > { %v4608_v23 = vmax.f32 %v4478_v53, 0.0 }
 0x4e1   : > { %v4319_v47 = vpop.f32.mrf.mxu1 }
 0x4e2   : > { %v4320_v17 = vadd.f32 %v8788_v62, %v4319_v47  ;;  %v4890_v52 = vmax.f32 %v4889_v12, %v4608_v23 }
 0x4e4   : > { %v4545_v0 = vmax.f32 %v4320_v17, 0.0 }
 0x4e5   : > { %v4479_v22 = vpop.f32.mrf.mxu3 }
 0x4e6   : > { %v4747_v50 = vmax.f32 %v4746_v42, %v4545_v0  ;;  %v4480_v57 = vadd.f32 %v8788_v62, %v4479_v22 }
 0x4e8   : > { %v4748_v34 = vrot.slane %v4747_v50, 4  ;;  %v4609_v14 = vmax.f32 %v4480_v57, 0.0 }
 0x4ea   : > { %v4749_v41 = vmax.f32 %v4747_v50, %v4748_v34  ;;  %v4891_v55 = vmax.f32 %v4890_v52, %v4609_v14 }
 0x4ec   : > { %v4750_v61 = vrot.slane %v4749_v41, 2  ;;  %v4892_v29 = vrot.slane %v4891_v55, 4 }
 0x4ee   : > { %v4751_v7 = vmax.f32 %v4749_v41, %v4750_v61  ;;  %v4893_v11 = vmax.f32 %v4891_v55, %v4892_v29 }
 0x4f0   : > { %v4752_v48 = vrot.slane %v4751_v7, 1  ;;  %v4894_v49 = vrot.slane %v4893_v11, 2 }
 0x4f2   : > { %v4753_v62 = vmax.f32 %v4751_v7, %v4752_v48  ;;  %v4895_v33 = vmax.f32 %v4893_v11, %v4894_v49 }
 0x4f4   : > { %v4950_v10 = vsel %vm4942_vm7, %v4753_v62, %v4949_v21  ;;  %v4896_v16 = vrot.slane %v4895_v33, 1 }
 0x4f5   : > { %4970 = vst [vmem:[%s8794_s30 + $0x8] sm:$0xff] %v4950_v10 }
 0x4f6   : > { %v4897_v56 = vmax.f32 %v4895_v33, %v4896_v16 }
 0x4f8   : > { %v4964_v54 = vsel %vm4942_vm7, %v4897_v56, %v4963_v9 }
 0x4f9   : > { %4972 = vst [vmem:[%s8794_s30 + $0x18] sm:$0xff] %v4964_v54 }
 0x4fa PF: > { %s17_s24 = sadd.s32 1, %s6535_s24  }
 0x4fb   : > { %p14_p5 = scmp.ge.s32.totalorder %s17_s24, 4  }
 0x4fd   :  { %16 = sbr.rel (!%p14_p5) target bundleno = 1 (0x1), region = 78 }

// kernel: _lambda_.4
= control target key start
LH: loop header
LB: loop body
LE: loop exit
PB: predicated region body
PF: predicated region fallthrough
CT: control target
= control target key end

     0   :  { %s3179_s24 = smov 0   ;;  %s4015_s0 = inlined_call_operand.vmem [shape: bf16[32,32,256], index: 0, kind: input, shape index: {}]   ;;  %s4016_s1 = inlined_call_operand.vmem [shape: bf16[256,128], index: 1, kind: input, shape index: {}]   ;;  %s4017_s2 = inlined_call_operand.vmem [shape: f32[1,128], index: 2, kind: input, shape index: {}, may-alias: {2,4}]   ;;  %s4018_s3 = inlined_call_operand.vmem [shape: bf16[128,128], index: 3, kind: input, shape index: {}]   ;;  %s4019_s4 = inlined_call_operand.vmem [shape: f32[1,128], index: 4, kind: input, shape index: {}, may-alias: {2,4}]   ;;  %s4020_s5 = inlined_call_operand.vmem [shape: bf16[128,256], index: 5, kind: input, shape index: {}]   ;;  %s4021_s6 = inlined_call_operand.vmem [shape: f32[1,256], index: 6, kind: input, shape index: {}]   ;;  %s4022_s7 = inlined_call_operand.vmem [shape: f32[32,256], index: 7, kind: output, shape index: {}]  }
   0x1 LB: > { %s2559_s25 = sadd.s32 4294967295, %s3137_s24   ;;  %p2563_p0 = scmp.ge.s32.totalorder %s3137_s24, 1  ;;  %s3137_s24 = sphi %s3179_s24, %s17_s24  }
   0x2   : > { %p239_p1 = scmp.lt.s32.totalorder %s3137_s24, 3 }
   0x4   : > { %p240_p2 = pnand %p2563_p0, %p239_p1 }
   0x5   : > { %s2564_s9 = sshll.u32 (!%p240_p2), %s2559_s25, 4  ;;  %s2567_s8 = sshll.u32 (!%p240_p2), %s2559_s25, 1 }
   0x6   : > { %243 = sbr.rel (%p240_p2) target bundleno = 1113 (0x459), region = 48  ;;  %p274_p3 = scmp.lt.s32.totalorder (!%p240_p2), %s2564_s9, 31 }
   0x7   : > { %p281_p4 = scmp.lt.s32.totalorder (!%p240_p2), %s2567_s8, 3 }
   0xb   : > { %v3061_v0 = vld [vmem:[%s4016_s1 + $0x38] sm:$0xff]  ;;  %v3060_v1 = vld [vmem:[%s4016_s1 + $0x30] sm:$0xff]  ;;  %v3059_v2 = vld [vmem:[%s4016_s1 + $0x28] sm:$0xff]  ;;  %s4024_s9 = smov (!%p274_p3, %s2564_s9), 31  ;;  %vm2458_vm0 = vcmask 1041409   ;;  %vm2460_vm1 = vcmask 1042434  }
   0xc   : > { %3094 = vmatpush.bf16.msra.mxu1 %v3061_v0  ;;  %803 = vmatpush.bf16.msra.mxu0 %v3061_v0  ;;  %v3058_v3 = vld [vmem:[%s4016_s1 + $0x20] sm:$0xff]  ;;  %v3057_v4 = vld [vmem:[%s4016_s1 + $0x18] sm:$0xff]  ;;  %v3056_v5 = vld [vmem:[%s4016_s1 + $0x10] sm:$0xff]  ;;  %s2988_s16 = sshll.u32 %s4024_s9, 5  ;;  %vm2462_vm2 = vcmask 1043459   ;;  %vm2464_vm3 = vcmask 1044484  }
   0xd   : > { %3095 = vmatpush.bf16.msra.mxu2 %v3061_v0  ;;  %3096 = vmatpush.bf16.msra.mxu3 %v3061_v0  ;;  %v3055_v6 = vld [vmem:[%s4016_s1 + $0x8] sm:$0xff]  ;;  %s3213_s21 = scalar_lea.vmem %s4015_s0, %s2988_s16  ;;  %v3054_v7 = vld [vmem:[%s4016_s1] sm:$0xff]  ;;  %v3069_v10 = vld [vmem:[%s4016_s1 + $0x78] sm:$0xff]  ;;  %vm2466_vm4 = vcmask 1045509   ;;  %s4026_s8 = smov (!%p281_p4, %s2567_s8), 3  ;;  %vm2468_vm5 = vcmask 1046534  }
   0xe   : > { %v2636_v8 = vld [vmem:[%s3213_s21 + $0x80] sm:$0xf]  ;;  %v3007_v9 = vld [vmem:[%s3213_s21 + $0x84] sm:$0xf0]  ;;  %v3068_v12 = vld [vmem:[%s4016_s1 + $0x70] sm:$0xff]  ;;  %s2989_s25 = sshll.u32 %s4026_s8, 4 }
   0xf   : > { %v2637_v11 = vor.u32 %v3007_v9, %v2636_v8  ;;  %v3067_v13 = vld [vmem:[%s4016_s1 + $0x68] sm:$0xff]  ;;  %v2644_v14 = vld [vmem:[%s3213_s21 + $0x90] sm:$0xf]  ;;  %v3009_v15 = vld [vmem:[%s3213_s21 + $0x94] sm:$0xf0]  ;;  %vm2470_vm6 = vcmask 1047559   ;;  %s3897_s11 = scalar_lea.vmem %s4022_s7, %s2989_s25 }
  0x10   : > { %3097 = vmatpush.bf16.msra.mxu1 %v3060_v1  ;;  %804 = vmatpush.bf16.msra.mxu0 %v3060_v1  ;;  %v2645_v16 = vor.u32 %v3009_v15, %v2644_v14  ;;  %v3066_v17 = vld [vmem:[%s4016_s1 + $0x60] sm:$0xff]  ;;  %v3011_v19 = vld [vmem:[%s3213_s21 + $0xa4] sm:$0xf0]  ;;  %v3065_v21 = vld [vmem:[%s4016_s1 + $0x58] sm:$0xff] }
  0x11   : > { %3098 = vmatpush.bf16.msra.mxu2 %v3060_v1  ;;  %3099 = vmatpush.bf16.msra.mxu3 %v3060_v1  ;;  %v2652_v18 = vld [vmem:[%s3213_s21 + $0xa0] sm:$0xf]  ;;  %v2660_v22 = vld [vmem:[%s3213_s21 + $0xb0] sm:$0xf]  ;;  %v3013_v23 = vld [vmem:[%s3213_s21 + $0xb4] sm:$0xf0] }
  0x12   : > { %v2653_v20 = vor.u32 %v3011_v19, %v2652_v18  ;;  %v2661_v24 = vor.u32 %v3013_v23, %v2660_v22  ;;  %v3064_v25 = vld [vmem:[%s4016_s1 + $0x50] sm:$0xff]  ;;  %v2668_v26 = vld [vmem:[%s3213_s21 + $0xc0] sm:$0xf]  ;;  %v3015_v27 = vld [vmem:[%s3213_s21 + $0xc4] sm:$0xf0] }
  0x13   : > { %v2669_v28 = vor.u32 %v3015_v27, %v2668_v26  ;;  %v3063_v29 = vld [vmem:[%s4016_s1 + $0x48] sm:$0xff]  ;;  %v2676_v30 = vld [vmem:[%s3213_s21 + $0xd0] sm:$0xf]  ;;  %v3017_v31 = vld [vmem:[%s3213_s21 + $0xd4] sm:$0xf0] }
  0x14   : > { %3100 = vmatpush.bf16.msra.mxu1 %v3059_v2  ;;  %805 = vmatpush.bf16.msra.mxu0 %v3059_v2  ;;  %v2677_v32 = vor.u32 %v3017_v31, %v2676_v30  ;;  %v3062_v33 = vld [vmem:[%s4016_s1 + $0x40] sm:$0xff]  ;;  %v2991_v35 = vld [vmem:[%s3213_s21 + $0x4] sm:$0xf0]  ;;  %v2580_v43 = vld [vmem:[%s3213_s21 + $0x10] sm:$0xf] }
  0x15   : > { %3101 = vmatpush.bf16.msra.mxu2 %v3059_v2  ;;  %3102 = vmatpush.bf16.msra.mxu3 %v3059_v2  ;;  %v2572_v34 = vld [vmem:[%s3213_s21] sm:$0xf]  ;;  %v3019_v38 = vld [vmem:[%s3213_s21 + $0xe4] sm:$0xf0]  ;;  %v2993_v44 = vld [vmem:[%s3213_s21 + $0x14] sm:$0xf0] }
  0x16   : > { %v2573_v36 = vor.u32 %v2991_v35, %v2572_v34  ;;  %v2684_v37 = vld [vmem:[%s3213_s21 + $0xe0] sm:$0xf]  ;;  %v3023_v41 = vld [vmem:[%s3213_s21 + $0x104] sm:$0xf0]  ;;  %v2581_v45 = vor.u32 %v2993_v44, %v2580_v43  ;;  %v3077_v46 = vld [vmem:[%s4018_s3 + $0x38] sm:$0xff] }
  0x17   : > { %v2685_v39 = vor.u32 %v3019_v38, %v2684_v37  ;;  %v2700_v40 = vld [vmem:[%s3213_s21 + $0x100] sm:$0xf]  ;;  %v2692_v47 = vld [vmem:[%s3213_s21 + $0xf0] sm:$0xf]  ;;  %v3021_v48 = vld [vmem:[%s3213_s21 + $0xf4] sm:$0xf0] }
  0x18   : > { %3103 = vmatpush.bf16.msra.mxu1 %v3058_v3  ;;  %806 = vmatpush.bf16.msra.mxu0 %v3058_v3  ;;  %v2701_v42 = vor.u32 %v3023_v41, %v2700_v40  ;;  %v2693_v49 = vor.u32 %v3021_v48, %v2692_v47  ;;  %v2708_v50 = vld [vmem:[%s3213_s21 + $0x110] sm:$0xf]  ;;  %v3025_v51 = vld [vmem:[%s3213_s21 + $0x114] sm:$0xf0]  ;;  %v2588_v53 = vld [vmem:[%s3213_s21 + $0x20] sm:$0xf] }
  0x19   : > { %3104 = vmatpush.bf16.msra.mxu2 %v3058_v3  ;;  %3105 = vmatpush.bf16.msra.mxu3 %v3058_v3  ;;  %v2709_v52 = vor.u32 %v3025_v51, %v2708_v50  ;;  %v2995_v54 = vld [vmem:[%s3213_s21 + $0x24] sm:$0xf0]  ;;  %v3076_v56 = vld [vmem:[%s4018_s3 + $0x30] sm:$0xff]  ;;  %v2990_v57 = vld [vmem:[%s3213_s21 + $0x4] sm:$0xf] }
  0x1a   : > { %v2589_v55 = vor.u32 %v2995_v54, %v2588_v53  ;;  %v2574_v58 = vld [vmem:[%s3213_s21 + $0x8] sm:$0xf0]  ;;  %v2716_v61 = vld [vmem:[%s3213_s21 + $0x120] sm:$0xf]  ;;  %v3027_v62 = vld [vmem:[%s3213_s21 + $0x124] sm:$0xf0] }
  0x1b   : > { %v2577_v59 = vor.u32 %v2990_v57, %v2574_v58  ;;  %v2717_v63 = vor.u32 %v3027_v62, %v2716_v61  ;;  %v2596_v0 = vld [vmem:[%s3213_s21 + $0x30] sm:$0xf]  ;;  %v2997_v1 = vld [vmem:[%s3213_s21 + $0x34] sm:$0xf0]  ;;  %v2590_v18 = vld [vmem:[%s3213_s21 + $0x28] sm:$0xf0] }
  0x1c   : > { %3106 = vmatpush.bf16.msra.mxu1 %v3057_v4  ;;  %807 = vmatpush.bf16.msra.mxu0 %v3057_v4  ;;  %v2597_v2 = vor.u32 %v2997_v1, %v2596_v0  ;;  %v2724_v9 = vld [vmem:[%s3213_s21 + $0x130] sm:$0xf]  ;;  %v3031_v22 = vld [vmem:[%s3213_s21 + $0x144] sm:$0xf0]  ;;  %v2598_v30 = vld [vmem:[%s3213_s21 + $0x38] sm:$0xf0] }
  0x1d   : > { %3107 = vmatpush.bf16.msra.mxu2 %v3057_v4  ;;  %3108 = vmatpush.bf16.msra.mxu3 %v3057_v4  ;;  %v3075_v4 = vld [vmem:[%s4018_s3 + $0x28] sm:$0xff]  ;;  %v3033_v34 = vld [vmem:[%s3213_s21 + $0x154] sm:$0xf0]  ;;  %v3072_v40 = vld [vmem:[%s4018_s3 + $0x10] sm:$0xff] }
  0x1e   : > { %v3003_v37 = vld [vmem:[%s3213_s21 + $0x64] sm:$0xf0]  ;;  %v2998_v41 = vld [vmem:[%s3213_s21 + $0x44] sm:$0xf]  ;;  %v2628_v48 = vld [vmem:[%s3213_s21 + $0x70] sm:$0xf] }
  0x1f   : > { %v3000_v53 = vld [vmem:[%s3213_s21 + $0x54] sm:$0xf]  ;;  %v2614_v54 = vld [vmem:[%s3213_s21 + $0x58] sm:$0xf0]  ;;  %v2756_v57 = vld [vmem:[%s3213_s21 + $0x170] sm:$0xf] }
  0x20   : > { %3109 = vmatpush.bf16.msra.mxu1 %v3056_v5  ;;  %808 = vmatpush.bf16.msra.mxu0 %v3056_v5  ;;  %v3037_v58 = vld [vmem:[%s3213_s21 + $0x174] sm:$0xf0]  ;;  %v3070_v62 = vld [vmem:[%s4018_s3] sm:$0xff]  ;;  %v2622_v0 = vld [vmem:[%s3213_s21 + $0x68] sm:$0xf0] }
  0x21   : > { %3110 = vmatpush.bf16.msra.mxu2 %v3056_v5  ;;  %3111 = vmatpush.bf16.msra.mxu3 %v3056_v5  ;;  %v2992_v5 = vld [vmem:[%s3213_s21 + $0x14] sm:$0xf] }
  0x24   : > { %3112 = vmatpush.bf16.msra.mxu1 %v3055_v6  ;;  %809 = vmatpush.bf16.msra.mxu0 %v3055_v6 }
  0x25   : > { %3113 = vmatpush.bf16.msra.mxu2 %v3055_v6  ;;  %3114 = vmatpush.bf16.msra.mxu3 %v3055_v6  ;;  %v2582_v6 = vld [vmem:[%s3213_s21 + $0x18] sm:$0xf0] }
  0x28   : > { %3115 = vmatpush.bf16.msra.mxu1 %v3054_v7  ;;  %810 = vmatpush.bf16.msra.mxu0 %v3054_v7 }
  0x29   : > { %3116 = vmatpush.bf16.msra.mxu2 %v3054_v7  ;;  %3117 = vmatpush.bf16.msra.mxu3 %v3054_v7  ;;  %v2585_v7 = vor.u32 %v2992_v5, %v2582_v6 }
  0x2b   : > { %851 = vmatmul.bf16.vlgmr.msra.gmra.mxu1 %v2637_v11  ;;  %811 = vmatmul.bf16.vlgmr.msra.gmra.mxu0 %v2573_v36  ;;  %v2620_v36 = vld [vmem:[%s3213_s21 + $0x60] sm:$0xf] }
  0x2c   : > { %972 = vmatpush.bf16.msrb.mxu1 %v3069_v10  ;;  %891 = vmatmul.bf16.vlgmr.msra.gmra.mxu2 %v2701_v42  ;;  %v3029_v10 = vld [vmem:[%s3213_s21 + $0x134] sm:$0xf0]  ;;  %v2621_v38 = vor.u32 %v3003_v37, %v2620_v36  ;;  %v2606_v42 = vld [vmem:[%s3213_s21 + $0x48] sm:$0xf0]  ;;  %v2772_v37 = vld [vmem:[%s3213_s21 + $0x190] sm:$0xf] }
  0x2d   : > { %1305 = vmatpush.bf16.msrb.mxu2 %v3077_v46  ;;  %v2725_v11 = vor.u32 %v3029_v10, %v2724_v9  ;;  %v2609_v43 = vor.u32 %v2998_v41, %v2606_v42  ;;  %v3035_v46 = vld [vmem:[%s3213_s21 + $0x164] sm:$0xf0]  ;;  %v2630_v9 = vld [vmem:[%s3213_s21 + $0x78] sm:$0xf0] }
  0x30   : > { %973 = vmatpush.bf16.msrb.mxu1 %v3068_v12  ;;  %v2604_v12 = vld [vmem:[%s3213_s21 + $0x40] sm:$0xf] }
  0x31   : > { %1306 = vmatpush.bf16.msrb.mxu2 %v3076_v56 }
  0x34   : > { %974 = vmatpush.bf16.msrb.mxu1 %v3067_v13  ;;  %v2999_v13 = vld [vmem:[%s3213_s21 + $0x44] sm:$0xf0] }
  0x35   : > { %1307 = vmatpush.bf16.msrb.mxu2 %v3075_v4  ;;  %v2605_v14 = vor.u32 %v2999_v13, %v2604_v12 }
  0x38   : > { %975 = vmatpush.bf16.msrb.mxu1 %v3066_v17  ;;  %v2994_v17 = vld [vmem:[%s3213_s21 + $0x24] sm:$0xf] }
  0x39   : > { %v2593_v19 = vor.u32 %v2994_v17, %v2590_v18 }
  0x3b   : > { %856 = vmatmul.bf16.gmra.mxu1 %v2645_v16  ;;  %816 = vmatmul.bf16.gmra.mxu0 %v2581_v45  ;;  %v3074_v16 = vld [vmem:[%s4018_s3 + $0x20] sm:$0xff] }
  0x3c   : > { %976 = vmatpush.bf16.msrb.mxu1 %v3065_v21  ;;  %896 = vmatmul.bf16.gmra.mxu2 %v2709_v52  ;;  %v2732_v21 = vld [vmem:[%s3213_s21 + $0x140] sm:$0xf]  ;;  %v3071_v52 = vld [vmem:[%s4018_s3 + $0x8] sm:$0xff] }
  0x3d   : > { %1308 = vmatpush.bf16.msrb.mxu2 %v3074_v16  ;;  %v2733_v23 = vor.u32 %v3031_v22, %v2732_v21  ;;  %v2748_v45 = vld [vmem:[%s3213_s21 + $0x160] sm:$0xf]  ;;  %v3039_v16 = vld [vmem:[%s3213_s21 + $0x184] sm:$0xf0]  ;;  %v2638_v21 = vld [vmem:[%s3213_s21 + $0x88] sm:$0xf0] }
  0x3e   : > { %v2749_v47 = vor.u32 %v3035_v46, %v2748_v45 }
  0x40   : > { %977 = vmatpush.bf16.msrb.mxu1 %v3064_v25  ;;  %v3001_v25 = vld [vmem:[%s3213_s21 + $0x54] sm:$0xf0] }
  0x44   : > { %978 = vmatpush.bf16.msrb.mxu1 %v3063_v29  ;;  %v2996_v29 = vld [vmem:[%s3213_s21 + $0x34] sm:$0xf] }
  0x45   : > { %v2601_v31 = vor.u32 %v2996_v29, %v2598_v30  ;;  %v2980_v29 = vld [vmem:[%s4020_s5 + $0x70] sm:$0xf]  ;;  %v3093_v30 = vld [vmem:[%s4020_s5 + $0x74] sm:$0xf0] }
  0x48   : > { %979 = vmatpush.bf16.msrb.mxu1 %v3062_v33  ;;  %v2740_v33 = vld [vmem:[%s3213_s21 + $0x150] sm:$0xf] }
  0x49   : > { %v2741_v35 = vor.u32 %v3033_v34, %v2740_v33  ;;  %v3092_v33 = vld [vmem:[%s4020_s5 + $0x74] sm:$0xf]  ;;  %v2982_v34 = vld [vmem:[%s4020_s5 + $0x78] sm:$0xf0] }
  0x4b   : > { %861 = vmatmul.bf16.gmra.mxu1 %v2653_v20  ;;  %821 = vmatmul.bf16.gmra.mxu0 %v2589_v55  ;;  %v2617_v55 = vor.u32 %v3000_v53, %v2614_v54 }
  0x4c   : > { %901 = vmatmul.bf16.gmra.mxu2 %v2717_v63  ;;  %v3002_v63 = vld [vmem:[%s3213_s21 + $0x64] sm:$0xf] }
  0x5b   : > { %866 = vmatmul.bf16.gmra.mxu1 %v2661_v24  ;;  %826 = vmatmul.bf16.gmra.mxu0 %v2597_v2  ;;  %v2612_v24 = vld [vmem:[%s3213_s21 + $0x50] sm:$0xf]  ;;  %v2625_v2 = vor.u32 %v3002_v63, %v2622_v0  ;;  %v3090_v0 = vld [vmem:[%s4020_s5 + $0x64] sm:$0xf] }
  0x5c   : > { %906 = vmatmul.bf16.gmra.mxu2 %v2725_v11  ;;  %v2613_v26 = vor.u32 %v3001_v25, %v2612_v24 }
  0x6b   : > { %871 = vmatmul.bf16.gmra.mxu1 %v2669_v28  ;;  %831 = vmatmul.bf16.gmra.mxu0 %v2605_v14  ;;  %v3073_v28 = vld [vmem:[%s4018_s3 + $0x18] sm:$0xff]  ;;  %v2764_v14 = vld [vmem:[%s3213_s21 + $0x180] sm:$0xf] }
  0x6c   : > { %911 = vmatmul.bf16.gmra.mxu2 %v2733_v23  ;;  %v2765_v17 = vor.u32 %v3039_v16, %v2764_v14 }
  0x6d   : > { %1309 = vmatpush.bf16.msrb.mxu2 %v3073_v28 }
  0x6e   : > { %931 = vmatmul.bf16.vlgmr.msra.gmra.mxu3 %v2765_v17 }
  0x71   : > { %1310 = vmatpush.bf16.msrb.mxu2 %v3072_v40 }
  0x75   : > { %1311 = vmatpush.bf16.msrb.mxu2 %v3071_v52 }
  0x79   : > { %1312 = vmatpush.bf16.msrb.mxu2 %v3070_v62  ;;  %v3091_v62 = vld [vmem:[%s4020_s5 + $0x64] sm:$0xf0] }
  0x7b   : > { %876 = vmatmul.bf16.gmra.mxu1 %v2677_v32  ;;  %836 = vmatmul.bf16.gmra.mxu0 %v2613_v26  ;;  %v3373_v26 = vld [vmem:[%s4017_s2] ss:$0 sm:$0xff] }
  0x7c   : > { %916 = vmatmul.bf16.gmra.mxu2 %v2741_v35  ;;  %v2985_v35 = vor.u32 %v3092_v33, %v2982_v34  ;;  %v2964_v33 = vld [vmem:[%s4020_s5 + $0x50] sm:$0xf]  ;;  %v3089_v34 = vld [vmem:[%s4020_s5 + $0x54] sm:$0xf0] }
  0x7e   : > { %1841 = vmatpush.bf16.msrb.mxu0 %v2985_v35 }
  0x8b   : > { %881 = vmatmul.bf16.gmra.mxu1 %v2685_v39  ;;  %841 = vmatmul.bf16.gmra.mxu0 %v2621_v38  ;;  %v3041_v38 = vld [vmem:[%s3213_s21 + $0x194] sm:$0xf0] }
  0x8c   : > { %921 = vmatmul.bf16.gmra.mxu2 %v2749_v47  ;;  %v2773_v42 = vor.u32 %v3041_v38, %v2772_v37  ;;  %v2965_v37 = vor.u32 %v3089_v34, %v2964_v33  ;;  %v3088_v38 = vld [vmem:[%s4020_s5 + $0x54] sm:$0xf]  ;;  %v3014_v33 = vld [vmem:[%s3213_s21 + $0xc4] sm:$0xf]  ;;  %v2670_v34 = vld [vmem:[%s3213_s21 + $0xc8] sm:$0xf0] }
  0x8e   : > { %936 = vmatmul.bf16.gmra.mxu3 %v2773_v42  ;;  %v2788_v42 = vld [vmem:[%s3213_s21 + $0x1b0] sm:$0xf] }
  0x9b   : > { %886 = vmatmul.bf16.gmra.mxu1 %v2693_v49  ;;  %v3005_v49 = vld [vmem:[%s3213_s21 + $0x74] sm:$0xf0] }
  0x9c   : > { %v2629_v50 = vor.u32 %v3005_v49, %v2628_v48  ;;  %v3008_v49 = vld [vmem:[%s3213_s21 + $0x94] sm:$0xf] }
  0x9e   : > { %846 = vmatmul.bf16.gmra.mxu0 %v2629_v50  ;;  %v2646_v50 = vld [vmem:[%s3213_s21 + $0x98] sm:$0xf0] }
  0x9f   : > { %v2649_v53 = vor.u32 %v3008_v49, %v2646_v50 }
  0xa8   : > { %v3276_v60 = vpop.f32.mrf.mxu1  ;;  %v812_v1 = vpop.f32.mrf.mxu0 }
  0xa9   : > { %v813_v28 = vadd.f32 %v3373_v26, %v812_v1  ;;  %v2974_v1 = vld [vmem:[%s4020_s5 + $0x68] sm:$0xf0] }
  0xab   : > { %980 = vmatmul.bf16.vlgmr.msrb.gmra.mxu1 %v2577_v59  ;;  %v2757_v59 = vor.u32 %v3037_v58, %v2756_v57 }
  0xad   : > { %926 = vmatmul.bf16.gmra.mxu2 %v2757_v59  ;;  %v2972_v59 = vld [vmem:[%s4020_s5 + $0x60] sm:$0xf] }
  0xae   : > { %v2973_v63 = vor.u32 %v3091_v62, %v2972_v59 }
  0xaf   : > { %v3360_v13 = vpop.f32.mrf.mxu2 }
  0xb0   : > { %v3282_v3 = vpop.f32.mrf.mxu1  ;;  %v814_v6 = vpop.f32.mrf.mxu0 }
  0xb1   : > { %v815_v40 = vadd.f32 %v3373_v26, %v814_v6  ;;  %v2780_v6 = vld [vmem:[%s3213_s21 + $0x1a0] sm:$0xf] }
  0xb7   : > { %v3368_v23 = vpop.f32.mrf.mxu2 }
  0xb8   : > { %v3289_v8 = vpop.f32.mrf.mxu1  ;;  %v817_v12 = vpop.f32.mrf.mxu0 }
  0xb9   : > { %v818_v58 = vadd.f32 %v3373_v26, %v817_v12 }
  0xbb   : > { %985 = vmatmul.bf16.gmra.mxu1 %v2585_v7  ;;  %v3004_v7 = vld [vmem:[%s3213_s21 + $0x74] sm:$0xf] }
  0xbc   : > { %v2633_v10 = vor.u32 %v3004_v7, %v2630_v9  ;;  %v3043_v7 = vld [vmem:[%s3213_s21 + $0x1a4] sm:$0xf0] }
  0xbd   : > { %v2781_v12 = vor.u32 %v3043_v7, %v2780_v6  ;;  %v3087_v6 = vld [vmem:[%s4020_s5 + $0x44] sm:$0xf0] }
  0xbf   : > { %v3391_v45 = vpop.f32.mrf.mxu2  ;;  %941 = vmatmul.bf16.gmra.mxu3 %v2781_v12 }
  0xc0   : > { %v3295_v15 = vpop.f32.mrf.mxu1  ;;  %v819_v22 = vpop.f32.mrf.mxu0 }
  0xc1   : > { %v820_v9 = vadd.f32 %v3373_v26, %v819_v22 }
  0xc7   : > { %v3395_v57 = vpop.f32.mrf.mxu2 }
  0xc8   : > { %v3302_v20 = vpop.f32.mrf.mxu1  ;;  %v822_v36 = vpop.f32.mrf.mxu0 }
  0xc9   : > { %v823_v22 = vadd.f32 %v3373_v26, %v822_v36  ;;  %v2966_v36 = vld [vmem:[%s4020_s5 + $0x58] sm:$0xf0] }
  0xcb   : > { %990 = vmatmul.bf16.gmra.mxu1 %v2593_v19  ;;  %v3006_v19 = vld [vmem:[%s3213_s21 + $0x84] sm:$0xf] }
  0xcc   : > { %v2641_v24 = vor.u32 %v3006_v19, %v2638_v21 }
  0xd0   : > { %v3308_v27 = vpop.f32.mrf.mxu1 }
  0xd8   : > { %v3315_v32 = vpop.f32.mrf.mxu1 }
  0xdb   : > { %995 = vmatmul.bf16.gmra.mxu1 %v2601_v31  ;;  %v2981_v31 = vor.u32 %v3093_v30, %v2980_v29 }
  0xdd   : > { %1672 = vmatpush.bf16.msrb.mxu3 %v2981_v31 }
  0xe0   : > { %v3321_v39 = vpop.f32.mrf.mxu1 }
  0xe1   : > { %1673 = vmatpush.bf16.msrb.mxu3 %v2973_v63 }
  0xe5   : > { %1674 = vmatpush.bf16.msrb.mxu3 %v2965_v37 }
  0xe8   : > { %v3328_v44 = vpop.f32.mrf.mxu1 }
  0xeb   : > { %1000 = vmatmul.bf16.gmra.mxu1 %v2609_v43 }
  0xf0   : > { %v3334_v51 = vpop.f32.mrf.mxu1 }
  0xf8   : > { %v3341_v56 = vpop.f32.mrf.mxu1 }
  0xfb   : > { %1005 = vmatmul.bf16.gmra.mxu1 %v2617_v55  ;;  %v824_v55 = vpop.f32.mrf.mxu0 }
 0x100   : > { %v3345_v61 = vpop.f32.mrf.mxu1 }
 0x103   : > { %v827_v17 = vpop.f32.mrf.mxu0 }
 0x108   : > { %v3352_v4 = vpop.f32.mrf.mxu1 }
 0x10b   : > { %1010 = vmatmul.bf16.gmra.mxu1 %v2625_v2  ;;  %v2977_v2 = vor.u32 %v3090_v0, %v2974_v1  ;;  %v829_v35 = vpop.f32.mrf.mxu0 }
 0x10d   : > { %1842 = vmatpush.bf16.msrb.mxu0 %v2977_v2  ;;  %v2956_v2 = vld [vmem:[%s4020_s5 + $0x40] sm:$0xf] }
 0x10e   : > { %v2957_v7 = vor.u32 %v3087_v6, %v2956_v2  ;;  %v3016_v6 = vld [vmem:[%s3213_s21 + $0xd4] sm:$0xf] }
 0x110   : > { %v3354_v5 = vpop.f32.mrf.mxu1  ;;  %1675 = vmatpush.bf16.msrb.mxu3 %v2957_v7  ;;  %v2678_v7 = vld [vmem:[%s3213_s21 + $0xd8] sm:$0xf0] }
 0x113   : > { %v832_v62 = vpop.f32.mrf.mxu0 }
 0x118   : > { %v3358_v11 = vpop.f32.mrf.mxu1 }
 0x11b   : > { %1015 = vmatmul.bf16.gmra.mxu1 %v2633_v10 }
 0x120   : > { %v3364_v18 = vpop.f32.mrf.mxu1 }
 0x128   : > { %v981_v25 = vpop.f32.mrf.mxu1 }
 0x129   : > { %v982_v41 = vadd.f32 %v981_v25, %v813_v28  ;;  %v2654_v25 = vld [vmem:[%s3213_s21 + $0xa8] sm:$0xf0]  ;;  %v3415_v28 = vpop.f32.mrf.mxu2 }
 0x12b   : > { %1020 = vmatmul.bf16.gmra.mxu1 %v2641_v24  ;;  %v1141_v47 = vmax.f32 %v982_v41, 0.0  ;;  %v3010_v24 = vld [vmem:[%s3213_s21 + $0xa4] sm:$0xf] }
 0x12c   : > { %v2657_v30 = vor.u32 %v3010_v24, %v2654_v25  ;;  %v834_v25 = vpop.f32.mrf.mxu0 }
 0x130   : > { %v983_v43 = vpop.f32.mrf.mxu1 }
 0x131   : > { %v984_v46 = vadd.f32 %v983_v43, %v815_v40  ;;  %v2969_v40 = vor.u32 %v3088_v38, %v2966_v36  ;;  %v3430_v41 = vpop.f32.mrf.mxu2  ;;  %v3045_v43 = vld [vmem:[%s3213_s21 + $0x1b4] sm:$0xf0]  ;;  %v2673_v38 = vor.u32 %v3014_v33, %v2670_v34  ;;  %v3051_v33 = vld [vmem:[%s3213_s21 + $0x1e4] sm:$0xf0] }
 0x133   : > { %v1142_v48 = vmax.f32 %v984_v46, 0.0  ;;  %v825_v46 = vadd.f32 %v3373_v26, %v824_v55  ;;  %1843 = vmatpush.bf16.msrb.mxu0 %v2969_v40  ;;  %v828_v55 = vadd.f32 %v3373_v26, %v827_v17  ;;  %v830_v17 = vadd.f32 %v3373_v26, %v829_v35 }
 0x134   : > { %v837_v35 = vpop.f32.mrf.mxu0  ;;  %v833_v40 = vadd.f32 %v3373_v26, %v832_v62 }
 0x135   : > { %v1205_v52 = vpack.c.bf16 %v1142_v48, %v1141_v47  ;;  %v2789_v48 = vor.u32 %v3045_v43, %v2788_v42  ;;  %v2948_v42 = vld [vmem:[%s4020_s5 + $0x30] sm:$0xf]  ;;  %v3085_v43 = vld [vmem:[%s4020_s5 + $0x34] sm:$0xf0] }
 0x137   : > { %1313 = vmatmul.bf16.vlgmr.msrb.gmra.mxu2 %v1205_v52  ;;  %946 = vmatmul.bf16.gmra.mxu3 %v2789_v48  ;;  %v3084_v48 = vld [vmem:[%s4020_s5 + $0x34] sm:$0xf] }
 0x138   : > { %v986_v54 = vpop.f32.mrf.mxu1 }
 0x139   : > { %v987_v10 = vadd.f32 %v986_v54, %v818_v58  ;;  %v3012_v54 = vld [vmem:[%s3213_s21 + $0xb4] sm:$0xf]  ;;  %v2662_v58 = vld [vmem:[%s3213_s21 + $0xb8] sm:$0xf0]  ;;  %v3437_v1 = vpop.f32.mrf.mxu2 }
 0x13a   : > { %v2665_v63 = vor.u32 %v3012_v54, %v2662_v58  ;;  %v835_v54 = vadd.f32 %v3373_v26, %v834_v25  ;;  %v2942_v25 = vld [vmem:[%s4020_s5 + $0x28] sm:$0xf0] }
 0x13b   : > { %1025 = vmatmul.bf16.gmra.mxu1 %v2649_v53  ;;  %v1143_v19 = vmax.f32 %v987_v10, 0.0  ;;  %v2958_v10 = vld [vmem:[%s4020_s5 + $0x48] sm:$0xf0] }
 0x13c   : > { %v839_v2 = vpop.f32.mrf.mxu0 }
 0x13d   : > { %v840_v34 = vadd.f32 %v3373_v26, %v839_v2 }
 0x140   : > { %v988_v14 = vpop.f32.mrf.mxu1 }
 0x141   : > { %v989_v16 = vadd.f32 %v988_v14, %v820_v9  ;;  %v3086_v9 = vld [vmem:[%s4020_s5 + $0x44] sm:$0xf]  ;;  %v2796_v14 = vld [vmem:[%s3213_s21 + $0x1c0] sm:$0xf] }
 0x142   : > { %v2961_v12 = vor.u32 %v3086_v9, %v2958_v10 }
 0x143   : > { %v1144_v21 = vmax.f32 %v989_v16, 0.0  ;;  %v3047_v16 = vld [vmem:[%s3213_s21 + $0x1c4] sm:$0xf0] }
 0x144   : > { %1844 = vmatpush.bf16.msrb.mxu0 %v2961_v12  ;;  %v2681_v12 = vor.u32 %v3016_v6, %v2678_v7  ;;  %v2820_v6 = vld [vmem:[%s3213_s21 + $0x1f0] sm:$0xf]  ;;  %v3053_v7 = vld [vmem:[%s3213_s21 + $0x1f4] sm:$0xf0] }
 0x145   : > { %v1206_v29 = vpack.c.bf16 %v1144_v21, %v1143_v19  ;;  %v2797_v21 = vor.u32 %v3047_v16, %v2796_v14  ;;  %v838_v16 = vadd.f32 %v3373_v26, %v837_v35 }
 0x147   : > { %1318 = vmatmul.bf16.gmra.mxu2 %v1206_v29  ;;  %951 = vmatmul.bf16.gmra.mxu3 %v2797_v21 }
 0x148   : > { %v991_v31 = vpop.f32.mrf.mxu1 }
 0x149   : > { %v992_v47 = vadd.f32 %v991_v31, %v823_v22 }
 0x14b   : > { %1030 = vmatmul.bf16.gmra.mxu1 %v2657_v30  ;;  %v1145_v52 = vmax.f32 %v992_v47, 0.0  ;;  %v3455_v30 = vpop.f32.mrf.mxu2  ;;  %v2949_v47 = vor.u32 %v3085_v43, %v2948_v42 }
 0x14d   : > { %1676 = vmatpush.bf16.msrb.mxu3 %v2949_v47  ;;  %v3018_v47 = vld [vmem:[%s3213_s21 + $0xe4] sm:$0xf] }
 0x150   : > { %v993_v49 = vpop.f32.mrf.mxu1 }
 0x151   : > { %v994_v50 = vadd.f32 %v993_v49, %v825_v46  ;;  %v2950_v49 = vld [vmem:[%s4020_s5 + $0x38] sm:$0xf0] }
 0x153   : > { %v1146_v53 = vmax.f32 %v994_v50, 0.0  ;;  %v3466_v46 = vpop.f32.mrf.mxu2  ;;  %v2953_v50 = vor.u32 %v3084_v48, %v2950_v49  ;;  %v2686_v48 = vld [vmem:[%s3213_s21 + $0xe8] sm:$0xf0] }
 0x155   : > { %v1207_v59 = vpack.c.bf16 %v1146_v53, %v1145_v52  ;;  %v2804_v52 = vld [vmem:[%s3213_s21 + $0x1d0] sm:$0xf]  ;;  %v3049_v53 = vld [vmem:[%s3213_s21 + $0x1d4] sm:$0xf0]  ;;  %1845 = vmatpush.bf16.msrb.mxu0 %v2953_v50  ;;  %v2689_v50 = vor.u32 %v3018_v47, %v2686_v48  ;;  %v2926_v47 = vld [vmem:[%s4020_s5 + $0x8] sm:$0xf0] }
 0x157   : > { %1323 = vmatmul.bf16.gmra.mxu2 %v1207_v59  ;;  %v2805_v59 = vor.u32 %v3049_v53, %v2804_v52 }
 0x158   : > { %v996_v0 = vpop.f32.mrf.mxu1 }
 0x159   : > { %v997_v19 = vadd.f32 %v996_v0, %v828_v55  ;;  %956 = vmatmul.bf16.gmra.mxu3 %v2805_v59  ;;  %v2932_v59 = vld [vmem:[%s4020_s5 + $0x10] sm:$0xf] }
 0x15b   : > { %1035 = vmatmul.bf16.gmra.mxu1 %v2665_v63  ;;  %v1147_v31 = vmax.f32 %v997_v19, 0.0  ;;  %v3479_v10 = vpop.f32.mrf.mxu2  ;;  %v3083_v19 = vld [vmem:[%s4020_s5 + $0x24] sm:$0xf0] }
 0x160   : > { %v998_v24 = vpop.f32.mrf.mxu1 }
 0x161   : > { %v999_v29 = vadd.f32 %v998_v24, %v830_v17  ;;  %v2940_v17 = vld [vmem:[%s4020_s5 + $0x20] sm:$0xf]  ;;  %v3082_v24 = vld [vmem:[%s4020_s5 + $0x24] sm:$0xf] }
 0x162   : > { %v2941_v21 = vor.u32 %v3083_v19, %v2940_v17 }
 0x163   : > { %v1148_v22 = vmax.f32 %v999_v29, 0.0  ;;  %v2945_v29 = vor.u32 %v3082_v24, %v2942_v25  ;;  %v3497_v35 = vpop.f32.mrf.mxu2 }
 0x164   : > { %1677 = vmatpush.bf16.msrb.mxu3 %v2941_v21 }
 0x165   : > { %v1208_v37 = vpack.c.bf16 %v1148_v22, %v1147_v31  ;;  %v842_v31 = vpop.f32.mrf.mxu0  ;;  %v2812_v22 = vld [vmem:[%s3213_s21 + $0x1e0] sm:$0xf]  ;;  %1846 = vmatpush.bf16.msrb.mxu0 %v2945_v29  ;;  %v3020_v29 = vld [vmem:[%s3213_s21 + $0xf4] sm:$0xf] }
 0x167   : > { %1328 = vmatmul.bf16.gmra.mxu2 %v1208_v37 }
 0x168   : > { %v1001_v36 = vpop.f32.mrf.mxu1 }
 0x169   : > { %v1002_v58 = vadd.f32 %v1001_v36, %v833_v40 }
 0x16b   : > { %1040 = vmatmul.bf16.gmra.mxu1 %v2673_v38  ;;  %v1149_v0 = vmax.f32 %v1002_v58, 0.0  ;;  %v2813_v38 = vor.u32 %v3051_v33, %v2812_v22  ;;  %v843_v58 = vadd.f32 %v3373_v26, %v842_v31  ;;  %v2694_v31 = vld [vmem:[%s3213_s21 + $0xf8] sm:$0xf0] }
 0x16c   : > { %v2697_v33 = vor.u32 %v3020_v29, %v2694_v31  ;;  %v3024_v31 = vld [vmem:[%s3213_s21 + $0x114] sm:$0xf] }
 0x16d   : > { %961 = vmatmul.bf16.gmra.mxu3 %v2813_v38  ;;  %v844_v52 = vpop.f32.mrf.mxu0  ;;  %v2924_v38 = vld [vmem:[%s4020_s5] sm:$0xf] }
 0x170   : > { %v1003_v62 = vpop.f32.mrf.mxu1 }
 0x171   : > { %v1004_v63 = vadd.f32 %v1003_v62, %v835_v54  ;;  %v3501_v54 = vpop.f32.mrf.mxu2  ;;  %v3081_v62 = vld [vmem:[%s4020_s5 + $0x14] sm:$0xf0] }
 0x173   : > { %v1150_v55 = vmax.f32 %v1004_v63, 0.0  ;;  %v2933_v63 = vor.u32 %v3081_v62, %v2932_v59 }
 0x175   : > { %v1209_v9 = vpack.c.bf16 %v1150_v55, %v1149_v0  ;;  %v3080_v0 = vld [vmem:[%s4020_s5 + $0x14] sm:$0xf]  ;;  %v2934_v55 = vld [vmem:[%s4020_s5 + $0x18] sm:$0xf0]  ;;  %1678 = vmatpush.bf16.msrb.mxu3 %v2933_v63  ;;  %v847_v19 = vpop.f32.mrf.mxu0  ;;  %v3022_v63 = vld [vmem:[%s3213_s21 + $0x104] sm:$0xf] }
 0x176   : > { %v2937_v2 = vor.u32 %v3080_v0, %v2934_v55  ;;  %v2702_v0 = vld [vmem:[%s3213_s21 + $0x108] sm:$0xf0] }
 0x177   : > { %1333 = vmatmul.bf16.gmra.mxu2 %v1209_v9  ;;  %v845_v9 = vadd.f32 %v3373_v26, %v844_v52 }
 0x178   : > { %v1006_v14 = vpop.f32.mrf.mxu1  ;;  %1847 = vmatpush.bf16.msrb.mxu0 %v2937_v2  ;;  %v2705_v2 = vor.u32 %v3022_v63, %v2702_v0 }
 0x179   : > { %v1007_v37 = vadd.f32 %v1006_v14, %v838_v16  ;;  %v2821_v14 = vor.u32 %v3053_v7, %v2820_v6  ;;  %v3519_v25 = vpop.f32.mrf.mxu2 }
 0x17b   : > { %1045 = vmatmul.bf16.gmra.mxu1 %v2681_v12  ;;  %v1151_v42 = vmax.f32 %v1007_v37, 0.0  ;;  %v848_v37 = vadd.f32 %v3373_v26, %v847_v19 }
 0x17d   : > { %966 = vmatmul.bf16.gmra.mxu3 %v2821_v14  ;;  %v855_v14 = vadd.f32 %v3373_v26, %v3282_v3  ;;  %v858_v3 = vadd.f32 %v3373_v26, %v3289_v8 }
 0x180   : > { %v1008_v36 = vpop.f32.mrf.mxu1 }
 0x181   : > { %v1009_v40 = vadd.f32 %v1008_v36, %v840_v34  ;;  %v3079_v36 = vld [vmem:[%s4020_s5 + $0x4] sm:$0xf0]  ;;  %v3536_v48 = vpop.f32.mrf.mxu2 }
 0x183   : > { %v1152_v43 = vmax.f32 %v1009_v40, 0.0  ;;  %v849_v40 = vpop.f32.mrf.mxu0 }
 0x185   : > { %v1210_v49 = vpack.c.bf16 %v1152_v43, %v1151_v42  ;;  %v2925_v42 = vor.u32 %v3079_v36, %v2924_v38  ;;  %v3078_v43 = vld [vmem:[%s4020_s5 + $0x4] sm:$0xf]  ;;  %v3560_v36 = vld [vmem:[%s4019_s4] ss:$0 sm:$0xff] }
 0x187   : > { %1338 = vmatmul.bf16.gmra.mxu2 %v1210_v49  ;;  %1679 = vmatpush.bf16.msrb.mxu3 %v2925_v42  ;;  %v2929_v49 = vor.u32 %v3078_v43, %v2926_v47 }
 0x188   : > { %v1011_v53 = vpop.f32.mrf.mxu1 }
 0x189   : > { %v1012_v12 = vadd.f32 %v1011_v53, %v843_v58  ;;  %1848 = vmatpush.bf16.msrb.mxu0 %v2929_v49  ;;  %v3541_v6 = vpop.f32.mrf.mxu2 }
 0x18b   : > { %1050 = vmatmul.bf16.gmra.mxu1 %v2689_v50  ;;  %v1153_v21 = vmax.f32 %v1012_v12, 0.0  ;;  %v850_v50 = vadd.f32 %v3373_v26, %v849_v40  ;;  %v3545_v12 = vpop.f32.mrf.mxu3  ;;  %v860_v40 = vadd.f32 %v3373_v26, %v3295_v15 }
 0x190   : > { %v1013_v16 = vpop.f32.mrf.mxu1 }
 0x191   : > { %v1014_v17 = vadd.f32 %v1013_v16, %v845_v9  ;;  %v853_v9 = vadd.f32 %v3373_v26, %v3276_v60 }
 0x193   : > { %v1154_v24 = vmax.f32 %v1014_v17, 0.0  ;;  %v3553_v60 = vpop.f32.mrf.mxu3 }
 0x195   : > { %v1211_v22 = vpack.c.bf16 %v1154_v24, %v1153_v21  ;;  %v3549_v21 = vpop.f32.mrf.mxu2 }
 0x197   : > { %1343 = vmatmul.bf16.gmra.mxu2 %v1211_v22  ;;  %v2710_v22 = vld [vmem:[%s3213_s21 + $0x118] sm:$0xf0] }
 0x198   : > { %v1016_v34 = vpop.f32.mrf.mxu1 }
 0x199   : > { %v1017_v52 = vadd.f32 %v1016_v34, %v848_v37  ;;  %v2713_v34 = vor.u32 %v3024_v31, %v2710_v22 }
 0x19b   : > { %1055 = vmatmul.bf16.gmra.mxu1 %v2697_v33  ;;  %v1155_v59 = vmax.f32 %v1017_v52, 0.0  ;;  %v3565_v52 = vpop.f32.mrf.mxu3 }
 0x1a0   : > { %v1018_v53 = vpop.f32.mrf.mxu1 }
 0x1a1   : > { %v1019_v58 = vadd.f32 %v1018_v53, %v850_v50 }
 0x1a3   : > { %v1156_v62 = vmax.f32 %v1019_v58, 0.0 }
 0x1a5   : > { %v1212_v55 = vpack.c.bf16 %v1156_v62, %v1155_v59  ;;  %v3026_v59 = vld [vmem:[%s3213_s21 + $0x124] sm:$0xf]  ;;  %v2718_v62 = vld [vmem:[%s3213_s21 + $0x128] sm:$0xf0] }
 0x1a6   : > { %v2721_v15 = vor.u32 %v3026_v59, %v2718_v62 }
 0x1a7   : > { %1348 = vmatmul.bf16.gmra.mxu2 %v1212_v55 }
 0x1a8   : > { %v1021_v7 = vpop.f32.mrf.mxu1 }
 0x1a9   : > { %v1022_v16 = vadd.f32 %v1021_v7, %v853_v9 }
 0x1ab   : > { %1060 = vmatmul.bf16.gmra.mxu1 %v2705_v2  ;;  %v1157_v24 = vmax.f32 %v1022_v16, 0.0  ;;  %v863_v16 = vadd.f32 %v3373_v26, %v3302_v20 }
 0x1b0   : > { %v1023_v17 = vpop.f32.mrf.mxu1 }
 0x1b1   : > { %v1024_v19 = vadd.f32 %v1023_v17, %v855_v14  ;;  %v3570_v14 = vpop.f32.mrf.mxu3  ;;  %v865_v17 = vadd.f32 %v3373_v26, %v3308_v27 }
 0x1b3   : > { %v1158_v29 = vmax.f32 %v1024_v19, 0.0 }
 0x1b5   : > { %v1213_v33 = vpack.c.bf16 %v1158_v29, %v1157_v24 }
 0x1b7   : > { %1353 = vmatmul.bf16.gmra.mxu2 %v1213_v33 }
 0x1b8   : > { %v1026_v37 = vpop.f32.mrf.mxu1 }
 0x1b9   : > { %v1027_v42 = vadd.f32 %v1026_v37, %v858_v3  ;;  %v2726_v3 = vld [vmem:[%s3213_s21 + $0x138] sm:$0xf0] }
 0x1ba   : > { %v1314_v38 = vpop.f32.mrf.mxu2 }
 0x1bb   : > { %1065 = vmatmul.bf16.gmra.mxu1 %v2713_v34  ;;  %v1315_v47 = vadd.f32 %v3560_v36, %v1314_v38  ;;  %v1159_v53 = vmax.f32 %v1027_v42, 0.0  ;;  %v3028_v38 = vld [vmem:[%s3213_s21 + $0x134] sm:$0xf] }
 0x1bc   : > { %v2729_v27 = vor.u32 %v3028_v38, %v2726_v3 }
 0x1bd   : > { %v1474_v63 = vmax.f32 %v1315_v47, 0.0  ;;  %v3580_v47 = vpop.f32.mrf.mxu3 }
 0x1c0   : > { %v1028_v43 = vpop.f32.mrf.mxu1 }
 0x1c1   : > { %v1029_v49 = vadd.f32 %v1028_v43, %v860_v40 }
 0x1c2   : > { %v1316_v50 = vpop.f32.mrf.mxu2 }
 0x1c3   : > { %v1160_v58 = vmax.f32 %v1029_v49, 0.0  ;;  %v1317_v8 = vadd.f32 %v3560_v36, %v1316_v50 }
 0x1c5   : > { %v1475_v0 = vmax.f32 %v1317_v8, 0.0  ;;  %v1214_v55 = vpack.c.bf16 %v1160_v58, %v1159_v53  ;;  %v868_v53 = vadd.f32 %v3373_v26, %v3315_v32  ;;  %v870_v58 = vadd.f32 %v3373_v26, %v3321_v39  ;;  %v3586_v62 = vpop.f32.mrf.mxu3 }
 0x1c7   : > { %1358 = vmatmul.bf16.gmra.mxu2 %v1214_v55  ;;  %v1538_v2 = vpack.c.bf16 %v1475_v0, %v1474_v63 }
 0x1c8   : > { %v1031_v7 = vpop.f32.mrf.mxu1 }
 0x1c9   : > { %1680 = vmatmul.bf16.vlgmr.msrb.gmra.mxu3 %v1538_v2  ;;  %1849 = vmatmul.bf16.vlgmr.msrb.gmra.mxu0 %v1538_v2  ;;  %v1032_v19 = vadd.f32 %v1031_v7, %v863_v16  ;;  %v2734_v16 = vld [vmem:[%s3213_s21 + $0x148] sm:$0xf0] }
 0x1ca   : > { %v1319_v9 = vpop.f32.mrf.mxu2 }
 0x1cb   : > { %1070 = vmatmul.bf16.gmra.mxu1 %v2721_v15  ;;  %v1320_v29 = vadd.f32 %v3560_v36, %v1319_v9  ;;  %v1161_v33 = vmax.f32 %v1032_v19, 0.0  ;;  %v3030_v9 = vld [vmem:[%s3213_s21 + $0x144] sm:$0xf] }
 0x1cc   : > { %v2737_v39 = vor.u32 %v3030_v9, %v2734_v16 }
 0x1cd   : > { %v1476_v40 = vmax.f32 %v1320_v29, 0.0 }
 0x1d0   : > { %v1033_v24 = vpop.f32.mrf.mxu1 }
 0x1d1   : > { %v1034_v31 = vadd.f32 %v1033_v24, %v865_v17 }
 0x1d2   : > { %v1321_v22 = vpop.f32.mrf.mxu2 }
 0x1d3   : > { %v1162_v34 = vmax.f32 %v1034_v31, 0.0  ;;  %v1322_v37 = vadd.f32 %v3560_v36, %v1321_v22  ;;  %v3592_v22 = vpop.f32.mrf.mxu3 }
 0x1d5   : > { %v1477_v42 = vmax.f32 %v1322_v37, 0.0  ;;  %v1215_v43 = vpack.c.bf16 %v1162_v34, %v1161_v33  ;;  %v873_v33 = vadd.f32 %v3373_v26, %v3328_v44  ;;  %v875_v34 = vadd.f32 %v3373_v26, %v3334_v51 }
 0x1d7   : > { %1363 = vmatmul.bf16.gmra.mxu2 %v1215_v43  ;;  %v1539_v20 = vpack.c.bf16 %v1477_v42, %v1476_v40 }
 0x1d8   : > { %v1036_v49 = vpop.f32.mrf.mxu1 }
 0x1d9   : > { %1685 = vmatmul.bf16.gmra.mxu3 %v1539_v20  ;;  %1854 = vmatmul.bf16.gmra.mxu0 %v1539_v20  ;;  %v1037_v8 = vadd.f32 %v1036_v49, %v868_v53  ;;  %v3032_v49 = vld [vmem:[%s3213_s21 + $0x154] sm:$0xf] }
 0x1da   : > { %v1324_v50 = vpop.f32.mrf.mxu2 }
 0x1db   : > { %1075 = vmatmul.bf16.gmra.mxu1 %v2729_v27  ;;  %v1325_v63 = vadd.f32 %v3560_v36, %v1324_v50  ;;  %v1163_v2 = vmax.f32 %v1037_v8, 0.0  ;;  %v2742_v50 = vld [vmem:[%s3213_s21 + $0x158] sm:$0xf0]  ;;  %v3602_v53 = vpop.f32.mrf.mxu3 }
 0x1dc   : > { %v2745_v51 = vor.u32 %v3032_v49, %v2742_v50 }
 0x1dd   : > { %v1478_v17 = vmax.f32 %v1325_v63, 0.0 }
 0x1e0   : > { %v1038_v59 = vpop.f32.mrf.mxu1 }
 0x1e1   : > { %v1039_v0 = vadd.f32 %v1038_v59, %v870_v58 }
 0x1e2   : > { %v1326_v55 = vpop.f32.mrf.mxu2 }
 0x1e3   : > { %v1164_v15 = vmax.f32 %v1039_v0, 0.0  ;;  %v1327_v7 = vadd.f32 %v3560_v36, %v1326_v55  ;;  %v878_v55 = vadd.f32 %v3373_v26, %v3341_v56 }
 0x1e5   : > { %v1479_v19 = vmax.f32 %v1327_v7, 0.0  ;;  %v1216_v32 = vpack.c.bf16 %v1164_v15, %v1163_v2  ;;  %v3606_v2 = vpop.f32.mrf.mxu3  ;;  %v880_v15 = vadd.f32 %v3373_v26, %v3345_v61 }
 0x1e7   : > { %1368 = vmatmul.bf16.gmra.mxu2 %v1216_v32  ;;  %v1540_v24 = vpack.c.bf16 %v1479_v19, %v1478_v17 }
 0x1e8   : > { %v1041_v29 = vpop.f32.mrf.mxu1 }
 0x1e9   : > { %1690 = vmatmul.bf16.gmra.mxu3 %v1540_v24  ;;  %1859 = vmatmul.bf16.gmra.mxu0 %v1540_v24  ;;  %v1042_v37 = vadd.f32 %v1041_v29, %v873_v33  ;;  %v3034_v29 = vld [vmem:[%s3213_s21 + $0x164] sm:$0xf] }
 0x1ea   : > { %v1329_v31 = vpop.f32.mrf.mxu2 }
 0x1eb   : > { %1080 = vmatmul.bf16.gmra.mxu1 %v2737_v39  ;;  %v1330_v3 = vadd.f32 %v3560_v36, %v1329_v31  ;;  %v1165_v43 = vmax.f32 %v1042_v37, 0.0  ;;  %v2750_v31 = vld [vmem:[%s3213_s21 + $0x168] sm:$0xf0] }
 0x1ed   : > { %v1480_v58 = vmax.f32 %v1330_v3, 0.0  ;;  %v3614_v61 = vpop.f32.mrf.mxu3 }
 0x1f0   : > { %v1043_v38 = vpop.f32.mrf.mxu1 }
 0x1f1   : > { %v1044_v40 = vadd.f32 %v1043_v38, %v875_v34  ;;  %v2753_v38 = vor.u32 %v3034_v29, %v2750_v31 }
 0x1f2   : > { %v1331_v42 = vpop.f32.mrf.mxu2 }
 0x1f3   : > { %v1166_v20 = vmax.f32 %v1044_v40, 0.0  ;;  %v1332_v27 = vadd.f32 %v3560_v36, %v1331_v42  ;;  %v883_v42 = vadd.f32 %v3373_v26, %v3352_v4 }
 0x1f5   : > { %v1481_v8 = vmax.f32 %v1332_v27, 0.0  ;;  %v1217_v44 = vpack.c.bf16 %v1166_v20, %v1165_v43  ;;  %v885_v43 = vadd.f32 %v3373_v26, %v3354_v5 }
 0x1f7   : > { %1373 = vmatmul.bf16.gmra.mxu2 %v1217_v44  ;;  %v1541_v59 = vpack.c.bf16 %v1481_v8, %v1480_v58  ;;  %v3621_v8 = vpop.f32.mrf.mxu3 }
 0x1f8   : > { %v1046_v63 = vpop.f32.mrf.mxu1 }
 0x1f9   : > { %1695 = vmatmul.bf16.gmra.mxu3 %v1541_v59  ;;  %1864 = vmatmul.bf16.gmra.mxu0 %v1541_v59  ;;  %v1047_v7 = vadd.f32 %v1046_v63, %v878_v55  ;;  %v3036_v63 = vld [vmem:[%s3213_s21 + $0x174] sm:$0xf] }
 0x1fa   : > { %v1334_v0 = vpop.f32.mrf.mxu2 }
 0x1fb   : > { %1085 = vmatmul.bf16.gmra.mxu1 %v2745_v51  ;;  %v1335_v16 = vadd.f32 %v3560_v36, %v1334_v0  ;;  %v1167_v32 = vmax.f32 %v1047_v7, 0.0  ;;  %v2758_v0 = vld [vmem:[%s3213_s21 + $0x178] sm:$0xf0] }
 0x1fc   : > { %v2761_v5 = vor.u32 %v3036_v63, %v2758_v0 }
 0x1fd   : > { %v1482_v33 = vmax.f32 %v1335_v16, 0.0 }
 0x200   : > { %v1048_v9 = vpop.f32.mrf.mxu1 }
 0x201   : > { %v1049_v17 = vadd.f32 %v1048_v9, %v880_v15 }
 0x202   : > { %v1336_v19 = vpop.f32.mrf.mxu2 }
 0x203   : > { %v1168_v24 = vmax.f32 %v1049_v17, 0.0  ;;  %v1337_v39 = vadd.f32 %v3560_v36, %v1336_v19  ;;  %v3626_v17 = vpop.f32.mrf.mxu3  ;;  %v888_v19 = vadd.f32 %v3373_v26, %v3358_v11 }
 0x205   : > { %v1483_v34 = vmax.f32 %v1337_v39, 0.0  ;;  %v1218_v56 = vpack.c.bf16 %v1168_v24, %v1167_v32  ;;  %v890_v32 = vadd.f32 %v3373_v26, %v3364_v18 }
 0x207   : > { %1378 = vmatmul.bf16.gmra.mxu2 %v1218_v56  ;;  %v1542_v37 = vpack.c.bf16 %v1483_v34, %v1482_v33 }
 0x208   : > { %v1051_v3 = vpop.f32.mrf.mxu1 }
 0x209   : > { %1700 = vmatmul.bf16.gmra.mxu3 %v1542_v37  ;;  %1869 = vmatmul.bf16.gmra.mxu0 %v1542_v37  ;;  %v1052_v20 = vadd.f32 %v1051_v3, %v883_v42  ;;  %v2766_v3 = vld [vmem:[%s3213_s21 + $0x188] sm:$0xf0] }
 0x20a   : > { %v1339_v40 = vpop.f32.mrf.mxu2 }
 0x20b   : > { %1090 = vmatmul.bf16.gmra.mxu1 %v2753_v38  ;;  %v1340_v49 = vadd.f32 %v3560_v36, %v1339_v40  ;;  %v1169_v44 = vmax.f32 %v1052_v20, 0.0  ;;  %v3038_v38 = vld [vmem:[%s3213_s21 + $0x184] sm:$0xf]  ;;  %v3636_v20 = vpop.f32.mrf.mxu3 }
 0x20c   : > { %v2769_v18 = vor.u32 %v3038_v38, %v2766_v3 }
 0x20d   : > { %v1484_v55 = vmax.f32 %v1340_v49, 0.0 }
 0x210   : > { %v1053_v27 = vpop.f32.mrf.mxu1 }
 0x211   : > { %v1054_v50 = vadd.f32 %v1053_v27, %v885_v43 }
 0x212   : > { %v1341_v58 = vpop.f32.mrf.mxu2 }
 0x213   : > { %v1170_v59 = vmax.f32 %v1054_v50, 0.0  ;;  %v1342_v51 = vadd.f32 %v3560_v36, %v1341_v58  ;;  %v893_v50 = vadd.f32 %v3373_v26, %v3360_v13  ;;  %v895_v58 = vadd.f32 %v3373_v26, %v3368_v23 }
 0x215   : > { %v1485_v15 = vmax.f32 %v1342_v51, 0.0  ;;  %v1219_v4 = vpack.c.bf16 %v1170_v59, %v1169_v44  ;;  %v3642_v59 = vpop.f32.mrf.mxu3 }
 0x217   : > { %1383 = vmatmul.bf16.gmra.mxu2 %v1219_v4  ;;  %v1543_v7 = vpack.c.bf16 %v1485_v15, %v1484_v55 }
 0x218   : > { %v1056_v9 = vpop.f32.mrf.mxu1 }
 0x219   : > { %1705 = vmatmul.bf16.gmra.mxu3 %v1543_v7  ;;  %1874 = vmatmul.bf16.gmra.mxu0 %v1543_v7  ;;  %v1057_v24 = vadd.f32 %v1056_v9, %v888_v19  ;;  %v2774_v9 = vld [vmem:[%s3213_s21 + $0x198] sm:$0xf0] }
 0x21a   : > { %v1344_v16 = vpop.f32.mrf.mxu2 }
 0x21b   : > { %1095 = vmatmul.bf16.gmra.mxu1 %v2761_v5  ;;  %v1345_v29 = vadd.f32 %v3560_v36, %v1344_v16  ;;  %v1171_v34 = vmax.f32 %v1057_v24, 0.0  ;;  %v3040_v5 = vld [vmem:[%s3213_s21 + $0x194] sm:$0xf] }
 0x21c   : > { %v2777_v23 = vor.u32 %v3040_v5, %v2774_v9 }
 0x21d   : > { %v1486_v40 = vmax.f32 %v1345_v29, 0.0 }
 0x220   : > { %v1058_v39 = vpop.f32.mrf.mxu1 }
 0x221   : > { %v1059_v31 = vadd.f32 %v1058_v39, %v890_v32  ;;  %v3648_v39 = vpop.f32.mrf.mxu3 }
 0x222   : > { %v1346_v33 = vpop.f32.mrf.mxu2 }
 0x223   : > { %v1172_v56 = vmax.f32 %v1059_v31, 0.0  ;;  %v1347_v37 = vadd.f32 %v3560_v36, %v1346_v33  ;;  %v898_v31 = vadd.f32 %v3373_v26, %v3391_v45  ;;  %v900_v33 = vadd.f32 %v3373_v26, %v3395_v57  ;;  %v1586_v57 = vld [vmem:[%s4021_s6] sm:$0x3] }
 0x225   : > { %v1487_v42 = vmax.f32 %v1347_v37, 0.0  ;;  %v1220_v43 = vpack.c.bf16 %v1172_v56, %v1171_v34 }
 0x227   : > { %1388 = vmatmul.bf16.gmra.mxu2 %v1220_v43  ;;  %v1544_v11 = vpack.c.bf16 %v1487_v42, %v1486_v40 }
 0x228   : > { %v1061_v27 = vpop.f32.mrf.mxu1 }
 0x229   : > { %1710 = vmatmul.bf16.gmra.mxu3 %v1544_v11  ;;  %1879 = vmatmul.bf16.gmra.mxu0 %v1544_v11  ;;  %v1062_v44 = vadd.f32 %v1061_v27, %v893_v50  ;;  %v3656_v11 = vpop.f32.mrf.mxu3  ;;  %v2782_v27 = vld [vmem:[%s3213_s21 + $0x1a8] sm:$0xf0] }
 0x22a   : > { %v1349_v49 = vpop.f32.mrf.mxu2 }
 0x22b   : > { %1100 = vmatmul.bf16.gmra.mxu1 %v2769_v18  ;;  %v1350_v63 = vadd.f32 %v3560_v36, %v1349_v49  ;;  %v1173_v15 = vmax.f32 %v1062_v44, 0.0  ;;  %v3042_v18 = vld [vmem:[%s3213_s21 + $0x1a4] sm:$0xf] }
 0x22d   : > { %v1488_v16 = vmax.f32 %v1350_v63, 0.0 }
 0x230   : > { %v1063_v51 = vpop.f32.mrf.mxu1 }
 0x231   : > { %v1064_v0 = vadd.f32 %v1063_v51, %v895_v58  ;;  %v2785_v51 = vor.u32 %v3042_v18, %v2782_v27 }
 0x232   : > { %v1351_v55 = vpop.f32.mrf.mxu2 }
 0x233   : > { %v1174_v4 = vmax.f32 %v1064_v0, 0.0  ;;  %v1352_v7 = vadd.f32 %v3560_v36, %v1351_v55  ;;  %v3663_v0 = vperm.slane %v1586_v57, 1 }
 0x235   : > { %v1489_v19 = vmax.f32 %v1352_v7, 0.0  ;;  %v1221_v13 = vpack.c.bf16 %v1174_v4, %v1173_v15  ;;  %v903_v15 = vadd.f32 %v3373_v26, %v3415_v28 }
 0x237   : > { %1393 = vmatmul.bf16.gmra.mxu2 %v1221_v13  ;;  %v1545_v32 = vpack.c.bf16 %v1489_v19, %v1488_v16  ;;  %v905_v16 = vadd.f32 %v3373_v26, %v3430_v41  ;;  %v3670_v19 = vperm.slane %v1586_v57, 0  ;;  %v2790_v26 = vld [vmem:[%s3213_s21 + $0x1b8] sm:$0xf0] }
 0x238   : > { %v1066_v24 = vpop.f32.mrf.mxu1 }
 0x239   : > { %1715 = vmatmul.bf16.gmra.mxu3 %v1545_v32  ;;  %1884 = vmatmul.bf16.gmra.mxu0 %v1545_v32  ;;  %v1067_v34 = vadd.f32 %v1066_v24, %v898_v31 }
 0x23a   : > { %v1354_v29 = vpop.f32.mrf.mxu2 }
 0x23b   : > { %1105 = vmatmul.bf16.gmra.mxu1 %v2777_v23  ;;  %v1355_v37 = vadd.f32 %v3560_v36, %v1354_v29  ;;  %v1175_v40 = vmax.f32 %v1067_v34, 0.0 }
 0x23d   : > { %v1490_v49 = vmax.f32 %v1355_v37, 0.0 }
 0x240   : > { %v1068_v56 = vpop.f32.mrf.mxu1 }
 0x241   : > { %v1069_v38 = vadd.f32 %v1068_v56, %v900_v33 }
 0x242   : > { %v1356_v3 = vpop.f32.mrf.mxu2 }
 0x243   : > { %v1176_v42 = vmax.f32 %v1069_v38, 0.0  ;;  %v1357_v43 = vadd.f32 %v3560_v36, %v1356_v3  ;;  %v3044_v3 = vld [vmem:[%s3213_s21 + $0x1b4] sm:$0xf] }
 0x245   : > { %v1491_v50 = vmax.f32 %v1357_v43, 0.0  ;;  %v1222_v45 = vpack.c.bf16 %v1176_v42, %v1175_v40 }
 0x246   : > { %v1850_v58 = vpop.f32.mrf.mxu0 }
 0x247   : > { %1398 = vmatmul.bf16.gmra.mxu2 %v1222_v45  ;;  %v1546_v44 = vpack.c.bf16 %v1491_v50, %v1490_v49  ;;  %v1851_v7 = vadd.f32 %v1850_v58, %v3663_v0  ;;  %v2793_v49 = vor.u32 %v3044_v3, %v2790_v26 }
 0x248   : > { %v1071_v63 = vpop.f32.mrf.mxu1 }
 0x249   : > { %1720 = vmatmul.bf16.gmra.mxu3 %v1546_v44  ;;  %1889 = vmatmul.bf16.gmra.mxu0 %v1546_v44  ;;  %v1072_v5 = vadd.f32 %v1071_v63, %v903_v15  ;;  %v2011_v23 = vmax.f32 %v1851_v7, 0.0  ;;  %v3683_v7 = vld [vmem:[%s4017_s2] ss:$0 sm:$0xff] }
 0x24a   : > { %v1359_v55 = vpop.f32.mrf.mxu2 }
 0x24b   : > { %1110 = vmatmul.bf16.gmra.mxu1 %v2785_v51  ;;  %v1360_v24 = vadd.f32 %v3560_v36, %v1359_v55  ;;  %v1177_v31 = vmax.f32 %v1072_v5, 0.0  ;;  %v908_v5 = vadd.f32 %v3683_v7, %v3437_v1 }
 0x24c   : > { %v1681_v4 = vpop.f32.mrf.mxu3 }
 0x24d   : > { %v1682_v34 = vadd.f32 %v1681_v4, %v3670_v19  ;;  %v1492_v40 = vmax.f32 %v1360_v24, 0.0 }
 0x24e   : > { %v1852_v9 = vpop.f32.mrf.mxu0 }
 0x24f   : > { %v1853_v13 = vadd.f32 %v1852_v9, %v3663_v0  ;;  %v2010_v50 = vmax.f32 %v1682_v34, 0.0 }
 0x250   : > { %v1073_v32 = vpop.f32.mrf.mxu1 }
 0x251   : > { %v2013_v29 = vmax.f32 %v1853_v13, 0.0  ;;  %v1074_v28 = vadd.f32 %v1073_v32, %v905_v16  ;;  %v910_v13 = vadd.f32 %v3683_v7, %v3455_v30  ;;  %v3046_v30 = vld [vmem:[%s3213_s21 + $0x1c4] sm:$0xf] }
 0x252   : > { %v1361_v33 = vpop.f32.mrf.mxu2 }
 0x253   : > { %v2147_v56 = vmax.f32 %v2011_v23, %v2013_v29  ;;  %v1178_v37 = vmax.f32 %v1074_v28, 0.0  ;;  %v1362_v38 = vadd.f32 %v3560_v36, %v1361_v33 }
 0x254   : > { %v1683_v41 = vpop.f32.mrf.mxu3 }
 0x255   : > { %v1493_v42 = vmax.f32 %v1362_v38, 0.0  ;;  %v1684_v43 = vadd.f32 %v1683_v41, %v3670_v19  ;;  %v1223_v18 = vpack.c.bf16 %v1178_v37, %v1177_v31  ;;  %v2798_v41 = vld [vmem:[%s3213_s21 + $0x1c8] sm:$0xf0] }
 0x256   : > { %v1855_v27 = vpop.f32.mrf.mxu0 }
 0x257   : > { %v2012_v45 = vmax.f32 %v1684_v43, 0.0  ;;  %v1856_v57 = vadd.f32 %v1855_v27, %v3663_v0  ;;  %1403 = vmatmul.bf16.gmra.mxu2 %v1223_v18  ;;  %v1547_v58 = vpack.c.bf16 %v1493_v42, %v1492_v40 }
 0x258   : > { %v1076_v44 = vpop.f32.mrf.mxu1 }
 0x259   : > { %v2138_v51 = vmax.f32 %v2010_v50, %v2012_v45  ;;  %v2015_v63 = vmax.f32 %v1856_v57, 0.0  ;;  %1725 = vmatmul.bf16.gmra.mxu3 %v1547_v58  ;;  %1894 = vmatmul.bf16.gmra.mxu0 %v1547_v58  ;;  %v1077_v32 = vadd.f32 %v1076_v44, %v908_v5  ;;  %v2801_v45 = vor.u32 %v3046_v30, %v2798_v41 }
 0x25a   : > { %v1364_v55 = vpop.f32.mrf.mxu2  ;;  %v915_v5 = vadd.f32 %v3683_v7, %v3479_v10 }
 0x25b   : > { %v2148_v15 = vmax.f32 %v2147_v56, %v2015_v63  ;;  %1115 = vmatmul.bf16.gmra.mxu1 %v2793_v49  ;;  %v1365_v28 = vadd.f32 %v3560_v36, %v1364_v55  ;;  %v1179_v1 = vmax.f32 %v1077_v32, 0.0 }
 0x25c   : > { %v1686_v4 = vpop.f32.mrf.mxu3 }
 0x25d   : > { %v1687_v9 = vadd.f32 %v1686_v4, %v3670_v19  ;;  %v1494_v40 = vmax.f32 %v1365_v28, 0.0 }
 0x25e   : > { %v1857_v16 = vpop.f32.mrf.mxu0 }
 0x25f   : > { %v2014_v23 = vmax.f32 %v1687_v9, 0.0  ;;  %v1858_v24 = vadd.f32 %v1857_v16, %v3663_v0 }
 0x260   : > { %v1078_v29 = vpop.f32.mrf.mxu1 }
 0x261   : > { %v2139_v31 = vmax.f32 %v2138_v51, %v2014_v23  ;;  %v2017_v33 = vmax.f32 %v1858_v24, 0.0  ;;  %v1079_v34 = vadd.f32 %v1078_v29, %v910_v13  ;;  %v913_v51 = vadd.f32 %v3683_v7, %v3466_v46 }
 0x262   : > { %v1366_v56 = vpop.f32.mrf.mxu2 }
 0x263   : > { %v3692_v37 = vmax.f32 %v2148_v15, %v2017_v33  ;;  %v1180_v38 = vmax.f32 %v1079_v34, 0.0  ;;  %v1367_v3 = vadd.f32 %v3560_v36, %v1366_v56  ;;  %v3048_v56 = vld [vmem:[%s3213_s21 + $0x1d4] sm:$0xf] }
 0x264   : > { %v1688_v26 = vpop.f32.mrf.mxu3 }
 0x265   : > { %v1495_v42 = vmax.f32 %v1367_v3, 0.0  ;;  %v1689_v43 = vadd.f32 %v1688_v26, %v3670_v19  ;;  %v1224_v18 = vpack.c.bf16 %v1180_v38, %v1179_v1  ;;  %v2806_v1 = vld [vmem:[%s3213_s21 + $0x1d8] sm:$0xf0] }
 0x266   : > { %v1860_v27 = vpop.f32.mrf.mxu0 }
 0x267   : > { %v2016_v49 = vmax.f32 %v1689_v43, 0.0  ;;  %1408 = vmatmul.bf16.gmra.mxu2 %v1224_v18  ;;  %v1548_v50 = vpack.c.bf16 %v1495_v42, %v1494_v40  ;;  %v1861_v55 = vadd.f32 %v1860_v27, %v3663_v0  ;;  %v2809_v40 = vor.u32 %v3048_v56, %v2806_v1  ;;  %v3050_v1 = vld [vmem:[%s3213_s21 + $0x1e4] sm:$0xf] }
 0x268   : > { %v1081_v57 = vpop.f32.mrf.mxu1 }
 0x269   : > { %v3698_v58 = vmax.f32 %v2139_v31, %v2016_v49  ;;  %1730 = vmatmul.bf16.gmra.mxu3 %v1548_v50  ;;  %1899 = vmatmul.bf16.gmra.mxu0 %v1548_v50  ;;  %v1082_v15 = vadd.f32 %v1081_v57, %v913_v51  ;;  %v2019_v13 = vmax.f32 %v1861_v55, 0.0  ;;  %v2150_v57 = vrot.slane %v3692_v37, 4 }
 0x26a   : > { %v1369_v44 = vpop.f32.mrf.mxu2  ;;  %v918_v55 = vadd.f32 %v3683_v7, %v3497_v35 }
 0x26b   : > { %1120 = vmatmul.bf16.gmra.mxu1 %v2801_v45  ;;  %v1370_v32 = vadd.f32 %v3560_v36, %v1369_v44  ;;  %v1181_v29 = vmax.f32 %v1082_v15, 0.0 }
 0x26c   : > { %v1691_v63 = vpop.f32.mrf.mxu3 }
 0x26d   : > { %v1692_v28 = vadd.f32 %v1691_v63, %v3670_v19  ;;  %v1496_v10 = vmax.f32 %v1370_v32, 0.0 }
 0x26e   : > { %v1862_v4 = vpop.f32.mrf.mxu0 }
 0x26f   : > { %v1863_v9 = vadd.f32 %v1862_v4, %v3663_v0  ;;  %v2018_v42 = vmax.f32 %v1692_v28, 0.0  ;;  %v2151_v4 = vmax.f32 %v3692_v37, %v2150_v57 }
 0x270   : > { %v1083_v16 = vpop.f32.mrf.mxu1 }
 0x271   : > { %v2021_v23 = vmax.f32 %v1863_v9, 0.0  ;;  %v1084_v24 = vadd.f32 %v1083_v16, %v915_v5  ;;  %v920_v9 = vadd.f32 %v3683_v7, %v3501_v54 }
 0x272   : > { %v1371_v46 = vpop.f32.mrf.mxu2 }
 0x273   : > { %v2165_v31 = vmax.f32 %v2019_v13, %v2021_v23  ;;  %v1182_v33 = vmax.f32 %v1084_v24, 0.0  ;;  %v1372_v34 = vadd.f32 %v3560_v36, %v1371_v46  ;;  %v2141_v23 = vrot.slane %v3698_v58, 4 }
 0x274   : > { %v1693_v38 = vpop.f32.mrf.mxu3 }
 0x275   : > { %v1225_v3 = vpack.c.bf16 %v1182_v33, %v1181_v29  ;;  %v1497_v26 = vmax.f32 %v1372_v34, 0.0  ;;  %v1694_v30 = vadd.f32 %v1693_v38, %v3670_v19  ;;  %v2814_v38 = vld [vmem:[%s3213_s21 + $0x1e8] sm:$0xf0] }
 0x276   : > { %v1865_v41 = vpop.f32.mrf.mxu0 }
 0x277   : > { %v2020_v43 = vmax.f32 %v1694_v30, 0.0  ;;  %v1866_v18 = vadd.f32 %v1865_v41, %v3663_v0  ;;  %1413 = vmatmul.bf16.gmra.mxu2 %v1225_v3  ;;  %v1549_v27 = vpack.c.bf16 %v1497_v26, %v1496_v10  ;;  %v2142_v10 = vmax.f32 %v3698_v58, %v2141_v23 }
 0x278   : > { %v1086_v49 = vpop.f32.mrf.mxu1 }
 0x279   : > { %v2156_v50 = vmax.f32 %v2018_v42, %v2020_v43  ;;  %v2023_v45 = vmax.f32 %v1866_v18, 0.0  ;;  %1735 = vmatmul.bf16.gmra.mxu3 %v1549_v27  ;;  %1904 = vmatmul.bf16.gmra.mxu0 %v1549_v27  ;;  %v1087_v16 = vadd.f32 %v1086_v49, %v918_v55  ;;  %v2817_v18 = vor.u32 %v3050_v1, %v2814_v38 }
 0x27a   : > { %v1374_v44 = vpop.f32.mrf.mxu2  ;;  %v2143_v57 = vrot.slane %v2142_v10, 2 }
 0x27b   : > { %v2166_v51 = vmax.f32 %v2165_v31, %v2023_v45  ;;  %1125 = vmatmul.bf16.gmra.mxu1 %v2809_v40  ;;  %v1375_v24 = vadd.f32 %v3560_v36, %v1374_v44  ;;  %v2152_v31 = vrot.slane %v2151_v4, 2  ;;  %v1183_v33 = vmax.f32 %v1087_v16, 0.0 }
 0x27c   : > { %v1696_v63 = vpop.f32.mrf.mxu3  ;;  %v2144_v16 = vmax.f32 %v2142_v10, %v2143_v57 }
 0x27d   : > { %v1697_v15 = vadd.f32 %v1696_v63, %v3670_v19  ;;  %v1498_v3 = vmax.f32 %v1375_v24, 0.0  ;;  %v2153_v27 = vmax.f32 %v2151_v4, %v2152_v31  ;;  %v925_v24 = vadd.f32 %v3683_v7, %v3536_v48 }
 0x27e   : > { %v1867_v5 = vpop.f32.mrf.mxu0 }
 0x27f   : > { %v2022_v13 = vmax.f32 %v1697_v15, 0.0  ;;  %v1868_v32 = vadd.f32 %v1867_v5, %v3663_v0  ;;  %v2154_v55 = vrot.slane %v2153_v27, 1 }
 0x280   : > { %v1088_v29 = vpop.f32.mrf.mxu1 }
 0x281   : > { %v2157_v35 = vmax.f32 %v2156_v50, %v2022_v13  ;;  %v2025_v46 = vmax.f32 %v1868_v32, 0.0  ;;  %v1089_v28 = vadd.f32 %v1088_v29, %v920_v9  ;;  %v923_v9 = vadd.f32 %v3683_v7, %v3519_v25 }
 0x282   : > { %v1376_v37 = vpop.f32.mrf.mxu2 }
 0x283   : > { %v2167_v34 = vmax.f32 %v2166_v51, %v2025_v46  ;;  %v1184_v56 = vmax.f32 %v1089_v28, 0.0  ;;  %v1377_v54 = vadd.f32 %v3560_v36, %v1376_v37  ;;  %v2155_v46 = vmax.f32 %v2153_v27, %v2154_v55 }
 0x284   : > { %v1698_v26 = vpop.f32.mrf.mxu3 }
 0x285   : > { %v2168_v30 = vrot.slane %v2167_v34, 4  ;;  %v1226_v41 = vpack.c.bf16 %v1184_v56, %v1183_v33  ;;  %v1499_v40 = vmax.f32 %v1377_v54, 0.0  ;;  %v1699_v42 = vadd.f32 %v1698_v26, %v3670_v19 }
 0x286   : > { %v1870_v43 = vpop.f32.mrf.mxu0  ;;  %v2145_v33 = vrot.slane %v2144_v16, 1 }
 0x287   : > { %v2169_v49 = vmax.f32 %v2167_v34, %v2168_v30  ;;  %v2024_v50 = vmax.f32 %v1699_v42, 0.0  ;;  %1418 = vmatmul.bf16.gmra.mxu2 %v1226_v41  ;;  %v1550_v45 = vpack.c.bf16 %v1499_v40, %v1498_v3  ;;  %v1871_v4 = vadd.f32 %v1870_v43, %v3663_v0  ;;  %v3052_v43 = vld [vmem:[%s3213_s21 + $0x1f4] sm:$0xf] }
 0x288   : > { %v1091_v44 = vpop.f32.mrf.mxu1  ;;  %v2146_v27 = vmax.f32 %v2144_v16, %v2145_v33 }
 0x289   : > { %v2170_v51 = vrot.slane %v2169_v49, 2  ;;  %v2158_v63 = vmax.f32 %v2157_v35, %v2024_v50  ;;  %1740 = vmatmul.bf16.gmra.mxu3 %v1550_v45  ;;  %1909 = vmatmul.bf16.gmra.mxu0 %v1550_v45  ;;  %v1092_v29 = vadd.f32 %v1091_v44, %v923_v9  ;;  %v2027_v25 = vmax.f32 %v1871_v4, 0.0 }
 0x28a   : > { %v1379_v58 = vpop.f32.mrf.mxu2 }
 0x28b   : > { %v2171_v15 = vmax.f32 %v2169_v49, %v2170_v51  ;;  %v2159_v5 = vrot.slane %v2158_v63, 4  ;;  %1130 = vmatmul.bf16.gmra.mxu1 %v2817_v18  ;;  %v1380_v34 = vadd.f32 %v3560_v36, %v1379_v58  ;;  %v1185_v10 = vmax.f32 %v1092_v29, 0.0  ;;  %v2822_v18 = vld [vmem:[%s3213_s21 + $0x1f8] sm:$0xf0] }
 0x28c   : > { %v1701_v13 = vpop.f32.mrf.mxu3  ;;  %v2825_v55 = vor.u32 %v3052_v43, %v2822_v18 }
 0x28d   : > { %v2172_v32 = vrot.slane %v2171_v15, 1  ;;  %v2160_v23 = vmax.f32 %v2158_v63, %v2159_v5  ;;  %v1702_v3 = vadd.f32 %v1701_v13, %v3670_v19  ;;  %v1500_v49 = vmax.f32 %v1380_v34, 0.0 }
 0x28e   : > { %v1872_v35 = vpop.f32.mrf.mxu0 }
 0x28f   : > { %v2173_v28 = vmax.f32 %v2171_v15, %v2172_v32  ;;  %v2161_v31 = vrot.slane %v2160_v23, 2  ;;  %v1873_v37 = vadd.f32 %v1872_v35, %v3663_v0  ;;  %v2026_v63 = vmax.f32 %v1702_v3, 0.0 }
 0x290   : > { %v1093_v56 = vpop.f32.mrf.mxu1  ;;  %v928_v35 = vadd.f32 %v3683_v7, %v3541_v6 }
 0x291   : > { %v3736_v54 = vsel %vm2458_vm0, %v2173_v28, %v2155_v46  ;;  %v2162_v1 = vmax.f32 %v2160_v23, %v2161_v31  ;;  %v2029_v48 = vmax.f32 %v1873_v37, 0.0  ;;  %v1094_v38 = vadd.f32 %v1093_v56, %v925_v24 }
 0x292   : > { %v1381_v26 = vpop.f32.mrf.mxu2  ;;  %v930_v31 = vadd.f32 %v3683_v7, %v3549_v21 }
 0x293   : > { %v2163_v30 = vrot.slane %v2162_v1, 1  ;;  %v2183_v41 = vmax.f32 %v2027_v25, %v2029_v48  ;;  %v1186_v40 = vmax.f32 %v1094_v38, 0.0  ;;  %v1382_v42 = vadd.f32 %v3560_v36, %v1381_v26 }
 0x294   : > { %v1703_v50 = vpop.f32.mrf.mxu3 }
 0x295   : > { %v2164_v45 = vmax.f32 %v2162_v1, %v2163_v30  ;;  %v1227_v57 = vpack.c.bf16 %v1186_v40, %v1185_v10  ;;  %v1501_v44 = vmax.f32 %v1382_v42, 0.0  ;;  %v1704_v51 = vadd.f32 %v1703_v50, %v3670_v19 }
 0x296   : > { %v1875_v58 = vpop.f32.mrf.mxu0 }
 0x297   : > { %v3744_v15 = vsel %vm2458_vm0, %v2164_v45, %v2146_v27  ;;  %v2028_v5 = vmax.f32 %v1704_v51, 0.0  ;;  %v1876_v9 = vadd.f32 %v1875_v58, %v3663_v0  ;;  %1423 = vmatmul.bf16.gmra.mxu2 %v1227_v57  ;;  %v1551_v4 = vpack.c.bf16 %v1501_v44, %v1500_v49 }
 0x298   : > { %v1096_v13 = vpop.f32.mrf.mxu1 }
 0x299   : > { %v2174_v16 = vmax.f32 %v2026_v63, %v2028_v5  ;;  %v2031_v32 = vmax.f32 %v1876_v9, 0.0  ;;  %1745 = vmatmul.bf16.gmra.mxu3 %v1551_v4  ;;  %1914 = vmatmul.bf16.gmra.mxu0 %v1551_v4  ;;  %v1097_v37 = vadd.f32 %v1096_v13, %v928_v35  ;;  %v933_v5 = vadd.f32 %v3683_v7, %v3545_v12 }
 0x29a   : > { %v1384_v23 = vpop.f32.mrf.mxu2 }
 0x29b   : > { %v2184_v24 = vmax.f32 %v2183_v41, %v2031_v32  ;;  %1135 = vmatmul.bf16.gmra.mxu1 %v2825_v55  ;;  %v1385_v34 = vadd.f32 %v3560_v36, %v1384_v23  ;;  %v1187_v3 = vmax.f32 %v1097_v37, 0.0 }
 0x29c   : > { %v1706_v29 = vpop.f32.mrf.mxu3 }
 0x29d   : > { %v1707_v46 = vadd.f32 %v1706_v29, %v3670_v19  ;;  %v1502_v41 = vmax.f32 %v1385_v34, 0.0 }
 0x29e   : > { %v1877_v28 = vpop.f32.mrf.mxu0 }
 0x29f   : > { %v2030_v33 = vmax.f32 %v1707_v46, 0.0  ;;  %v1878_v25 = vadd.f32 %v1877_v28, %v3663_v0 }
 0x2a0   : > { %v1098_v56 = vpop.f32.mrf.mxu1 }
 0x2a1   : > { %v2175_v1 = vmax.f32 %v2174_v16, %v2030_v33  ;;  %v2033_v48 = vmax.f32 %v1878_v25, 0.0  ;;  %v1099_v38 = vadd.f32 %v1098_v56, %v930_v31 }
 0x2a2   : > { %v1386_v10 = vpop.f32.mrf.mxu2 }
 0x2a3   : > { %v2185_v26 = vmax.f32 %v2184_v24, %v2033_v48  ;;  %v1188_v6 = vmax.f32 %v1099_v38, 0.0  ;;  %v1387_v30 = vadd.f32 %v3560_v36, %v1386_v10  ;;  %v935_v24 = vadd.f32 %v3683_v7, %v3553_v60 }
 0x2a4   : > { %v1708_v40 = vpop.f32.mrf.mxu3 }
 0x2a5   : > { %v2186_v42 = vrot.slane %v2185_v26, 4  ;;  %v1228_v21 = vpack.c.bf16 %v1188_v6, %v1187_v3  ;;  %v1503_v43 = vmax.f32 %v1387_v30, 0.0  ;;  %v1709_v18 = vadd.f32 %v1708_v40, %v3670_v19 }
 0x2a6   : > { %v1880_v27 = vpop.f32.mrf.mxu0 }
 0x2a7   : > { %v2187_v49 = vmax.f32 %v2185_v26, %v2186_v42  ;;  %v2032_v50 = vmax.f32 %v1709_v18, 0.0  ;;  %1428 = vmatmul.bf16.gmra.mxu2 %v1228_v21  ;;  %v1552_v45 = vpack.c.bf16 %v1503_v43, %v1502_v41  ;;  %v1881_v9 = vadd.f32 %v1880_v27, %v3663_v0 }
 0x2a8   : > { %v1101_v57 = vpop.f32.mrf.mxu1 }
 0x2a9   : > { %v2188_v44 = vrot.slane %v2187_v49, 2  ;;  %v2176_v51 = vmax.f32 %v2175_v1, %v2032_v50  ;;  %1750 = vmatmul.bf16.gmra.mxu3 %v1552_v45  ;;  %1919 = vmatmul.bf16.gmra.mxu0 %v1552_v45  ;;  %v1102_v32 = vadd.f32 %v1101_v57, %v933_v5  ;;  %v2035_v28 = vmax.f32 %v1881_v9, 0.0 }
 0x2aa   : > { %v1389_v63 = vpop.f32.mrf.mxu2 }
 0x2ab   : > { %v2189_v58 = vmax.f32 %v2187_v49, %v2188_v44  ;;  %v2177_v55 = vrot.slane %v2176_v51, 4  ;;  %v1390_v31 = vadd.f32 %v3560_v36, %v1389_v63  ;;  %v1189_v56 = vmax.f32 %v1102_v32, 0.0 }
 0x2ac   : > { %v1711_v4 = vpop.f32.mrf.mxu3  ;;  %v938_v63 = vadd.f32 %v3683_v7, %v3565_v52 }
 0x2ad   : > { %v2190_v13 = vrot.slane %v2189_v58, 1  ;;  %v2178_v16 = vmax.f32 %v2176_v51, %v2177_v55  ;;  %v1712_v1 = vadd.f32 %v1711_v4, %v3670_v19  ;;  %v1504_v26 = vmax.f32 %v1390_v31, 0.0 }
 0x2ae   : > { %v1882_v23 = vpop.f32.mrf.mxu0  ;;  %v940_v55 = vadd.f32 %v3683_v7, %v3570_v14 }
 0x2af   : > { %v2191_v29 = vmax.f32 %v2189_v58, %v2190_v13  ;;  %v2179_v35 = vrot.slane %v2178_v16, 2  ;;  %v1883_v46 = vadd.f32 %v1882_v23, %v3663_v0  ;;  %v2034_v42 = vmax.f32 %v1712_v1, 0.0  ;;  %v3784_v13 = vld [vmem:[%s4019_s4] ss:$0 sm:$0xff] }
 0x2b0   : > { %v1103_v37 = vpop.f32.mrf.mxu1 }
 0x2b1   : > { %v3765_v12 = vsel %vm2460_vm1, %v2191_v29, %v3736_v54  ;;  %v2180_v33 = vmax.f32 %v2178_v16, %v2179_v35  ;;  %v2037_v25 = vmax.f32 %v1883_v46, 0.0  ;;  %v1104_v34 = vadd.f32 %v1103_v37, %v935_v24 }
 0x2b2   : > { %v1391_v48 = vpop.f32.mrf.mxu2 }
 0x2b3   : > { %v2181_v60 = vrot.slane %v2180_v33, 1  ;;  %v2201_v38 = vmax.f32 %v2035_v28, %v2037_v25  ;;  %v1190_v10 = vmax.f32 %v1104_v34, 0.0  ;;  %v1392_v3 = vadd.f32 %v3560_v36, %v1391_v48 }
 0x2b4   : > { %v1713_v6 = vpop.f32.mrf.mxu3 }
 0x2b5   : > { %v2182_v30 = vmax.f32 %v2180_v33, %v2181_v60  ;;  %v1229_v41 = vpack.c.bf16 %v1190_v10, %v1189_v56  ;;  %v1505_v40 = vmax.f32 %v1392_v3, 0.0  ;;  %v1714_v54 = vadd.f32 %v1713_v6, %v3670_v19 }
 0x2b6   : > { %v1885_v21 = vpop.f32.mrf.mxu0 }
 0x2b7   : > { %v3772_v43 = vsel %vm2460_vm1, %v2182_v30, %v3744_v15  ;;  %v2036_v18 = vmax.f32 %v1714_v54, 0.0  ;;  %v1886_v27 = vadd.f32 %v1885_v21, %v3663_v0  ;;  %1433 = vmatmul.bf16.gmra.mxu2 %v1229_v41  ;;  %v1553_v49 = vpack.c.bf16 %v1505_v40, %v1504_v26 }
 0x2b8   : > { %v1106_v50 = vpop.f32.mrf.mxu1  ;;  %v943_v40 = vadd.f32 %v3683_v7, %v3580_v47 }
 0x2b9   : > { %v2192_v36 = vmax.f32 %v2034_v42, %v2036_v18  ;;  %v2039_v45 = vmax.f32 %v1886_v27, 0.0  ;;  %1755 = vmatmul.bf16.gmra.mxu3 %v1553_v49  ;;  %1924 = vmatmul.bf16.gmra.mxu0 %v1553_v49  ;;  %v1107_v5 = vadd.f32 %v1106_v50, %v938_v63  ;;  %v945_v50 = vadd.f32 %v3683_v7, %v3586_v62 }
 0x2ba   : > { %v1394_v57 = vpop.f32.mrf.mxu2 }
 0x2bb   : > { %v2202_v44 = vmax.f32 %v2201_v38, %v2039_v45  ;;  %v1395_v16 = vadd.f32 %v3784_v13, %v1394_v57  ;;  %v1191_v35 = vmax.f32 %v1107_v5, 0.0 }
 0x2bc   : > { %v1716_v51 = vpop.f32.mrf.mxu3 }
 0x2bd   : > { %v1717_v58 = vadd.f32 %v1716_v51, %v3670_v19  ;;  %v1506_v31 = vmax.f32 %v1395_v16, 0.0 }
 0x2be   : > { %v1887_v15 = vpop.f32.mrf.mxu0 }
 0x2bf   : > { %v2038_v9 = vmax.f32 %v1717_v58, 0.0  ;;  %v1888_v4 = vadd.f32 %v1887_v15, %v3663_v0 }
 0x2c0   : > { %v1108_v32 = vpop.f32.mrf.mxu1 }
 0x2c1   : > { %v2193_v23 = vmax.f32 %v2192_v36, %v2038_v9  ;;  %v2041_v52 = vmax.f32 %v1888_v4, 0.0  ;;  %v1109_v24 = vadd.f32 %v1108_v32, %v940_v55 }
 0x2c2   : > { %v1396_v29 = vpop.f32.mrf.mxu2 }
 0x2c3   : > { %v2203_v46 = vmax.f32 %v2202_v44, %v2041_v52  ;;  %v1192_v28 = vmax.f32 %v1109_v24, 0.0  ;;  %v1397_v14 = vadd.f32 %v3784_v13, %v1396_v29 }
 0x2c4   : > { %v1718_v37 = vpop.f32.mrf.mxu3 }
 0x2c5   : > { %v2204_v33 = vrot.slane %v2203_v46, 4  ;;  %v1230_v25 = vpack.c.bf16 %v1192_v28, %v1191_v35  ;;  %v1507_v34 = vmax.f32 %v1397_v14, 0.0  ;;  %v1719_v56 = vadd.f32 %v1718_v37, %v3670_v19 }
 0x2c6   : > { %v1890_v1 = vpop.f32.mrf.mxu0 }
 0x2c7   : > { %v2205_v48 = vmax.f32 %v2203_v46, %v2204_v33  ;;  %v2040_v60 = vmax.f32 %v1719_v56, 0.0  ;;  %1438 = vmatmul.bf16.gmra.mxu2 %v1230_v25  ;;  %v1554_v38 = vpack.c.bf16 %v1507_v34, %v1506_v31  ;;  %v1891_v54 = vadd.f32 %v1890_v1, %v3663_v0 }
 0x2c8   : > { %v1111_v10 = vpop.f32.mrf.mxu1 }
 0x2c9   : > { %v2206_v3 = vrot.slane %v2205_v48, 2  ;;  %v2194_v26 = vmax.f32 %v2193_v23, %v2040_v60  ;;  %1760 = vmatmul.bf16.gmra.mxu3 %v1554_v38  ;;  %1929 = vmatmul.bf16.gmra.mxu0 %v1554_v38  ;;  %v1112_v27 = vadd.f32 %v1111_v10, %v943_v40  ;;  %v2043_v44 = vmax.f32 %v1891_v54, 0.0 }
 0x2ca   : > { %v1399_v6 = vpop.f32.mrf.mxu2  ;;  %v948_v10 = vadd.f32 %v3683_v7, %v3592_v22 }
 0x2cb   : > { %v2207_v30 = vmax.f32 %v2205_v48, %v2206_v3  ;;  %v2195_v41 = vrot.slane %v2194_v26, 4  ;;  %v1400_v51 = vadd.f32 %v3784_v13, %v1399_v6  ;;  %v1193_v5 = vmax.f32 %v1112_v27, 0.0 }
 0x2cc   : > { %v1721_v42 = vpop.f32.mrf.mxu3 }
 0x2cd   : > { %v2208_v21 = vrot.slane %v2207_v30, 1  ;;  %v2196_v18 = vmax.f32 %v2194_v26, %v2195_v41  ;;  %v1722_v9 = vadd.f32 %v1721_v42, %v3670_v19  ;;  %v1508_v52 = vmax.f32 %v1400_v51, 0.0 }
 0x2ce   : > { %v1892_v49 = vpop.f32.mrf.mxu0  ;;  %v950_v26 = vadd.f32 %v3683_v7, %v3602_v53 }
 0x2cf   : > { %v2209_v36 = vmax.f32 %v2207_v30, %v2208_v21  ;;  %v2197_v45 = vrot.slane %v2196_v18, 2  ;;  %v1893_v57 = vadd.f32 %v1892_v49, %v3663_v0  ;;  %v2042_v28 = vmax.f32 %v1722_v9, 0.0 }
 0x2d0   : > { %v1113_v63 = vpop.f32.mrf.mxu1 }
 0x2d1   : > { %v3798_v47 = vsel %vm2462_vm2, %v2209_v36, %v3765_v12  ;;  %v2198_v58 = vmax.f32 %v2196_v18, %v2197_v45  ;;  %v2045_v15 = vmax.f32 %v1893_v57, 0.0  ;;  %v1114_v55 = vadd.f32 %v1113_v63, %v945_v50 }
 0x2d2   : > { %v1401_v4 = vpop.f32.mrf.mxu2 }
 0x2d3   : > { %v2199_v62 = vrot.slane %v2198_v58, 1  ;;  %v2219_v16 = vmax.f32 %v2043_v44, %v2045_v15  ;;  %v1194_v32 = vmax.f32 %v1114_v55, 0.0  ;;  %v1402_v23 = vadd.f32 %v3784_v13, %v1401_v4 }
 0x2d4   : > { %v1723_v24 = vpop.f32.mrf.mxu3 }
 0x2d5   : > { %v2200_v29 = vmax.f32 %v2198_v58, %v2199_v62  ;;  %v1231_v35 = vpack.c.bf16 %v1194_v32, %v1193_v5  ;;  %v1509_v46 = vmax.f32 %v1402_v23, 0.0  ;;  %v1724_v12 = vadd.f32 %v1723_v24, %v3670_v19 }
 0x2d6   : > { %v1895_v14 = vpop.f32.mrf.mxu0 }
 0x2d7   : > { %v3805_v31 = vsel %vm2462_vm2, %v2200_v29, %v3772_v43  ;;  %v2044_v37 = vmax.f32 %v1724_v12, 0.0  ;;  %v1896_v33 = vadd.f32 %v1895_v14, %v3663_v0  ;;  %1443 = vmatmul.bf16.gmra.mxu2 %v1231_v35  ;;  %v1555_v25 = vpack.c.bf16 %v1509_v46, %v1508_v52 }
 0x2d8   : > { %v1116_v34 = vpop.f32.mrf.mxu1  ;;  %v953_v52 = vadd.f32 %v3683_v7, %v3606_v2  ;;  %v955_v14 = vadd.f32 %v3683_v7, %v3614_v61 }
 0x2d9   : > { %v2210_v56 = vmax.f32 %v2042_v28, %v2044_v37  ;;  %v2047_v1 = vmax.f32 %v1896_v33, 0.0  ;;  %1765 = vmatmul.bf16.gmra.mxu3 %v1555_v25  ;;  %1934 = vmatmul.bf16.gmra.mxu0 %v1555_v25  ;;  %v1117_v6 = vadd.f32 %v1116_v34, %v948_v10 }
 0x2da   : > { %v1404_v48 = vpop.f32.mrf.mxu2 }
 0x2db   : > { %v2220_v60 = vmax.f32 %v2219_v16, %v2047_v1  ;;  %v1405_v40 = vadd.f32 %v3784_v13, %v1404_v48  ;;  %v1195_v49 = vmax.f32 %v1117_v6, 0.0 }
 0x2dc   : > { %v1726_v38 = vpop.f32.mrf.mxu3 }
 0x2dd   : > { %v1727_v3 = vadd.f32 %v1726_v38, %v3670_v19  ;;  %v1510_v45 = vmax.f32 %v1405_v40, 0.0 }
 0x2de   : > { %v1897_v43 = vpop.f32.mrf.mxu0 }
 0x2df   : > { %v2046_v30 = vmax.f32 %v1727_v3, 0.0  ;;  %v1898_v41 = vadd.f32 %v1897_v43, %v3663_v0 }
 0x2e0   : > { %v1118_v54 = vpop.f32.mrf.mxu1 }
 0x2e1   : > { %v2211_v42 = vmax.f32 %v2210_v56, %v2046_v30  ;;  %v2049_v21 = vmax.f32 %v1898_v41, 0.0  ;;  %v1119_v18 = vadd.f32 %v1118_v54, %v950_v26 }
 0x2e2   : > { %v1406_v27 = vpop.f32.mrf.mxu2 }
 0x2e3   : > { %v2221_v50 = vmax.f32 %v2220_v60, %v2049_v21  ;;  %v1196_v22 = vmax.f32 %v1119_v18, 0.0  ;;  %v1407_v36 = vadd.f32 %v3784_v13, %v1406_v27 }
 0x2e4   : > { %v1728_v57 = vpop.f32.mrf.mxu3 }
 0x2e5   : > { %v2222_v44 = vrot.slane %v2221_v50, 4  ;;  %v1232_v53 = vpack.c.bf16 %v1196_v22, %v1195_v49  ;;  %v1511_v51 = vmax.f32 %v1407_v36, 0.0  ;;  %v1729_v63 = vadd.f32 %v1728_v57, %v3670_v19 }
 0x2e6   : > { %v1900_v58 = vpop.f32.mrf.mxu0 }
 0x2e7   : > { %v2223_v15 = vmax.f32 %v2221_v50, %v2222_v44  ;;  %v2048_v55 = vmax.f32 %v1729_v63, 0.0  ;;  %1448 = vmatmul.bf16.gmra.mxu2 %v1232_v53  ;;  %v1556_v5 = vpack.c.bf16 %v1511_v51, %v1510_v45  ;;  %v1901_v24 = vadd.f32 %v1900_v58, %v3663_v0 }
 0x2e8   : > { %v1121_v9 = vpop.f32.mrf.mxu1  ;;  %v958_v58 = vadd.f32 %v3683_v7, %v3621_v8 }
 0x2e9   : > { %v2224_v4 = vrot.slane %v2223_v15, 2  ;;  %v2212_v62 = vmax.f32 %v2211_v42, %v2048_v55  ;;  %1770 = vmatmul.bf16.gmra.mxu3 %v1556_v5  ;;  %1939 = vmatmul.bf16.gmra.mxu0 %v1556_v5  ;;  %v1122_v12 = vadd.f32 %v1121_v9, %v953_v52  ;;  %v2051_v34 = vmax.f32 %v1901_v24, 0.0 }
 0x2ea   : > { %v1409_v16 = vpop.f32.mrf.mxu2  ;;  %v960_v55 = vadd.f32 %v3683_v7, %v3626_v17 }
 0x2eb   : > { %v2225_v32 = vmax.f32 %v2223_v15, %v2224_v4  ;;  %v2213_v23 = vrot.slane %v2212_v62, 4  ;;  %v1410_v56 = vadd.f32 %v3784_v13, %v1409_v16  ;;  %v1197_v10 = vmax.f32 %v1122_v12, 0.0 }
 0x2ec   : > { %v1731_v29 = vpop.f32.mrf.mxu3 }
 0x2ed   : > { %v2226_v35 = vrot.slane %v2225_v32, 1  ;;  %v2214_v46 = vmax.f32 %v2212_v62, %v2213_v23  ;;  %v1732_v3 = vadd.f32 %v1731_v29, %v3670_v19  ;;  %v1512_v41 = vmax.f32 %v1410_v56, 0.0 }
 0x2ee   : > { %v1902_v28 = vpop.f32.mrf.mxu0 }
 0x2ef   : > { %v2227_v37 = vmax.f32 %v2225_v32, %v2226_v35  ;;  %v2215_v33 = vrot.slane %v2214_v46, 2  ;;  %v1903_v25 = vadd.f32 %v1902_v28, %v3663_v0  ;;  %v2050_v18 = vmax.f32 %v1732_v3, 0.0 }
 0x2f0   : > { %v1123_v1 = vpop.f32.mrf.mxu1 }
 0x2f1   : > { %v3826_v2 = vsel %vm2464_vm3, %v2227_v37, %v3798_v47  ;;  %v2216_v48 = vmax.f32 %v2214_v46, %v2215_v33  ;;  %v2053_v60 = vmax.f32 %v1903_v25, 0.0  ;;  %v1124_v38 = vadd.f32 %v1123_v1, %v955_v14 }
 0x2f2   : > { %v1411_v43 = vpop.f32.mrf.mxu2 }
 0x2f3   : > { %v2217_v61 = vrot.slane %v2216_v48, 1  ;;  %v2237_v26 = vmax.f32 %v2051_v34, %v2053_v60  ;;  %v1198_v6 = vmax.f32 %v1124_v38, 0.0  ;;  %v1412_v30 = vadd.f32 %v3784_v13, %v1411_v43 }
 0x2f4   : > { %v1733_v40 = vpop.f32.mrf.mxu3 }
 0x2f5   : > { %v2218_v54 = vmax.f32 %v2216_v48, %v2217_v61  ;;  %v1233_v42 = vpack.c.bf16 %v1198_v6, %v1197_v10  ;;  %v1513_v21 = vmax.f32 %v1412_v30, 0.0  ;;  %v1734_v47 = vadd.f32 %v1733_v40, %v3670_v19 }
 0x2f6   : > { %v1905_v27 = vpop.f32.mrf.mxu0  ;;  %v965_v40 = vadd.f32 %v3683_v7, %v3642_v59 }
 0x2f7   : > { %v3833_v49 = vsel %vm2464_vm3, %v2218_v54, %v3805_v31  ;;  %v2052_v50 = vmax.f32 %v1734_v47, 0.0  ;;  %v1906_v22 = vadd.f32 %v1905_v27, %v3663_v0  ;;  %1453 = vmatmul.bf16.gmra.mxu2 %v1233_v42  ;;  %v1557_v36 = vpack.c.bf16 %v1513_v21, %v1512_v41 }
 0x2f8   : > { %v1126_v45 = vpop.f32.mrf.mxu1 }
 0x2f9   : > { %v2228_v57 = vmax.f32 %v2050_v18, %v2052_v50  ;;  %v2055_v44 = vmax.f32 %v1906_v22, 0.0  ;;  %1775 = vmatmul.bf16.gmra.mxu3 %v1557_v36  ;;  %1944 = vmatmul.bf16.gmra.mxu0 %v1557_v36  ;;  %v1127_v5 = vadd.f32 %v1126_v45, %v958_v58 }
 0x2fa   : > { %v1414_v53 = vpop.f32.mrf.mxu2 }
 0x2fb   : > { %v2238_v51 = vmax.f32 %v2237_v26, %v2055_v44  ;;  %v1415_v62 = vadd.f32 %v3784_v13, %v1414_v53  ;;  %v1199_v29 = vmax.f32 %v1127_v5, 0.0  ;;  %v963_v26 = vadd.f32 %v3683_v7, %v3636_v20 }
 0x2fc   : > { %v1736_v63 = vpop.f32.mrf.mxu3 }
 0x2fd   : > { %v1737_v15 = vadd.f32 %v1736_v63, %v3670_v19  ;;  %v1514_v12 = vmax.f32 %v1415_v62, 0.0 }
 0x2fe   : > { %v1907_v31 = vpop.f32.mrf.mxu0 }
 0x2ff   : > { %v2054_v9 = vmax.f32 %v1737_v15, 0.0  ;;  %v1908_v4 = vadd.f32 %v1907_v31, %v3663_v0 }
 0x300   : > { %v1128_v16 = vpop.f32.mrf.mxu1 }
 0x301   : > { %v2229_v32 = vmax.f32 %v2228_v57, %v2054_v9  ;;  %v2057_v23 = vmax.f32 %v1908_v4, 0.0  ;;  %v1129_v52 = vadd.f32 %v1128_v16, %v960_v55  ;;  %v968_v4 = vadd.f32 %v3683_v7, %v3648_v39 }
 0x302   : > { %v1416_v24 = vpop.f32.mrf.mxu2  ;;  %v970_v16 = vadd.f32 %v3683_v7, %v3656_v11 }
 0x303   : > { %v2239_v35 = vmax.f32 %v2238_v51, %v2057_v23  ;;  %v1200_v8 = vmax.f32 %v1129_v52, 0.0  ;;  %v1417_v46 = vadd.f32 %v3784_v13, %v1416_v24 }
 0x304   : > { %v1738_v28 = vpop.f32.mrf.mxu3 }
 0x305   : > { %v2240_v14 = vrot.slane %v2239_v35, 4  ;;  %v1234_v17 = vpack.c.bf16 %v1200_v8, %v1199_v29  ;;  %v1515_v37 = vmax.f32 %v1417_v46, 0.0  ;;  %v1739_v33 = vadd.f32 %v1738_v28, %v3670_v19 }
 0x306   : > { %v3845_v25 = vpop.f32.mrf.mxu0 }
 0x307   : > { %v2241_v34 = vmax.f32 %v2239_v35, %v2240_v14  ;;  %v1558_v56 = vpack.c.bf16 %v1515_v37, %v1514_v12  ;;  %v2056_v1 = vmax.f32 %v1739_v33, 0.0  ;;  %1458 = vmatmul.bf16.gmra.mxu2 %v1234_v17  ;;  %v1911_v11 = vadd.f32 %v3845_v25, %v3663_v0 }
 0x308   : > { %v1131_v48 = vpop.f32.mrf.mxu1 }
 0x309   : > { %v2242_v60 = vrot.slane %v2241_v34, 2  ;;  %v2230_v38 = vmax.f32 %v2229_v32, %v2056_v1  ;;  %1780 = vmatmul.bf16.gmra.mxu3 %v1558_v56  ;;  %1949 = vmatmul.bf16.gmra.mxu0 %v1558_v56  ;;  %v1132_v21 = vadd.f32 %v1131_v48, %v963_v26  ;;  %v2059_v48 = vmax.f32 %v1911_v11, 0.0 }
 0x30a   : > { %v1419_v10 = vpop.f32.mrf.mxu2 }
 0x30b   : > { %v2243_v3 = vmax.f32 %v2241_v34, %v2242_v60  ;;  %v2231_v43 = vrot.slane %v2230_v38, 4  ;;  %v1420_v50 = vadd.f32 %v3784_v13, %v1419_v10  ;;  %v1201_v45 = vmax.f32 %v1132_v21, 0.0 }
 0x30c   : > { %v3847_v61 = vpop.f32.mrf.mxu3 }
 0x30d   : > { %v2244_v6 = vrot.slane %v2243_v3, 1  ;;  %v2232_v30 = vmax.f32 %v2230_v38, %v2231_v43  ;;  %v1516_v51 = vmax.f32 %v1420_v50, 0.0 }
 0x30e   : > { %v1912_v41 = vpop.f32.mrf.mxu0 }
 0x30f   : > { %v2245_v54 = vmax.f32 %v2243_v3, %v2244_v6  ;;  %v2233_v42 = vrot.slane %v2232_v30, 2  ;;  %v1913_v37 = vadd.f32 %v1912_v41, %v3663_v0  ;;  %v1742_v3 = vadd.f32 %v3847_v61, %v3670_v19 }
 0x310   : > { %v1133_v47 = vpop.f32.mrf.mxu1 }
 0x311   : > { %v3855_v18 = vsel %vm2466_vm4, %v2245_v54, %v3826_v2  ;;  %v2234_v27 = vmax.f32 %v2232_v30, %v2233_v42  ;;  %v1134_v22 = vadd.f32 %v1133_v47, %v965_v40  ;;  %v2061_v34 = vmax.f32 %v1913_v37, 0.0 }
 0x312   : > { %v1421_v20 = vpop.f32.mrf.mxu2  ;;  %v2058_v21 = vmax.f32 %v1742_v3, 0.0 }
 0x313   : > { %v2235_v36 = vrot.slane %v2234_v27, 1  ;;  %v1202_v57 = vmax.f32 %v1134_v22, 0.0  ;;  %v1422_v44 = vadd.f32 %v3784_v13, %v1421_v20  ;;  %v2255_v43 = vmax.f32 %v2059_v48, %v2061_v34 }
 0x314   : > { %v1743_v53 = vpop.f32.mrf.mxu3 }
 0x315   : > { %v2236_v59 = vmax.f32 %v2234_v27, %v2235_v36  ;;  %v1235_v63 = vpack.c.bf16 %v1202_v57, %v1201_v45  ;;  %v1517_v58 = vmax.f32 %v1422_v44, 0.0  ;;  %v1744_v60 = vadd.f32 %v1743_v53, %v3670_v19 }
 0x316   : > { %v1915_v15 = vpop.f32.mrf.mxu0 }
 0x317   : > { %v3861_v2 = vsel %vm2466_vm4, %v2236_v59, %v3833_v49  ;;  %v1559_v31 = vpack.c.bf16 %v1517_v58, %v1516_v51  ;;  %1463 = vmatmul.bf16.gmra.mxu2 %v1235_v63  ;;  %v1916_v7 = vadd.f32 %v1915_v15, %v3663_v0  ;;  %v2060_v30 = vmax.f32 %v1744_v60, 0.0 }
 0x318   : > { %v1136_v55 = vpop.f32.mrf.mxu1 }
 0x319   : > { %1785 = vmatmul.bf16.gmra.mxu3 %v1559_v31  ;;  %1954 = vmatmul.bf16.gmra.mxu0 %v1559_v31  ;;  %v1137_v32 = vadd.f32 %v1136_v55, %v968_v4  ;;  %v2063_v38 = vmax.f32 %v1916_v7, 0.0  ;;  %v2246_v61 = vmax.f32 %v2058_v21, %v2060_v30 }
 0x31a   : > { %v1424_v5 = vpop.f32.mrf.mxu2 }
 0x31b   : > { %v1425_v52 = vadd.f32 %v3784_v13, %v1424_v5  ;;  %v1203_v29 = vmax.f32 %v1137_v32, 0.0  ;;  %v2256_v41 = vmax.f32 %v2255_v43, %v2063_v38 }
 0x31c   : > { %v1746_v9 = vpop.f32.mrf.mxu3 }
 0x31d   : > { %v1518_v12 = vmax.f32 %v1425_v52, 0.0  ;;  %v1747_v26 = vadd.f32 %v1746_v9, %v3670_v19 }
 0x31e   : > { %v1917_v62 = vpop.f32.mrf.mxu0 }
 0x31f   : > { %v1918_v56 = vadd.f32 %v1917_v62, %v3663_v0  ;;  %v2062_v47 = vmax.f32 %v1747_v26, 0.0 }
 0x320   : > { %v1138_v23 = vpop.f32.mrf.mxu1 }
 0x321   : > { %v1139_v49 = vadd.f32 %v1138_v23, %v970_v16  ;;  %v2065_v6 = vmax.f32 %v1918_v56, 0.0  ;;  %v2247_v53 = vmax.f32 %v2246_v61, %v2062_v47 }
 0x322   : > { %v1426_v24 = vpop.f32.mrf.mxu2 }
 0x323   : > { %v1204_v35 = vmax.f32 %v1139_v49, 0.0  ;;  %v1427_v8 = vadd.f32 %v3784_v13, %v1426_v24  ;;  %v2257_v27 = vmax.f32 %v2256_v41, %v2065_v6 }
 0x324   : > { %v1748_v46 = vpop.f32.mrf.mxu3 }
 0x325   : > { %v1236_v28 = vpack.c.bf16 %v1204_v35, %v1203_v29  ;;  %v1519_v14 = vmax.f32 %v1427_v8, 0.0  ;;  %v1749_v40 = vadd.f32 %v1748_v46, %v3670_v19  ;;  %v2258_v59 = vrot.slane %v2257_v27, 4 }
 0x326   : > { %v1920_v17 = vpop.f32.mrf.mxu0 }
 0x327   : > { %v1560_v39 = vpack.c.bf16 %v1519_v14, %v1518_v12  ;;  %1468 = vmatmul.bf16.gmra.mxu2 %v1236_v28  ;;  %v2064_v36 = vmax.f32 %v1749_v40, 0.0  ;;  %v1921_v51 = vadd.f32 %v1920_v17, %v3663_v0  ;;  %v2259_v55 = vmax.f32 %v2257_v27, %v2258_v59 }
 0x329   : > { %1790 = vmatmul.bf16.gmra.mxu3 %v1560_v39  ;;  %1959 = vmatmul.bf16.gmra.mxu0 %v1560_v39  ;;  %v2248_v58 = vmax.f32 %v2247_v53, %v2064_v36  ;;  %v2067_v4 = vmax.f32 %v1921_v51, 0.0  ;;  %v2260_v29 = vrot.slane %v2259_v55, 2 }
 0x32a   : > { %v1429_v33 = vpop.f32.mrf.mxu2 }
 0x32b   : > { %v1430_v25 = vadd.f32 %v3784_v13, %v1429_v33  ;;  %v2249_v16 = vrot.slane %v2248_v58, 4  ;;  %v2261_v7 = vmax.f32 %v2259_v55, %v2260_v29 }
 0x32c   : > { %v1751_v1 = vpop.f32.mrf.mxu3 }
 0x32d   : > { %v1520_v22 = vmax.f32 %v1430_v25, 0.0  ;;  %v1752_v32 = vadd.f32 %v1751_v1, %v3670_v19  ;;  %v2250_v28 = vmax.f32 %v2248_v58, %v2249_v16  ;;  %v2262_v25 = vrot.slane %v2261_v7, 1 }
 0x32e   : > { %v1922_v10 = vpop.f32.mrf.mxu0 }
 0x32f   : > { %v1923_v57 = vadd.f32 %v1922_v10, %v3663_v0  ;;  %v2066_v14 = vmax.f32 %v1752_v32, 0.0  ;;  %v2251_v38 = vrot.slane %v2250_v28, 2  ;;  %v2263_v47 = vmax.f32 %v2261_v7, %v2262_v25 }
 0x331   : > { %v2069_v31 = vmax.f32 %v1923_v57, 0.0  ;;  %v2252_v40 = vmax.f32 %v2250_v28, %v2251_v38  ;;  %v2477_v53 = vsel %vm2468_vm5, %v2263_v47, %v3855_v18 }
 0x332   : > { %v1431_v54 = vpop.f32.mrf.mxu2 }
 0x333   : > { %v1432_v42 = vadd.f32 %v3784_v13, %v1431_v54  ;;  %v2273_v52 = vmax.f32 %v2067_v4, %v2069_v31  ;;  %v2253_v61 = vrot.slane %v2252_v40, 1 }
 0x334   : > { %v1753_v50 = vpop.f32.mrf.mxu3 }
 0x335   : > { %v1521_v20 = vmax.f32 %v1432_v42, 0.0  ;;  %v1754_v5 = vadd.f32 %v1753_v50, %v3670_v19  ;;  %v2254_v31 = vmax.f32 %v2252_v40, %v2253_v61 }
 0x336   : > { %v1925_v45 = vpop.f32.mrf.mxu0 }
 0x337   : > { %v1561_v44 = vpack.c.bf16 %v1521_v20, %v1520_v22  ;;  %v1926_v63 = vadd.f32 %v1925_v45, %v3663_v0  ;;  %v2068_v35 = vmax.f32 %v1754_v5, 0.0 }
 0x339   : > { %1795 = vmatmul.bf16.gmra.mxu3 %v1561_v44  ;;  %1964 = vmatmul.bf16.gmra.mxu0 %v1561_v44  ;;  %v2071_v62 = vmax.f32 %v1926_v63, 0.0  ;;  %v2264_v33 = vmax.f32 %v2066_v14, %v2068_v35 }
 0x33a   : > { %v1434_v15 = vpop.f32.mrf.mxu2 }
 0x33b   : > { %v2274_v8 = vmax.f32 %v2273_v52, %v2071_v62  ;;  %v1435_v46 = vadd.f32 %v3784_v13, %v1434_v15 }
 0x33c   : > { %v1756_v9 = vpop.f32.mrf.mxu3 }
 0x33d   : > { %v1757_v49 = vadd.f32 %v1756_v9, %v3670_v19  ;;  %v1522_v56 = vmax.f32 %v1435_v46, 0.0 }
 0x33e   : > { %v1927_v23 = vpop.f32.mrf.mxu0 }
 0x33f   : > { %v1928_v24 = vadd.f32 %v1927_v23, %v3663_v0  ;;  %v2070_v39 = vmax.f32 %v1757_v49, 0.0  ;;  %v2469_v49 = vsel %vm2468_vm5, %v2254_v31, %v3861_v2 }
 0x341   : > { %v2073_v12 = vmax.f32 %v1928_v24, 0.0  ;;  %v2265_v3 = vmax.f32 %v2264_v33, %v2070_v39 }
 0x342   : > { %v1436_v17 = vpop.f32.mrf.mxu2 }
 0x343   : > { %v2275_v37 = vmax.f32 %v2274_v8, %v2073_v12  ;;  %v1437_v11 = vadd.f32 %v3784_v13, %v1436_v17 }
 0x344   : > { %v1758_v34 = vpop.f32.mrf.mxu3 }
 0x345   : > { %v2276_v1 = vrot.slane %v2275_v37, 4  ;;  %v1523_v48 = vmax.f32 %v1437_v11, 0.0  ;;  %v1759_v60 = vadd.f32 %v1758_v34, %v3670_v19 }
 0x346   : > { %v1930_v10 = vpop.f32.mrf.mxu0 }
 0x347   : > { %v2277_v43 = vmax.f32 %v2275_v37, %v2276_v1  ;;  %v1562_v26 = vpack.c.bf16 %v1523_v48, %v1522_v56  ;;  %v2072_v6 = vmax.f32 %v1759_v60, 0.0  ;;  %v1931_v27 = vadd.f32 %v1930_v10, %v3663_v0 }
 0x349   : > { %v2278_v30 = vrot.slane %v2277_v43, 2  ;;  %v2266_v41 = vmax.f32 %v2265_v3, %v2072_v6  ;;  %1800 = vmatmul.bf16.gmra.mxu3 %v1562_v26  ;;  %1969 = vmatmul.bf16.gmra.mxu0 %v1562_v26  ;;  %v2075_v59 = vmax.f32 %v1931_v27, 0.0 }
 0x34a   : > { %v1439_v54 = vpop.f32.mrf.mxu2 }
 0x34b   : > { %v2279_v42 = vmax.f32 %v2277_v43, %v2278_v30  ;;  %v2267_v21 = vrot.slane %v2266_v41, 4  ;;  %v1440_v58 = vadd.f32 %v3784_v13, %v1439_v54 }
 0x34c   : > { %v1761_v50 = vpop.f32.mrf.mxu3 }
 0x34d   : > { %v2280_v22 = vrot.slane %v2279_v42, 1  ;;  %v2268_v20 = vmax.f32 %v2266_v41, %v2267_v21  ;;  %v1762_v55 = vadd.f32 %v1761_v50, %v3670_v19  ;;  %v1524_v18 = vmax.f32 %v1440_v58, 0.0 }
 0x34e   : > { %v1932_v36 = vpop.f32.mrf.mxu0 }
 0x34f   : > { %v2281_v45 = vmax.f32 %v2279_v42, %v2280_v22  ;;  %v2269_v57 = vrot.slane %v2268_v20, 2  ;;  %v1933_v44 = vadd.f32 %v1932_v36, %v3663_v0  ;;  %v2074_v24 = vmax.f32 %v1762_v55, 0.0 }
 0x351   : > { %v2478_v51 = vsel %vm2470_vm6, %v2281_v45, %v2477_v53  ;;  %v2270_v63 = vmax.f32 %v2268_v20, %v2269_v57  ;;  %v2077_v15 = vmax.f32 %v1933_v44, 0.0 }
 0x352   : > { %2498 = vst [vmem:[%s3897_s11 + $0x8] sm:$0xff] %v2478_v51  ;;  %v1441_v5 = vpop.f32.mrf.mxu2 }
 0x353   : > { %v2271_v9 = vrot.slane %v2270_v63, 1  ;;  %v2291_v4 = vmax.f32 %v2075_v59, %v2077_v15  ;;  %v1442_v62 = vadd.f32 %v3784_v13, %v1441_v5 }
 0x354   : > { %v1763_v16 = vpop.f32.mrf.mxu3 }
 0x355   : > { %v2272_v32 = vmax.f32 %v2270_v63, %v2271_v9  ;;  %v1525_v23 = vmax.f32 %v1442_v62, 0.0  ;;  %v1764_v52 = vadd.f32 %v1763_v16, %v3670_v19 }
 0x356   : > { %v1935_v29 = vpop.f32.mrf.mxu0 }
 0x357   : > { %v2471_v35 = vsel %vm2470_vm6, %v2272_v32, %v2469_v49  ;;  %v1563_v8 = vpack.c.bf16 %v1525_v23, %v1524_v18  ;;  %v2076_v46 = vmax.f32 %v1764_v52, 0.0  ;;  %v1936_v12 = vadd.f32 %v1935_v29, %v3663_v0 }
 0x358   : > { %2497 = vst [vmem:[%s3897_s11] sm:$0xff] %v2471_v35 }
 0x359   : > { %v2282_v28 = vmax.f32 %v2074_v24, %v2076_v46  ;;  %v2079_v14 = vmax.f32 %v1936_v12, 0.0  ;;  %1805 = vmatmul.bf16.gmra.mxu3 %v1563_v8  ;;  %1974 = vmatmul.bf16.gmra.mxu0 %v1563_v8 }
 0x35a   : > { %v1444_v17 = vpop.f32.mrf.mxu2 }
 0x35b   : > { %v2292_v39 = vmax.f32 %v2291_v4, %v2079_v14  ;;  %v1445_v34 = vadd.f32 %v3784_v13, %v1444_v17 }
 0x35c   : > { %v1766_v37 = vpop.f32.mrf.mxu3 }
 0x35d   : > { %v1767_v11 = vadd.f32 %v1766_v37, %v3670_v19  ;;  %v1526_v3 = vmax.f32 %v1445_v34, 0.0 }
 0x35e   : > { %v1937_v7 = vpop.f32.mrf.mxu0 }
 0x35f   : > { %v2078_v2 = vmax.f32 %v1767_v11, 0.0  ;;  %v1938_v33 = vadd.f32 %v1937_v7, %v3663_v0 }
 0x361   : > { %v2283_v56 = vmax.f32 %v2282_v28, %v2078_v2  ;;  %v2081_v1 = vmax.f32 %v1938_v33, 0.0 }
 0x362   : > { %v1446_v48 = vpop.f32.mrf.mxu2 }
 0x363   : > { %v2293_v60 = vmax.f32 %v2292_v39, %v2081_v1  ;;  %v1447_v38 = vadd.f32 %v3784_v13, %v1446_v48 }
 0x364   : > { %v1768_v10 = vpop.f32.mrf.mxu3 }
 0x365   : > { %v1527_v43 = vmax.f32 %v1447_v38, 0.0  ;;  %v1769_v26 = vadd.f32 %v1768_v10, %v3670_v19  ;;  %v2294_v4 = vrot.slane %v2293_v60, 4 }
 0x366   : > { %v1940_v6 = vpop.f32.mrf.mxu0 }
 0x367   : > { %v1564_v25 = vpack.c.bf16 %v1527_v43, %v1526_v3  ;;  %v2080_v30 = vmax.f32 %v1769_v26, 0.0  ;;  %v1941_v42 = vadd.f32 %v1940_v6, %v3663_v0  ;;  %v2295_v23 = vmax.f32 %v2293_v60, %v2294_v4 }
 0x369   : > { %v2284_v41 = vmax.f32 %v2283_v56, %v2080_v30  ;;  %1810 = vmatmul.bf16.gmra.mxu3 %v1564_v25  ;;  %1979 = vmatmul.bf16.gmra.mxu0 %v1564_v25  ;;  %v2083_v27 = vmax.f32 %v1941_v42, 0.0  ;;  %v2296_v12 = vrot.slane %v2295_v23, 2 }
 0x36a   : > { %v1449_v40 = vpop.f32.mrf.mxu2 }
 0x36b   : > { %v1450_v50 = vadd.f32 %v3784_v13, %v1449_v40  ;;  %v2285_v24 = vrot.slane %v2284_v41, 4  ;;  %v2297_v34 = vmax.f32 %v2295_v23, %v2296_v12 }
 0x36c   : > { %v1771_v54 = vpop.f32.mrf.mxu3 }
 0x36d   : > { %v1772_v61 = vadd.f32 %v1771_v54, %v3670_v19  ;;  %v1528_v44 = vmax.f32 %v1450_v50, 0.0  ;;  %v2286_v17 = vmax.f32 %v2284_v41, %v2285_v24  ;;  %v2298_v43 = vrot.slane %v2297_v34, 1 }
 0x36e   : > { %v1942_v21 = vpop.f32.mrf.mxu0 }
 0x36f   : > { %v1943_v47 = vadd.f32 %v1942_v21, %v3663_v0  ;;  %v2082_v63 = vmax.f32 %v1772_v61, 0.0  ;;  %v2287_v60 = vrot.slane %v2286_v17, 2  ;;  %v2299_v21 = vmax.f32 %v2297_v34, %v2298_v43 }
 0x371   : > { %v2085_v22 = vmax.f32 %v1943_v47, 0.0  ;;  %v2288_v25 = vmax.f32 %v2286_v17, %v2287_v60 }
 0x372   : > { %v1451_v20 = vpop.f32.mrf.mxu2 }
 0x373   : > { %v2309_v36 = vmax.f32 %v2083_v27, %v2085_v22  ;;  %v1452_v45 = vadd.f32 %v3784_v13, %v1451_v20  ;;  %v2289_v22 = vrot.slane %v2288_v25, 1 }
 0x374   : > { %v1773_v57 = vpop.f32.mrf.mxu3 }
 0x375   : > { %v1529_v53 = vmax.f32 %v1452_v45, 0.0  ;;  %v1774_v59 = vadd.f32 %v1773_v57, %v3670_v19 }
 0x376   : > { %v1945_v51 = vpop.f32.mrf.mxu0 }
 0x377   : > { %v1565_v58 = vpack.c.bf16 %v1529_v53, %v1528_v44  ;;  %v2084_v15 = vmax.f32 %v1774_v59, 0.0  ;;  %v1946_v31 = vadd.f32 %v1945_v51, %v3663_v0 }
 0x379   : > { %v2300_v55 = vmax.f32 %v2082_v63, %v2084_v15  ;;  %v2087_v5 = vmax.f32 %v1946_v31, 0.0  ;;  %1815 = vmatmul.bf16.gmra.mxu3 %v1565_v58  ;;  %1984 = vmatmul.bf16.gmra.mxu0 %v1565_v58  ;;  %v2290_v58 = vmax.f32 %v2288_v25, %v2289_v22 }
 0x37a   : > { %v1454_v9 = vpop.f32.mrf.mxu2 }
 0x37b   : > { %v2310_v62 = vmax.f32 %v2309_v36, %v2087_v5  ;;  %v1455_v29 = vadd.f32 %v3784_v13, %v1454_v9 }
 0x37c   : > { %v1776_v16 = vpop.f32.mrf.mxu3 }
 0x37d   : > { %v1777_v32 = vadd.f32 %v1776_v16, %v3670_v19  ;;  %v1530_v37 = vmax.f32 %v1455_v29, 0.0 }
 0x37e   : > { %v1947_v18 = vpop.f32.mrf.mxu0 }
 0x37f   : > { %v2086_v52 = vmax.f32 %v1777_v32, 0.0  ;;  %v1948_v49 = vadd.f32 %v1947_v18, %v3663_v0 }
 0x381   : > { %v2301_v35 = vmax.f32 %v2300_v55, %v2086_v52  ;;  %v2089_v8 = vmax.f32 %v1948_v49, 0.0 }
 0x382   : > { %v1456_v46 = vpop.f32.mrf.mxu2 }
 0x383   : > { %v2311_v28 = vmax.f32 %v2310_v62, %v2089_v8  ;;  %v1457_v14 = vadd.f32 %v3784_v13, %v1456_v46 }
 0x384   : > { %v1778_v39 = vpop.f32.mrf.mxu3 }
 0x385   : > { %v2312_v11 = vrot.slane %v2311_v28, 4  ;;  %v1531_v7 = vmax.f32 %v1457_v14, 0.0  ;;  %v1779_v2 = vadd.f32 %v1778_v39, %v3670_v19 }
 0x386   : > { %v1950_v33 = vpop.f32.mrf.mxu0 }
 0x387   : > { %v2313_v56 = vmax.f32 %v2311_v28, %v2312_v11  ;;  %v1566_v1 = vpack.c.bf16 %v1531_v7, %v1530_v37  ;;  %v2088_v48 = vmax.f32 %v1779_v2, 0.0  ;;  %v1951_v30 = vadd.f32 %v1950_v33, %v3663_v0  ;;  %v3130_v7 = vld [vmem:[%s4019_s4] ss:$0 sm:$0xff] }
 0x389   : > { %v2314_v38 = vrot.slane %v2313_v56, 2  ;;  %v2302_v10 = vmax.f32 %v2301_v35, %v2088_v48  ;;  %1820 = vmatmul.bf16.gmra.mxu3 %v1566_v1  ;;  %1989 = vmatmul.bf16.gmra.mxu0 %v1566_v1  ;;  %v2091_v20 = vmax.f32 %v1951_v30, 0.0 }
 0x38a   : > { %v1459_v3 = vpop.f32.mrf.mxu2 }
 0x38b   : > { %v2315_v26 = vmax.f32 %v2313_v56, %v2314_v38  ;;  %v2303_v6 = vrot.slane %v2302_v10, 4  ;;  %v1460_v45 = vadd.f32 %v3784_v13, %v1459_v3 }
 0x38c   : > { %v1781_v41 = vpop.f32.mrf.mxu3 }
 0x38d   : > { %v2316_v40 = vrot.slane %v2315_v26, 1  ;;  %v2304_v54 = vmax.f32 %v2302_v10, %v2303_v6  ;;  %v1782_v44 = vadd.f32 %v1781_v41, %v3670_v19  ;;  %v1532_v55 = vmax.f32 %v1460_v45, 0.0 }
 0x38e   : > { %v1952_v42 = vpop.f32.mrf.mxu0 }
 0x38f   : > { %v2317_v47 = vmax.f32 %v2315_v26, %v2316_v40  ;;  %v2305_v27 = vrot.slane %v2304_v54, 2  ;;  %v1953_v50 = vadd.f32 %v1952_v42, %v3663_v0  ;;  %v2090_v4 = vmax.f32 %v1782_v44, 0.0 }
 0x391   : > { %v3933_v61 = vsel %vm2458_vm0, %v2317_v47, %v2299_v21  ;;  %v2306_v36 = vmax.f32 %v2304_v54, %v2305_v27  ;;  %v2093_v57 = vmax.f32 %v1953_v50, 0.0 }
 0x392   : > { %v1461_v53 = vpop.f32.mrf.mxu2 }
 0x393   : > { %v2307_v59 = vrot.slane %v2306_v36, 1  ;;  %v2327_v51 = vmax.f32 %v2091_v20, %v2093_v57  ;;  %v1462_v63 = vadd.f32 %v3784_v13, %v1461_v53 }
 0x394   : > { %v1783_v15 = vpop.f32.mrf.mxu3 }
 0x395   : > { %v2308_v31 = vmax.f32 %v2306_v36, %v2307_v59  ;;  %v1533_v5 = vmax.f32 %v1462_v63, 0.0  ;;  %v1784_v9 = vadd.f32 %v1783_v15, %v3670_v19 }
 0x396   : > { %v1955_v62 = vpop.f32.mrf.mxu0 }
 0x397   : > { %v3940_v16 = vsel %vm2458_vm0, %v2308_v31, %v2290_v58  ;;  %v1567_v32 = vpack.c.bf16 %v1533_v5, %v1532_v55  ;;  %v2092_v18 = vmax.f32 %v1784_v9, 0.0  ;;  %v1956_v23 = vadd.f32 %v1955_v62, %v3663_v0 }
 0x399   : > { %v2318_v52 = vmax.f32 %v2090_v4, %v2092_v18  ;;  %v2095_v49 = vmax.f32 %v1956_v23, 0.0  ;;  %1825 = vmatmul.bf16.gmra.mxu3 %v1567_v32  ;;  %1994 = vmatmul.bf16.gmra.mxu0 %v1567_v32 }
 0x39a   : > { %v1464_v24 = vpop.f32.mrf.mxu2 }
 0x39b   : > { %v2328_v29 = vmax.f32 %v2327_v51, %v2095_v49  ;;  %v1465_v14 = vadd.f32 %v3784_v13, %v1464_v24 }
 0x39c   : > { %v1786_v35 = vpop.f32.mrf.mxu3 }
 0x39d   : > { %v1787_v8 = vadd.f32 %v1786_v35, %v3670_v19  ;;  %v1534_v34 = vmax.f32 %v1465_v14, 0.0 }
 0x39e   : > { %v1957_v46 = vpop.f32.mrf.mxu0 }
 0x39f   : > { %v2094_v12 = vmax.f32 %v1787_v8, 0.0  ;;  %v1958_v28 = vadd.f32 %v1957_v46, %v3663_v0 }
 0x3a1   : > { %v2319_v17 = vmax.f32 %v2318_v52, %v2094_v12  ;;  %v2097_v39 = vmax.f32 %v1958_v28, 0.0 }
 0x3a2   : > { %v1466_v37 = vpop.f32.mrf.mxu2 }
 0x3a3   : > { %v2329_v11 = vmax.f32 %v2328_v29, %v2097_v39  ;;  %v1467_v2 = vadd.f32 %v3130_v7, %v1466_v37 }
 0x3a4   : > { %v1788_v33 = vpop.f32.mrf.mxu3 }
 0x3a5   : > { %v2330_v56 = vrot.slane %v2329_v11, 4  ;;  %v1535_v1 = vmax.f32 %v1467_v2, 0.0  ;;  %v1789_v48 = vadd.f32 %v1788_v33, %v3670_v19 }
 0x3a6   : > { %v1960_v60 = vpop.f32.mrf.mxu0 }
 0x3a7   : > { %v2331_v38 = vmax.f32 %v2329_v11, %v2330_v56  ;;  %v1568_v10 = vpack.c.bf16 %v1535_v1, %v1534_v34  ;;  %v2096_v3 = vmax.f32 %v1789_v48, 0.0  ;;  %v1961_v30 = vadd.f32 %v1960_v60, %v3663_v0 }
 0x3a9   : > { %v2332_v13 = vrot.slane %v2331_v38, 2  ;;  %v2320_v43 = vmax.f32 %v2319_v17, %v2096_v3  ;;  %1830 = vmatmul.bf16.gmra.mxu3 %v1568_v10  ;;  %1999 = vmatmul.bf16.gmra.mxu0 %v1568_v10  ;;  %v2099_v50 = vmax.f32 %v1961_v30, 0.0 }
 0x3aa   : > { %v1469_v26 = vpop.f32.mrf.mxu2 }
 0x3ab   : > { %v2333_v6 = vmax.f32 %v2331_v38, %v2332_v13  ;;  %v2321_v25 = vrot.slane %v2320_v43, 4  ;;  %v1470_v36 = vadd.f32 %v3130_v7, %v1469_v26 }
 0x3ac   : > { %v1791_v41 = vpop.f32.mrf.mxu3 }
 0x3ad   : > { %v2334_v40 = vrot.slane %v2333_v6, 1  ;;  %v2322_v54 = vmax.f32 %v2320_v43, %v2321_v25  ;;  %v1792_v57 = vadd.f32 %v1791_v41, %v3670_v19  ;;  %v1536_v15 = vmax.f32 %v1470_v36, 0.0 }
 0x3ae   : > { %v1962_v42 = vpop.f32.mrf.mxu0 }
 0x3af   : > { %v2335_v21 = vmax.f32 %v2333_v6, %v2334_v40  ;;  %v2323_v47 = vrot.slane %v2322_v54, 2  ;;  %v1963_v27 = vadd.f32 %v1962_v42, %v3663_v0  ;;  %v2098_v5 = vmax.f32 %v1792_v57, 0.0 }
 0x3b1   : > { %v2487_v22 = vsel %vm2460_vm1, %v2335_v21, %v3933_v61  ;;  %v2324_v20 = vmax.f32 %v2322_v54, %v2323_v47  ;;  %v2101_v45 = vmax.f32 %v1963_v27, 0.0 }
 0x3b2   : > { %v1471_v44 = vpop.f32.mrf.mxu2 }
 0x3b3   : > { %v2325_v53 = vrot.slane %v2324_v20, 1  ;;  %v2345_v59 = vmax.f32 %v2099_v50, %v2101_v45  ;;  %v1472_v51 = vadd.f32 %v3130_v7, %v1471_v44 }
 0x3b4   : > { %v1793_v63 = vpop.f32.mrf.mxu3 }
 0x3b5   : > { %v2326_v58 = vmax.f32 %v2324_v20, %v2325_v53  ;;  %v1537_v31 = vmax.f32 %v1472_v51, 0.0  ;;  %v1794_v55 = vadd.f32 %v1793_v63, %v3670_v19 }
 0x3b6   : > { %v1965_v9 = vpop.f32.mrf.mxu0 }
 0x3b7   : > { %v2480_v61 = vsel %vm2460_vm1, %v2326_v58, %v3940_v16  ;;  %v1569_v4 = vpack.c.bf16 %v1537_v31, %v1536_v15  ;;  %v2100_v62 = vmax.f32 %v1794_v55, 0.0  ;;  %v1966_v32 = vadd.f32 %v1965_v9, %v3663_v0 }
 0x3b9   : > { %v2336_v18 = vmax.f32 %v2098_v5, %v2100_v62  ;;  %v2103_v23 = vmax.f32 %v1966_v32, 0.0  ;;  %1835 = vmatmul.bf16.gmra.mxu3 %v1569_v4  ;;  %2004 = vmatmul.bf16.gmra.mxu0 %v1569_v4 }
 0x3bb   : > { %v2346_v52 = vmax.f32 %v2345_v59, %v2103_v23 }
 0x3bc   : > { %v1796_v49 = vpop.f32.mrf.mxu3 }
 0x3bd   : > { %v1797_v24 = vadd.f32 %v1796_v49, %v3670_v19 }
 0x3be   : > { %v1967_v29 = vpop.f32.mrf.mxu0 }
 0x3bf   : > { %v2102_v35 = vmax.f32 %v1797_v24, 0.0  ;;  %v1968_v8 = vadd.f32 %v1967_v29, %v3663_v0 }
 0x3c1   : > { %v2337_v46 = vmax.f32 %v2336_v18, %v2102_v35  ;;  %v2105_v12 = vmax.f32 %v1968_v8, 0.0 }
 0x3c3   : > { %v2347_v28 = vmax.f32 %v2346_v52, %v2105_v12 }
 0x3c4   : > { %v1798_v16 = vpop.f32.mrf.mxu3 }
 0x3c5   : > { %v2348_v14 = vrot.slane %v2347_v28, 4  ;;  %v1799_v17 = vadd.f32 %v1798_v16, %v3670_v19 }
 0x3c6   : > { %v1970_v39 = vpop.f32.mrf.mxu0 }
 0x3c7   : > { %v2349_v37 = vmax.f32 %v2347_v28, %v2348_v14  ;;  %v2104_v11 = vmax.f32 %v1799_v17, 0.0  ;;  %v1971_v60 = vadd.f32 %v1970_v39, %v3663_v0 }
 0x3c9   : > { %v2350_v7 = vrot.slane %v2349_v37, 2  ;;  %v2338_v2 = vmax.f32 %v2337_v46, %v2104_v11  ;;  %v2107_v6 = vmax.f32 %v1971_v60, 0.0 }
 0x3cb   : > { %v2351_v33 = vmax.f32 %v2349_v37, %v2350_v7  ;;  %v2339_v34 = vrot.slane %v2338_v2, 4 }
 0x3cc   : > { %v1801_v56 = vpop.f32.mrf.mxu3 }
 0x3cd   : > { %v2352_v1 = vrot.slane %v2351_v33, 1  ;;  %v2340_v48 = vmax.f32 %v2338_v2, %v2339_v34  ;;  %v1802_v41 = vadd.f32 %v1801_v56, %v3670_v19 }
 0x3ce   : > { %v1972_v38 = vpop.f32.mrf.mxu0 }
 0x3cf   : > { %v2353_v10 = vmax.f32 %v2351_v33, %v2352_v1  ;;  %v2341_v3 = vrot.slane %v2340_v48, 2  ;;  %v1973_v13 = vadd.f32 %v1972_v38, %v3663_v0  ;;  %v2106_v50 = vmax.f32 %v1802_v41, 0.0 }
 0x3d1   : > { %v2488_v43 = vsel %vm2462_vm2, %v2353_v10, %v2487_v22  ;;  %v2342_v26 = vmax.f32 %v2340_v48, %v2341_v3  ;;  %v2109_v25 = vmax.f32 %v1973_v13, 0.0 }
 0x3d3   : > { %v2343_v30 = vrot.slane %v2342_v26, 1  ;;  %v2363_v40 = vmax.f32 %v2107_v6, %v2109_v25 }
 0x3d4   : > { %v1803_v54 = vpop.f32.mrf.mxu3 }
 0x3d5   : > { %v2344_v42 = vmax.f32 %v2342_v26, %v2343_v30  ;;  %v1804_v21 = vadd.f32 %v1803_v54, %v3670_v19 }
 0x3d6   : > { %v1975_v47 = vpop.f32.mrf.mxu0 }
 0x3d7   : > { %v2481_v27 = vsel %vm2462_vm2, %v2344_v42, %v2480_v61  ;;  %v2108_v20 = vmax.f32 %v1804_v21, 0.0  ;;  %v1976_v36 = vadd.f32 %v1975_v47, %v3663_v0 }
 0x3d9   : > { %v2354_v45 = vmax.f32 %v2106_v50, %v2108_v20  ;;  %v2111_v22 = vmax.f32 %v1976_v36, 0.0 }
 0x3db   : > { %v2364_v57 = vmax.f32 %v2363_v40, %v2111_v22 }
 0x3dc   : > { %v1806_v44 = vpop.f32.mrf.mxu3 }
 0x3dd   : > { %v1807_v53 = vadd.f32 %v1806_v44, %v3670_v19 }
 0x3de   : > { %v1977_v59 = vpop.f32.mrf.mxu0 }
 0x3df   : > { %v2110_v51 = vmax.f32 %v1807_v53, 0.0  ;;  %v1978_v63 = vadd.f32 %v1977_v59, %v3663_v0 }
 0x3e1   : > { %v2355_v58 = vmax.f32 %v2354_v45, %v2110_v51  ;;  %v2113_v15 = vmax.f32 %v1978_v63, 0.0 }
 0x3e3   : > { %v2365_v31 = vmax.f32 %v2364_v57, %v2113_v15 }
 0x3e4   : > { %v1808_v55 = vpop.f32.mrf.mxu3 }
 0x3e5   : > { %v2366_v5 = vrot.slane %v2365_v31, 4  ;;  %v1809_v9 = vadd.f32 %v1808_v55, %v3670_v19 }
 0x3e6   : > { %v1980_v61 = vpop.f32.mrf.mxu0 }
 0x3e7   : > { %v2367_v4 = vmax.f32 %v2365_v31, %v2366_v5  ;;  %v2112_v62 = vmax.f32 %v1809_v9, 0.0  ;;  %v1981_v35 = vadd.f32 %v1980_v61, %v3663_v0 }
 0x3e9   : > { %v2368_v32 = vrot.slane %v2367_v4, 2  ;;  %v2356_v18 = vmax.f32 %v2355_v58, %v2112_v62  ;;  %v2115_v17 = vmax.f32 %v1981_v35, 0.0 }
 0x3eb   : > { %v2369_v23 = vmax.f32 %v2367_v4, %v2368_v32  ;;  %v2357_v52 = vrot.slane %v2356_v18, 4 }
 0x3ec   : > { %v1811_v49 = vpop.f32.mrf.mxu3 }
 0x3ed   : > { %v2370_v24 = vrot.slane %v2369_v23, 1  ;;  %v2358_v29 = vmax.f32 %v2356_v18, %v2357_v52  ;;  %v1812_v11 = vadd.f32 %v1811_v49, %v3670_v19 }
 0x3ee   : > { %v1982_v8 = vpop.f32.mrf.mxu0 }
 0x3ef   : > { %v2371_v46 = vmax.f32 %v2369_v23, %v2370_v24  ;;  %v2359_v12 = vrot.slane %v2358_v29, 2  ;;  %v1983_v28 = vadd.f32 %v1982_v8, %v3663_v0  ;;  %v2114_v48 = vmax.f32 %v1812_v11, 0.0 }
 0x3f1   : > { %v2489_v16 = vsel %vm2464_vm3, %v2371_v46, %v2488_v43  ;;  %v2360_v14 = vmax.f32 %v2358_v29, %v2359_v12  ;;  %v2117_v39 = vmax.f32 %v1983_v28, 0.0 }
 0x3f3   : > { %v2361_v37 = vrot.slane %v2360_v14, 1  ;;  %v2381_v7 = vmax.f32 %v2115_v17, %v2117_v39 }
 0x3f4   : > { %v1813_v2 = vpop.f32.mrf.mxu3 }
 0x3f5   : > { %v2362_v33 = vmax.f32 %v2360_v14, %v2361_v37  ;;  %v1814_v34 = vadd.f32 %v1813_v2, %v3670_v19 }
 0x3f6   : > { %v1985_v56 = vpop.f32.mrf.mxu0 }
 0x3f7   : > { %v2482_v1 = vsel %vm2464_vm3, %v2362_v33, %v2481_v27  ;;  %v2116_v60 = vmax.f32 %v1814_v34, 0.0  ;;  %v1986_v38 = vadd.f32 %v1985_v56, %v3663_v0 }
 0x3f9   : > { %v2372_v10 = vmax.f32 %v2114_v48, %v2116_v60  ;;  %v2119_v3 = vmax.f32 %v1986_v38, 0.0 }
 0x3fb   : > { %v2382_v13 = vmax.f32 %v2381_v7, %v2119_v3 }
 0x3fc   : > { %v1816_v43 = vpop.f32.mrf.mxu3 }
 0x3fd   : > { %v1817_v26 = vadd.f32 %v1816_v43, %v3670_v19 }
 0x3fe   : > { %v1987_v6 = vpop.f32.mrf.mxu0 }
 0x3ff   : > { %v2118_v25 = vmax.f32 %v1817_v26, 0.0  ;;  %v1988_v30 = vadd.f32 %v1987_v6, %v3663_v0 }
 0x401   : > { %v2373_v41 = vmax.f32 %v2372_v10, %v2118_v25  ;;  %v2121_v40 = vmax.f32 %v1988_v30, 0.0 }
 0x403   : > { %v2383_v54 = vmax.f32 %v2382_v13, %v2121_v40 }
 0x404   : > { %v1818_v42 = vpop.f32.mrf.mxu3 }
 0x405   : > { %v2384_v21 = vrot.slane %v2383_v54, 4  ;;  %v1819_v47 = vadd.f32 %v1818_v42, %v3670_v19 }
 0x406   : > { %v1990_v27 = vpop.f32.mrf.mxu0 }
 0x407   : > { %v2385_v50 = vmax.f32 %v2383_v54, %v2384_v21  ;;  %v2120_v20 = vmax.f32 %v1819_v47, 0.0  ;;  %v1991_v49 = vadd.f32 %v1990_v27, %v3663_v0 }
 0x409   : > { %v2386_v36 = vrot.slane %v2385_v50, 2  ;;  %v2374_v45 = vmax.f32 %v2373_v41, %v2120_v20  ;;  %v2123_v46 = vmax.f32 %v1991_v49, 0.0 }
 0x40b   : > { %v2387_v22 = vmax.f32 %v2385_v50, %v2386_v36  ;;  %v2375_v57 = vrot.slane %v2374_v45, 4 }
 0x40c   : > { %v1821_v44 = vpop.f32.mrf.mxu3 }
 0x40d   : > { %v2388_v53 = vrot.slane %v2387_v22, 1  ;;  %v2376_v59 = vmax.f32 %v2374_v45, %v2375_v57  ;;  %v1822_v14 = vadd.f32 %v1821_v44, %v3670_v19 }
 0x40e   : > { %v1992_v51 = vpop.f32.mrf.mxu0 }
 0x40f   : > { %v2389_v63 = vmax.f32 %v2387_v22, %v2388_v53  ;;  %v2377_v58 = vrot.slane %v2376_v59, 2  ;;  %v1993_v52 = vadd.f32 %v1992_v51, %v3663_v0  ;;  %v2122_v33 = vmax.f32 %v1822_v14, 0.0 }
 0x411   : > { %v3983_v15 = vsel %vm2466_vm4, %v2389_v63, %v2489_v16  ;;  %v2378_v31 = vmax.f32 %v2376_v59, %v2377_v58  ;;  %v2125_v29 = vmax.f32 %v1993_v52, 0.0 }
 0x413   : > { %v2379_v55 = vrot.slane %v2378_v31, 1  ;;  %v2399_v17 = vmax.f32 %v2123_v46, %v2125_v29 }
 0x414   : > { %v1823_v5 = vpop.f32.mrf.mxu3 }
 0x415   : > { %v2380_v9 = vmax.f32 %v2378_v31, %v2379_v55  ;;  %v1824_v12 = vadd.f32 %v1823_v5, %v3670_v19 }
 0x416   : > { %v1995_v61 = vpop.f32.mrf.mxu0 }
 0x417   : > { %v3986_v4 = vsel %vm2466_vm4, %v2380_v9, %v2482_v1  ;;  %v1996_v24 = vadd.f32 %v1995_v61, %v3663_v0  ;;  %v2124_v11 = vmax.f32 %v1824_v12, 0.0 }
 0x419   : > { %v2127_v28 = vmax.f32 %v1996_v24, 0.0  ;;  %v2390_v48 = vmax.f32 %v2122_v33, %v2124_v11 }
 0x41b   : > { %v2400_v7 = vmax.f32 %v2399_v17, %v2127_v28 }
 0x41c   : > { %v1826_v62 = vpop.f32.mrf.mxu3 }
 0x41d   : > { %v1827_v39 = vadd.f32 %v1826_v62, %v3670_v19 }
 0x41e   : > { %v1997_v32 = vpop.f32.mrf.mxu0 }
 0x41f   : > { %v1998_v35 = vadd.f32 %v1997_v32, %v3663_v0  ;;  %v2126_v34 = vmax.f32 %v1827_v39, 0.0 }
 0x421   : > { %v2129_v37 = vmax.f32 %v1998_v35, 0.0  ;;  %v2391_v3 = vmax.f32 %v2390_v48, %v2126_v34 }
 0x423   : > { %v2401_v56 = vmax.f32 %v2400_v7, %v2129_v37 }
 0x424   : > { %v1828_v18 = vpop.f32.mrf.mxu3 }
 0x425   : > { %v1829_v2 = vadd.f32 %v1828_v18, %v3670_v19  ;;  %v2402_v13 = vrot.slane %v2401_v56, 4 }
 0x426   : > { %v2000_v23 = vpop.f32.mrf.mxu0 }
 0x427   : > { %v2128_v60 = vmax.f32 %v1829_v2, 0.0  ;;  %v2001_v43 = vadd.f32 %v2000_v23, %v3663_v0  ;;  %v2403_v30 = vmax.f32 %v2401_v56, %v2402_v13 }
 0x429   : > { %v2392_v6 = vmax.f32 %v2391_v3, %v2128_v60  ;;  %v2131_v40 = vmax.f32 %v2001_v43, 0.0  ;;  %v2404_v45 = vrot.slane %v2403_v30, 2 }
 0x42b   : > { %v2393_v21 = vrot.slane %v2392_v6, 4  ;;  %v2405_v58 = vmax.f32 %v2403_v30, %v2404_v45 }
 0x42c   : > { %v1831_v8 = vpop.f32.mrf.mxu3 }
 0x42d   : > { %v1832_v27 = vadd.f32 %v1831_v8, %v3670_v19  ;;  %v2394_v53 = vmax.f32 %v2392_v6, %v2393_v21  ;;  %v2406_v23 = vrot.slane %v2405_v58, 1 }
 0x42e   : > { %v2002_v16 = vpop.f32.mrf.mxu0 }
 0x42f   : > { %v2003_v10 = vadd.f32 %v2002_v16, %v3663_v0  ;;  %v2130_v59 = vmax.f32 %v1832_v27, 0.0  ;;  %v2395_v61 = vrot.slane %v2394_v53, 2  ;;  %v2407_v35 = vmax.f32 %v2405_v58, %v2406_v23 }
 0x431   : > { %v2133_v25 = vmax.f32 %v2003_v10, 0.0  ;;  %v2396_v49 = vmax.f32 %v2394_v53, %v2395_v61 }
 0x433   : > { %v2417_v50 = vmax.f32 %v2131_v40, %v2133_v25  ;;  %v2397_v12 = vrot.slane %v2396_v49, 1 }
 0x434   : > { %v1833_v1 = vpop.f32.mrf.mxu3 }
 0x435   : > { %v1834_v54 = vadd.f32 %v1833_v1, %v3670_v19  ;;  %v2398_v39 = vmax.f32 %v2396_v49, %v2397_v12 }
 0x436   : > { %v2005_v38 = vpop.f32.mrf.mxu0 }
 0x437   : > { %v2006_v26 = vadd.f32 %v2005_v38, %v3663_v0  ;;  %v2132_v22 = vmax.f32 %v1834_v54, 0.0  ;;  %v2484_v7 = vsel %vm2468_vm5, %v2398_v39, %v3986_v4 }
 0x439   : > { %v2135_v42 = vmax.f32 %v2006_v26, 0.0  ;;  %v2408_v55 = vmax.f32 %v2130_v59, %v2132_v22 }
 0x43b   : > { %v2418_v57 = vmax.f32 %v2417_v50, %v2135_v42 }
 0x43c   : > { %v1836_v41 = vpop.f32.mrf.mxu3 }
 0x43d   : > { %v1837_v20 = vadd.f32 %v1836_v41, %v3670_v19 }
 0x43e   : > { %v2007_v47 = vpop.f32.mrf.mxu0 }
 0x43f   : > { %v2008_v36 = vadd.f32 %v2007_v47, %v3663_v0  ;;  %v2134_v51 = vmax.f32 %v1837_v20, 0.0 }
 0x441   : > { %v2137_v44 = vmax.f32 %v2008_v36, 0.0  ;;  %v2409_v62 = vmax.f32 %v2408_v55, %v2134_v51 }
 0x443   : > { %v2419_v63 = vmax.f32 %v2418_v57, %v2137_v44 }
 0x444   : > { %v1838_v31 = vpop.f32.mrf.mxu3 }
 0x445   : > { %v2420_v5 = vrot.slane %v2419_v63, 4  ;;  %v1839_v9 = vadd.f32 %v1838_v31, %v3670_v19  ;;  %v2491_v19 = vsel %vm2468_vm5, %v2407_v35, %v3983_v15 }
 0x447   : > { %v2421_v32 = vmax.f32 %v2419_v63, %v2420_v5  ;;  %v2136_v18 = vmax.f32 %v1839_v9, 0.0 }
 0x449   : > { %v2422_v0 = vrot.slane %v2421_v32, 2  ;;  %v2410_v52 = vmax.f32 %v2409_v62, %v2136_v18 }
 0x44b   : > { %v2423_v24 = vmax.f32 %v2421_v32, %v2422_v0  ;;  %v2411_v29 = vrot.slane %v2410_v52, 4 }
 0x44d   : > { %v2424_v8 = vrot.slane %v2423_v24, 1  ;;  %v2412_v46 = vmax.f32 %v2410_v52, %v2411_v29 }
 0x44f   : > { %v2425_v28 = vmax.f32 %v2423_v24, %v2424_v8  ;;  %v2413_v16 = vrot.slane %v2412_v46, 2 }
 0x451   : > { %v2492_v14 = vsel %vm2470_vm6, %v2425_v28, %v2491_v19  ;;  %v2414_v17 = vmax.f32 %v2412_v46, %v2413_v16 }
 0x452   : > { %2500 = vst [vmem:[%s3897_s11 + $0x18] sm:$0xff] %v2492_v14 }
 0x453   : > { %v2415_v37 = vrot.slane %v2414_v17, 1 }
 0x455   : > { %v2416_v11 = vmax.f32 %v2414_v17, %v2415_v37 }
 0x457   : > { %v2485_v2 = vsel %vm2470_vm6, %v2416_v11, %v2484_v7 }
 0x458   : > { %2499 = vst [vmem:[%s3897_s11 + $0x10] sm:$0xff] %v2485_v2 }
 0x459 PF: > { %s17_s24 = sadd.s32 1, %s3137_s24  }
 0x45a   : > { %p14_p5 = scmp.ge.s32.totalorder %s17_s24, 4  }
 0x45c   :  { %16 = sbr.rel (!%p14_p5) target bundleno = 1 (0x1), region = 78 }

// kernel: _lambda_.5
= control target key start
LH: loop header
LB: loop body
LE: loop exit
PB: predicated region body
PF: predicated region fallthrough
CT: control target
= control target key end

     0   :  { %12 = vsyncpa [#allocation3], 0  ;;  %s5619_s0 = inlined_call_operand.vmem [shape: bf16[16,32,384], index: 0, kind: input, shape index: {}]   ;;  %s5620_s1 = inlined_call_operand.vmem [shape: bf16[384,256], index: 1, kind: input, shape index: {}]   ;;  %s5621_s2 = inlined_call_operand.vmem [shape: f32[1,256], index: 2, kind: input, shape index: {}, may-alias: {2,4,6}]   ;;  %s5622_s3 = inlined_call_operand.vmem [shape: bf16[256,256], index: 3, kind: input, shape index: {}]   ;;  %s5623_s4 = inlined_call_operand.vmem [shape: f32[1,256], index: 4, kind: input, shape index: {}, may-alias: {2,4,6}]   ;;  %s5624_s5 = inlined_call_operand.vmem [shape: bf16[256,256], index: 5, kind: input, shape index: {}]   ;;  %s5625_s6 = inlined_call_operand.vmem [shape: f32[1,256], index: 6, kind: input, shape index: {}, may-alias: {2,4,6}]   ;;  %s5626_s7 = inlined_call_operand.hbm [shape: f32[16,256], index: 7, kind: output, shape index: {}]  }
   0x1   :  { %14 = vsyncpa [#allocation3 + $0x1], 0  ;;  %s4028_s24 = smov 0   ;;  %s4030_s25 = smov 0  }
   0x2   :  { %s4032_s26 = smov 0   ;;  %s4034_s27 = smov 0  }
   0x3 LB: > { %s4049_s28 = sadd.s32 4294967295, %s3986_s27   ;;  %s3055_s29 = sadd.s32 4294967294, %s3986_s27   ;;  %s3986_s27 = sphi %s4034_s27, %s5638_s27   ;;  %s3982_s26 = sphi %s4032_s26, %s5637_s26   ;;  %s3978_s25 = sphi %s4030_s25, %s5636_s25   ;;  %s3974_s24 = sphi %s4028_s24, %s5635_s24  }
   0x4   : > { %s4053_s30 = sadd.s32 1, %s3986_s27   ;;  %s179_s8 = sadd.s32 1, %s3982_s26 }
   0x5   : > { %s176_s9 = ssub.s32 %s3986_s27, %s4053_s30  ;;  %p189_p0 = scmp.ne.s32.totalorder %s3982_s26, %s3978_s25 }
   0x6   : > { %p177_p1 = scmp.eq.s32.totalorder %s176_s9, 0  ;;  %p190_p2 = scmp.eq.s32.totalorder %s4049_s28, 1 }
   0x7   : > { %p195_p3 = scmp.ne.s32.totalorder %s3978_s25, %s3974_s24  ;;  %p196_p4 = scmp.eq.s32.totalorder %s3055_s29, 1 }
   0x8   : > { %s4064_s10 = scalar_select %p177_p1, %s3982_s26, %s179_s8  }
   0x9   : > { %p4066_p5 = por %p190_p2, %p189_p0  ;;  %p4070_p6 = por %p196_p4, %p195_p3 }
   0xa   : > { %p3058_p7 = scmp.ge.s32.totalorder %s3986_s27, 1  ;;  %p242_p8 = scmp.lt.s32.totalorder %s3986_s27, 3 }
   0xc   : > { %p243_p9 = pnand %p3058_p7, %p242_p8 }
   0xe   : > { %246 = sbr.rel (%p243_p9) target bundleno = 1098 (0x44a), region = 48 }
  0x13   : > { %v3312_v0 = vld [vmem:[%s5620_s1 + $0x70] sm:$0xf]  ;;  %v3770_v1 = vld [vmem:[%s5620_s1 + $0x74] sm:$0xf0]  ;;  %v3304_v5 = vld [vmem:[%s5620_s1 + $0x60] sm:$0xf] }
  0x14   : > { %v3376_v2 = vld [vmem:[%s5620_s1 + $0xf0] sm:$0xf]  ;;  %v3313_v3 = vor.u32 %v3770_v1, %v3312_v0  ;;  %v3786_v4 = vld [vmem:[%s5620_s1 + $0xf4] sm:$0xf0]  ;;  %v3768_v6 = vld [vmem:[%s5620_s1 + $0x64] sm:$0xf0] }
  0x15   : > { %v3377_v7 = vor.u32 %v3786_v4, %v3376_v2  ;;  %v3368_v8 = vld [vmem:[%s5620_s1 + $0xe0] sm:$0xf]  ;;  %v3784_v9 = vld [vmem:[%s5620_s1 + $0xe4] sm:$0xf0]  ;;  %v3305_v10 = vor.u32 %v3768_v6, %v3304_v5  ;;  %v3296_v12 = vld [vmem:[%s5620_s1 + $0x50] sm:$0xf] }
  0x16   : > { %896 = vmatpush.bf16.msra.mxu0 %v3313_v3  ;;  %3868 = vmatpush.bf16.msra.mxu2 %v3313_v3  ;;  %v3369_v11 = vor.u32 %v3784_v9, %v3368_v8  ;;  %v3766_v13 = vld [vmem:[%s5620_s1 + $0x54] sm:$0xf0]  ;;  %v3360_v14 = vld [vmem:[%s5620_s1 + $0xd0] sm:$0xf]  ;;  %v3288_v18 = vld [vmem:[%s5620_s1 + $0x40] sm:$0xf] }
  0x17   : > { %985 = vmatpush.bf16.msra.mxu1 %v3377_v7  ;;  %3876 = vmatpush.bf16.msra.mxu3 %v3377_v7  ;;  %v3782_v15 = vld [vmem:[%s5620_s1 + $0xd4] sm:$0xf0]  ;;  %v3297_v16 = vor.u32 %v3766_v13, %v3296_v12  ;;  %v3764_v19 = vld [vmem:[%s5620_s1 + $0x44] sm:$0xf0]  ;;  %v3352_v20 = vld [vmem:[%s5620_s1 + $0xc0] sm:$0xf] }
  0x18   : > { %v3361_v17 = vor.u32 %v3782_v15, %v3360_v14  ;;  %v3780_v21 = vld [vmem:[%s5620_s1 + $0xc4] sm:$0xf0]  ;;  %s3060_s17 = sshll.u32 %s4049_s28, 3  ;;  %v3289_v22 = vor.u32 %v3764_v19, %v3288_v18  ;;  %v3280_v24 = vld [vmem:[%s5620_s1 + $0x30] sm:$0xf]  ;;  %vm2954_vm0 = vcmask 1041409  }
  0x19   : > { %p276_p10 = scmp.lt.s32.totalorder %s3060_s17, 15  ;;  %v3353_v23 = vor.u32 %v3780_v21, %v3352_v20  ;;  %v3762_v25 = vld [vmem:[%s5620_s1 + $0x34] sm:$0xf0]  ;;  %v3344_v26 = vld [vmem:[%s5620_s1 + $0xb0] sm:$0xf]  ;;  %vm2956_vm1 = vcmask 1042434  }
  0x1a   : > { %897 = vmatpush.bf16.msra.mxu0 %v3305_v10  ;;  %3869 = vmatpush.bf16.msra.mxu2 %v3305_v10  ;;  %v3778_v27 = vld [vmem:[%s5620_s1 + $0xb4] sm:$0xf0]  ;;  %v3281_v28 = vor.u32 %v3762_v25, %v3280_v24  ;;  %v3272_v30 = vld [vmem:[%s5620_s1 + $0x20] sm:$0xf]  ;;  %v3760_v31 = vld [vmem:[%s5620_s1 + $0x24] sm:$0xf0] }
  0x1b   : > { %986 = vmatpush.bf16.msra.mxu1 %v3369_v11  ;;  %3877 = vmatpush.bf16.msra.mxu3 %v3369_v11  ;;  %s5640_s17 = smov (!%p276_p10, %s3060_s17), 15  ;;  %v3345_v29 = vor.u32 %v3778_v27, %v3344_v26  ;;  %v3336_v32 = vld [vmem:[%s5620_s1 + $0xa0] sm:$0xf]  ;;  %v3776_v33 = vld [vmem:[%s5620_s1 + $0xa4] sm:$0xf0]  ;;  %v3273_v34 = vor.u32 %v3760_v31, %v3272_v30  ;;  %vm2958_vm2 = vcmask 1043459  }
  0x1c   : > { %s3884_s21 = smul.u32 48, %s5640_s17  ;;  %v3337_v35 = vor.u32 %v3776_v33, %v3336_v32  ;;  %v3264_v36 = vld [vmem:[%s5620_s1 + $0x10] sm:$0xf]  ;;  %v3758_v37 = vld [vmem:[%s5620_s1 + $0x14] sm:$0xf0]  ;;  %vm2960_vm3 = vcmask 1044484  }
  0x1d   : > { %v3328_v38 = vld [vmem:[%s5620_s1 + $0x90] sm:$0xf]  ;;  %v3774_v39 = vld [vmem:[%s5620_s1 + $0x94] sm:$0xf0]  ;;  %v3265_v40 = vor.u32 %v3758_v37, %v3264_v36  ;;  %v3256_v41 = vld [vmem:[%s5620_s1] sm:$0xf] }
  0x1e   : > { %898 = vmatpush.bf16.msra.mxu0 %v3297_v16  ;;  %3870 = vmatpush.bf16.msra.mxu2 %v3297_v16  ;;  %s4167_s20 = scalar_lea.vmem %s5619_s0, %s3884_s21  ;;  %v3329_v42 = vor.u32 %v3774_v39, %v3328_v38  ;;  %v3756_v43 = vld [vmem:[%s5620_s1 + $0x4] sm:$0xf0]  ;;  %v3320_v44 = vld [vmem:[%s5620_s1 + $0x80] sm:$0xf]  ;;  %v3440_v46 = vld [vmem:[%s5620_s1 + $0x170] sm:$0xf] }
  0x1f   : > { %987 = vmatpush.bf16.msra.mxu1 %v3361_v17  ;;  %3878 = vmatpush.bf16.msra.mxu3 %v3361_v17  ;;  %v3772_v45 = vld [vmem:[%s5620_s1 + $0x84] sm:$0xf0]  ;;  %v3802_v47 = vld [vmem:[%s5620_s1 + $0x174] sm:$0xf0]  ;;  %v3769_v48 = vld [vmem:[%s5620_s1 + $0x74] sm:$0xf]  ;;  %v3257_v52 = vor.u32 %v3756_v43, %v3256_v41 }
  0x20   : > { %v3064_v49 = vld [vmem:[%s4167_s20] sm:$0xf]  ;;  %v3708_v50 = vld [vmem:[%s4167_s20 + $0x8] sm:$0xf0]  ;;  %v3314_v51 = vld [vmem:[%s5620_s1 + $0x78] sm:$0xf0]  ;;  %v3321_v58 = vor.u32 %v3772_v45, %v3320_v44  ;;  %v3441_v62 = vor.u32 %v3802_v47, %v3440_v46 }
  0x21   : > { %v3160_v53 = vld [vmem:[%s4167_s20 + $0xc0] sm:$0xf]  ;;  %v3732_v54 = vld [vmem:[%s4167_s20 + $0xc8] sm:$0xf0]  ;;  %v3707_v55 = vld [vmem:[%s4167_s20 + $0x4] sm:$0xf]  ;;  %v3317_v63 = vor.u32 %v3769_v48, %v3314_v51  ;;  %v4213_v3 = vor.u32 %v3708_v50, %v3064_v49 }
  0x22   : > { %899 = vmatpush.bf16.msra.mxu0 %v3289_v22  ;;  %3871 = vmatpush.bf16.msra.mxu2 %v3289_v22  ;;  %v3785_v56 = vld [vmem:[%s5620_s1 + $0xf4] sm:$0xf]  ;;  %v3378_v57 = vld [vmem:[%s5620_s1 + $0xf8] sm:$0xf0]  ;;  %v3066_v59 = vld [vmem:[%s4167_s20 + $0xc] sm:$0xf0]  ;;  %v4215_v4 = vor.u32 %v3732_v54, %v3160_v53 }
  0x23   : > { %988 = vmatpush.bf16.msra.mxu1 %v3353_v23  ;;  %3879 = vmatpush.bf16.msra.mxu3 %v3353_v23  ;;  %v3731_v60 = vld [vmem:[%s4167_s20 + $0xc4] sm:$0xf]  ;;  %v3162_v61 = vld [vmem:[%s4167_s20 + $0xcc] sm:$0xf0]  ;;  %v3801_v0 = vld [vmem:[%s5620_s1 + $0x174] sm:$0xf]  ;;  %v4226_v8 = vor.u32 %v3707_v55, %v3066_v59  ;;  %v3381_v10 = vor.u32 %v3785_v56, %v3378_v57 }
  0x24   : > { %v3442_v1 = vld [vmem:[%s5620_s1 + $0x178] sm:$0xf0]  ;;  %v3432_v2 = vld [vmem:[%s5620_s1 + $0x160] sm:$0xf]  ;;  %v3800_v5 = vld [vmem:[%s5620_s1 + $0x164] sm:$0xf0]  ;;  %v4228_v9 = vor.u32 %v3731_v60, %v3162_v61 }
  0x25   : > { %v3767_v6 = vld [vmem:[%s5620_s1 + $0x64] sm:$0xf]  ;;  %v3306_v7 = vld [vmem:[%s5620_s1 + $0x68] sm:$0xf0]  ;;  %v3445_v11 = vor.u32 %v3801_v0, %v3442_v1  ;;  %v3433_v13 = vor.u32 %v3800_v5, %v3432_v2  ;;  %v3424_v18 = vld [vmem:[%s5620_s1 + $0x150] sm:$0xf] }
  0x26   : > { %900 = vmatpush.bf16.msra.mxu0 %v3281_v28  ;;  %3872 = vmatpush.bf16.msra.mxu2 %v3281_v28  ;;  %v3783_v12 = vld [vmem:[%s5620_s1 + $0xe4] sm:$0xf]  ;;  %v3309_v14 = vor.u32 %v3767_v6, %v3306_v7  ;;  %v3370_v15 = vld [vmem:[%s5620_s1 + $0xe8] sm:$0xf0]  ;;  %v3798_v19 = vld [vmem:[%s5620_s1 + $0x154] sm:$0xf0] }
  0x27   : > { %989 = vmatpush.bf16.msra.mxu1 %v3345_v29  ;;  %3880 = vmatpush.bf16.msra.mxu3 %v3345_v29  ;;  %v3799_v16 = vld [vmem:[%s5620_s1 + $0x164] sm:$0xf]  ;;  %v3434_v17 = vld [vmem:[%s5620_s1 + $0x168] sm:$0xf0]  ;;  %v3765_v20 = vld [vmem:[%s5620_s1 + $0x54] sm:$0xf]  ;;  %v3373_v21 = vor.u32 %v3783_v12, %v3370_v15  ;;  %v3425_v25 = vor.u32 %v3798_v19, %v3424_v18 }
  0x28   : > { %v3437_v22 = vor.u32 %v3799_v16, %v3434_v17  ;;  %v3298_v23 = vld [vmem:[%s5620_s1 + $0x58] sm:$0xf0]  ;;  %v3781_v24 = vld [vmem:[%s5620_s1 + $0xd4] sm:$0xf]  ;;  %v3076_v32 = vld [vmem:[%s4167_s20 + $0x18] sm:$0xf] }
  0x29   : > { %v3301_v26 = vor.u32 %v3765_v20, %v3298_v23  ;;  %v3362_v27 = vld [vmem:[%s5620_s1 + $0xd8] sm:$0xf0]  ;;  %v3797_v28 = vld [vmem:[%s5620_s1 + $0x154] sm:$0xf]  ;;  %v3711_v33 = vld [vmem:[%s4167_s20 + $0x20] sm:$0xf0] }
  0x2a   : > { %901 = vmatpush.bf16.msra.mxu0 %v3273_v34  ;;  %3873 = vmatpush.bf16.msra.mxu2 %v3273_v34  ;;  %v3426_v29 = vld [vmem:[%s5620_s1 + $0x158] sm:$0xf0]  ;;  %v3365_v30 = vor.u32 %v3781_v24, %v3362_v27  ;;  %v3172_v34 = vld [vmem:[%s4167_s20 + $0xd8] sm:$0xf]  ;;  %v3078_v37 = vld [vmem:[%s4167_s20 + $0x24] sm:$0xf0] }
  0x2b   : > { %990 = vmatpush.bf16.msra.mxu1 %v3337_v35  ;;  %3881 = vmatpush.bf16.msra.mxu3 %v3337_v35  ;;  %v3429_v31 = vor.u32 %v3797_v28, %v3426_v29  ;;  %v3735_v35 = vld [vmem:[%s4167_s20 + $0xe0] sm:$0xf0]  ;;  %v3710_v36 = vld [vmem:[%s4167_s20 + $0x1c] sm:$0xf]  ;;  %v3174_v39 = vld [vmem:[%s4167_s20 + $0xe4] sm:$0xf0] }
  0x2c   : > { %v3734_v38 = vld [vmem:[%s4167_s20 + $0xdc] sm:$0xf]  ;;  %v4280_v41 = vor.u32 %v3735_v35, %v3172_v34  ;;  %v3416_v44 = vld [vmem:[%s5620_s1 + $0x140] sm:$0xf]  ;;  %v3796_v45 = vld [vmem:[%s5620_s1 + $0x144] sm:$0xf0] }
  0x2d   : > { %v4284_v43 = vor.u32 %v3734_v38, %v3174_v39  ;;  %v3763_v46 = vld [vmem:[%s5620_s1 + $0x44] sm:$0xf]  ;;  %v3417_v47 = vor.u32 %v3796_v45, %v3416_v44  ;;  %v3290_v48 = vld [vmem:[%s5620_s1 + $0x48] sm:$0xf0]  ;;  %v3088_v56 = vld [vmem:[%s4167_s20 + $0x30] sm:$0xf] }
  0x2e   : > { %902 = vmatpush.bf16.msra.mxu0 %v3265_v40  ;;  %3874 = vmatpush.bf16.msra.mxu2 %v3265_v40  ;;  %v4278_v40 = vor.u32 %v3711_v33, %v3076_v32  ;;  %v3779_v49 = vld [vmem:[%s5620_s1 + $0xc4] sm:$0xf]  ;;  %v3354_v50 = vld [vmem:[%s5620_s1 + $0xc8] sm:$0xf0]  ;;  %v3293_v51 = vor.u32 %v3763_v46, %v3290_v48  ;;  %v3714_v57 = vld [vmem:[%s4167_s20 + $0x38] sm:$0xf0] }
  0x2f   : > { %991 = vmatpush.bf16.msra.mxu1 %v3329_v42  ;;  %3882 = vmatpush.bf16.msra.mxu3 %v3329_v42  ;;  %v4282_v42 = vor.u32 %v3710_v36, %v3078_v37  ;;  %v3795_v53 = vld [vmem:[%s5620_s1 + $0x144] sm:$0xf]  ;;  %v3418_v54 = vld [vmem:[%s5620_s1 + $0x148] sm:$0xf0]  ;;  %v3738_v59 = vld [vmem:[%s4167_s20 + $0xf8] sm:$0xf0]  ;;  %v4322_v0 = vor.u32 %v3714_v57, %v3088_v56 }
  0x30   : > { %v3421_v55 = vor.u32 %v3795_v53, %v3418_v54  ;;  %v3713_v60 = vld [vmem:[%s4167_s20 + $0x34] sm:$0xf]  ;;  %v3090_v61 = vld [vmem:[%s4167_s20 + $0x3c] sm:$0xf0]  ;;  %v3408_v6 = vld [vmem:[%s5620_s1 + $0x130] sm:$0xf] }
  0x31   : > { %v4326_v2 = vor.u32 %v3713_v60, %v3090_v61  ;;  %v3794_v7 = vld [vmem:[%s5620_s1 + $0x134] sm:$0xf0]  ;;  %v3282_v12 = vld [vmem:[%s5620_s1 + $0x38] sm:$0xf0]  ;;  %v3793_v17 = vld [vmem:[%s5620_s1 + $0x134] sm:$0xf] }
  0x32   : > { %903 = vmatpush.bf16.msra.mxu0 %v3257_v52  ;;  %3875 = vmatpush.bf16.msra.mxu2 %v3257_v52  ;;  %v3357_v52 = vor.u32 %v3779_v49, %v3354_v50  ;;  %v3410_v18 = vld [vmem:[%s5620_s1 + $0x138] sm:$0xf0]  ;;  %v3100_v20 = vld [vmem:[%s4167_s20 + $0x48] sm:$0xf]  ;;  %v3741_v23 = vld [vmem:[%s4167_s20 + $0x110] sm:$0xf0] }
  0x33   : > { %992 = vmatpush.bf16.msra.mxu1 %v3321_v58  ;;  %3883 = vmatpush.bf16.msra.mxu3 %v3321_v58  ;;  %v3184_v58 = vld [vmem:[%s4167_s20 + $0xf0] sm:$0xf]  ;;  %v3413_v19 = vor.u32 %v3793_v17, %v3410_v18  ;;  %v3716_v24 = vld [vmem:[%s4167_s20 + $0x4c] sm:$0xf]  ;;  %v3198_v27 = vld [vmem:[%s4167_s20 + $0x114] sm:$0xf0] }
  0x34   : > { %v4324_v1 = vor.u32 %v3738_v59, %v3184_v58  ;;  %v3400_v32 = vld [vmem:[%s5620_s1 + $0x120] sm:$0xf]  ;;  %v3792_v33 = vld [vmem:[%s5620_s1 + $0x124] sm:$0xf0]  ;;  %v3759_v34 = vld [vmem:[%s5620_s1 + $0x24] sm:$0xf] }
  0x35   : > { %904 = vmatmul.bf16.vlgmr.msra.gmra.mxu0 %v4213_v3  ;;  %944 = vmatmul.bf16.vlgmr.msra.gmra.mxu2 %v4215_v4  ;;  %v3401_v35 = vor.u32 %v3792_v33, %v3400_v32  ;;  %v3274_v36 = vld [vmem:[%s5620_s1 + $0x28] sm:$0xf0]  ;;  %v3775_v37 = vld [vmem:[%s5620_s1 + $0xa4] sm:$0xf]  ;;  %v3112_v48 = vld [vmem:[%s4167_s20 + $0x60] sm:$0xf] }
  0x36   : > { %1074 = vmatpush.bf16.msrb.mxu2 %v3441_v62  ;;  %993 = vmatmul.bf16.vlgmr.msra.gmra.mxu1 %v4226_v8  ;;  %v3737_v62 = vld [vmem:[%s4167_s20 + $0xf4] sm:$0xf]  ;;  %v3338_v38 = vld [vmem:[%s5620_s1 + $0xa8] sm:$0xf0]  ;;  %v3277_v39 = vor.u32 %v3759_v34, %v3274_v36  ;;  %v3791_v45 = vld [vmem:[%s5620_s1 + $0x124] sm:$0xf] }
  0x37   : > { %1163 = vmatpush.bf16.msrb.mxu3 %v3317_v63  ;;  %1252 = vmatpush.bf16.msrb.mxu0 %v3381_v10  ;;  %v3186_v63 = vld [vmem:[%s4167_s20 + $0xfc] sm:$0xf0]  ;;  %v3761_v10 = vld [vmem:[%s5620_s1 + $0x34] sm:$0xf]  ;;  %v3341_v44 = vor.u32 %v3775_v37, %v3338_v38  ;;  %v3402_v46 = vld [vmem:[%s5620_s1 + $0x128] sm:$0xf0] }
  0x38   : > { %1033 = vmatmul.bf16.vlgmr.msra.gmra.mxu3 %v4228_v9  ;;  %1341 = vmatpush.bf16.msrb.mxu1 %v3445_v11  ;;  %v4328_v5 = vor.u32 %v3737_v62, %v3186_v63  ;;  %v3409_v11 = vor.u32 %v3794_v7, %v3408_v6  ;;  %v3285_v15 = vor.u32 %v3761_v10, %v3282_v12  ;;  %v3720_v49 = vld [vmem:[%s4167_s20 + $0x68] sm:$0xf0]  ;;  %v3208_v50 = vld [vmem:[%s4167_s20 + $0x120] sm:$0xf]  ;;  %v3114_v53 = vld [vmem:[%s4167_s20 + $0x6c] sm:$0xf0] }
  0x39   : > { %v3743_v54 = vld [vmem:[%s4167_s20 + $0x124] sm:$0xf]  ;;  %v4410_v56 = vor.u32 %v3720_v49, %v3112_v48  ;;  %v3392_v60 = vld [vmem:[%s5620_s1 + $0x110] sm:$0xf]  ;;  %v3790_v61 = vld [vmem:[%s5620_s1 + $0x114] sm:$0xf0] }
  0x3a   : > { %1075 = vmatpush.bf16.msrb.mxu2 %v3433_v13  ;;  %v3777_v13 = vld [vmem:[%s5620_s1 + $0xb4] sm:$0xf]  ;;  %v3393_v63 = vor.u32 %v3790_v61, %v3392_v60  ;;  %v3266_v6 = vld [vmem:[%s5620_s1 + $0x18] sm:$0xf0]  ;;  %v3723_v17 = vld [vmem:[%s4167_s20 + $0x80] sm:$0xf0] }
  0x3b   : > { %1164 = vmatpush.bf16.msrb.mxu3 %v3309_v14  ;;  %1253 = vmatpush.bf16.msrb.mxu0 %v3373_v21  ;;  %v3346_v14 = vld [vmem:[%s5620_s1 + $0xb8] sm:$0xf0]  ;;  %v3717_v21 = vld [vmem:[%s4167_s20 + $0x50] sm:$0xf0]  ;;  %v3220_v18 = vld [vmem:[%s4167_s20 + $0x138] sm:$0xf] }
  0x3c   : > { %1342 = vmatpush.bf16.msrb.mxu1 %v3437_v22  ;;  %v3349_v16 = vor.u32 %v3777_v13, %v3346_v14  ;;  %v3196_v22 = vld [vmem:[%s4167_s20 + $0x108] sm:$0xf]  ;;  %v4366_v28 = vor.u32 %v3717_v21, %v3100_v20  ;;  %v3757_v62 = vld [vmem:[%s5620_s1 + $0x14] sm:$0xf]  ;;  %v3330_v10 = vld [vmem:[%s5620_s1 + $0x98] sm:$0xf0] }
  0x3d   : > { %v4368_v29 = vor.u32 %v3741_v23, %v3196_v22  ;;  %v3773_v7 = vld [vmem:[%s5620_s1 + $0x94] sm:$0xf]  ;;  %v3394_v14 = vld [vmem:[%s5620_s1 + $0x118] sm:$0xf0]  ;;  %v3126_v21 = vld [vmem:[%s4167_s20 + $0x84] sm:$0xf0] }
  0x3e   : > { %1076 = vmatpush.bf16.msrb.mxu2 %v3425_v25  ;;  %v3102_v25 = vld [vmem:[%s4167_s20 + $0x54] sm:$0xf0]  ;;  %v3333_v12 = vor.u32 %v3773_v7, %v3330_v10  ;;  %v3789_v13 = vld [vmem:[%s5620_s1 + $0x114] sm:$0xf]  ;;  %v3722_v20 = vld [vmem:[%s4167_s20 + $0x7c] sm:$0xf] }
  0x3f   : > { %1165 = vmatpush.bf16.msrb.mxu3 %v3301_v26  ;;  %1254 = vmatpush.bf16.msrb.mxu0 %v3365_v30  ;;  %v3740_v26 = vld [vmem:[%s4167_s20 + $0x10c] sm:$0xf]  ;;  %v4370_v30 = vor.u32 %v3716_v24, %v3102_v25  ;;  %v3746_v22 = vld [vmem:[%s4167_s20 + $0x13c] sm:$0xf]  ;;  %v3222_v23 = vld [vmem:[%s4167_s20 + $0x144] sm:$0xf0] }
  0x40   : > { %1343 = vmatpush.bf16.msrb.mxu1 %v3429_v31  ;;  %v4372_v31 = vor.u32 %v3740_v26, %v3198_v27  ;;  %v4458_v26 = vor.u32 %v3722_v20, %v3126_v21  ;;  %v4460_v27 = vor.u32 %v3746_v22, %v3222_v23  ;;  %v3384_v32 = vld [vmem:[%s5620_s1 + $0x100] sm:$0xf]  ;;  %v3788_v33 = vld [vmem:[%s5620_s1 + $0x104] sm:$0xf0]  ;;  %v3755_v34 = vld [vmem:[%s5620_s1 + $0x4] sm:$0xf] }
  0x41   : > { %v3258_v36 = vld [vmem:[%s5620_s1 + $0x8] sm:$0xf0]  ;;  %v3771_v37 = vld [vmem:[%s5620_s1 + $0x84] sm:$0xf]  ;;  %v3136_v48 = vld [vmem:[%s4167_s20 + $0x90] sm:$0xf] }
  0x42   : > { %1077 = vmatpush.bf16.msrb.mxu2 %v3417_v47  ;;  %v3405_v47 = vor.u32 %v3791_v45, %v3402_v46  ;;  %v3322_v38 = vld [vmem:[%s5620_s1 + $0x88] sm:$0xf0]  ;;  %v3787_v45 = vld [vmem:[%s5620_s1 + $0x104] sm:$0xf]  ;;  %v3726_v49 = vld [vmem:[%s4167_s20 + $0x98] sm:$0xf0] }
  0x43   : > { %1166 = vmatpush.bf16.msrb.mxu3 %v3293_v51  ;;  %1255 = vmatpush.bf16.msrb.mxu0 %v3357_v52  ;;  %v3744_v51 = vld [vmem:[%s4167_s20 + $0x128] sm:$0xf0]  ;;  %v3719_v52 = vld [vmem:[%s4167_s20 + $0x64] sm:$0xf]  ;;  %v4498_v60 = vor.u32 %v3726_v49, %v3136_v48  ;;  %v3818_v7 = vld [vmem:[%s5622_s3 + $0x74] sm:$0xf0] }
  0x44   : > { %1344 = vmatpush.bf16.msrb.mxu1 %v3421_v55  ;;  %v3210_v55 = vld [vmem:[%s4167_s20 + $0x12c] sm:$0xf0]  ;;  %v4412_v57 = vor.u32 %v3744_v51, %v3208_v50  ;;  %v4414_v58 = vor.u32 %v3719_v52, %v3114_v53  ;;  %v3386_v46 = vld [vmem:[%s5620_s1 + $0x108] sm:$0xf0]  ;;  %v3750_v51 = vld [vmem:[%s4167_s20 + $0x158] sm:$0xf0] }
  0x45   : > { %909 = vmatmul.bf16.gmra.mxu0 %v4278_v40  ;;  %949 = vmatmul.bf16.gmra.mxu2 %v4280_v41  ;;  %v4416_v59 = vor.u32 %v3743_v54, %v3210_v55  ;;  %v3232_v50 = vld [vmem:[%s4167_s20 + $0x150] sm:$0xf]  ;;  %v3725_v52 = vld [vmem:[%s4167_s20 + $0x94] sm:$0xf]  ;;  %v3138_v53 = vld [vmem:[%s4167_s20 + $0x9c] sm:$0xf0] }
  0x46   : > { %998 = vmatmul.bf16.gmra.mxu1 %v4282_v42  ;;  %1078 = vmatpush.bf16.msrb.mxu2 %v3409_v11  ;;  %v3269_v11 = vor.u32 %v3757_v62, %v3266_v6  ;;  %v3749_v54 = vld [vmem:[%s4167_s20 + $0x154] sm:$0xf]  ;;  %v3234_v55 = vld [vmem:[%s4167_s20 + $0x15c] sm:$0xf0]  ;;  %v4500_v61 = vor.u32 %v3750_v51, %v3232_v50  ;;  %v4502_v62 = vor.u32 %v3725_v52, %v3138_v53  ;;  %v3504_v6 = vld [vmem:[%s5622_s3 + $0x70] sm:$0xf] }
  0x47   : > { %1167 = vmatpush.bf16.msrb.mxu3 %v3285_v15  ;;  %1256 = vmatpush.bf16.msrb.mxu0 %v3349_v16  ;;  %v3397_v15 = vor.u32 %v3789_v13, %v3394_v14  ;;  %v3124_v16 = vld [vmem:[%s4167_s20 + $0x78] sm:$0xf]  ;;  %v3568_v10 = vld [vmem:[%s5622_s3 + $0xf0] sm:$0xf]  ;;  %v3148_v14 = vld [vmem:[%s4167_s20 + $0xa8] sm:$0xf] }
  0x48   : > { %1038 = vmatmul.bf16.gmra.mxu3 %v4284_v43  ;;  %1345 = vmatpush.bf16.msrb.mxu1 %v3413_v19  ;;  %v3747_v19 = vld [vmem:[%s4167_s20 + $0x140] sm:$0xf0]  ;;  %v4454_v24 = vor.u32 %v3723_v17, %v3124_v16  ;;  %v3244_v16 = vld [vmem:[%s4167_s20 + $0x168] sm:$0xf]  ;;  %v3817_v17 = vld [vmem:[%s5622_s3 + $0x74] sm:$0xf] }
  0x49   : > { %v4456_v25 = vor.u32 %v3747_v19, %v3220_v18  ;;  %v3506_v18 = vld [vmem:[%s5622_s3 + $0x78] sm:$0xf0]  ;;  %v3833_v19 = vld [vmem:[%s5622_s3 + $0xf4] sm:$0xf]  ;;  %v3728_v21 = vld [vmem:[%s4167_s20 + $0xac] sm:$0xf] }
  0x4a   : > { %1079 = vmatpush.bf16.msrb.mxu2 %v3401_v35  ;;  %v3385_v35 = vor.u32 %v3788_v33, %v3384_v32  ;;  %v3753_v20 = vld [vmem:[%s4167_s20 + $0x170] sm:$0xf0]  ;;  %v3509_v22 = vor.u32 %v3817_v17, %v3506_v18  ;;  %v3570_v23 = vld [vmem:[%s5622_s3 + $0xf8] sm:$0xf0]  ;;  %v3150_v32 = vld [vmem:[%s4167_s20 + $0xb4] sm:$0xf0] }
  0x4b   : > { %1168 = vmatpush.bf16.msrb.mxu3 %v3277_v39  ;;  %1257 = vmatpush.bf16.msrb.mxu0 %v3341_v44  ;;  %v3261_v39 = vor.u32 %v3755_v34, %v3258_v36  ;;  %v3325_v44 = vor.u32 %v3771_v37, %v3322_v38  ;;  %v3752_v33 = vld [vmem:[%s4167_s20 + $0x16c] sm:$0xf]  ;;  %v3246_v34 = vld [vmem:[%s4167_s20 + $0x174] sm:$0xf0]  ;;  %v4544_v37 = vor.u32 %v3753_v20, %v3244_v16  ;;  %v3496_v53 = vld [vmem:[%s5622_s3 + $0x60] sm:$0xf] }
  0x4c   : > { %1346 = vmatpush.bf16.msrb.mxu1 %v3405_v47  ;;  %v3389_v47 = vor.u32 %v3787_v45, %v3386_v46  ;;  %v4546_v38 = vor.u32 %v3728_v21, %v3150_v32  ;;  %v3072_v45 = vld [vmem:[%s4167_s20 + $0x8] sm:$0xf]  ;;  %v3709_v46 = vld [vmem:[%s4167_s20 + $0x10] sm:$0xf0]  ;;  %v3815_v17 = vld [vmem:[%s5622_s3 + $0x64] sm:$0xf] }
  0x4d   : > { %v3073_v48 = vor.u32 %v3709_v46, %v3072_v45  ;;  %v3498_v18 = vld [vmem:[%s5622_s3 + $0x68] sm:$0xf0]  ;;  %v3084_v20 = vld [vmem:[%s4167_s20 + $0x20] sm:$0xf]  ;;  %vm2962_vm4 = vcmask 1045509   ;;  %s272_s16 = sand.u32 1, %s3978_s25  }
  0x4e   : > { %1080 = vmatpush.bf16.msrb.mxu2 %v3393_v63  ;;  %v4504_v63 = vor.u32 %v3749_v54, %v3234_v55  ;;  %v3816_v54 = vld [vmem:[%s5622_s3 + $0x64] sm:$0xf0]  ;;  %v3560_v55 = vld [vmem:[%s5622_s3 + $0xe0] sm:$0xf]  ;;  %v3712_v21 = vld [vmem:[%s4167_s20 + $0x28] sm:$0xf0] }
  0x4f   : > { %1169 = vmatpush.bf16.msrb.mxu3 %v3269_v11  ;;  %1258 = vmatpush.bf16.msrb.mxu0 %v3333_v12  ;;  %v3505_v11 = vor.u32 %v3818_v7, %v3504_v6  ;;  %v3834_v12 = vld [vmem:[%s5622_s3 + $0xf4] sm:$0xf0]  ;;  %v3497_v6 = vor.u32 %v3816_v54, %v3496_v53  ;;  %v3085_v45 = vor.u32 %v3712_v21, %v3084_v20  ;;  %s3059_s18 = sshll.u32 %s272_s16, 4  ;;  %vm2964_vm5 = vcmask 1046534   ;;  %s3867_s19 = sshll.u32 %s4049_s28, 4 }
  0x50   : > { %1347 = vmatpush.bf16.msrb.mxu1 %v3397_v15  ;;  %v3569_v13 = vor.u32 %v3834_v12, %v3568_v10  ;;  %v3729_v15 = vld [vmem:[%s4167_s20 + $0xb0] sm:$0xf0]  ;;  %vm2966_vm6 = vcmask 1047559   ;;  %s2991_s29 = scalar_lea.hbm %s5626_s7, %s3867_s19  ;;  %s274_s8 = scalar_lea.vmem [#allocation2], %s3059_s18 }
  0x51   : > { %v4542_v36 = vor.u32 %v3729_v15, %v3148_v14  ;;  %s2993_s28 = sshll.u32 %s274_s8, 4  ;;  %s2995_s9 = sshll.u32 %s2991_s29, 4  ;;  %s2994_s28 = int_to_ptr.vmem [resolvable:$true] %s2993_s28  ;;  %s2996_s9 = int_to_ptr.hbm [resolvable:$true] %s2995_s9 }
  0x52   : > { %1081 = vmatpush.bf16.msrb.mxu2 %v3385_v35  ;;  %v3573_v35 = vor.u32 %v3833_v19, %v3570_v23  ;;  %v3831_v19 = vld [vmem:[%s5622_s3 + $0xe4] sm:$0xf]  ;;  %v3562_v23 = vld [vmem:[%s5622_s3 + $0xe8] sm:$0xf0]  ;;  %s2980_s13 = scalar_lea.sflag [#allocation3], %s272_s16  ;;  %s3944_s17 = scalar_lea.hbm %s5626_s7, 32 }
  0x53   : > { %1170 = vmatpush.bf16.msrb.mxu3 %v3261_v39  ;;  %1259 = vmatpush.bf16.msrb.mxu0 %v3325_v44  ;;  %v4548_v39 = vor.u32 %v3752_v33, %v3246_v34  ;;  %v4557_v44 = vld [vmem:[%s5621_s2] sm:$0x3]  ;;  %v3565_v32 = vor.u32 %v3831_v19, %v3562_v23  ;;  %v3814_v23 = vld [vmem:[%s5622_s3 + $0x54] sm:$0xf0] }
  0x54   : > { %1348 = vmatpush.bf16.msrb.mxu1 %v3389_v47  ;;  %v4562_v47 = vperm.slane %v4557_v44, 0 }
  0x55   : > { %914 = vmatmul.bf16.gmra.mxu0 %v4322_v0  ;;  %954 = vmatmul.bf16.gmra.mxu2 %v4324_v1 }
  0x56   : > { %1003 = vmatmul.bf16.gmra.mxu1 %v4326_v2  ;;  %1724 = vmatpush.bf16.msra.mxu2 %v3505_v11 }
  0x57   : > { %1813 = vmatpush.bf16.msra.mxu3 %v3569_v13  ;;  %1902 = vmatpush.bf16.msra.mxu0 %v3509_v22  ;;  %v3501_v22 = vor.u32 %v3815_v17, %v3498_v18 }
  0x58   : > { %1043 = vmatmul.bf16.gmra.mxu3 %v4328_v5  ;;  %1991 = vmatpush.bf16.msra.mxu1 %v3573_v35 }
  0x5a   : > { %1725 = vmatpush.bf16.msra.mxu2 %v3497_v6 }
  0x5b   : > { %1903 = vmatpush.bf16.msra.mxu0 %v3501_v22  ;;  %v3488_v22 = vld [vmem:[%s5622_s3 + $0x50] sm:$0xf] }
  0x5c   : > { %1992 = vmatpush.bf16.msra.mxu1 %v3565_v32  ;;  %v3552_v32 = vld [vmem:[%s5622_s3 + $0xd0] sm:$0xf] }
  0x65   : > { %919 = vmatmul.bf16.gmra.mxu0 %v4366_v28  ;;  %959 = vmatmul.bf16.gmra.mxu2 %v4368_v29 }
  0x66   : > { %1008 = vmatmul.bf16.gmra.mxu1 %v4370_v30 }
  0x68   : > { %1048 = vmatmul.bf16.gmra.mxu3 %v4372_v31 }
  0x75   : > { %924 = vmatmul.bf16.gmra.mxu0 %v4410_v56  ;;  %964 = vmatmul.bf16.gmra.mxu2 %v4412_v57 }
  0x76   : > { %1013 = vmatmul.bf16.gmra.mxu1 %v4414_v58 }
  0x78   : > { %1053 = vmatmul.bf16.gmra.mxu3 %v4416_v59 }
  0x85   : > { %929 = vmatmul.bf16.gmra.mxu0 %v4454_v24  ;;  %969 = vmatmul.bf16.gmra.mxu2 %v4456_v25 }
  0x86   : > { %1018 = vmatmul.bf16.gmra.mxu1 %v4458_v26 }
  0x88   : > { %1058 = vmatmul.bf16.gmra.mxu3 %v4460_v27 }
  0x95   : > { %934 = vmatmul.bf16.gmra.mxu0 %v4498_v60  ;;  %974 = vmatmul.bf16.gmra.mxu2 %v4500_v61 }
  0x96   : > { %1023 = vmatmul.bf16.gmra.mxu1 %v4502_v62 }
  0x98   : > { %1063 = vmatmul.bf16.gmra.mxu3 %v4504_v63 }
  0xa5   : > { %939 = vmatmul.bf16.gmra.mxu0 %v4542_v36  ;;  %979 = vmatmul.bf16.gmra.mxu2 %v4544_v37 }
  0xa6   : > { %1028 = vmatmul.bf16.gmra.mxu1 %v4546_v38 }
  0xa8   : > { %1068 = vmatmul.bf16.gmra.mxu3 %v4548_v39 }
  0xb2   : > { %v905_v49 = vpop.f32.mrf.mxu0 }
  0xb3   : > { %v906_v50 = vadd.f32 %v905_v49, %v4562_v47  ;;  %v994_v51 = vpop.f32.mrf.mxu1 }
  0xb5   : > { %v4565_v52 = vadd.f32 %v994_v51, %v906_v50  ;;  %1082 = vmatmul.bf16.vlgmr.msrb.gmra.mxu2 %v3073_v48  ;;  %1260 = vmatmul.bf16.vlgmr.msrb.gmra.mxu0 %v4226_v8  ;;  %v3832_v8 = vld [vmem:[%s5622_s3 + $0xe4] sm:$0xf0] }
  0xb6   : > { %1349 = vmatmul.bf16.vlgmr.msrb.gmra.mxu1 %v3073_v48  ;;  %v3561_v7 = vor.u32 %v3832_v8, %v3560_v55 }
  0xb8   : > { %1171 = vmatmul.bf16.vlgmr.msrb.gmra.mxu3 %v4213_v3  ;;  %v945_v3 = vpop.f32.mrf.mxu2 }
  0xb9   : > { %v946_v10 = vadd.f32 %v945_v3, %v4562_v47  ;;  %1814 = vmatpush.bf16.msra.mxu3 %v3561_v7 }
  0xba   : > { %v907_v12 = vpop.f32.mrf.mxu0 }
  0xbb   : > { %v1034_v11 = vpop.f32.mrf.mxu3  ;;  %v908_v14 = vadd.f32 %v907_v12, %v4562_v47  ;;  %v996_v15 = vpop.f32.mrf.mxu1  ;;  %v3715_v12 = vld [vmem:[%s4167_s20 + $0x40] sm:$0xf0] }
  0xbc   : > { %v4582_v13 = vadd.f32 %v1034_v11, %v946_v10  ;;  %v3096_v11 = vld [vmem:[%s4167_s20 + $0x38] sm:$0xf] }
  0xbd   : > { %v4585_v16 = vadd.f32 %v996_v15, %v908_v14 }
  0xc0   : > { %v947_v33 = vpop.f32.mrf.mxu2 }
  0xc1   : > { %v948_v34 = vadd.f32 %v947_v33, %v4562_v47  ;;  %v3489_v33 = vor.u32 %v3814_v23, %v3488_v22 }
  0xc2   : > { %v910_v46 = vpop.f32.mrf.mxu0 }
  0xc3   : > { %v1036_v35 = vpop.f32.mrf.mxu3  ;;  %v911_v49 = vadd.f32 %v910_v46, %v4562_v47  ;;  %v999_v50 = vpop.f32.mrf.mxu1  ;;  %1726 = vmatpush.bf16.msra.mxu2 %v3489_v33 }
  0xc4   : > { %v4602_v48 = vadd.f32 %v1036_v35, %v948_v34 }
  0xc5   : > { %v4605_v51 = vadd.f32 %v999_v50, %v911_v49  ;;  %1087 = vmatmul.bf16.gmra.mxu2 %v3085_v45  ;;  %1265 = vmatmul.bf16.gmra.mxu0 %v4282_v42 }
  0xc6   : > { %1354 = vmatmul.bf16.gmra.mxu1 %v3085_v45 }
  0xc8   : > { %1176 = vmatmul.bf16.gmra.mxu3 %v4278_v40  ;;  %v950_v53 = vpop.f32.mrf.mxu2  ;;  %v3097_v40 = vor.u32 %v3715_v12, %v3096_v11  ;;  %v3718_v11 = vld [vmem:[%s4167_s20 + $0x58] sm:$0xf0] }
  0xc9   : > { %v951_v54 = vadd.f32 %v950_v53, %v4562_v47 }
  0xca   : > { %v912_v6 = vpop.f32.mrf.mxu0 }
  0xcb   : > { %v1039_v55 = vpop.f32.mrf.mxu3  ;;  %v913_v3 = vadd.f32 %v912_v6, %v4562_v47  ;;  %v1001_v7 = vpop.f32.mrf.mxu1  ;;  %v3490_v6 = vld [vmem:[%s5622_s3 + $0x58] sm:$0xf0] }
  0xcc   : > { %v4610_v8 = vadd.f32 %v1039_v55, %v951_v54  ;;  %v3813_v55 = vld [vmem:[%s5622_s3 + $0x54] sm:$0xf] }
  0xcd   : > { %v4613_v10 = vadd.f32 %v1001_v7, %v913_v3  ;;  %v3829_v3 = vld [vmem:[%s5622_s3 + $0xd4] sm:$0xf]  ;;  %v3108_v7 = vld [vmem:[%s4167_s20 + $0x50] sm:$0xf]  ;;  %v3493_v12 = vor.u32 %v3813_v55, %v3490_v6  ;;  %v3120_v55 = vld [vmem:[%s4167_s20 + $0x68] sm:$0xf] }
  0xce   : > { %v3721_v6 = vld [vmem:[%s4167_s20 + $0x70] sm:$0xf0] }
  0xcf   : > { %1904 = vmatpush.bf16.msra.mxu0 %v3493_v12 }
  0xd0   : > { %v952_v14 = vpop.f32.mrf.mxu2 }
  0xd1   : > { %v953_v42 = vadd.f32 %v952_v14, %v4562_v47  ;;  %v3554_v14 = vld [vmem:[%s5622_s3 + $0xd8] sm:$0xf0] }
  0xd2   : > { %v915_v17 = vpop.f32.mrf.mxu0 }
  0xd3   : > { %v1041_v15 = vpop.f32.mrf.mxu3  ;;  %v916_v19 = vadd.f32 %v915_v17, %v4562_v47  ;;  %v1004_v20 = vpop.f32.mrf.mxu1 }
  0xd4   : > { %v4618_v18 = vadd.f32 %v1041_v15, %v953_v42  ;;  %v3557_v42 = vor.u32 %v3829_v3, %v3554_v14 }
  0xd5   : > { %v4621_v21 = vadd.f32 %v1004_v20, %v916_v19  ;;  %1092 = vmatmul.bf16.gmra.mxu2 %v3097_v40  ;;  %1270 = vmatmul.bf16.gmra.mxu0 %v4326_v2  ;;  %v3830_v2 = vld [vmem:[%s5622_s3 + $0xd4] sm:$0xf0]  ;;  %v3109_v19 = vor.u32 %v3718_v11, %v3108_v7 }
  0xd6   : > { %1359 = vmatmul.bf16.gmra.mxu1 %v3097_v40  ;;  %v3553_v34 = vor.u32 %v3830_v2, %v3552_v32 }
  0xd7   : > { %1993 = vmatpush.bf16.msra.mxu1 %v3557_v42 }
  0xd8   : > { %1181 = vmatmul.bf16.gmra.mxu3 %v4322_v0  ;;  %v955_v0 = vpop.f32.mrf.mxu2 }
  0xd9   : > { %v956_v35 = vadd.f32 %v955_v0, %v4562_v47  ;;  %1815 = vmatpush.bf16.msra.mxu3 %v3553_v34 }
  0xda   : > { %v917_v46 = vpop.f32.mrf.mxu0 }
  0xdb   : > { %v1044_v45 = vpop.f32.mrf.mxu3  ;;  %v918_v50 = vadd.f32 %v917_v46, %v4562_v47  ;;  %v1006_v53 = vpop.f32.mrf.mxu1 }
  0xdc   : > { %v4638_v49 = vadd.f32 %v1044_v45, %v956_v35 }
  0xdd   : > { %v4641_v54 = vadd.f32 %v1006_v53, %v918_v50 }
  0xe0   : > { %v957_v15 = vpop.f32.mrf.mxu2 }
  0xe1   : > { %v958_v40 = vadd.f32 %v957_v15, %v4562_v47 }
  0xe2   : > { %v920_v20 = vpop.f32.mrf.mxu0 }
  0xe3   : > { %v1046_v17 = vpop.f32.mrf.mxu3  ;;  %v921_v23 = vadd.f32 %v920_v20, %v4562_v47  ;;  %v1009_v32 = vpop.f32.mrf.mxu1 }
  0xe4   : > { %v4658_v22 = vadd.f32 %v1046_v17, %v958_v40  ;;  %v3480_v40 = vld [vmem:[%s5622_s3 + $0x40] sm:$0xf]  ;;  %v3812_v17 = vld [vmem:[%s5622_s3 + $0x44] sm:$0xf0] }
  0xe5   : > { %v4661_v33 = vadd.f32 %v1009_v32, %v921_v23  ;;  %1097 = vmatmul.bf16.gmra.mxu2 %v3109_v19  ;;  %1275 = vmatmul.bf16.gmra.mxu0 %v4370_v30  ;;  %v3481_v20 = vor.u32 %v3812_v17, %v3480_v40 }
  0xe6   : > { %1364 = vmatmul.bf16.gmra.mxu1 %v3109_v19  ;;  %v3544_v19 = vld [vmem:[%s5622_s3 + $0xc0] sm:$0xf] }
  0xe7   : > { %1727 = vmatpush.bf16.msra.mxu2 %v3481_v20 }
  0xe8   : > { %1186 = vmatmul.bf16.gmra.mxu3 %v4366_v28  ;;  %v960_v2 = vpop.f32.mrf.mxu2  ;;  %v3121_v28 = vor.u32 %v3721_v6, %v3120_v55  ;;  %v3811_v55 = vld [vmem:[%s5622_s3 + $0x44] sm:$0xf]  ;;  %v3482_v6 = vld [vmem:[%s5622_s3 + $0x48] sm:$0xf0] }
  0xe9   : > { %v961_v0 = vadd.f32 %v960_v2, %v4562_v47 }
  0xea   : > { %v922_v35 = vpop.f32.mrf.mxu0 }
  0xeb   : > { %v1049_v34 = vpop.f32.mrf.mxu3  ;;  %v923_v46 = vadd.f32 %v922_v35, %v4562_v47  ;;  %v1011_v50 = vpop.f32.mrf.mxu1 }
  0xec   : > { %v4666_v45 = vadd.f32 %v1049_v34, %v961_v0 }
  0xed   : > { %v4669_v53 = vadd.f32 %v1011_v50, %v923_v46 }
  0xf0   : > { %v962_v3 = vpop.f32.mrf.mxu2 }
  0xf1   : > { %v963_v30 = vadd.f32 %v962_v3, %v4562_v47  ;;  %v3827_v3 = vld [vmem:[%s5622_s3 + $0xc4] sm:$0xf] }
  0xf2   : > { %v925_v11 = vpop.f32.mrf.mxu0 }
  0xf3   : > { %v1051_v7 = vpop.f32.mrf.mxu3  ;;  %v926_v14 = vadd.f32 %v925_v11, %v4562_v47  ;;  %v1014_v42 = vpop.f32.mrf.mxu1  ;;  %v3546_v11 = vld [vmem:[%s5622_s3 + $0xc8] sm:$0xf0] }
  0xf4   : > { %v4674_v12 = vadd.f32 %v1051_v7, %v963_v30  ;;  %v3132_v30 = vld [vmem:[%s4167_s20 + $0x80] sm:$0xf]  ;;  %v3724_v7 = vld [vmem:[%s4167_s20 + $0x88] sm:$0xf0] }
  0xf5   : > { %v4677_v15 = vadd.f32 %v1014_v42, %v926_v14  ;;  %1102 = vmatmul.bf16.gmra.mxu2 %v3121_v28  ;;  %1280 = vmatmul.bf16.gmra.mxu0 %v4414_v58  ;;  %v3828_v58 = vld [vmem:[%s5622_s3 + $0xc4] sm:$0xf0]  ;;  %v3549_v14 = vor.u32 %v3827_v3, %v3546_v11 }
  0xf6   : > { %1369 = vmatmul.bf16.gmra.mxu1 %v3121_v28  ;;  %v3545_v23 = vor.u32 %v3828_v58, %v3544_v19  ;;  %v3485_v28 = vor.u32 %v3811_v55, %v3482_v6  ;;  %v3133_v19 = vor.u32 %v3724_v7, %v3132_v30  ;;  %v3144_v7 = vld [vmem:[%s4167_s20 + $0x98] sm:$0xf] }
  0xf7   : > { %1994 = vmatpush.bf16.msra.mxu1 %v3549_v14 }
  0xf8   : > { %1191 = vmatmul.bf16.gmra.mxu3 %v4410_v56  ;;  %v965_v56 = vpop.f32.mrf.mxu2  ;;  %1905 = vmatpush.bf16.msra.mxu0 %v3485_v28  ;;  %v3727_v28 = vld [vmem:[%s4167_s20 + $0xa0] sm:$0xf0] }
  0xf9   : > { %v966_v32 = vadd.f32 %v965_v56, %v4562_v47  ;;  %1816 = vmatpush.bf16.msra.mxu3 %v3545_v23 }
  0xfa   : > { %v927_v0 = vpop.f32.mrf.mxu0 }
  0xfb   : > { %v1054_v2 = vpop.f32.mrf.mxu3  ;;  %v928_v35 = vadd.f32 %v927_v0, %v4562_v47  ;;  %v1016_v46 = vpop.f32.mrf.mxu1 }
  0xfc   : > { %v4694_v34 = vadd.f32 %v1054_v2, %v966_v32 }
  0xfd   : > { %v4697_v50 = vadd.f32 %v1016_v46, %v928_v35 }
 0x100   : > { %v967_v42 = vpop.f32.mrf.mxu2 }
 0x101   : > { %v968_v40 = vadd.f32 %v967_v42, %v4562_v47 }
 0x102   : > { %v930_v20 = vpop.f32.mrf.mxu0 }
 0x103   : > { %v1056_v17 = vpop.f32.mrf.mxu3  ;;  %v931_v56 = vadd.f32 %v930_v20, %v4562_v47  ;;  %v1019_v23 = vpop.f32.mrf.mxu1 }
 0x104   : > { %v4714_v58 = vadd.f32 %v1056_v17, %v968_v40 }
 0x105   : > { %v4717_v32 = vadd.f32 %v1019_v23, %v931_v56  ;;  %1107 = vmatmul.bf16.gmra.mxu2 %v3133_v19  ;;  %1285 = vmatmul.bf16.gmra.mxu0 %v4458_v26  ;;  %v3472_v56 = vld [vmem:[%s5622_s3 + $0x30] sm:$0xf]  ;;  %v3810_v23 = vld [vmem:[%s5622_s3 + $0x34] sm:$0xf0] }
 0x106   : > { %1374 = vmatmul.bf16.gmra.mxu1 %v3133_v19 }
 0x108   : > { %1196 = vmatmul.bf16.gmra.mxu3 %v4454_v24  ;;  %v970_v2 = vpop.f32.mrf.mxu2  ;;  %v3145_v24 = vor.u32 %v3727_v28, %v3144_v7 }
 0x109   : > { %v971_v0 = vadd.f32 %v970_v2, %v4562_v47  ;;  %v3536_v2 = vld [vmem:[%s5622_s3 + $0xb0] sm:$0xf] }
 0x10a   : > { %v932_v46 = vpop.f32.mrf.mxu0 }
 0x10b   : > { %v1059_v35 = vpop.f32.mrf.mxu3  ;;  %v933_v6 = vadd.f32 %v932_v46, %v4562_v47  ;;  %v1021_v3 = vpop.f32.mrf.mxu1 }
 0x10c   : > { %v4722_v55 = vadd.f32 %v1059_v35, %v971_v0  ;;  %v3473_v0 = vor.u32 %v3810_v23, %v3472_v56  ;;  %v3825_v56 = vld [vmem:[%s5622_s3 + $0xb4] sm:$0xf] }
 0x10d   : > { %v4725_v30 = vadd.f32 %v1021_v3, %v933_v6 }
 0x10e   : > { %1728 = vmatpush.bf16.msra.mxu2 %v3473_v0 }
 0x110   : > { %v972_v11 = vpop.f32.mrf.mxu2 }
 0x111   : > { %v973_v26 = vadd.f32 %v972_v11, %v4562_v47 }
 0x112   : > { %v935_v42 = vpop.f32.mrf.mxu0 }
 0x113   : > { %v1061_v14 = vpop.f32.mrf.mxu3  ;;  %v936_v17 = vadd.f32 %v935_v42, %v4562_v47  ;;  %v1024_v19 = vpop.f32.mrf.mxu1 }
 0x114   : > { %v4730_v40 = vadd.f32 %v1061_v14, %v973_v26  ;;  %v3156_v14 = vld [vmem:[%s4167_s20 + $0xb0] sm:$0xf] }
 0x115   : > { %v4733_v20 = vadd.f32 %v1024_v19, %v936_v17  ;;  %1112 = vmatmul.bf16.gmra.mxu2 %v3145_v24  ;;  %1290 = vmatmul.bf16.gmra.mxu0 %v4502_v62  ;;  %v3809_v17 = vld [vmem:[%s5622_s3 + $0x34] sm:$0xf]  ;;  %v3474_v19 = vld [vmem:[%s5622_s3 + $0x38] sm:$0xf0] }
 0x116   : > { %1379 = vmatmul.bf16.gmra.mxu1 %v3145_v24  ;;  %v3730_v24 = vld [vmem:[%s4167_s20 + $0xb8] sm:$0xf0] }
 0x117   : > { %v3157_v0 = vor.u32 %v3730_v24, %v3156_v14 }
 0x118   : > { %1201 = vmatmul.bf16.gmra.mxu3 %v4498_v60  ;;  %v3826_v60 = vld [vmem:[%s5622_s3 + $0xb4] sm:$0xf0]  ;;  %v975_v62 = vpop.f32.mrf.mxu2 }
 0x119   : > { %v3537_v35 = vor.u32 %v3826_v60, %v3536_v2  ;;  %v976_v46 = vadd.f32 %v975_v62, %v4562_v47  ;;  %v3477_v60 = vor.u32 %v3809_v17, %v3474_v19  ;;  %v3538_v62 = vld [vmem:[%s5622_s3 + $0xb8] sm:$0xf0] }
 0x11a   : > { %v937_v3 = vpop.f32.mrf.mxu0 }
 0x11b   : > { %v1064_v6 = vpop.f32.mrf.mxu3  ;;  %1817 = vmatpush.bf16.msra.mxu3 %v3537_v35  ;;  %v938_v28 = vadd.f32 %v937_v3, %v4562_v47  ;;  %v1026_v11 = vpop.f32.mrf.mxu1  ;;  %1906 = vmatpush.bf16.msra.mxu0 %v3477_v60  ;;  %v3168_v60 = vld [vmem:[%s4167_s20 + $0xc8] sm:$0xf] }
 0x11c   : > { %v4750_v7 = vadd.f32 %v1064_v6, %v976_v46  ;;  %v3541_v46 = vor.u32 %v3825_v56, %v3538_v62  ;;  %v3733_v62 = vld [vmem:[%s4167_s20 + $0xd0] sm:$0xf0] }
 0x11d   : > { %v4753_v26 = vadd.f32 %v1026_v11, %v938_v28 }
 0x11e   : > { %1995 = vmatpush.bf16.msra.mxu1 %v3541_v46 }
 0x120   : > { %v977_v42 = vpop.f32.mrf.mxu2 }
 0x121   : > { %v978_v23 = vadd.f32 %v977_v42, %v4562_v47 }
 0x122   : > { %v940_v35 = vpop.f32.mrf.mxu0 }
 0x123   : > { %v1066_v2 = vpop.f32.mrf.mxu3  ;;  %v941_v3 = vadd.f32 %v940_v35, %v4562_v47  ;;  %v1029_v28 = vpop.f32.mrf.mxu1 }
 0x124   : > { %v4770_v6 = vadd.f32 %v1066_v2, %v978_v23 }
 0x125   : > { %v4773_v11 = vadd.f32 %v1029_v28, %v941_v3  ;;  %1117 = vmatmul.bf16.gmra.mxu2 %v3157_v0  ;;  %1295 = vmatmul.bf16.gmra.mxu0 %v4546_v38 }
 0x126   : > { %5629 = vst [vmem:[#allocation5_spill] sm:$0xff] %v4770_v6  ;;  %1384 = vmatmul.bf16.gmra.mxu1 %v3157_v0 }
 0x128   : > { %1206 = vmatmul.bf16.gmra.mxu3 %v4542_v36  ;;  %v980_v14 = vpop.f32.mrf.mxu2  ;;  %v3169_v36 = vor.u32 %v3733_v62, %v3168_v60 }
 0x129   : > { %v981_v24 = vadd.f32 %v980_v14, %v4562_v47  ;;  %v4790_v14 = vperm.slane %v4557_v44, 1 }
 0x12a   : > { %v942_v17 = vpop.f32.mrf.mxu0 }
 0x12b   : > { %v1069_v42 = vpop.f32.mrf.mxu3  ;;  %v943_v56 = vadd.f32 %v942_v17, %v4562_v47  ;;  %v1031_v23 = vpop.f32.mrf.mxu1 }
 0x12c   : > { %v4778_v19 = vadd.f32 %v1069_v42, %v981_v24  ;;  %v3464_v24 = vld [vmem:[%s5622_s3 + $0x20] sm:$0xf] }
 0x12d   : > { %v4781_v2 = vadd.f32 %v1031_v23, %v943_v56 }
 0x12e   : > { %5630 = vst [vmem:[#allocation6_spill] sm:$0xff] %v4778_v19 }
 0x130   : > { %v982_v35 = vpop.f32.mrf.mxu2 }
 0x131   : > { %v983_v38 = vadd.f32 %v982_v35, %v4562_v47  ;;  %v3808_v47 = vld [vmem:[%s5622_s3 + $0x24] sm:$0xf0] }
 0x132   : > { %v1261_v0 = vpop.f32.mrf.mxu0  ;;  %v3465_v42 = vor.u32 %v3808_v47, %v3464_v24  ;;  %v3807_v47 = vld [vmem:[%s5622_s3 + $0x24] sm:$0xf] }
 0x133   : > { %v1071_v46 = vpop.f32.mrf.mxu3  ;;  %v1350_v28 = vpop.f32.mrf.mxu1 }
 0x134   : > { %v4786_v3 = vadd.f32 %v1071_v46, %v983_v38  ;;  %1729 = vmatpush.bf16.msra.mxu2 %v3465_v42 }
 0x135   : > { %1122 = vmatmul.bf16.gmra.mxu2 %v3169_v36  ;;  %1300 = vmatmul.bf16.gmra.mxu0 %v4228_v9  ;;  %v3528_v9 = vld [vmem:[%s5622_s3 + $0xa0] sm:$0xf] }
 0x136   : > { %5631 = vst [vmem:[#allocation7_spill] sm:$0xff] %v4786_v3  ;;  %1389 = vmatmul.bf16.gmra.mxu1 %v3169_v36  ;;  %v3180_v36 = vld [vmem:[%s4167_s20 + $0xe0] sm:$0xf]  ;;  %v3736_v3 = vld [vmem:[%s4167_s20 + $0xe8] sm:$0xf0] }
 0x138   : > { %1211 = vmatmul.bf16.gmra.mxu3 %v4215_v4  ;;  %v3824_v4 = vld [vmem:[%s5622_s3 + $0xa4] sm:$0xf0]  ;;  %v1083_v44 = vpop.f32.mrf.mxu2 }
 0x139   : > { %v3529_v17 = vor.u32 %v3824_v4, %v3528_v9  ;;  %v1084_v56 = vadd.f32 %v1083_v44, %v4565_v52  ;;  %v3466_v52 = vld [vmem:[%s5622_s3 + $0x28] sm:$0xf0]  ;;  %v3181_v4 = vor.u32 %v3736_v3, %v3180_v36 }
 0x13a   : > { %v1263_v62 = vpop.f32.mrf.mxu0  ;;  %v3469_v44 = vor.u32 %v3807_v47, %v3466_v52 }
 0x13b   : > { %v1172_v23 = vpop.f32.mrf.mxu3  ;;  %1818 = vmatpush.bf16.msra.mxu3 %v3529_v17  ;;  %v1352_v35 = vpop.f32.mrf.mxu1 }
 0x13c   : > { %v1173_v60 = vadd.f32 %v1172_v23, %v4790_v14  ;;  %1907 = vmatpush.bf16.msra.mxu0 %v3469_v44 }
 0x13e   : > { %v1262_v38 = vadd.f32 %v1261_v0, %v1173_v60  ;;  %v3823_v0 = vld [vmem:[%s5622_s3 + $0xa4] sm:$0xf] }
 0x140   : > { %v1351_v46 = vadd.f32 %v1350_v28, %v1262_v38  ;;  %v1085_v24 = vpop.f32.mrf.mxu2  ;;  %v3530_v28 = vld [vmem:[%s5622_s3 + $0xa8] sm:$0xf0]  ;;  %v1430_v38 = vmax.f32 %v1084_v56, 0.0 }
 0x141   : > { %v1086_v9 = vadd.f32 %v1085_v24, %v4585_v16  ;;  %v3533_v60 = vor.u32 %v3823_v0, %v3530_v28 }
 0x142   : > { %v1266_v23 = vpop.f32.mrf.mxu0  ;;  %v1431_v24 = vmax.f32 %v1351_v46, 0.0 }
 0x143   : > { %v1174_v42 = vpop.f32.mrf.mxu3  ;;  %v1432_v19 = vmax.f32 %v1086_v9, 0.0  ;;  %v1355_v6 = vpop.f32.mrf.mxu1  ;;  %1996 = vmatpush.bf16.msra.mxu1 %v3533_v60 }
 0x144   : > { %v1175_v17 = vadd.f32 %v1174_v42, %v4790_v14 }
 0x145   : > { %v4823_v3 = vpack.c.bf16 %v1432_v19, %v1430_v38  ;;  %1127 = vmatmul.bf16.gmra.mxu2 %v3181_v4  ;;  %1305 = vmatmul.bf16.gmra.mxu0 %v4284_v43  ;;  %v3192_v43 = vld [vmem:[%s4167_s20 + $0xf8] sm:$0xf] }
 0x146   : > { %v1264_v16 = vadd.f32 %v1263_v62, %v1175_v17  ;;  %1394 = vmatmul.bf16.gmra.mxu1 %v3181_v4  ;;  %v3739_v17 = vld [vmem:[%s4167_s20 + $0x100] sm:$0xf0] }
 0x147   : > { %v3193_v46 = vor.u32 %v3739_v17, %v3192_v43 }
 0x148   : > { %v1353_v36 = vadd.f32 %v1352_v35, %v1264_v16  ;;  %1216 = vmatmul.bf16.gmra.mxu3 %v4280_v41  ;;  %v1088_v52 = vpop.f32.mrf.mxu2 }
 0x149   : > { %v1089_v56 = vadd.f32 %v1088_v52, %v4605_v51  ;;  %v3520_v52 = vld [vmem:[%s5622_s3 + $0x90] sm:$0xf] }
 0x14a   : > { %v1433_v47 = vmax.f32 %v1353_v36, 0.0  ;;  %v1268_v62 = vpop.f32.mrf.mxu0 }
 0x14b   : > { %v1177_v9 = vpop.f32.mrf.mxu3  ;;  %v1357_v44 = vpop.f32.mrf.mxu1  ;;  %v1434_v51 = vmax.f32 %v1089_v56, 0.0 }
 0x14c   : > { %v4828_v42 = vpack.c.bf16 %v1433_v47, %v1431_v24  ;;  %v1178_v19 = vadd.f32 %v1177_v9, %v4790_v14 }
 0x14e   : > { %v1267_v0 = vadd.f32 %v1266_v23, %v1178_v19  ;;  %v3806_v23 = vld [vmem:[%s5622_s3 + $0x14] sm:$0xf0] }
 0x150   : > { %v1356_v28 = vadd.f32 %v1355_v6, %v1267_v0  ;;  %v1090_v35 = vpop.f32.mrf.mxu2 }
 0x151   : > { %v1091_v41 = vadd.f32 %v1090_v35, %v4613_v10  ;;  %v3456_v10 = vld [vmem:[%s5622_s3 + $0x10] sm:$0xf] }
 0x152   : > { %v1271_v38 = vpop.f32.mrf.mxu0  ;;  %v3457_v56 = vor.u32 %v3806_v23, %v3456_v10 }
 0x153   : > { %v1179_v4 = vpop.f32.mrf.mxu3  ;;  %v1436_v16 = vmax.f32 %v1091_v41, 0.0  ;;  %v1360_v36 = vpop.f32.mrf.mxu1 }
 0x154   : > { %v1180_v60 = vadd.f32 %v1179_v4, %v4790_v14  ;;  %1730 = vmatpush.bf16.msra.mxu2 %v3457_v56 }
 0x155   : > { %1132 = vmatmul.bf16.gmra.mxu2 %v3193_v46  ;;  %1310 = vmatmul.bf16.gmra.mxu0 %v4328_v5  ;;  %v4836_v47 = vpack.c.bf16 %v1436_v16, %v1434_v51  ;;  %v3822_v5 = vld [vmem:[%s5622_s3 + $0x94] sm:$0xf0]  ;;  %v3742_v51 = vld [vmem:[%s4167_s20 + $0x118] sm:$0xf0] }
 0x156   : > { %v1269_v24 = vadd.f32 %v1268_v62, %v1180_v60  ;;  %1399 = vmatmul.bf16.gmra.mxu1 %v3193_v46  ;;  %v3521_v19 = vor.u32 %v3822_v5, %v3520_v52  ;;  %v3204_v60 = vld [vmem:[%s4167_s20 + $0x110] sm:$0xf] }
 0x157   : > { %v3205_v10 = vor.u32 %v3742_v51, %v3204_v60 }
 0x158   : > { %v1358_v6 = vadd.f32 %v1357_v44, %v1269_v24  ;;  %1221 = vmatmul.bf16.gmra.mxu3 %v4324_v1  ;;  %v1435_v1 = vmax.f32 %v1356_v28, 0.0  ;;  %v1093_v9 = vpop.f32.mrf.mxu2  ;;  %v3805_v28 = vld [vmem:[%s5622_s3 + $0x14] sm:$0xf] }
 0x159   : > { %v1094_v44 = vadd.f32 %v1093_v9, %v4621_v21  ;;  %1819 = vmatpush.bf16.msra.mxu3 %v3521_v19  ;;  %v3458_v21 = vld [vmem:[%s5622_s3 + $0x18] sm:$0xf0] }
 0x15a   : > { %v1437_v62 = vmax.f32 %v1358_v6, 0.0  ;;  %v1273_v17 = vpop.f32.mrf.mxu0  ;;  %v3461_v23 = vor.u32 %v3805_v28, %v3458_v21 }
 0x15b   : > { %v1182_v0 = vpop.f32.mrf.mxu3  ;;  %v1362_v41 = vpop.f32.mrf.mxu1 }
 0x15c   : > { %v1183_v43 = vadd.f32 %v1182_v0, %v4790_v14  ;;  %v4853_v35 = vpack.c.bf16 %v1437_v62, %v1435_v1  ;;  %v1438_v1 = vmax.f32 %v1094_v44, 0.0  ;;  %1908 = vmatpush.bf16.msra.mxu0 %v3461_v23  ;;  %v3745_v23 = vld [vmem:[%s4167_s20 + $0x130] sm:$0xf0] }
 0x15e   : > { %v1272_v4 = vadd.f32 %v1271_v38, %v1183_v43  ;;  %v3821_v38 = vld [vmem:[%s5622_s3 + $0x94] sm:$0xf] }
 0x160   : > { %v1361_v46 = vadd.f32 %v1360_v36, %v1272_v4  ;;  %v1095_v16 = vpop.f32.mrf.mxu2  ;;  %v3522_v36 = vld [vmem:[%s5622_s3 + $0x98] sm:$0xf0] }
 0x161   : > { %v1096_v24 = vadd.f32 %v1095_v16, %v4641_v54  ;;  %v3525_v5 = vor.u32 %v3821_v38, %v3522_v36 }
 0x162   : > { %v1276_v56 = vpop.f32.mrf.mxu0  ;;  %v1439_v43 = vmax.f32 %v1361_v46, 0.0 }
 0x163   : > { %v1184_v6 = vpop.f32.mrf.mxu3  ;;  %v1440_v9 = vmax.f32 %v1096_v24, 0.0  ;;  %v1365_v19 = vpop.f32.mrf.mxu1  ;;  %1997 = vmatpush.bf16.msra.mxu1 %v3525_v5 }
 0x164   : > { %v1185_v52 = vadd.f32 %v1184_v6, %v4790_v14  ;;  %v3216_v6 = vld [vmem:[%s4167_s20 + $0x128] sm:$0xf] }
 0x165   : > { %1137 = vmatmul.bf16.gmra.mxu2 %v3205_v10  ;;  %1315 = vmatmul.bf16.gmra.mxu0 %v4372_v31  ;;  %v4872_v62 = vpack.c.bf16 %v1440_v9, %v1438_v1  ;;  %v3217_v46 = vor.u32 %v3745_v23, %v3216_v6 }
 0x166   : > { %v1274_v54 = vadd.f32 %v1273_v17, %v1185_v52  ;;  %1404 = vmatmul.bf16.gmra.mxu1 %v3205_v10 }
 0x168   : > { %v1363_v0 = vadd.f32 %v1362_v41, %v1274_v54  ;;  %1226 = vmatmul.bf16.gmra.mxu3 %v4368_v29  ;;  %v1098_v4 = vpop.f32.mrf.mxu2  ;;  %v3512_v54 = vld [vmem:[%s5622_s3 + $0x80] sm:$0xf] }
 0x169   : > { %v1099_v44 = vadd.f32 %v1098_v4, %v4661_v33 }
 0x16a   : > { %v1441_v60 = vmax.f32 %v1363_v0, 0.0  ;;  %v1278_v16 = vpop.f32.mrf.mxu0 }
 0x16b   : > { %v1187_v51 = vpop.f32.mrf.mxu3  ;;  %v1367_v31 = vpop.f32.mrf.mxu1  ;;  %v1442_v33 = vmax.f32 %v1099_v44, 0.0 }
 0x16c   : > { %v1188_v17 = vadd.f32 %v1187_v51, %v4790_v14  ;;  %v4877_v28 = vpack.c.bf16 %v1441_v60, %v1439_v43 }
 0x16e   : > { %v1277_v21 = vadd.f32 %v1276_v56, %v1188_v17 }
 0x170   : > { %v1366_v24 = vadd.f32 %v1365_v19, %v1277_v21  ;;  %v1100_v41 = vpop.f32.mrf.mxu2  ;;  %v3804_v19 = vld [vmem:[%s5622_s3 + $0x4] sm:$0xf0] }
 0x171   : > { %v1101_v29 = vadd.f32 %v1100_v41, %v4669_v53  ;;  %v3448_v53 = vld [vmem:[%s5622_s3] sm:$0xf] }
 0x172   : > { %v1281_v36 = vpop.f32.mrf.mxu0  ;;  %v3449_v0 = vor.u32 %v3804_v19, %v3448_v53  ;;  %v3228_v41 = vld [vmem:[%s4167_s20 + $0x140] sm:$0xf] }
 0x173   : > { %v1189_v10 = vpop.f32.mrf.mxu3  ;;  %v1444_v52 = vmax.f32 %v1101_v29, 0.0  ;;  %v1370_v5 = vpop.f32.mrf.mxu1  ;;  %v3748_v29 = vld [vmem:[%s4167_s20 + $0x148] sm:$0xf0] }
 0x174   : > { %v1190_v38 = vadd.f32 %v1189_v10, %v4790_v14  ;;  %1731 = vmatpush.bf16.msra.mxu2 %v3449_v0 }
 0x175   : > { %1142 = vmatmul.bf16.gmra.mxu2 %v3217_v46  ;;  %1320 = vmatmul.bf16.gmra.mxu0 %v4416_v59  ;;  %v4884_v9 = vpack.c.bf16 %v1444_v52, %v1442_v33  ;;  %v3820_v59 = vld [vmem:[%s5622_s3 + $0x84] sm:$0xf0]  ;;  %v3229_v33 = vor.u32 %v3748_v29, %v3228_v41 }
 0x176   : > { %v1279_v1 = vadd.f32 %v1278_v16, %v1190_v38  ;;  %1409 = vmatmul.bf16.gmra.mxu1 %v3217_v46  ;;  %v3513_v4 = vor.u32 %v3820_v59, %v3512_v54 }
 0x178   : > { %v1368_v56 = vadd.f32 %v1367_v31, %v1279_v1  ;;  %1231 = vmatmul.bf16.gmra.mxu3 %v4412_v57  ;;  %v1443_v57 = vmax.f32 %v1366_v24, 0.0  ;;  %v1103_v43 = vpop.f32.mrf.mxu2  ;;  %v3803_v24 = vld [vmem:[%s5622_s3 + $0x4] sm:$0xf] }
 0x179   : > { %v1104_v44 = vadd.f32 %v1103_v43, %v4677_v15  ;;  %1820 = vmatpush.bf16.msra.mxu3 %v3513_v4  ;;  %v3450_v15 = vld [vmem:[%s5622_s3 + $0x8] sm:$0xf0] }
 0x17a   : > { %v1445_v60 = vmax.f32 %v1368_v56, 0.0  ;;  %v1283_v16 = vpop.f32.mrf.mxu0  ;;  %v3453_v52 = vor.u32 %v3803_v24, %v3450_v15  ;;  %v3751_v24 = vld [vmem:[%s4167_s20 + $0x160] sm:$0xf0] }
 0x17b   : > { %v1192_v51 = vpop.f32.mrf.mxu3  ;;  %v1372_v21 = vpop.f32.mrf.mxu1  ;;  %v1446_v19 = vmax.f32 %v1104_v44, 0.0 }
 0x17c   : > { %v1193_v17 = vadd.f32 %v1192_v51, %v4790_v14  ;;  %v4901_v31 = vpack.c.bf16 %v1445_v60, %v1443_v57  ;;  %1909 = vmatpush.bf16.msra.mxu0 %v3453_v52 }
 0x17e   : > { %v1282_v6 = vadd.f32 %v1281_v36, %v1193_v17  ;;  %v3819_v36 = vld [vmem:[%s5622_s3 + $0x84] sm:$0xf] }
 0x180   : > { %v1371_v23 = vadd.f32 %v1370_v5, %v1282_v6  ;;  %v1105_v10 = vpop.f32.mrf.mxu2  ;;  %v3514_v5 = vld [vmem:[%s5622_s3 + $0x88] sm:$0xf0] }
 0x181   : > { %v1106_v46 = vadd.f32 %v1105_v10, %v4697_v50  ;;  %v3517_v53 = vor.u32 %v3819_v36, %v3514_v5  ;;  %v3240_v10 = vld [vmem:[%s4167_s20 + $0x158] sm:$0xf] }
 0x182   : > { %v1286_v56 = vpop.f32.mrf.mxu0  ;;  %v1447_v43 = vmax.f32 %v1371_v23, 0.0  ;;  %v3241_v23 = vor.u32 %v3751_v24, %v3240_v10 }
 0x183   : > { %v1194_v38 = vpop.f32.mrf.mxu3  ;;  %v1448_v54 = vmax.f32 %v1106_v46, 0.0  ;;  %v1375_v0 = vpop.f32.mrf.mxu1  ;;  %1998 = vmatpush.bf16.msra.mxu1 %v3517_v53  ;;  %v3696_v53 = vld [vmem:[%s5624_s5 + $0xf0] sm:$0xf] }
 0x184   : > { %v1195_v1 = vadd.f32 %v1194_v38, %v4790_v14 }
 0x185   : > { %1147 = vmatmul.bf16.gmra.mxu2 %v3229_v33  ;;  %1325 = vmatmul.bf16.gmra.mxu0 %v4460_v27  ;;  %v4920_v59 = vpack.c.bf16 %v1448_v54, %v1446_v19 }
 0x186   : > { %v1284_v50 = vadd.f32 %v1283_v16, %v1195_v1  ;;  %1414 = vmatmul.bf16.gmra.mxu1 %v3229_v33 }
 0x188   : > { %v1373_v57 = vadd.f32 %v1372_v21, %v1284_v50  ;;  %1236 = vmatmul.bf16.gmra.mxu3 %v4456_v25  ;;  %v1108_v4 = vpop.f32.mrf.mxu2 }
 0x189   : > { %v1109_v44 = vadd.f32 %v1108_v4, %v4717_v32 }
 0x18a   : > { %v1449_v60 = vmax.f32 %v1373_v57, 0.0  ;;  %v1288_v16 = vpop.f32.mrf.mxu0 }
 0x18b   : > { %v1197_v51 = vpop.f32.mrf.mxu3  ;;  %v1377_v27 = vpop.f32.mrf.mxu1  ;;  %v1450_v32 = vmax.f32 %v1109_v44, 0.0 }
 0x18c   : > { %v1198_v17 = vadd.f32 %v1197_v51, %v4790_v14  ;;  %v4925_v6 = vpack.c.bf16 %v1449_v60, %v1447_v43 }
 0x18e   : > { %v1287_v41 = vadd.f32 %v1286_v56, %v1198_v17  ;;  %v3850_v56 = vld [vmem:[%s5624_s5 + $0x74] sm:$0xf0] }
 0x190   : > { %v1376_v29 = vadd.f32 %v1375_v0, %v1287_v41  ;;  %v1110_v21 = vpop.f32.mrf.mxu2  ;;  %v3754_v41 = vld [vmem:[%s4167_s20 + $0x178] sm:$0xf0] }
 0x191   : > { %v1111_v25 = vadd.f32 %v1110_v21, %v4725_v30  ;;  %v3632_v30 = vld [vmem:[%s5624_s5 + $0x70] sm:$0xf] }
 0x192   : > { %v1291_v38 = vpop.f32.mrf.mxu0  ;;  %v3633_v19 = vor.u32 %v3850_v56, %v3632_v30 }
 0x193   : > { %v1199_v15 = vpop.f32.mrf.mxu3  ;;  %v1452_v33 = vmax.f32 %v1111_v25, 0.0  ;;  %v1380_v52 = vpop.f32.mrf.mxu1 }
 0x194   : > { %v1200_v46 = vadd.f32 %v1199_v15, %v4790_v14  ;;  %2374 = vmatpush.bf16.msrb.mxu2 %v3633_v19 }
 0x195   : > { %1152 = vmatmul.bf16.gmra.mxu2 %v3241_v23  ;;  %1330 = vmatmul.bf16.gmra.mxu0 %v4504_v63  ;;  %v4932_v5 = vpack.c.bf16 %v1452_v33, %v1450_v32  ;;  %v3866_v63 = vld [vmem:[%s5624_s5 + $0xf4] sm:$0xf0] }
 0x196   : > { %v1289_v36 = vadd.f32 %v1288_v16, %v1200_v46  ;;  %1419 = vmatmul.bf16.gmra.mxu1 %v3241_v23  ;;  %v3697_v0 = vor.u32 %v3866_v63, %v3696_v53  ;;  %v3865_v23 = vld [vmem:[%s5624_s5 + $0xf4] sm:$0xf]  ;;  %v3698_v46 = vld [vmem:[%s5624_s5 + $0xf8] sm:$0xf0] }
 0x197   : > { %v3701_v33 = vor.u32 %v3865_v23, %v3698_v46 }
 0x198   : > { %v1378_v1 = vadd.f32 %v1377_v27, %v1289_v36  ;;  %1241 = vmatmul.bf16.gmra.mxu3 %v4500_v61  ;;  %v1451_v61 = vmax.f32 %v1376_v29, 0.0  ;;  %v1113_v54 = vpop.f32.mrf.mxu2  ;;  %v3252_v27 = vld [vmem:[%s4167_s20 + $0x170] sm:$0xf]  ;;  %v3849_v29 = vld [vmem:[%s5624_s5 + $0x74] sm:$0xf]  ;;  %s3938_s20 = sshra.s32 %s2996_s9, 4  ;;  %s3939_s20 = int_to_ptr.hbm [resolvable:$true] %s3938_s20 }
 0x199   : > { %v1114_v57 = vadd.f32 %v1113_v54, %v4733_v20  ;;  %2463 = vmatpush.bf16.msrb.mxu3 %v3697_v0  ;;  %v3634_v20 = vld [vmem:[%s5624_s5 + $0x78] sm:$0xf0]  ;;  %v3253_v25 = vor.u32 %v3754_v41, %v3252_v27  ;;  %2641 = vmatpush.bf16.msrb.mxu1 %v3701_v33  ;;  %s3940_s21 = scalar_lea.hbm %s3939_s20, 16  ;;  %p3945_p0 = scmp.lt.s32.totalorder %s3939_s20, %s5626_s7 }
 0x19a   : > { %v1453_v50 = vmax.f32 %v1378_v1, 0.0  ;;  %v1293_v60 = vpop.f32.mrf.mxu0  ;;  %v3637_v15 = vor.u32 %v3849_v29, %v3634_v20  ;;  %p3941_p11 = scmp.ne.s32.totalorder %s3939_s20, %s3940_s21  ;;  %p3946_p1 = scmp.lt.s32.totalorder %s3944_s17, %s3940_s21 }
 0x19b   : > { %v1202_v43 = vpop.f32.mrf.mxu3  ;;  %v1382_v51 = vpop.f32.mrf.mxu1 }
 0x19c   : > { %v1203_v4 = vadd.f32 %v1202_v43, %v4790_v14  ;;  %v4949_v44 = vpack.c.bf16 %v1453_v50, %v1451_v61  ;;  %2552 = vmatpush.bf16.msrb.mxu0 %v3637_v15  ;;  %p3942_p12 = pnand %p3941_p11, %p4066_p5  ;;  %p3947_p2 = por %p3946_p1, %p3945_p0 }
 0x19e   : > { %v1292_v17 = vadd.f32 %v1291_v38, %v1203_v4  ;;  %p3943_p13 = pneg %p3942_p12 }
 0x1a0   : > { %v1381_v16 = vadd.f32 %v1380_v52, %v1292_v17  ;;  %v1115_v10 = vpop.f32.mrf.mxu2  ;;  %v1454_v52 = vmax.f32 %v1114_v57, 0.0  ;;  %p3948_p3 = pnand %p3947_p2, %p3943_p13 }
 0x1a1   : > { %v1116_v24 = vadd.f32 %v1115_v10, %v4753_v26 }
 0x1a2   : > { %v1296_v32 = vpop.f32.mrf.mxu0  ;;  %v1455_v53 = vmax.f32 %v1381_v16, 0.0 }
 0x1a3   : > { %v1204_v21 = vpop.f32.mrf.mxu3  ;;  %v1456_v36 = vmax.f32 %v1116_v24, 0.0  ;;  %v1385_v1 = vpop.f32.mrf.mxu1  ;;  %v3848_v24 = vld [vmem:[%s5624_s5 + $0x64] sm:$0xf0] }
 0x1a4   : > { %v1205_v38 = vadd.f32 %v1204_v21, %v4790_v14  ;;  %v3688_v21 = vld [vmem:[%s5624_s5 + $0xe0] sm:$0xf] }
 0x1a5   : > { %1157 = vmatmul.bf16.gmra.mxu2 %v3253_v25  ;;  %1335 = vmatmul.bf16.gmra.mxu0 %v4548_v39  ;;  %v4968_v30 = vpack.c.bf16 %v1456_v36, %v1454_v52 }
 0x1a6   : > { %v1294_v26 = vadd.f32 %v1293_v60, %v1205_v38  ;;  %1424 = vmatmul.bf16.gmra.mxu1 %v3253_v25  ;;  %v3864_v25 = vld [vmem:[%s5624_s5 + $0xe4] sm:$0xf0] }
 0x1a8   : > { %v1383_v56 = vadd.f32 %v1382_v51, %v1294_v26  ;;  %1246 = vmatmul.bf16.gmra.mxu3 %v4544_v37  ;;  %v1118_v19 = vpop.f32.mrf.mxu2 }
 0x1a9   : > { %v1119_v61 = vadd.f32 %v1118_v19, %v4773_v11  ;;  %v3847_v19 = vld [vmem:[%s5624_s5 + $0x64] sm:$0xf] }
 0x1aa   : > { %v1457_v63 = vmax.f32 %v1383_v56, 0.0  ;;  %v1298_v50 = vpop.f32.mrf.mxu0 }
 0x1ab   : > { %v1207_v54 = vpop.f32.mrf.mxu3  ;;  %v1387_v43 = vpop.f32.mrf.mxu1  ;;  %v1458_v27 = vmax.f32 %v1119_v61, 0.0 }
 0x1ac   : > { %v1208_v0 = vadd.f32 %v1207_v54, %v4790_v14  ;;  %v4973_v57 = vpack.c.bf16 %v1457_v63, %v1455_v53 }
 0x1ae   : > { %v1297_v4 = vadd.f32 %v1296_v32, %v1208_v0  ;;  %v3863_v0 = vld [vmem:[%s5624_s5 + $0xe4] sm:$0xf] }
 0x1b0   : > { %v1386_v39 = vadd.f32 %v1385_v1, %v1297_v4  ;;  %v1120_v60 = vpop.f32.mrf.mxu2 }
 0x1b1   : > { %v1121_v51 = vadd.f32 %v1120_v60, %v4781_v2  ;;  %v3624_v2 = vld [vmem:[%s5624_s5 + $0x60] sm:$0xf] }
 0x1b2   : > { %v1301_v16 = vpop.f32.mrf.mxu0  ;;  %v1459_v15 = vmax.f32 %v1386_v39, 0.0 }
 0x1b3   : > { %v1209_v17 = vpop.f32.mrf.mxu3  ;;  %v1460_v41 = vmax.f32 %v1121_v51, 0.0  ;;  %v1390_v10 = vpop.f32.mrf.mxu1 }
 0x1b4   : > { %v1210_v37 = vadd.f32 %v1209_v17, %v4790_v14 }
 0x1b5   : > { %1732 = vmatmul.bf16.vlgmr.msra.gmra.mxu2 %v4823_v3  ;;  %1910 = vmatmul.bf16.vlgmr.msra.gmra.mxu0 %v4823_v3  ;;  %v4979_v29 = vpack.c.bf16 %v1460_v41, %v1458_v27  ;;  %v3625_v3 = vor.u32 %v3848_v24, %v3624_v2 }
 0x1b6   : > { %v1299_v11 = vadd.f32 %v1298_v50, %v1210_v37  ;;  %1999 = vmatmul.bf16.vlgmr.msra.gmra.mxu1 %v4828_v42  ;;  %v3690_v50 = vld [vmem:[%s5624_s5 + $0xe8] sm:$0xf0] }
 0x1b7   : > { %2375 = vmatpush.bf16.msrb.mxu2 %v3625_v3  ;;  %v3693_v39 = vor.u32 %v3863_v0, %v3690_v50 }
 0x1b8   : > { %v1388_v20 = vadd.f32 %v1387_v43, %v1299_v11  ;;  %1821 = vmatmul.bf16.vlgmr.msra.gmra.mxu3 %v4828_v42  ;;  %v1123_v23 = vpop.f32.mrf.mxu2  ;;  %v3689_v42 = vor.u32 %v3864_v25, %v3688_v21 }
 0x1b9   : > { %v1124_v38 = vadd.f32 %v1123_v23, %v4582_v13  ;;  %v3626_v13 = vld [vmem:[%s5624_s5 + $0x68] sm:$0xf0]  ;;  %2642 = vmatpush.bf16.msrb.mxu1 %v3693_v39 }
 0x1ba   : > { %v1461_v46 = vmax.f32 %v1388_v20, 0.0  ;;  %v1303_v52 = vpop.f32.mrf.mxu0  ;;  %2464 = vmatpush.bf16.msrb.mxu3 %v3689_v42  ;;  %v3629_v54 = vor.u32 %v3847_v19, %v3626_v13 }
 0x1bb   : > { %v1212_v32 = vpop.f32.mrf.mxu3  ;;  %v1392_v1 = vpop.f32.mrf.mxu1  ;;  %v1462_v60 = vmax.f32 %v1124_v38, 0.0 }
 0x1bc   : > { %v1213_v33 = vadd.f32 %v1212_v32, %v4790_v14  ;;  %v4997_v36 = vpack.c.bf16 %v1461_v46, %v1459_v15  ;;  %2553 = vmatpush.bf16.msrb.mxu0 %v3629_v54 }
 0x1be   : > { %v1302_v26 = vadd.f32 %v1301_v16, %v1213_v33 }
 0x1c0   : > { %v1391_v56 = vadd.f32 %v1390_v10, %v1302_v26  ;;  %v1125_v53 = vpop.f32.mrf.mxu2  ;;  %v3846_v26 = vld [vmem:[%s5624_s5 + $0x54] sm:$0xf0] }
 0x1c1   : > { %v1126_v63 = vadd.f32 %v1125_v53, %v4602_v48  ;;  %v3862_v53 = vld [vmem:[%s5624_s5 + $0xd4] sm:$0xf0] }
 0x1c2   : > { %v1306_v4 = vpop.f32.mrf.mxu0  ;;  %v1463_v27 = vmax.f32 %v1391_v56, 0.0  ;;  %v3680_v56 = vld [vmem:[%s5624_s5 + $0xd0] sm:$0xf] }
 0x1c3   : > { %v1214_v61 = vpop.f32.mrf.mxu3  ;;  %v1464_v51 = vmax.f32 %v1126_v63, 0.0  ;;  %v1395_v17 = vpop.f32.mrf.mxu1 }
 0x1c4   : > { %v1215_v43 = vadd.f32 %v1214_v61, %v4790_v14 }
 0x1c5   : > { %1737 = vmatmul.bf16.gmra.mxu2 %v4836_v47  ;;  %1915 = vmatmul.bf16.gmra.mxu0 %v4836_v47  ;;  %v5015_v48 = vpack.c.bf16 %v1464_v51, %v1462_v60 }
 0x1c6   : > { %v1304_v37 = vadd.f32 %v1303_v52, %v1215_v43  ;;  %2004 = vmatmul.bf16.gmra.mxu1 %v4853_v35 }
 0x1c8   : > { %v1393_v16 = vadd.f32 %v1392_v1, %v1304_v37  ;;  %1826 = vmatmul.bf16.gmra.mxu3 %v4853_v35  ;;  %v1128_v41 = vpop.f32.mrf.mxu2 }
 0x1c9   : > { %v1129_v11 = vadd.f32 %v1128_v41, %v4610_v8  ;;  %v3861_v41 = vld [vmem:[%s5624_s5 + $0xd4] sm:$0xf] }
 0x1ca   : > { %v1465_v10 = vmax.f32 %v1393_v16, 0.0  ;;  %v1308_v24 = vpop.f32.mrf.mxu0 }
 0x1cb   : > { %v1217_v20 = vpop.f32.mrf.mxu3  ;;  %v1397_v3 = vpop.f32.mrf.mxu1  ;;  %v1466_v38 = vmax.f32 %v1129_v11, 0.0 }
 0x1cc   : > { %v1218_v2 = vadd.f32 %v1217_v20, %v4790_v14  ;;  %v5021_v21 = vpack.c.bf16 %v1465_v10, %v1463_v27  ;;  %v3682_v10 = vld [vmem:[%s5624_s5 + $0xd8] sm:$0xf0] }
 0x1ce   : > { %v1307_v47 = vadd.f32 %v1306_v4, %v1218_v2  ;;  %v3685_v2 = vor.u32 %v3861_v41, %v3682_v10 }
 0x1d0   : > { %v1396_v25 = vadd.f32 %v1395_v17, %v1307_v47  ;;  %v1130_v15 = vpop.f32.mrf.mxu2  ;;  %v3845_v17 = vld [vmem:[%s5624_s5 + $0x54] sm:$0xf]  ;;  %2643 = vmatpush.bf16.msrb.mxu1 %v3685_v2 }
 0x1d1   : > { %v1131_v23 = vadd.f32 %v1130_v15, %v4618_v18  ;;  %v3616_v18 = vld [vmem:[%s5624_s5 + $0x50] sm:$0xf] }
 0x1d2   : > { %v1311_v46 = vpop.f32.mrf.mxu0  ;;  %v1467_v19 = vmax.f32 %v1396_v25, 0.0 }
 0x1d3   : > { %v1219_v42 = vpop.f32.mrf.mxu3  ;;  %v1468_v32 = vmax.f32 %v1131_v23, 0.0  ;;  %v1400_v33 = vpop.f32.mrf.mxu1 }
 0x1d4   : > { %v1220_v35 = vadd.f32 %v1219_v42, %v4790_v14 }
 0x1d5   : > { %1742 = vmatmul.bf16.gmra.mxu2 %v4872_v62  ;;  %1920 = vmatmul.bf16.gmra.mxu0 %v4872_v62  ;;  %v5027_v52 = vpack.c.bf16 %v1468_v32, %v1466_v38  ;;  %v3617_v62 = vor.u32 %v3846_v26, %v3616_v18 }
 0x1d6   : > { %v1309_v8 = vadd.f32 %v1308_v24, %v1220_v35  ;;  %2009 = vmatmul.bf16.gmra.mxu1 %v4877_v28 }
 0x1d7   : > { %2376 = vmatpush.bf16.msrb.mxu2 %v3617_v62 }
 0x1d8   : > { %v1398_v1 = vadd.f32 %v1397_v3, %v1309_v8  ;;  %1831 = vmatmul.bf16.gmra.mxu3 %v4877_v28  ;;  %v1133_v13 = vpop.f32.mrf.mxu2  ;;  %v3681_v28 = vor.u32 %v3862_v53, %v3680_v56 }
 0x1d9   : > { %v1134_v61 = vadd.f32 %v1133_v13, %v4638_v49  ;;  %v3618_v49 = vld [vmem:[%s5624_s5 + $0x58] sm:$0xf0] }
 0x1da   : > { %v1469_v63 = vmax.f32 %v1398_v1, 0.0  ;;  %v1313_v50 = vpop.f32.mrf.mxu0  ;;  %2465 = vmatpush.bf16.msrb.mxu3 %v3681_v28  ;;  %v3621_v27 = vor.u32 %v3845_v17, %v3618_v49 }
 0x1db   : > { %v1222_v54 = vpop.f32.mrf.mxu3  ;;  %v1402_v4 = vpop.f32.mrf.mxu1  ;;  %v1470_v24 = vmax.f32 %v1134_v61, 0.0 }
 0x1dc   : > { %v1223_v0 = vadd.f32 %v1222_v54, %v4790_v14  ;;  %v5045_v43 = vpack.c.bf16 %v1469_v63, %v1467_v19  ;;  %2554 = vmatpush.bf16.msrb.mxu0 %v3621_v27  ;;  %v3844_v54 = vld [vmem:[%s5624_s5 + $0x44] sm:$0xf0] }
 0x1de   : > { %v1312_v39 = vadd.f32 %v1311_v46, %v1223_v0  ;;  %v3672_v0 = vld [vmem:[%s5624_s5 + $0xc0] sm:$0xf] }
 0x1e0   : > { %v1401_v60 = vadd.f32 %v1400_v33, %v1312_v39  ;;  %v1135_v51 = vpop.f32.mrf.mxu2 }
 0x1e1   : > { %v1136_v37 = vadd.f32 %v1135_v51, %v4658_v22 }
 0x1e2   : > { %v1316_v20 = vpop.f32.mrf.mxu0  ;;  %v1471_v23 = vmax.f32 %v1401_v60, 0.0 }
 0x1e3   : > { %v1224_v16 = vpop.f32.mrf.mxu3  ;;  %v1472_v3 = vmax.f32 %v1136_v37, 0.0  ;;  %v1405_v47 = vpop.f32.mrf.mxu1 }
 0x1e4   : > { %v1225_v11 = vadd.f32 %v1224_v16, %v4790_v14 }
 0x1e5   : > { %1747 = vmatmul.bf16.gmra.mxu2 %v4884_v9  ;;  %1925 = vmatmul.bf16.gmra.mxu0 %v4884_v9  ;;  %v5063_v22 = vpack.c.bf16 %v1472_v3, %v1470_v24 }
 0x1e6   : > { %v1314_v25 = vadd.f32 %v1313_v50, %v1225_v11  ;;  %2014 = vmatmul.bf16.gmra.mxu1 %v4901_v31  ;;  %v3860_v50 = vld [vmem:[%s5624_s5 + $0xc4] sm:$0xf0] }
 0x1e8   : > { %v1403_v15 = vadd.f32 %v1402_v4, %v1314_v25  ;;  %1836 = vmatmul.bf16.gmra.mxu3 %v4901_v31  ;;  %v1138_v42 = vpop.f32.mrf.mxu2  ;;  %v3674_v25 = vld [vmem:[%s5624_s5 + $0xc8] sm:$0xf0] }
 0x1e9   : > { %v1139_v46 = vadd.f32 %v1138_v42, %v4666_v45 }
 0x1ea   : > { %v1473_v35 = vmax.f32 %v1403_v15, 0.0  ;;  %v1318_v33 = vpop.f32.mrf.mxu0 }
 0x1eb   : > { %v1227_v38 = vpop.f32.mrf.mxu3  ;;  %v1407_v1 = vpop.f32.mrf.mxu1  ;;  %v1474_v19 = vmax.f32 %v1139_v46, 0.0 }
 0x1ec   : > { %v1228_v32 = vadd.f32 %v1227_v38, %v4790_v14  ;;  %v5069_v8 = vpack.c.bf16 %v1473_v35, %v1471_v23 }
 0x1ee   : > { %v1317_v9 = vadd.f32 %v1316_v20, %v1228_v32  ;;  %v3843_v20 = vld [vmem:[%s5624_s5 + $0x44] sm:$0xf] }
 0x1f0   : > { %v1406_v18 = vadd.f32 %v1405_v47, %v1317_v9  ;;  %v1140_v26 = vpop.f32.mrf.mxu2  ;;  %v3859_v47 = vld [vmem:[%s5624_s5 + $0xc4] sm:$0xf] }
 0x1f1   : > { %v1141_v56 = vadd.f32 %v1140_v26, %v4674_v12  ;;  %v3608_v12 = vld [vmem:[%s5624_s5 + $0x40] sm:$0xf]  ;;  %v3677_v42 = vor.u32 %v3859_v47, %v3674_v25 }
 0x1f2   : > { %v1321_v53 = vpop.f32.mrf.mxu0  ;;  %v1475_v4 = vmax.f32 %v1406_v18, 0.0 }
 0x1f3   : > { %v1229_v62 = vpop.f32.mrf.mxu3  ;;  %v1476_v13 = vmax.f32 %v1141_v56, 0.0  ;;  %v1410_v28 = vpop.f32.mrf.mxu1  ;;  %2644 = vmatpush.bf16.msrb.mxu1 %v3677_v42 }
 0x1f4   : > { %v1230_v31 = vadd.f32 %v1229_v62, %v4790_v14 }
 0x1f5   : > { %1752 = vmatmul.bf16.gmra.mxu2 %v4920_v59  ;;  %1930 = vmatmul.bf16.gmra.mxu0 %v4920_v59  ;;  %v5075_v63 = vpack.c.bf16 %v1476_v13, %v1474_v19  ;;  %v3609_v59 = vor.u32 %v3844_v54, %v3608_v12 }
 0x1f6   : > { %v1319_v45 = vadd.f32 %v1318_v33, %v1230_v31  ;;  %2019 = vmatmul.bf16.gmra.mxu1 %v4925_v6 }
 0x1f7   : > { %2377 = vmatpush.bf16.msrb.mxu2 %v3609_v59 }
 0x1f8   : > { %v1408_v61 = vadd.f32 %v1407_v1, %v1319_v45  ;;  %1841 = vmatmul.bf16.gmra.mxu3 %v4925_v6  ;;  %v1143_v39 = vpop.f32.mrf.mxu2  ;;  %v3673_v6 = vor.u32 %v3860_v50, %v3672_v0 }
 0x1f9   : > { %v1144_v51 = vadd.f32 %v1143_v39, %v4694_v34  ;;  %v3610_v34 = vld [vmem:[%s5624_s5 + $0x48] sm:$0xf0]  ;;  %v3842_v39 = vld [vmem:[%s5624_s5 + $0x34] sm:$0xf0] }
 0x1fa   : > { %v1477_v60 = vmax.f32 %v1408_v61, 0.0  ;;  %v1323_v37 = vpop.f32.mrf.mxu0  ;;  %2466 = vmatpush.bf16.msrb.mxu3 %v3673_v6  ;;  %v3613_v3 = vor.u32 %v3843_v20, %v3610_v34  ;;  %v3664_v6 = vld [vmem:[%s5624_s5 + $0xb0] sm:$0xf] }
 0x1fb   : > { %v1232_v17 = vpop.f32.mrf.mxu3  ;;  %v1412_v27 = vpop.f32.mrf.mxu1  ;;  %v1478_v35 = vmax.f32 %v1144_v51, 0.0 }
 0x1fc   : > { %v1233_v49 = vadd.f32 %v1232_v17, %v4790_v14  ;;  %v5093_v16 = vpack.c.bf16 %v1477_v60, %v1475_v4  ;;  %2555 = vmatpush.bf16.msrb.mxu0 %v3613_v3  ;;  %v3858_v17 = vld [vmem:[%s5624_s5 + $0xb4] sm:$0xf0] }
 0x1fd   : > { %v5632_v3 = vld [vmem:[#allocation5_spill] sm:$0xff] }
 0x1fe   : > { %v1322_v41 = vadd.f32 %v1321_v53, %v1233_v49 }
 0x200   : > { %v1411_v10 = vadd.f32 %v1410_v28, %v1322_v41  ;;  %v1145_v11 = vpop.f32.mrf.mxu2 }
 0x201   : > { %v1146_v2 = vadd.f32 %v1145_v11, %v4714_v58 }
 0x202   : > { %v1326_v23 = vpop.f32.mrf.mxu0  ;;  %v1479_v1 = vmax.f32 %v1411_v10, 0.0 }
 0x203   : > { %v1234_v24 = vpop.f32.mrf.mxu3  ;;  %v1480_v46 = vmax.f32 %v1146_v2, 0.0  ;;  %v1415_v38 = vpop.f32.mrf.mxu1 }
 0x204   : > { %v1235_v15 = vadd.f32 %v1234_v24, %v4790_v14 }
 0x205   : > { %1757 = vmatmul.bf16.gmra.mxu2 %v4932_v5  ;;  %1935 = vmatmul.bf16.gmra.mxu0 %v4932_v5  ;;  %v5111_v58 = vpack.c.bf16 %v1480_v46, %v1478_v35 }
 0x206   : > { %v1324_v32 = vadd.f32 %v1323_v37, %v1235_v15  ;;  %2024 = vmatmul.bf16.gmra.mxu1 %v4949_v44  ;;  %v3602_v15 = vld [vmem:[%s5624_s5 + $0x38] sm:$0xf0] }
 0x208   : > { %v1413_v33 = vadd.f32 %v1412_v27, %v1324_v32  ;;  %1846 = vmatmul.bf16.gmra.mxu3 %v4949_v44  ;;  %v1148_v9 = vpop.f32.mrf.mxu2  ;;  %v3665_v27 = vor.u32 %v3858_v17, %v3664_v6 }
 0x209   : > { %v1149_v26 = vadd.f32 %v1148_v9, %v4722_v55 }
 0x20a   : > { %v1481_v18 = vmax.f32 %v1413_v33, 0.0  ;;  %v1328_v31 = vpop.f32.mrf.mxu0  ;;  %2467 = vmatpush.bf16.msrb.mxu3 %v3665_v27 }
 0x20b   : > { %v1237_v56 = vpop.f32.mrf.mxu3  ;;  %v1417_v19 = vpop.f32.mrf.mxu1  ;;  %v1482_v54 = vmax.f32 %v1149_v26, 0.0 }
 0x20c   : > { %v1238_v62 = vadd.f32 %v1237_v56, %v4790_v14  ;;  %v5117_v53 = vpack.c.bf16 %v1481_v18, %v1479_v1 }
 0x20e   : > { %v1327_v5 = vadd.f32 %v1326_v23, %v1238_v62  ;;  %v3857_v23 = vld [vmem:[%s5624_s5 + $0xb4] sm:$0xf] }
 0x210   : > { %v1416_v13 = vadd.f32 %v1415_v38, %v1327_v5  ;;  %v1150_v28 = vpop.f32.mrf.mxu2  ;;  %v3666_v38 = vld [vmem:[%s5624_s5 + $0xb8] sm:$0xf0]  ;;  %v5633_v5 = vld [vmem:[#allocation6_spill] sm:$0xff] }
 0x211   : > { %v1151_v45 = vadd.f32 %v1150_v28, %v4730_v40  ;;  %v3600_v40 = vld [vmem:[%s5624_s5 + $0x30] sm:$0xf]  ;;  %v3669_v9 = vor.u32 %v3857_v23, %v3666_v38 }
 0x212   : > { %v1331_v12 = vpop.f32.mrf.mxu0  ;;  %v3601_v51 = vor.u32 %v3842_v39, %v3600_v40 }
 0x213   : > { %v1239_v61 = vpop.f32.mrf.mxu3  ;;  %v1484_v0 = vmax.f32 %v1151_v45, 0.0  ;;  %v1420_v59 = vpop.f32.mrf.mxu1  ;;  %2645 = vmatpush.bf16.msrb.mxu1 %v3669_v9 }
 0x214   : > { %v1240_v44 = vadd.f32 %v1239_v61, %v4790_v14  ;;  %2378 = vmatpush.bf16.msrb.mxu2 %v3601_v51 }
 0x215   : > { %1762 = vmatmul.bf16.gmra.mxu2 %v4968_v30  ;;  %1940 = vmatmul.bf16.gmra.mxu0 %v4968_v30  ;;  %v5123_v50 = vpack.c.bf16 %v1484_v0, %v1482_v54  ;;  %v1483_v30 = vmax.f32 %v1416_v13, 0.0  ;;  %v1558_v54 = vld [vmem:[%s5623_s4] sm:$0x3] }
 0x216   : > { %v1329_v55 = vadd.f32 %v1328_v31, %v1240_v44  ;;  %2029 = vmatmul.bf16.gmra.mxu1 %v4973_v57 }
 0x218   : > { %v1418_v4 = vadd.f32 %v1417_v19, %v1329_v55  ;;  %1851 = vmatmul.bf16.gmra.mxu3 %v4973_v57  ;;  %v1153_v60 = vpop.f32.mrf.mxu2  ;;  %v5634_v55 = vld [vmem:[#allocation7_spill] sm:$0xff] }
 0x219   : > { %v1154_v49 = vadd.f32 %v1153_v60, %v4750_v7  ;;  %v3841_v7 = vld [vmem:[%s5624_s5 + $0x34] sm:$0xf] }
 0x21a   : > { %v1485_v57 = vmax.f32 %v1418_v4, 0.0  ;;  %v1333_v10 = vpop.f32.mrf.mxu0  ;;  %v3605_v46 = vor.u32 %v3841_v7, %v3602_v15 }
 0x21b   : > { %v1242_v37 = vpop.f32.mrf.mxu3  ;;  %v1422_v20 = vpop.f32.mrf.mxu1  ;;  %v1486_v32 = vmax.f32 %v1154_v49, 0.0 }
 0x21c   : > { %v1243_v41 = vadd.f32 %v1242_v37, %v4790_v14  ;;  %v5141_v11 = vpack.c.bf16 %v1485_v57, %v1483_v30  ;;  %2556 = vmatpush.bf16.msrb.mxu0 %v3605_v46  ;;  %v5177_v37 = vperm.slane %v1558_v54, 0 }
 0x21e   : > { %v1332_v34 = vadd.f32 %v1331_v12, %v1243_v41 }
 0x220   : > { %v1421_v2 = vadd.f32 %v1420_v59, %v1332_v34  ;;  %v1155_v24 = vpop.f32.mrf.mxu2 }
 0x221   : > { %v1156_v47 = vadd.f32 %v1155_v24, %v5632_v3  ;;  %v3856_v24 = vld [vmem:[%s5624_s5 + $0xa4] sm:$0xf0] }
 0x222   : > { %v1336_v35 = vpop.f32.mrf.mxu0  ;;  %v1487_v62 = vmax.f32 %v1421_v2, 0.0  ;;  %v3656_v2 = vld [vmem:[%s5624_s5 + $0xa0] sm:$0xf] }
 0x223   : > { %v1244_v25 = vpop.f32.mrf.mxu3  ;;  %v1488_v33 = vmax.f32 %v1156_v47, 0.0  ;;  %v1425_v1 = vpop.f32.mrf.mxu1 }
 0x224   : > { %v1245_v42 = vadd.f32 %v1244_v25, %v4790_v14  ;;  %v3657_v25 = vor.u32 %v3856_v24, %v3656_v2 }
 0x225   : > { %1767 = vmatmul.bf16.gmra.mxu2 %v4979_v29  ;;  %1945 = vmatmul.bf16.gmra.mxu0 %v4979_v29  ;;  %v5159_v26 = vpack.c.bf16 %v1488_v33, %v1486_v32  ;;  %v3839_v33 = vld [vmem:[%s5624_s5 + $0x24] sm:$0xf] }
 0x226   : > { %v1334_v18 = vadd.f32 %v1333_v10, %v1245_v42  ;;  %2034 = vmatmul.bf16.gmra.mxu1 %v4997_v36  ;;  %v3840_v10 = vld [vmem:[%s5624_s5 + $0x24] sm:$0xf0]  ;;  %2468 = vmatpush.bf16.msrb.mxu3 %v3657_v25 }
 0x228   : > { %v1423_v56 = vadd.f32 %v1422_v20, %v1334_v18  ;;  %1856 = vmatmul.bf16.gmra.mxu3 %v4997_v36  ;;  %v1158_v31 = vpop.f32.mrf.mxu2  ;;  %v5170_v36 = vperm.slane %v1558_v54, 1 }
 0x229   : > { %v1159_v13 = vadd.f32 %v1158_v31, %v5633_v5 }
 0x22a   : > { %v1489_v19 = vmax.f32 %v1423_v56, 0.0  ;;  %v1338_v61 = vpop.f32.mrf.mxu0  ;;  %v3855_v56 = vld [vmem:[%s5624_s5 + $0xa4] sm:$0xf] }
 0x22b   : > { %v1247_v28 = vpop.f32.mrf.mxu3  ;;  %v1427_v29 = vpop.f32.mrf.mxu1  ;;  %v1490_v30 = vmax.f32 %v1159_v13, 0.0 }
 0x22c   : > { %v1248_v45 = vadd.f32 %v1247_v28, %v4790_v14  ;;  %v5165_v44 = vpack.c.bf16 %v1489_v19, %v1487_v62  ;;  %v3658_v62 = vld [vmem:[%s5624_s5 + $0xa8] sm:$0xf0] }
 0x22d   : > { %v3661_v13 = vor.u32 %v3855_v56, %v3658_v62  ;;  %v3837_v56 = vld [vmem:[%s5624_s5 + $0x14] sm:$0xf]  ;;  %v3586_v62 = vld [vmem:[%s5624_s5 + $0x18] sm:$0xf0] }
 0x22e   : > { %v1337_v12 = vadd.f32 %v1336_v35, %v1248_v45 }
 0x22f   : > { %2646 = vmatpush.bf16.msrb.mxu1 %v3661_v13  ;;  %v3853_v13 = vld [vmem:[%s5624_s5 + $0x94] sm:$0xf] }
 0x230   : > { %v1426_v0 = vadd.f32 %v1425_v1, %v1337_v12  ;;  %v1160_v59 = vpop.f32.mrf.mxu2  ;;  %v3594_v1 = vld [vmem:[%s5624_s5 + $0x28] sm:$0xf0] }
 0x231   : > { %v1161_v4 = vadd.f32 %v1160_v59, %v5634_v55  ;;  %v3597_v18 = vor.u32 %v3839_v33, %v3594_v1 }
 0x232   : > { %v1911_v6 = vpop.f32.mrf.mxu0  ;;  %v1491_v20 = vmax.f32 %v1426_v0, 0.0 }
 0x233   : > { %v1249_v40 = vpop.f32.mrf.mxu3  ;;  %v1492_v60 = vmax.f32 %v1161_v4, 0.0  ;;  %v1912_v51 = vadd.f32 %v1911_v6, %v5170_v36  ;;  %v2000_v17 = vpop.f32.mrf.mxu1  ;;  %2557 = vmatpush.bf16.msrb.mxu0 %v3597_v18 }
 0x234   : > { %v1250_v39 = vadd.f32 %v1249_v40, %v4790_v14  ;;  %v3592_v14 = vld [vmem:[%s5624_s5 + $0x20] sm:$0xf] }
 0x235   : > { %v2001_v49 = vadd.f32 %v2000_v17, %v1912_v51  ;;  %1772 = vmatmul.bf16.gmra.mxu2 %v5015_v48  ;;  %1950 = vmatmul.bf16.gmra.mxu0 %v5015_v48  ;;  %v5179_v27 = vpack.c.bf16 %v1492_v60, %v1490_v30  ;;  %v3593_v48 = vor.u32 %v3840_v10, %v3592_v14 }
 0x236   : > { %v1339_v57 = vadd.f32 %v1338_v61, %v1250_v39  ;;  %2039 = vmatmul.bf16.gmra.mxu1 %v5021_v21 }
 0x237   : > { %2379 = vmatpush.bf16.msrb.mxu2 %v3593_v48  ;;  %v2081_v38 = vmax.f32 %v2001_v49, 0.0 }
 0x238   : > { %v1428_v41 = vadd.f32 %v1427_v29, %v1339_v57  ;;  %1861 = vmatmul.bf16.gmra.mxu3 %v5021_v21  ;;  %v1733_v34 = vpop.f32.mrf.mxu2 }
 0x239   : > { %v1734_v3 = vadd.f32 %v1733_v34, %v5177_v37 }
 0x23a   : > { %v1493_v21 = vmax.f32 %v1428_v41, 0.0  ;;  %v1913_v7 = vpop.f32.mrf.mxu0 }
 0x23b   : > { %v1822_v47 = vpop.f32.mrf.mxu3  ;;  %v1914_v42 = vadd.f32 %v1913_v7, %v5170_v36  ;;  %v2002_v35 = vpop.f32.mrf.mxu1 }
 0x23c   : > { %v5196_v15 = vpack.c.bf16 %v1493_v21, %v1491_v20  ;;  %v1823_v23 = vadd.f32 %v1822_v47, %v1734_v3  ;;  %v3584_v21 = vld [vmem:[%s5624_s5 + $0x10] sm:$0xf]  ;;  %v3838_v3 = vld [vmem:[%s5624_s5 + $0x14] sm:$0xf0] }
 0x23d   : > { %v2003_v46 = vadd.f32 %v2002_v35, %v1914_v42  ;;  %v3585_v7 = vor.u32 %v3838_v3, %v3584_v21 }
 0x23e   : > { %v2080_v12 = vmax.f32 %v1823_v23, 0.0 }
 0x23f   : > { %v2083_v32 = vmax.f32 %v2003_v46, 0.0  ;;  %2380 = vmatpush.bf16.msrb.mxu2 %v3585_v7 }
 0x240   : > { %v1735_v9 = vpop.f32.mrf.mxu2 }
 0x241   : > { %v5211_v31 = vpack.c.bf16 %v2083_v32, %v2081_v38  ;;  %v1736_v19 = vadd.f32 %v1735_v9, %v5177_v37 }
 0x242   : > { %v1916_v28 = vpop.f32.mrf.mxu0 }
 0x243   : > { %v1824_v5 = vpop.f32.mrf.mxu3  ;;  %v1917_v61 = vadd.f32 %v1916_v28, %v5170_v36  ;;  %v2005_v29 = vpop.f32.mrf.mxu1  ;;  %v3650_v28 = vld [vmem:[%s5624_s5 + $0x98] sm:$0xf0] }
 0x244   : > { %v1825_v45 = vadd.f32 %v1824_v5, %v1736_v19  ;;  %v3589_v5 = vor.u32 %v3837_v56, %v3586_v62 }
 0x245   : > { %v2006_v0 = vadd.f32 %v2005_v29, %v1917_v61  ;;  %1777 = vmatmul.bf16.gmra.mxu2 %v5027_v52  ;;  %1955 = vmatmul.bf16.gmra.mxu0 %v5027_v52  ;;  %v3653_v29 = vor.u32 %v3853_v13, %v3650_v28  ;;  %v3835_v13 = vld [vmem:[%s5624_s5 + $0x4] sm:$0xf]  ;;  %v3578_v28 = vld [vmem:[%s5624_s5 + $0x8] sm:$0xf0] }
 0x246   : > { %v2082_v54 = vmax.f32 %v1825_v45, 0.0  ;;  %2044 = vmatmul.bf16.gmra.mxu1 %v5045_v43  ;;  %2558 = vmatpush.bf16.msrb.mxu0 %v3589_v5 }
 0x247   : > { %v2085_v17 = vmax.f32 %v2006_v0, 0.0  ;;  %2647 = vmatpush.bf16.msrb.mxu1 %v3653_v29  ;;  %v3851_v29 = vld [vmem:[%s5624_s5 + $0x84] sm:$0xf] }
 0x248   : > { %1866 = vmatmul.bf16.gmra.mxu3 %v5045_v43  ;;  %v5219_v59 = vpack.c.bf16 %v2082_v54, %v2080_v12  ;;  %v1738_v55 = vpop.f32.mrf.mxu2 }
 0x249   : > { %v1739_v4 = vadd.f32 %v1738_v55, %v5177_v37 }
 0x24a   : > { %v1918_v39 = vpop.f32.mrf.mxu0 }
 0x24b   : > { %v1827_v40 = vpop.f32.mrf.mxu3  ;;  %v1919_v30 = vadd.f32 %v1918_v39, %v5170_v36  ;;  %v2007_v60 = vpop.f32.mrf.mxu1 }
 0x24c   : > { %v1828_v6 = vadd.f32 %v1827_v40, %v1739_v4 }
 0x24d   : > { %v2008_v51 = vadd.f32 %v2007_v60, %v1919_v30 }
 0x24e   : > { %v2084_v48 = vmax.f32 %v1828_v6, 0.0 }
 0x24f   : > { %v2087_v57 = vmax.f32 %v2008_v51, 0.0 }
 0x250   : > { %v1740_v49 = vpop.f32.mrf.mxu2 }
 0x251   : > { %v1741_v52 = vadd.f32 %v1740_v49, %v5177_v37  ;;  %v5224_v14 = vpack.c.bf16 %v2087_v57, %v2085_v17 }
 0x252   : > { %v1921_v43 = vpop.f32.mrf.mxu0 }
 0x253   : > { %v1829_v41 = vpop.f32.mrf.mxu3  ;;  %v1922_v20 = vadd.f32 %v1921_v43, %v5170_v36  ;;  %v2010_v34 = vpop.f32.mrf.mxu1 }
 0x254   : > { %v1830_v10 = vadd.f32 %v1829_v41, %v1741_v52 }
 0x255   : > { %v2011_v24 = vadd.f32 %v2010_v34, %v1922_v20  ;;  %1782 = vmatmul.bf16.gmra.mxu2 %v5063_v22  ;;  %1960 = vmatmul.bf16.gmra.mxu0 %v5063_v22  ;;  %v3648_v22 = vld [vmem:[%s5624_s5 + $0x90] sm:$0xf] }
 0x256   : > { %v2086_v2 = vmax.f32 %v1830_v10, 0.0  ;;  %2049 = vmatmul.bf16.gmra.mxu1 %v5069_v8 }
 0x257   : > { %v2089_v9 = vmax.f32 %v2011_v24, 0.0 }
 0x258   : > { %1871 = vmatmul.bf16.gmra.mxu3 %v5069_v8  ;;  %v5237_v47 = vpack.c.bf16 %v2086_v2, %v2084_v48  ;;  %v1743_v25 = vpop.f32.mrf.mxu2  ;;  %v3854_v8 = vld [vmem:[%s5624_s5 + $0x94] sm:$0xf0] }
 0x259   : > { %v1744_v23 = vadd.f32 %v1743_v25, %v5177_v37  ;;  %v3649_v35 = vor.u32 %v3854_v8, %v3648_v22  ;;  %v3576_v8 = vld [vmem:[%s5624_s5] sm:$0xf] }
 0x25a   : > { %v1923_v46 = vpop.f32.mrf.mxu0 }
 0x25b   : > { %v1832_v42 = vpop.f32.mrf.mxu3  ;;  %v1924_v32 = vadd.f32 %v1923_v46, %v5170_v36  ;;  %v2012_v33 = vpop.f32.mrf.mxu1  ;;  %2469 = vmatpush.bf16.msrb.mxu3 %v3649_v35 }
 0x25c   : > { %v1833_v38 = vadd.f32 %v1832_v42, %v1744_v23  ;;  %v3836_v23 = vld [vmem:[%s5624_s5 + $0x4] sm:$0xf0] }
 0x25d   : > { %v2013_v1 = vadd.f32 %v2012_v33, %v1924_v32  ;;  %v3577_v46 = vor.u32 %v3836_v23, %v3576_v8 }
 0x25e   : > { %v2088_v40 = vmax.f32 %v1833_v38, 0.0 }
 0x25f   : > { %v2091_v18 = vmax.f32 %v2013_v1, 0.0  ;;  %2381 = vmatpush.bf16.msrb.mxu2 %v3577_v46 }
 0x260   : > { %v1745_v19 = vpop.f32.mrf.mxu2 }
 0x261   : > { %v1746_v45 = vadd.f32 %v1745_v19, %v5177_v37  ;;  %v5260_v12 = vpack.c.bf16 %v2091_v18, %v2089_v9 }
 0x262   : > { %v1926_v54 = vpop.f32.mrf.mxu0 }
 0x263   : > { %v1834_v61 = vpop.f32.mrf.mxu3  ;;  %v1927_v55 = vadd.f32 %v1926_v54, %v5170_v36  ;;  %v2015_v4 = vpop.f32.mrf.mxu1  ;;  %v3642_v54 = vld [vmem:[%s5624_s5 + $0x88] sm:$0xf0] }
 0x264   : > { %v1835_v0 = vadd.f32 %v1834_v61, %v1746_v45  ;;  %v3581_v61 = vor.u32 %v3835_v13, %v3578_v28 }
 0x265   : > { %v2016_v6 = vadd.f32 %v2015_v4, %v1927_v55  ;;  %1787 = vmatmul.bf16.gmra.mxu2 %v5075_v63  ;;  %1965 = vmatmul.bf16.gmra.mxu0 %v5075_v63  ;;  %v3645_v4 = vor.u32 %v3851_v29, %v3642_v54 }
 0x266   : > { %v2090_v39 = vmax.f32 %v1835_v0, 0.0  ;;  %2054 = vmatmul.bf16.gmra.mxu1 %v5093_v16  ;;  %2559 = vmatpush.bf16.msrb.mxu0 %v3581_v61 }
 0x267   : > { %v2093_v10 = vmax.f32 %v2016_v6, 0.0  ;;  %2648 = vmatpush.bf16.msrb.mxu1 %v3645_v4 }
 0x268   : > { %1876 = vmatmul.bf16.gmra.mxu3 %v5093_v16  ;;  %v5267_v30 = vpack.c.bf16 %v2090_v39, %v2088_v40  ;;  %v1748_v60 = vpop.f32.mrf.mxu2 }
 0x269   : > { %v1749_v51 = vadd.f32 %v1748_v60, %v5177_v37 }
 0x26a   : > { %v1928_v57 = vpop.f32.mrf.mxu0 }
 0x26b   : > { %v1837_v17 = vpop.f32.mrf.mxu3  ;;  %v1929_v52 = vadd.f32 %v1928_v57, %v5170_v36  ;;  %v2017_v41 = vpop.f32.mrf.mxu1 }
 0x26c   : > { %v1838_v49 = vadd.f32 %v1837_v17, %v1749_v51 }
 0x26d   : > { %v2018_v43 = vadd.f32 %v2017_v41, %v1929_v52 }
 0x26e   : > { %v2092_v25 = vmax.f32 %v1838_v49, 0.0 }
 0x26f   : > { %v2095_v20 = vmax.f32 %v2018_v43, 0.0 }
 0x270   : > { %v1750_v34 = vpop.f32.mrf.mxu2 }
 0x271   : > { %v1751_v63 = vadd.f32 %v1750_v34, %v5177_v37  ;;  %v5272_v2 = vpack.c.bf16 %v2095_v20, %v2093_v10 }
 0x272   : > { %v1931_v16 = vpop.f32.mrf.mxu0 }
 0x273   : > { %v1839_v48 = vpop.f32.mrf.mxu3  ;;  %v1932_v21 = vadd.f32 %v1931_v16, %v5170_v36  ;;  %v2020_v3 = vpop.f32.mrf.mxu1 }
 0x274   : > { %v1840_v24 = vadd.f32 %v1839_v48, %v1751_v63 }
 0x275   : > { %v2021_v22 = vadd.f32 %v2020_v3, %v1932_v21  ;;  %1792 = vmatmul.bf16.gmra.mxu2 %v5111_v58  ;;  %1970 = vmatmul.bf16.gmra.mxu0 %v5111_v58  ;;  %v3640_v58 = vld [vmem:[%s5624_s5 + $0x80] sm:$0xf] }
 0x276   : > { %v2094_v7 = vmax.f32 %v1840_v24, 0.0  ;;  %2059 = vmatmul.bf16.gmra.mxu1 %v5117_v53 }
 0x277   : > { %v2097_v19 = vmax.f32 %v2021_v22, 0.0 }
 0x278   : > { %1881 = vmatmul.bf16.gmra.mxu3 %v5117_v53  ;;  %v5285_v42 = vpack.c.bf16 %v2094_v7, %v2092_v25  ;;  %v1753_v35 = vpop.f32.mrf.mxu2  ;;  %v3852_v53 = vld [vmem:[%s5624_s5 + $0x84] sm:$0xf0] }
 0x279   : > { %v1754_v38 = vadd.f32 %v1753_v35, %v5177_v37  ;;  %v3641_v33 = vor.u32 %v3852_v53, %v3640_v58 }
 0x27a   : > { %v1933_v1 = vpop.f32.mrf.mxu0 }
 0x27b   : > { %v1842_v32 = vpop.f32.mrf.mxu3  ;;  %v1934_v18 = vadd.f32 %v1933_v1, %v5170_v36  ;;  %v2022_v56 = vpop.f32.mrf.mxu1  ;;  %2470 = vmatpush.bf16.msrb.mxu3 %v3641_v33 }
 0x27c   : > { %v1843_v9 = vadd.f32 %v1842_v32, %v1754_v38 }
 0x27d   : > { %v2023_v62 = vadd.f32 %v2022_v56, %v1934_v18 }
 0x27e   : > { %v2096_v17 = vmax.f32 %v1843_v9, 0.0 }
 0x27f   : > { %v2099_v5 = vmax.f32 %v2023_v62, 0.0 }
 0x280   : > { %v1755_v45 = vpop.f32.mrf.mxu2 }
 0x281   : > { %v1756_v0 = vadd.f32 %v1755_v45, %v5177_v37  ;;  %v5308_v40 = vpack.c.bf16 %v2099_v5, %v2097_v19 }
 0x282   : > { %v1936_v39 = vpop.f32.mrf.mxu0 }
 0x283   : > { %v1844_v55 = vpop.f32.mrf.mxu3  ;;  %v1937_v60 = vadd.f32 %v1936_v39, %v5170_v36  ;;  %v2025_v51 = vpop.f32.mrf.mxu1 }
 0x284   : > { %v1845_v6 = vadd.f32 %v1844_v55, %v1756_v0 }
 0x285   : > { %v2026_v49 = vadd.f32 %v2025_v51, %v1937_v60  ;;  %1797 = vmatmul.bf16.gmra.mxu2 %v5123_v50  ;;  %1975 = vmatmul.bf16.gmra.mxu0 %v5123_v50 }
 0x286   : > { %v2098_v57 = vmax.f32 %v1845_v6, 0.0  ;;  %2064 = vmatmul.bf16.gmra.mxu1 %v5141_v11 }
 0x287   : > { %v2101_v24 = vmax.f32 %v2026_v49, 0.0 }
 0x288   : > { %1886 = vmatmul.bf16.gmra.mxu3 %v5141_v11  ;;  %v5315_v52 = vpack.c.bf16 %v2098_v57, %v2096_v17  ;;  %v1758_v41 = vpop.f32.mrf.mxu2 }
 0x289   : > { %v1759_v43 = vadd.f32 %v1758_v41, %v5177_v37 }
 0x28a   : > { %v1938_v20 = vpop.f32.mrf.mxu0 }
 0x28b   : > { %v1847_v10 = vpop.f32.mrf.mxu3  ;;  %v1939_v63 = vadd.f32 %v1938_v20, %v5170_v36  ;;  %v2027_v48 = vpop.f32.mrf.mxu1 }
 0x28c   : > { %v1848_v34 = vadd.f32 %v1847_v10, %v1759_v43 }
 0x28d   : > { %v2028_v16 = vadd.f32 %v2027_v48, %v1939_v63 }
 0x28e   : > { %v2100_v35 = vmax.f32 %v1848_v34, 0.0 }
 0x28f   : > { %v2103_v21 = vmax.f32 %v2028_v16, 0.0 }
 0x290   : > { %v1760_v3 = vpop.f32.mrf.mxu2 }
 0x291   : > { %v1761_v50 = vadd.f32 %v1760_v3, %v5177_v37  ;;  %v5320_v7 = vpack.c.bf16 %v2103_v21, %v2101_v24 }
 0x292   : > { %v1941_v11 = vpop.f32.mrf.mxu0 }
 0x293   : > { %v1849_v25 = vpop.f32.mrf.mxu3  ;;  %v1942_v8 = vadd.f32 %v1941_v11, %v5170_v36  ;;  %v2030_v23 = vpop.f32.mrf.mxu1 }
 0x294   : > { %v1850_v22 = vadd.f32 %v1849_v25, %v1761_v50 }
 0x295   : > { %v2031_v58 = vadd.f32 %v2030_v23, %v1942_v8  ;;  %1802 = vmatmul.bf16.gmra.mxu2 %v5159_v26  ;;  %1980 = vmatmul.bf16.gmra.mxu0 %v5159_v26 }
 0x296   : > { %v2102_v46 = vmax.f32 %v1850_v22, 0.0  ;;  %2069 = vmatmul.bf16.gmra.mxu1 %v5165_v44 }
 0x297   : > { %v2105_v19 = vmax.f32 %v2031_v58, 0.0 }
 0x298   : > { %1891 = vmatmul.bf16.gmra.mxu3 %v5165_v44  ;;  %v5327_v53 = vpack.c.bf16 %v2102_v46, %v2100_v35  ;;  %v1763_v38 = vpop.f32.mrf.mxu2 }
 0x299   : > { %v1764_v32 = vadd.f32 %v1763_v38, %v5177_v37 }
 0x29a   : > { %v1943_v1 = vpop.f32.mrf.mxu0 }
 0x29b   : > { %v1852_v33 = vpop.f32.mrf.mxu3  ;;  %v1944_v18 = vadd.f32 %v1943_v1, %v5170_v36  ;;  %v2032_v56 = vpop.f32.mrf.mxu1 }
 0x29c   : > { %v1853_v9 = vadd.f32 %v1852_v33, %v1764_v32 }
 0x29d   : > { %v2033_v62 = vadd.f32 %v2032_v56, %v1944_v18 }
 0x29e   : > { %v2104_v0 = vmax.f32 %v1853_v9, 0.0 }
 0x29f   : > { %v2107_v5 = vmax.f32 %v2033_v62, 0.0 }
 0x2a0   : > { %v1765_v13 = vpop.f32.mrf.mxu2 }
 0x2a1   : > { %v1766_v26 = vadd.f32 %v1765_v13, %v5177_v37  ;;  %v5332_v45 = vpack.c.bf16 %v2107_v5, %v2105_v19 }
 0x2a2   : > { %v1946_v44 = vpop.f32.mrf.mxu0 }
 0x2a3   : > { %v1854_v28 = vpop.f32.mrf.mxu3  ;;  %v1947_v29 = vadd.f32 %v1946_v44, %v5170_v36  ;;  %v2035_v54 = vpop.f32.mrf.mxu1 }
 0x2a4   : > { %v1855_v61 = vadd.f32 %v1854_v28, %v1766_v26 }
 0x2a5   : > { %v2036_v4 = vadd.f32 %v2035_v54, %v1947_v29  ;;  %1807 = vmatmul.bf16.gmra.mxu2 %v5179_v27  ;;  %1985 = vmatmul.bf16.gmra.mxu0 %v5179_v27 }
 0x2a6   : > { %v2106_v55 = vmax.f32 %v1855_v61, 0.0  ;;  %2074 = vmatmul.bf16.gmra.mxu1 %v5196_v15 }
 0x2a7   : > { %v2109_v10 = vmax.f32 %v2036_v4, 0.0 }
 0x2a8   : > { %1896 = vmatmul.bf16.gmra.mxu3 %v5196_v15  ;;  %v5339_v39 = vpack.c.bf16 %v2106_v55, %v2104_v0  ;;  %v1768_v6 = vpop.f32.mrf.mxu2 }
 0x2a9   : > { %v1769_v60 = vadd.f32 %v1768_v6, %v5177_v37 }
 0x2aa   : > { %v1948_v17 = vpop.f32.mrf.mxu0 }
 0x2ab   : > { %v1857_v51 = vpop.f32.mrf.mxu3  ;;  %v1949_v49 = vadd.f32 %v1948_v17, %v5170_v36  ;;  %v2037_v41 = vpop.f32.mrf.mxu1 }
 0x2ac   : > { %v1858_v57 = vadd.f32 %v1857_v51, %v1769_v60 }
 0x2ad   : > { %v2038_v43 = vadd.f32 %v2037_v41, %v1949_v49 }
 0x2ae   : > { %v2108_v3 = vmax.f32 %v1858_v57, 0.0 }
 0x2af   : > { %v2111_v20 = vmax.f32 %v2038_v43, 0.0 }
 0x2b0   : > { %v1770_v34 = vpop.f32.mrf.mxu2 }
 0x2b1   : > { %v1771_v27 = vadd.f32 %v1770_v34, %v5177_v37  ;;  %v5344_v48 = vpack.c.bf16 %v2111_v20, %v2109_v10 }
 0x2b2   : > { %v1951_v15 = vpop.f32.mrf.mxu0 }
 0x2b3   : > { %v1859_v63 = vpop.f32.mrf.mxu3  ;;  %v1952_v24 = vadd.f32 %v1951_v15, %v5170_v36  ;;  %v2040_v21 = vpop.f32.mrf.mxu1 }
 0x2b4   : > { %v1860_v16 = vadd.f32 %v1859_v63, %v1771_v27 }
 0x2b5   : > { %v2041_v25 = vadd.f32 %v2040_v21, %v1952_v24  ;;  %2382 = vmatmul.bf16.vlgmr.msrb.gmra.mxu2 %v5219_v59  ;;  %2560 = vmatmul.bf16.vlgmr.msrb.gmra.mxu0 %v5219_v59 }
 0x2b6   : > { %v2110_v50 = vmax.f32 %v1860_v16, 0.0  ;;  %2649 = vmatmul.bf16.vlgmr.msrb.gmra.mxu1 %v5211_v31 }
 0x2b7   : > { %v2113_v33 = vmax.f32 %v2041_v25, 0.0 }
 0x2b8   : > { %2471 = vmatmul.bf16.vlgmr.msrb.gmra.mxu3 %v5211_v31  ;;  %v5351_v11 = vpack.c.bf16 %v2110_v50, %v2108_v3  ;;  %v1773_v22 = vpop.f32.mrf.mxu2 }
 0x2b9   : > { %v1774_v8 = vadd.f32 %v1773_v22, %v5177_v37 }
 0x2ba   : > { %v1953_v35 = vpop.f32.mrf.mxu0 }
 0x2bb   : > { %v1862_v23 = vpop.f32.mrf.mxu3  ;;  %v1954_v58 = vadd.f32 %v1953_v35, %v5170_v36  ;;  %v2042_v38 = vpop.f32.mrf.mxu1 }
 0x2bc   : > { %v1863_v46 = vadd.f32 %v1862_v23, %v1774_v8 }
 0x2bd   : > { %v2043_v32 = vadd.f32 %v2042_v38, %v1954_v58 }
 0x2be   : > { %v2112_v13 = vmax.f32 %v1863_v46, 0.0 }
 0x2bf   : > { %v2115_v1 = vmax.f32 %v2043_v32, 0.0 }
 0x2c0   : > { %v1775_v9 = vpop.f32.mrf.mxu2 }
 0x2c1   : > { %v1776_v59 = vadd.f32 %v1775_v9, %v5177_v37  ;;  %v5356_v56 = vpack.c.bf16 %v2115_v1, %v2113_v33 }
 0x2c2   : > { %v1956_v31 = vpop.f32.mrf.mxu0 }
 0x2c3   : > { %v1864_v18 = vpop.f32.mrf.mxu3  ;;  %v1957_v19 = vadd.f32 %v1956_v31, %v5170_v36  ;;  %v2045_v5 = vpop.f32.mrf.mxu1 }
 0x2c4   : > { %v1865_v62 = vadd.f32 %v1864_v18, %v1776_v59 }
 0x2c5   : > { %v2046_v28 = vadd.f32 %v2045_v5, %v1957_v19  ;;  %2387 = vmatmul.bf16.gmra.mxu2 %v5237_v47  ;;  %2565 = vmatmul.bf16.gmra.mxu0 %v5237_v47 }
 0x2c6   : > { %v2114_v26 = vmax.f32 %v1865_v62, 0.0  ;;  %2654 = vmatmul.bf16.gmra.mxu1 %v5224_v14 }
 0x2c7   : > { %v2117_v51 = vmax.f32 %v2046_v28, 0.0 }
 0x2c8   : > { %2476 = vmatmul.bf16.gmra.mxu3 %v5224_v14  ;;  %v5363_v44 = vpack.c.bf16 %v2114_v26, %v2112_v13  ;;  %v1778_v61 = vpop.f32.mrf.mxu2 }
 0x2c9   : > { %v1779_v29 = vadd.f32 %v1778_v61, %v5177_v37 }
 0x2ca   : > { %v1958_v0 = vpop.f32.mrf.mxu0 }
 0x2cb   : > { %v1867_v54 = vpop.f32.mrf.mxu3  ;;  %v1959_v4 = vadd.f32 %v1958_v0, %v5170_v36  ;;  %v2047_v6 = vpop.f32.mrf.mxu1 }
 0x2cc   : > { %v1868_v55 = vadd.f32 %v1867_v54, %v1779_v29 }
 0x2cd   : > { %v2048_v60 = vadd.f32 %v2047_v6, %v1959_v4 }
 0x2ce   : > { %v2116_v34 = vmax.f32 %v1868_v55, 0.0 }
 0x2cf   : > { %v2119_v17 = vmax.f32 %v2048_v60, 0.0 }
 0x2d0   : > { %v1780_v57 = vpop.f32.mrf.mxu2 }
 0x2d1   : > { %v1781_v47 = vadd.f32 %v1780_v57, %v5177_v37  ;;  %v5368_v41 = vpack.c.bf16 %v2119_v17, %v2117_v51 }
 0x2d2   : > { %v1961_v14 = vpop.f32.mrf.mxu0 }
 0x2d3   : > { %v1869_v49 = vpop.f32.mrf.mxu3  ;;  %v1962_v10 = vadd.f32 %v1961_v14, %v5170_v36  ;;  %v2050_v20 = vpop.f32.mrf.mxu1 }
 0x2d4   : > { %v1870_v43 = vadd.f32 %v1869_v49, %v1781_v47 }
 0x2d5   : > { %v2051_v63 = vadd.f32 %v2050_v20, %v1962_v10  ;;  %2392 = vmatmul.bf16.gmra.mxu2 %v5267_v30  ;;  %2570 = vmatmul.bf16.gmra.mxu0 %v5267_v30 }
 0x2d6   : > { %v2118_v27 = vmax.f32 %v1870_v43, 0.0  ;;  %2659 = vmatmul.bf16.gmra.mxu1 %v5260_v12 }
 0x2d7   : > { %v2121_v23 = vmax.f32 %v2051_v63, 0.0 }
 0x2d8   : > { %2481 = vmatmul.bf16.gmra.mxu3 %v5260_v12  ;;  %v5375_v15 = vpack.c.bf16 %v2118_v27, %v2116_v34  ;;  %v1783_v16 = vpop.f32.mrf.mxu2 }
 0x2d9   : > { %v1784_v24 = vadd.f32 %v1783_v16, %v5177_v37 }
 0x2da   : > { %v1963_v3 = vpop.f32.mrf.mxu0 }
 0x2db   : > { %v1872_v21 = vpop.f32.mrf.mxu3  ;;  %v1964_v25 = vadd.f32 %v1963_v3, %v5170_v36  ;;  %v2052_v22 = vpop.f32.mrf.mxu1 }
 0x2dc   : > { %v1873_v50 = vadd.f32 %v1872_v21, %v1784_v24 }
 0x2dd   : > { %v2053_v8 = vadd.f32 %v2052_v22, %v1964_v25 }
 0x2de   : > { %v2120_v9 = vmax.f32 %v1873_v50, 0.0 }
 0x2df   : > { %v2123_v35 = vmax.f32 %v2053_v8, 0.0 }
 0x2e0   : > { %v1785_v46 = vpop.f32.mrf.mxu2 }
 0x2e1   : > { %v1786_v30 = vadd.f32 %v1785_v46, %v5177_v37  ;;  %v5380_v38 = vpack.c.bf16 %v2123_v35, %v2121_v23 }
 0x2e2   : > { %v1966_v12 = vpop.f32.mrf.mxu0 }
 0x2e3   : > { %v1874_v58 = vpop.f32.mrf.mxu3  ;;  %v1967_v33 = vadd.f32 %v1966_v12, %v5170_v36  ;;  %v2055_v1 = vpop.f32.mrf.mxu1 }
 0x2e4   : > { %v1875_v32 = vadd.f32 %v1874_v58, %v1786_v30 }
 0x2e5   : > { %v2056_v18 = vadd.f32 %v2055_v1, %v1967_v33  ;;  %2397 = vmatmul.bf16.gmra.mxu2 %v5285_v42  ;;  %2575 = vmatmul.bf16.gmra.mxu0 %v5285_v42 }
 0x2e6   : > { %v2122_v59 = vmax.f32 %v1875_v32, 0.0  ;;  %2664 = vmatmul.bf16.gmra.mxu1 %v5272_v2 }
 0x2e7   : > { %v2125_v54 = vmax.f32 %v2056_v18, 0.0 }
 0x2e8   : > { %2486 = vmatmul.bf16.gmra.mxu3 %v5272_v2  ;;  %v5387_v31 = vpack.c.bf16 %v2122_v59, %v2120_v9  ;;  %v1788_v62 = vpop.f32.mrf.mxu2 }
 0x2e9   : > { %v1789_v19 = vadd.f32 %v1788_v62, %v5177_v37 }
 0x2ea   : > { %v1968_v13 = vpop.f32.mrf.mxu0 }
 0x2eb   : > { %v1877_v5 = vpop.f32.mrf.mxu3  ;;  %v1969_v28 = vadd.f32 %v1968_v13, %v5170_v36  ;;  %v2057_v61 = vpop.f32.mrf.mxu1 }
 0x2ec   : > { %v1878_v26 = vadd.f32 %v1877_v5, %v1789_v19 }
 0x2ed   : > { %v2058_v29 = vadd.f32 %v2057_v61, %v1969_v28 }
 0x2ee   : > { %v2124_v57 = vmax.f32 %v1878_v26, 0.0 }
 0x2ef   : > { %v2127_v0 = vmax.f32 %v2058_v29, 0.0 }
 0x2f0   : > { %v1790_v55 = vpop.f32.mrf.mxu2 }
 0x2f1   : > { %v1791_v42 = vadd.f32 %v1790_v55, %v5177_v37  ;;  %v5392_v6 = vpack.c.bf16 %v2127_v0, %v2125_v54 }
 0x2f2   : > { %v1971_v2 = vpop.f32.mrf.mxu0 }
 0x2f3   : > { %v1879_v4 = vpop.f32.mrf.mxu3  ;;  %v1972_v51 = vadd.f32 %v1971_v2, %v5170_v36  ;;  %v2060_v17 = vpop.f32.mrf.mxu1 }
 0x2f4   : > { %v1880_v60 = vadd.f32 %v1879_v4, %v1791_v42 }
 0x2f5   : > { %v2061_v49 = vadd.f32 %v2060_v17, %v1972_v51  ;;  %2402 = vmatmul.bf16.gmra.mxu2 %v5315_v52  ;;  %2580 = vmatmul.bf16.gmra.mxu0 %v5315_v52 }
 0x2f6   : > { %v2126_v47 = vmax.f32 %v1880_v60, 0.0  ;;  %2669 = vmatmul.bf16.gmra.mxu1 %v5308_v40 }
 0x2f7   : > { %v2129_v21 = vmax.f32 %v2061_v49, 0.0 }
 0x2f8   : > { %2491 = vmatmul.bf16.gmra.mxu3 %v5308_v40  ;;  %v5399_v14 = vpack.c.bf16 %v2126_v47, %v2124_v57  ;;  %v1793_v43 = vpop.f32.mrf.mxu2 }
 0x2f9   : > { %v1794_v10 = vadd.f32 %v1793_v43, %v5177_v37 }
 0x2fa   : > { %v1973_v34 = vpop.f32.mrf.mxu0 }
 0x2fb   : > { %v1882_v20 = vpop.f32.mrf.mxu3  ;;  %v1974_v63 = vadd.f32 %v1973_v34, %v5170_v36  ;;  %v2062_v16 = vpop.f32.mrf.mxu1 }
 0x2fc   : > { %v1883_v27 = vadd.f32 %v1882_v20, %v1794_v10 }
 0x2fd   : > { %v2063_v24 = vadd.f32 %v2062_v16, %v1974_v63 }
 0x2fe   : > { %v2128_v46 = vmax.f32 %v1883_v27, 0.0 }
 0x2ff   : > { %v2131_v3 = vmax.f32 %v2063_v24, 0.0 }
 0x300   : > { %v1795_v50 = vpop.f32.mrf.mxu2 }
 0x301   : > { %v1796_v52 = vadd.f32 %v1795_v50, %v5177_v37  ;;  %v5404_v22 = vpack.c.bf16 %v2131_v3, %v2129_v21 }
 0x302   : > { %v1976_v40 = vpop.f32.mrf.mxu0 }
 0x303   : > { %v1884_v25 = vpop.f32.mrf.mxu3  ;;  %v1977_v23 = vadd.f32 %v1976_v40, %v5170_v36  ;;  %v2065_v35 = vpop.f32.mrf.mxu1 }
 0x304   : > { %v1885_v8 = vadd.f32 %v1884_v25, %v1796_v52 }
 0x305   : > { %v2066_v58 = vadd.f32 %v2065_v35, %v1977_v23  ;;  %2407 = vmatmul.bf16.gmra.mxu2 %v5327_v53  ;;  %2585 = vmatmul.bf16.gmra.mxu0 %v5327_v53 }
 0x306   : > { %v2130_v30 = vmax.f32 %v1885_v8, 0.0  ;;  %2674 = vmatmul.bf16.gmra.mxu1 %v5320_v7 }
 0x307   : > { %v2133_v5 = vmax.f32 %v2066_v58, 0.0 }
 0x308   : > { %2496 = vmatmul.bf16.gmra.mxu3 %v5320_v7  ;;  %v5411_v12 = vpack.c.bf16 %v2130_v30, %v2128_v46  ;;  %v1798_v32 = vpop.f32.mrf.mxu2 }
 0x309   : > { %v1799_v33 = vadd.f32 %v1798_v32, %v5177_v37 }
 0x30a   : > { %v1978_v9 = vpop.f32.mrf.mxu0 }
 0x30b   : > { %v1887_v1 = vpop.f32.mrf.mxu3  ;;  %v1979_v18 = vadd.f32 %v1978_v9, %v5170_v36  ;;  %v2067_v62 = vpop.f32.mrf.mxu1 }
 0x30c   : > { %v1888_v59 = vadd.f32 %v1887_v1, %v1799_v33  ;;  %v2208_v33 = vld [vmem:[%s5625_s6] sm:$0x3] }
 0x30d   : > { %v2068_v19 = vadd.f32 %v2067_v62, %v1979_v18 }
 0x30e   : > { %v2132_v55 = vmax.f32 %v1888_v59, 0.0  ;;  %v5442_v59 = vperm.slane %v2208_v33, 1 }
 0x30f   : > { %v2135_v13 = vmax.f32 %v2068_v19, 0.0 }
 0x310   : > { %v1800_v26 = vpop.f32.mrf.mxu2 }
 0x311   : > { %v1801_v53 = vadd.f32 %v1800_v26, %v5177_v37  ;;  %v5416_v61 = vpack.c.bf16 %v2135_v13, %v2133_v5 }
 0x312   : > { %v1981_v7 = vpop.f32.mrf.mxu0 }
 0x313   : > { %v1889_v28 = vpop.f32.mrf.mxu3  ;;  %v1982_v54 = vadd.f32 %v1981_v7, %v5170_v36  ;;  %v2070_v0 = vpop.f32.mrf.mxu1 }
 0x314   : > { %v1890_v29 = vadd.f32 %v1889_v28, %v1801_v53 }
 0x315   : > { %v2071_v4 = vadd.f32 %v2070_v0, %v1982_v54  ;;  %2412 = vmatmul.bf16.gmra.mxu2 %v5339_v39  ;;  %2590 = vmatmul.bf16.gmra.mxu0 %v5339_v39 }
 0x316   : > { %v2134_v42 = vmax.f32 %v1890_v29, 0.0  ;;  %2679 = vmatmul.bf16.gmra.mxu1 %v5332_v45  ;;  %v5450_v29 = vperm.slane %v2208_v33, 0 }
 0x317   : > { %v2137_v20 = vmax.f32 %v2071_v4, 0.0 }
 0x318   : > { %2501 = vmatmul.bf16.gmra.mxu3 %v5332_v45  ;;  %v5423_v2 = vpack.c.bf16 %v2134_v42, %v2132_v55  ;;  %v1803_v60 = vpop.f32.mrf.mxu2 }
 0x319   : > { %v1804_v51 = vadd.f32 %v1803_v60, %v5177_v37 }
 0x31a   : > { %v1983_v57 = vpop.f32.mrf.mxu0 }
 0x31b   : > { %v1892_v17 = vpop.f32.mrf.mxu3  ;;  %v1984_v49 = vadd.f32 %v1983_v57, %v5170_v36  ;;  %v2072_v43 = vpop.f32.mrf.mxu1 }
 0x31c   : > { %v1893_v47 = vadd.f32 %v1892_v17, %v1804_v51 }
 0x31d   : > { %v2073_v10 = vadd.f32 %v2072_v43, %v1984_v49 }
 0x31e   : > { %v2136_v50 = vmax.f32 %v1893_v47, 0.0 }
 0x31f   : > { %v2139_v34 = vmax.f32 %v2073_v10, 0.0 }
 0x320   : > { %v1805_v27 = vpop.f32.mrf.mxu2 }
 0x321   : > { %v1806_v39 = vadd.f32 %v1805_v27, %v5177_v37  ;;  %v5428_v16 = vpack.c.bf16 %v2139_v34, %v2137_v20 }
 0x322   : > { %v1986_v45 = vpop.f32.mrf.mxu0 }
 0x323   : > { %v1894_v63 = vpop.f32.mrf.mxu3  ;;  %v1987_v21 = vadd.f32 %v1986_v45, %v5170_v36  ;;  %v2075_v3 = vpop.f32.mrf.mxu1 }
 0x324   : > { %v1895_v24 = vadd.f32 %v1894_v63, %v1806_v39 }
 0x325   : > { %v2076_v25 = vadd.f32 %v2075_v3, %v1987_v21  ;;  %2417 = vmatmul.bf16.gmra.mxu2 %v5351_v11  ;;  %2595 = vmatmul.bf16.gmra.mxu0 %v5351_v11 }
 0x326   : > { %v2138_v52 = vmax.f32 %v1895_v24, 0.0  ;;  %2684 = vmatmul.bf16.gmra.mxu1 %v5344_v48 }
 0x327   : > { %v2141_v1 = vmax.f32 %v2076_v25, 0.0 }
 0x328   : > { %2506 = vmatmul.bf16.gmra.mxu3 %v5344_v48  ;;  %v5435_v40 = vpack.c.bf16 %v2138_v52, %v2136_v50  ;;  %v1808_v8 = vpop.f32.mrf.mxu2 }
 0x329   : > { %v1809_v23 = vadd.f32 %v1808_v8, %v5177_v37 }
 0x32a   : > { %v1988_v46 = vpop.f32.mrf.mxu0 }
 0x32b   : > { %v1897_v35 = vpop.f32.mrf.mxu3  ;;  %v1989_v58 = vadd.f32 %v1988_v46, %v5170_v36  ;;  %v2077_v32 = vpop.f32.mrf.mxu1 }
 0x32c   : > { %v1898_v30 = vadd.f32 %v1897_v35, %v1809_v23 }
 0x32d   : > { %v2078_v11 = vadd.f32 %v2077_v32, %v1989_v58 }
 0x32e   : > { %v2140_v53 = vmax.f32 %v1898_v30, 0.0 }
 0x32f   : > { %v2143_v9 = vmax.f32 %v2078_v11, 0.0 }
 0x330   : > { %v1810_v48 = vpop.f32.mrf.mxu2 }
 0x331   : > { %v1811_v18 = vadd.f32 %v1810_v48, %v5177_v37  ;;  %v5445_v19 = vpack.c.bf16 %v2143_v9, %v2141_v1 }
 0x332   : > { %v2561_v5 = vpop.f32.mrf.mxu0 }
 0x333   : > { %v1899_v62 = vpop.f32.mrf.mxu3  ;;  %v2562_v36 = vadd.f32 %v2561_v5, %v5442_v59  ;;  %v2650_v26 = vpop.f32.mrf.mxu1 }
 0x334   : > { %v1900_v13 = vadd.f32 %v1899_v62, %v1811_v18 }
 0x335   : > { %v2651_v7 = vadd.f32 %v2650_v26, %v2562_v36  ;;  %2422 = vmatmul.bf16.gmra.mxu2 %v5363_v44  ;;  %2600 = vmatmul.bf16.gmra.mxu0 %v5363_v44 }
 0x336   : > { %v2142_v28 = vmax.f32 %v1900_v13, 0.0  ;;  %2689 = vmatmul.bf16.gmra.mxu1 %v5356_v56 }
 0x337   : > { %v2731_v57 = vmax.f32 %v2651_v7, 0.0 }
 0x338   : > { %2511 = vmatmul.bf16.gmra.mxu3 %v5356_v56  ;;  %v5454_v37 = vpack.c.bf16 %v2142_v28, %v2140_v53  ;;  %v2383_v54 = vpop.f32.mrf.mxu2 }
 0x339   : > { %v2384_v0 = vadd.f32 %v2383_v54, %v5450_v29 }
 0x33a   : > { %v2563_v42 = vpop.f32.mrf.mxu0 }
 0x33b   : > { %v2472_v55 = vpop.f32.mrf.mxu3  ;;  %v2564_v60 = vadd.f32 %v2563_v42, %v5442_v59  ;;  %v2652_v51 = vpop.f32.mrf.mxu1 }
 0x33c   : > { %v2473_v4 = vadd.f32 %v2472_v55, %v2384_v0 }
 0x33d   : > { %v2653_v17 = vadd.f32 %v2652_v51, %v2564_v60 }
 0x33e   : > { %v2730_v39 = vmax.f32 %v2473_v4, 0.0 }
 0x33f   : > { %v2733_v44 = vmax.f32 %v2653_v17, 0.0 }
 0x340   : > { %v2385_v47 = vpop.f32.mrf.mxu2 }
 0x341   : > { %v2803_v49 = vmax.f32 %v2731_v57, %v2733_v44  ;;  %v2386_v43 = vadd.f32 %v2385_v47, %v5450_v29 }
 0x342   : > { %v2566_v56 = vpop.f32.mrf.mxu0 }
 0x343   : > { %v2474_v10 = vpop.f32.mrf.mxu3  ;;  %v2567_v34 = vadd.f32 %v2566_v56, %v5442_v59  ;;  %v2655_v27 = vpop.f32.mrf.mxu1 }
 0x344   : > { %v2475_v20 = vadd.f32 %v2474_v10, %v2386_v43 }
 0x345   : > { %v2656_v45 = vadd.f32 %v2655_v27, %v2567_v34  ;;  %2427 = vmatmul.bf16.gmra.mxu2 %v5375_v15  ;;  %2605 = vmatmul.bf16.gmra.mxu0 %v5375_v15 }
 0x346   : > { %v2732_v63 = vmax.f32 %v2475_v20, 0.0  ;;  %2694 = vmatmul.bf16.gmra.mxu1 %v5368_v41 }
 0x347   : > { %v2735_v21 = vmax.f32 %v2656_v45, 0.0 }
 0x348   : > { %2516 = vmatmul.bf16.gmra.mxu3 %v5368_v41  ;;  %v2794_v24 = vmax.f32 %v2730_v39, %v2732_v63  ;;  %v2388_v3 = vpop.f32.mrf.mxu2 }
 0x349   : > { %v2804_v50 = vmax.f32 %v2803_v49, %v2735_v21  ;;  %v2389_v52 = vadd.f32 %v2388_v3, %v5450_v29 }
 0x34a   : > { %v2568_v8 = vpop.f32.mrf.mxu0 }
 0x34b   : > { %v2477_v25 = vpop.f32.mrf.mxu3  ;;  %v2569_v35 = vadd.f32 %v2568_v8, %v5442_v59  ;;  %v2657_v46 = vpop.f32.mrf.mxu1 }
 0x34c   : > { %v2478_v23 = vadd.f32 %v2477_v25, %v2389_v52 }
 0x34d   : > { %v2658_v58 = vadd.f32 %v2657_v46, %v2569_v35 }
 0x34e   : > { %v2734_v30 = vmax.f32 %v2478_v23, 0.0 }
 0x34f   : > { %v2737_v15 = vmax.f32 %v2658_v58, 0.0 }
 0x350   : > { %v2795_v32 = vmax.f32 %v2794_v24, %v2734_v30  ;;  %v2390_v33 = vpop.f32.mrf.mxu2 }
 0x351   : > { %v2805_v11 = vmax.f32 %v2804_v50, %v2737_v15  ;;  %v2391_v41 = vadd.f32 %v2390_v33, %v5450_v29 }
 0x352   : > { %v2571_v9 = vpop.f32.mrf.mxu0 }
 0x353   : > { %v2479_v1 = vpop.f32.mrf.mxu3  ;;  %v2572_v18 = vadd.f32 %v2571_v9, %v5442_v59  ;;  %v2660_v62 = vpop.f32.mrf.mxu1  ;;  %v2806_v39 = vrot.slane %v2805_v11, 4 }
 0x354   : > { %v2480_v48 = vadd.f32 %v2479_v1, %v2391_v41 }
 0x355   : > { %v2661_v13 = vadd.f32 %v2660_v62, %v2572_v18  ;;  %2432 = vmatmul.bf16.gmra.mxu2 %v5387_v31  ;;  %2610 = vmatmul.bf16.gmra.mxu0 %v5387_v31  ;;  %v2807_v25 = vmax.f32 %v2805_v11, %v2806_v39 }
 0x356   : > { %v2736_v5 = vmax.f32 %v2480_v48, 0.0  ;;  %2699 = vmatmul.bf16.gmra.mxu1 %v5380_v38 }
 0x357   : > { %v2739_v4 = vmax.f32 %v2661_v13, 0.0  ;;  %v2808_v30 = vrot.slane %v2807_v25, 2 }
 0x358   : > { %2521 = vmatmul.bf16.gmra.mxu3 %v5380_v38  ;;  %v2796_v36 = vmax.f32 %v2795_v32, %v2736_v5  ;;  %v2393_v26 = vpop.f32.mrf.mxu2 }
 0x359   : > { %v2394_v53 = vadd.f32 %v2393_v26, %v5450_v29  ;;  %v2809_v62 = vmax.f32 %v2807_v25, %v2808_v30 }
 0x35a   : > { %v2573_v7 = vpop.f32.mrf.mxu0  ;;  %v2797_v23 = vrot.slane %v2796_v36, 4 }
 0x35b   : > { %v2482_v28 = vpop.f32.mrf.mxu3  ;;  %v2574_v0 = vadd.f32 %v2573_v7, %v5442_v59  ;;  %v2662_v55 = vpop.f32.mrf.mxu1  ;;  %v2810_v7 = vrot.slane %v2809_v62, 1 }
 0x35c   : > { %v2483_v54 = vadd.f32 %v2482_v28, %v2394_v53  ;;  %v2798_v33 = vmax.f32 %v2796_v36, %v2797_v23 }
 0x35d   : > { %v2663_v42 = vadd.f32 %v2662_v55, %v2574_v0 }
 0x35e   : > { %v2738_v43 = vmax.f32 %v2483_v54, 0.0  ;;  %v2799_v26 = vrot.slane %v2798_v33, 2 }
 0x35f   : > { %v2741_v60 = vmax.f32 %v2663_v42, 0.0 }
 0x360   : > { %v2395_v51 = vpop.f32.mrf.mxu2 }
 0x361   : > { %v2821_v17 = vmax.f32 %v2739_v4, %v2741_v60  ;;  %v2396_v31 = vadd.f32 %v2395_v51, %v5450_v29  ;;  %v2800_v4 = vmax.f32 %v2798_v33, %v2799_v26 }
 0x362   : > { %v2576_v44 = vpop.f32.mrf.mxu0 }
 0x363   : > { %v2484_v57 = vpop.f32.mrf.mxu3  ;;  %v2577_v47 = vadd.f32 %v2576_v44, %v5442_v59  ;;  %v2665_v49 = vpop.f32.mrf.mxu1  ;;  %v2811_v44 = vmax.f32 %v2809_v62, %v2810_v7 }
 0x364   : > { %v2485_v38 = vadd.f32 %v2484_v57, %v2396_v31 }
 0x365   : > { %v2666_v56 = vadd.f32 %v2665_v49, %v2577_v47  ;;  %2437 = vmatmul.bf16.gmra.mxu2 %v5399_v14  ;;  %2615 = vmatmul.bf16.gmra.mxu0 %v5399_v14  ;;  %v2801_v49 = vrot.slane %v2800_v4, 1 }
 0x366   : > { %v2740_v10 = vmax.f32 %v2485_v38, 0.0  ;;  %2704 = vmatmul.bf16.gmra.mxu1 %v5392_v6 }
 0x367   : > { %v2743_v34 = vmax.f32 %v2666_v56, 0.0 }
 0x368   : > { %2526 = vmatmul.bf16.gmra.mxu3 %v5392_v6  ;;  %v2812_v20 = vmax.f32 %v2738_v43, %v2740_v10  ;;  %v2398_v27 = vpop.f32.mrf.mxu2 }
 0x369   : > { %v2822_v63 = vmax.f32 %v2821_v17, %v2743_v34  ;;  %v2399_v45 = vadd.f32 %v2398_v27, %v5450_v29 }
 0x36a   : > { %v2578_v21 = vpop.f32.mrf.mxu0 }
 0x36b   : > { %v2487_v24 = vpop.f32.mrf.mxu3  ;;  %v2579_v50 = vadd.f32 %v2578_v21, %v5442_v59  ;;  %v2667_v52 = vpop.f32.mrf.mxu1  ;;  %v2802_v21 = vmax.f32 %v2800_v4, %v2801_v49 }
 0x36c   : > { %v2488_v3 = vadd.f32 %v2487_v24, %v2399_v45 }
 0x36d   : > { %v2668_v14 = vadd.f32 %v2667_v52, %v2579_v50 }
 0x36e   : > { %v2742_v8 = vmax.f32 %v2488_v3, 0.0 }
 0x36f   : > { %v2745_v46 = vmax.f32 %v2668_v14, 0.0 }
 0x370   : > { %v2813_v35 = vmax.f32 %v2812_v20, %v2742_v8  ;;  %v2400_v6 = vpop.f32.mrf.mxu2 }
 0x371   : > { %v2823_v58 = vmax.f32 %v2822_v63, %v2745_v46  ;;  %v2401_v32 = vadd.f32 %v2400_v6, %v5450_v29 }
 0x372   : > { %v2581_v41 = vpop.f32.mrf.mxu0 }
 0x373   : > { %v2489_v15 = vpop.f32.mrf.mxu3  ;;  %v2824_v1 = vrot.slane %v2823_v58, 4  ;;  %v2582_v48 = vadd.f32 %v2581_v41, %v5442_v59  ;;  %v2670_v18 = vpop.f32.mrf.mxu1 }
 0x374   : > { %v2490_v9 = vadd.f32 %v2489_v15, %v2401_v32 }
 0x375   : > { %v2825_v11 = vmax.f32 %v2823_v58, %v2824_v1  ;;  %v2671_v13 = vadd.f32 %v2670_v18, %v2582_v48  ;;  %2442 = vmatmul.bf16.gmra.mxu2 %v5411_v12  ;;  %2620 = vmatmul.bf16.gmra.mxu0 %v5411_v12 }
 0x376   : > { %v2744_v5 = vmax.f32 %v2490_v9, 0.0  ;;  %2709 = vmatmul.bf16.gmra.mxu1 %v5404_v22 }
 0x377   : > { %v2826_v36 = vrot.slane %v2825_v11, 2  ;;  %v2747_v56 = vmax.f32 %v2671_v13, 0.0 }
 0x378   : > { %2531 = vmatmul.bf16.gmra.mxu3 %v5404_v22  ;;  %v2814_v53 = vmax.f32 %v2813_v35, %v2744_v5  ;;  %v2403_v28 = vpop.f32.mrf.mxu2 }
 0x379   : > { %v2827_v54 = vmax.f32 %v2825_v11, %v2826_v36  ;;  %v2404_v55 = vadd.f32 %v2403_v28, %v5450_v29 }
 0x37a   : > { %v2815_v0 = vrot.slane %v2814_v53, 4  ;;  %v2583_v60 = vpop.f32.mrf.mxu0 }
 0x37b   : > { %v2492_v42 = vpop.f32.mrf.mxu3  ;;  %v2828_v51 = vrot.slane %v2827_v54, 1  ;;  %v2584_v12 = vadd.f32 %v2583_v60, %v5442_v59  ;;  %v2672_v57 = vpop.f32.mrf.mxu1 }
 0x37c   : > { %v2816_v17 = vmax.f32 %v2814_v53, %v2815_v0  ;;  %v2493_v31 = vadd.f32 %v2492_v42, %v2404_v55 }
 0x37d   : > { %v2829_v22 = vmax.f32 %v2827_v54, %v2828_v51  ;;  %v2673_v47 = vadd.f32 %v2672_v57, %v2584_v12 }
 0x37e   : > { %v2817_v38 = vrot.slane %v2816_v17, 2  ;;  %v2746_v14 = vmax.f32 %v2493_v31, 0.0 }
 0x37f   : > { %v5491_v43 = vsel %vm2954_vm0, %v2829_v22, %v2811_v44  ;;  %v2749_v20 = vmax.f32 %v2673_v47, 0.0 }
 0x380   : > { %v2818_v10 = vmax.f32 %v2816_v17, %v2817_v38  ;;  %v2405_v34 = vpop.f32.mrf.mxu2 }
 0x381   : > { %v2839_v39 = vmax.f32 %v2747_v56, %v2749_v20  ;;  %v2406_v63 = vadd.f32 %v2405_v34, %v5450_v29 }
 0x382   : > { %v2819_v27 = vrot.slane %v2818_v10, 1  ;;  %v2586_v24 = vpop.f32.mrf.mxu0 }
 0x383   : > { %v2494_v45 = vpop.f32.mrf.mxu3  ;;  %v2587_v52 = vadd.f32 %v2586_v24, %v5442_v59  ;;  %v2675_v25 = vpop.f32.mrf.mxu1 }
 0x384   : > { %v2820_v3 = vmax.f32 %v2818_v10, %v2819_v27  ;;  %v2495_v50 = vadd.f32 %v2494_v45, %v2406_v63 }
 0x385   : > { %v2676_v35 = vadd.f32 %v2675_v25, %v2587_v52  ;;  %2447 = vmatmul.bf16.gmra.mxu2 %v5423_v2  ;;  %2625 = vmatmul.bf16.gmra.mxu0 %v5423_v2 }
 0x386   : > { %v5496_v8 = vsel %vm2954_vm0, %v2820_v3, %v2802_v21  ;;  %v2748_v23 = vmax.f32 %v2495_v50, 0.0  ;;  %2714 = vmatmul.bf16.gmra.mxu1 %v5416_v61 }
 0x387   : > { %v2751_v6 = vmax.f32 %v2676_v35, 0.0 }
 0x388   : > { %2536 = vmatmul.bf16.gmra.mxu3 %v5416_v61  ;;  %v2830_v46 = vmax.f32 %v2746_v14, %v2748_v23  ;;  %v2408_v30 = vpop.f32.mrf.mxu2 }
 0x389   : > { %v2840_v58 = vmax.f32 %v2839_v39, %v2751_v6  ;;  %v2409_v32 = vadd.f32 %v2408_v30, %v5450_v29 }
 0x38a   : > { %v2588_v33 = vpop.f32.mrf.mxu0 }
 0x38b   : > { %v2497_v15 = vpop.f32.mrf.mxu3  ;;  %v2589_v1 = vadd.f32 %v2588_v33, %v5442_v59  ;;  %v2677_v9 = vpop.f32.mrf.mxu1 }
 0x38c   : > { %v2498_v41 = vadd.f32 %v2497_v15, %v2409_v32 }
 0x38d   : > { %v2678_v18 = vadd.f32 %v2677_v9, %v2589_v1 }
 0x38e   : > { %v2750_v48 = vmax.f32 %v2498_v41, 0.0 }
 0x38f   : > { %v2753_v2 = vmax.f32 %v2678_v18, 0.0 }
 0x390   : > { %v2831_v62 = vmax.f32 %v2830_v46, %v2750_v48  ;;  %v2410_v11 = vpop.f32.mrf.mxu2 }
 0x391   : > { %v2841_v5 = vmax.f32 %v2840_v58, %v2753_v2  ;;  %v2411_v61 = vadd.f32 %v2410_v11, %v5450_v29 }
 0x392   : > { %v2591_v26 = vpop.f32.mrf.mxu0 }
 0x393   : > { %v2499_v13 = vpop.f32.mrf.mxu3  ;;  %v2842_v36 = vrot.slane %v2841_v5, 4  ;;  %v2592_v28 = vadd.f32 %v2591_v26, %v5442_v59  ;;  %v2680_v7 = vpop.f32.mrf.mxu1 }
 0x394   : > { %v2500_v53 = vadd.f32 %v2499_v13, %v2411_v61 }
 0x395   : > { %v2843_v54 = vmax.f32 %v2841_v5, %v2842_v36  ;;  %v2681_v55 = vadd.f32 %v2680_v7, %v2592_v28  ;;  %2452 = vmatmul.bf16.gmra.mxu2 %v5435_v40  ;;  %2630 = vmatmul.bf16.gmra.mxu0 %v5435_v40 }
 0x396   : > { %v2752_v0 = vmax.f32 %v2500_v53, 0.0  ;;  %2719 = vmatmul.bf16.gmra.mxu1 %v5428_v16 }
 0x397   : > { %v2844_v42 = vrot.slane %v2843_v54, 2  ;;  %v2755_v34 = vmax.f32 %v2681_v55, 0.0 }
 0x398   : > { %2541 = vmatmul.bf16.gmra.mxu3 %v5428_v16  ;;  %v2832_v4 = vmax.f32 %v2831_v62, %v2752_v0  ;;  %v2413_v60 = vpop.f32.mrf.mxu2 }
 0x399   : > { %v2845_v51 = vmax.f32 %v2843_v54, %v2844_v42  ;;  %v2414_v31 = vadd.f32 %v2413_v60, %v5450_v29 }
 0x39a   : > { %v2833_v17 = vrot.slane %v2832_v4, 4  ;;  %v2593_v57 = vpop.f32.mrf.mxu0 }
 0x39b   : > { %v2502_v12 = vpop.f32.mrf.mxu3  ;;  %v2846_v44 = vrot.slane %v2845_v51, 1  ;;  %v2594_v47 = vadd.f32 %v2593_v57, %v5442_v59  ;;  %v2682_v49 = vpop.f32.mrf.mxu1 }
 0x39c   : > { %v2834_v22 = vmax.f32 %v2832_v4, %v2833_v17  ;;  %v2503_v38 = vadd.f32 %v2502_v12, %v2414_v31 }
 0x39d   : > { %v2847_v40 = vmax.f32 %v2845_v51, %v2846_v44  ;;  %v2683_v56 = vadd.f32 %v2682_v49, %v2594_v47 }
 0x39e   : > { %v2835_v10 = vrot.slane %v2834_v22, 2 }
 0x39f   : > { %v5514_v16 = vsel %vm2956_vm1, %v2847_v40, %v5491_v43  ;;  %v2757_v27 = vmax.f32 %v2683_v56, 0.0  ;;  %v2754_v43 = vmax.f32 %v2503_v38, 0.0 }
 0x3a0   : > { %v2836_v20 = vmax.f32 %v2834_v22, %v2835_v10  ;;  %v2415_v39 = vpop.f32.mrf.mxu2 }
 0x3a1   : > { %v2857_v45 = vmax.f32 %v2755_v34, %v2757_v27  ;;  %v2416_v24 = vadd.f32 %v2415_v39, %v5450_v29 }
 0x3a2   : > { %v2837_v63 = vrot.slane %v2836_v20, 1  ;;  %v2596_v3 = vpop.f32.mrf.mxu0 }
 0x3a3   : > { %v2504_v21 = vpop.f32.mrf.mxu3  ;;  %v2597_v25 = vadd.f32 %v2596_v3, %v5442_v59  ;;  %v2685_v14 = vpop.f32.mrf.mxu1 }
 0x3a4   : > { %v2838_v50 = vmax.f32 %v2836_v20, %v2837_v63  ;;  %v2505_v52 = vadd.f32 %v2504_v21, %v2416_v24 }
 0x3a5   : > { %v2686_v46 = vadd.f32 %v2685_v14, %v2597_v25  ;;  %2457 = vmatmul.bf16.gmra.mxu2 %v5454_v37  ;;  %2635 = vmatmul.bf16.gmra.mxu0 %v5454_v37 }
 0x3a6   : > { %v5520_v23 = vsel %vm2956_vm1, %v2838_v50, %v5496_v8  ;;  %v2756_v35 = vmax.f32 %v2505_v52, 0.0  ;;  %2724 = vmatmul.bf16.gmra.mxu1 %v5445_v19 }
 0x3a7   : > { %v2759_v30 = vmax.f32 %v2686_v46, 0.0 }
 0x3a8   : > { %2546 = vmatmul.bf16.gmra.mxu3 %v5445_v19  ;;  %v2848_v6 = vmax.f32 %v2754_v43, %v2756_v35  ;;  %v2418_v58 = vpop.f32.mrf.mxu2 }
 0x3a9   : > { %v2858_v32 = vmax.f32 %v2857_v45, %v2759_v30  ;;  %v2419_v15 = vadd.f32 %v2418_v58, %v5450_v29 }
 0x3aa   : > { %v2598_v8 = vpop.f32.mrf.mxu0 }
 0x3ab   : > { %v2507_v33 = vpop.f32.mrf.mxu3  ;;  %v2599_v1 = vadd.f32 %v2598_v8, %v5442_v59  ;;  %v2687_v9 = vpop.f32.mrf.mxu1 }
 0x3ac   : > { %v2508_v41 = vadd.f32 %v2507_v33, %v2419_v15 }
 0x3ad   : > { %v2688_v18 = vadd.f32 %v2687_v9, %v2599_v1 }
 0x3ae   : > { %v2758_v48 = vmax.f32 %v2508_v41, 0.0 }
 0x3af   : > { %v2761_v37 = vmax.f32 %v2688_v18, 0.0 }
 0x3b0   : > { %v2849_v62 = vmax.f32 %v2848_v6, %v2758_v48  ;;  %v2420_v2 = vpop.f32.mrf.mxu2 }
 0x3b1   : > { %v2859_v11 = vmax.f32 %v2858_v32, %v2761_v37  ;;  %v2421_v19 = vadd.f32 %v2420_v2, %v5450_v29 }
 0x3b2   : > { %v2601_v61 = vpop.f32.mrf.mxu0 }
 0x3b3   : > { %v2509_v5 = vpop.f32.mrf.mxu3  ;;  %v2860_v13 = vrot.slane %v2859_v11, 4  ;;  %v2602_v36 = vadd.f32 %v2601_v61, %v5442_v59  ;;  %v2690_v53 = vpop.f32.mrf.mxu1 }
 0x3b4   : > { %v2510_v26 = vadd.f32 %v2509_v5, %v2421_v19 }
 0x3b5   : > { %v2861_v28 = vmax.f32 %v2859_v11, %v2860_v13  ;;  %v2691_v54 = vadd.f32 %v2690_v53, %v2602_v36 }
 0x3b6   : > { %v2760_v7 = vmax.f32 %v2510_v26, 0.0 }
 0x3b7   : > { %v2862_v0 = vrot.slane %v2861_v28, 2  ;;  %v2763_v20 = vmax.f32 %v2691_v54, 0.0 }
 0x3b8   : > { %v2850_v55 = vmax.f32 %v2849_v62, %v2760_v7  ;;  %v2423_v42 = vpop.f32.mrf.mxu2 }
 0x3b9   : > { %v2863_v4 = vmax.f32 %v2861_v28, %v2862_v0  ;;  %v2424_v51 = vadd.f32 %v2423_v42, %v5450_v29 }
 0x3ba   : > { %v2851_v60 = vrot.slane %v2850_v55, 4  ;;  %v2603_v31 = vpop.f32.mrf.mxu0 }
 0x3bb   : > { %v2512_v17 = vpop.f32.mrf.mxu3  ;;  %v2864_v12 = vrot.slane %v2863_v4, 1  ;;  %v2604_v22 = vadd.f32 %v2603_v31, %v5442_v59  ;;  %v2692_v38 = vpop.f32.mrf.mxu1 }
 0x3bc   : > { %v2852_v57 = vmax.f32 %v2850_v55, %v2851_v60  ;;  %v2513_v44 = vadd.f32 %v2512_v17, %v2424_v51 }
 0x3bd   : > { %v2865_v47 = vmax.f32 %v2863_v4, %v2864_v12  ;;  %v2693_v40 = vadd.f32 %v2692_v38, %v2604_v22 }
 0x3be   : > { %v2853_v49 = vrot.slane %v2852_v57, 2 }
 0x3bf   : > { %v5534_v10 = vsel %vm2958_vm2, %v2865_v47, %v5514_v16  ;;  %v2765_v34 = vmax.f32 %v2693_v40, 0.0  ;;  %v2762_v16 = vmax.f32 %v2513_v44, 0.0 }
 0x3c0   : > { %v2854_v56 = vmax.f32 %v2852_v57, %v2853_v49  ;;  %v2425_v27 = vpop.f32.mrf.mxu2 }
 0x3c1   : > { %v2875_v63 = vmax.f32 %v2763_v20, %v2765_v34  ;;  %v2426_v45 = vadd.f32 %v2425_v27, %v5450_v29 }
 0x3c2   : > { %v2855_v39 = vrot.slane %v2854_v56, 1  ;;  %v2606_v21 = vpop.f32.mrf.mxu0 }
 0x3c3   : > { %v2514_v24 = vpop.f32.mrf.mxu3  ;;  %v2607_v52 = vadd.f32 %v2606_v21, %v5442_v59  ;;  %v2695_v25 = vpop.f32.mrf.mxu1 }
 0x3c4   : > { %v2856_v3 = vmax.f32 %v2854_v56, %v2855_v39  ;;  %v2515_v50 = vadd.f32 %v2514_v24, %v2426_v45 }
 0x3c5   : > { %v2696_v35 = vadd.f32 %v2695_v25, %v2607_v52 }
 0x3c6   : > { %v5540_v14 = vsel %vm2958_vm2, %v2856_v3, %v5520_v23  ;;  %v2764_v43 = vmax.f32 %v2515_v50, 0.0 }
 0x3c7   : > { %v2767_v6 = vmax.f32 %v2696_v35, 0.0 }
 0x3c8   : > { %v2866_v46 = vmax.f32 %v2762_v16, %v2764_v43  ;;  %v2428_v30 = vpop.f32.mrf.mxu2 }
 0x3c9   : > { %v2876_v58 = vmax.f32 %v2875_v63, %v2767_v6  ;;  %v2429_v32 = vadd.f32 %v2428_v30, %v5450_v29 }
 0x3ca   : > { %v2608_v33 = vpop.f32.mrf.mxu0 }
 0x3cb   : > { %v2517_v15 = vpop.f32.mrf.mxu3  ;;  %v2609_v41 = vadd.f32 %v2608_v33, %v5442_v59  ;;  %v2697_v1 = vpop.f32.mrf.mxu1 }
 0x3cc   : > { %v2518_v8 = vadd.f32 %v2517_v15, %v2429_v32 }
 0x3cd   : > { %v2698_v48 = vadd.f32 %v2697_v1, %v2609_v41 }
 0x3ce   : > { %v2766_v9 = vmax.f32 %v2518_v8, 0.0 }
 0x3cf   : > { %v2769_v23 = vmax.f32 %v2698_v48, 0.0 }
 0x3d0   : > { %v2867_v18 = vmax.f32 %v2866_v46, %v2766_v9  ;;  %v2430_v62 = vpop.f32.mrf.mxu2 }
 0x3d1   : > { %v2877_v37 = vmax.f32 %v2876_v58, %v2769_v23  ;;  %v2431_v2 = vadd.f32 %v2430_v62, %v5450_v29 }
 0x3d2   : > { %v2611_v19 = vpop.f32.mrf.mxu0 }
 0x3d3   : > { %v2519_v11 = vpop.f32.mrf.mxu3  ;;  %v2878_v5 = vrot.slane %v2877_v37, 4  ;;  %v2612_v13 = vadd.f32 %v2611_v19, %v5442_v59  ;;  %v2700_v26 = vpop.f32.mrf.mxu1 }
 0x3d4   : > { %v2520_v61 = vadd.f32 %v2519_v11, %v2431_v2 }
 0x3d5   : > { %v2879_v36 = vmax.f32 %v2877_v37, %v2878_v5  ;;  %v2701_v28 = vadd.f32 %v2700_v26, %v2612_v13 }
 0x3d6   : > { %v2768_v53 = vmax.f32 %v2520_v61, 0.0 }
 0x3d7   : > { %v2880_v7 = vrot.slane %v2879_v36, 2  ;;  %v2771_v40 = vmax.f32 %v2701_v28, 0.0 }
 0x3d8   : > { %v2868_v54 = vmax.f32 %v2867_v18, %v2768_v53  ;;  %v2433_v0 = vpop.f32.mrf.mxu2 }
 0x3d9   : > { %v2881_v55 = vmax.f32 %v2879_v36, %v2880_v7  ;;  %v2434_v4 = vadd.f32 %v2433_v0, %v5450_v29 }
 0x3da   : > { %v2869_v42 = vrot.slane %v2868_v54, 4  ;;  %v2613_v51 = vpop.f32.mrf.mxu0 }
 0x3db   : > { %v2522_v60 = vpop.f32.mrf.mxu3  ;;  %v2882_v17 = vrot.slane %v2881_v55, 1  ;;  %v2614_v57 = vadd.f32 %v2613_v51, %v5442_v59  ;;  %v2702_v44 = vpop.f32.mrf.mxu1 }
 0x3dc   : > { %v2870_v31 = vmax.f32 %v2868_v54, %v2869_v42  ;;  %v2523_v12 = vadd.f32 %v2522_v60, %v2434_v4 }
 0x3dd   : > { %v2883_v22 = vmax.f32 %v2881_v55, %v2882_v17  ;;  %v2703_v47 = vadd.f32 %v2702_v44, %v2614_v57 }
 0x3de   : > { %v2871_v38 = vrot.slane %v2870_v31, 2  ;;  %v2770_v25 = vmax.f32 %v2523_v12, 0.0 }
 0x3df   : > { %v2773_v56 = vmax.f32 %v2703_v47, 0.0  ;;  %v2971_v20 = vsel %vm2960_vm3, %v2883_v22, %v5534_v10 }
 0x3e0   : > { %v2872_v49 = vmax.f32 %v2870_v31, %v2871_v38  ;;  %v2435_v34 = vpop.f32.mrf.mxu2 }
 0x3e1   : > { %v2893_v39 = vmax.f32 %v2771_v40, %v2773_v56  ;;  %v2436_v63 = vadd.f32 %v2435_v34, %v5450_v29 }
 0x3e2   : > { %v2873_v27 = vrot.slane %v2872_v49, 1  ;;  %v2616_v24 = vpop.f32.mrf.mxu0 }
 0x3e3   : > { %v2524_v45 = vpop.f32.mrf.mxu3  ;;  %v2617_v50 = vadd.f32 %v2616_v24, %v5442_v59  ;;  %v2705_v52 = vpop.f32.mrf.mxu1 }
 0x3e4   : > { %v2874_v21 = vmax.f32 %v2872_v49, %v2873_v27  ;;  %v2525_v3 = vadd.f32 %v2524_v45, %v2436_v63 }
 0x3e5   : > { %v2706_v43 = vadd.f32 %v2705_v52, %v2617_v50 }
 0x3e6   : > { %v2772_v16 = vmax.f32 %v2525_v3, 0.0  ;;  %v2961_v35 = vsel %vm2960_vm3, %v2874_v21, %v5540_v14 }
 0x3e7   : > { %v2775_v10 = vmax.f32 %v2706_v43, 0.0 }
 0x3e8   : > { %v2884_v46 = vmax.f32 %v2770_v25, %v2772_v16  ;;  %v2438_v6 = vpop.f32.mrf.mxu2 }
 0x3e9   : > { %v2894_v30 = vmax.f32 %v2893_v39, %v2775_v10  ;;  %v2439_v58 = vadd.f32 %v2438_v6, %v5450_v29 }
 0x3ea   : > { %v2618_v15 = vpop.f32.mrf.mxu0 }
 0x3eb   : > { %v2527_v32 = vpop.f32.mrf.mxu3  ;;  %v2619_v8 = vadd.f32 %v2618_v15, %v5442_v59  ;;  %v2707_v41 = vpop.f32.mrf.mxu1 }
 0x3ec   : > { %v2528_v33 = vadd.f32 %v2527_v32, %v2439_v58 }
 0x3ed   : > { %v2708_v9 = vadd.f32 %v2707_v41, %v2619_v8 }
 0x3ee   : > { %v2774_v1 = vmax.f32 %v2528_v33, 0.0 }
 0x3ef   : > { %v2777_v18 = vmax.f32 %v2708_v9, 0.0 }
 0x3f0   : > { %v2885_v48 = vmax.f32 %v2884_v46, %v2774_v1  ;;  %v2440_v23 = vpop.f32.mrf.mxu2 }
 0x3f1   : > { %v2895_v62 = vmax.f32 %v2894_v30, %v2777_v18  ;;  %v2441_v14 = vadd.f32 %v2440_v23, %v5450_v29 }
 0x3f2   : > { %v2621_v2 = vpop.f32.mrf.mxu0 }
 0x3f3   : > { %v2529_v37 = vpop.f32.mrf.mxu3  ;;  %v2896_v11 = vrot.slane %v2895_v62, 4  ;;  %v2710_v5 = vpop.f32.mrf.mxu1 }
 0x3f4   : > { %v2530_v19 = vadd.f32 %v2529_v37, %v2441_v14 }
 0x3f5   : > { %v2897_v61 = vmax.f32 %v2895_v62, %v2896_v11 }
 0x3f6   : > { %v2776_v13 = vmax.f32 %v2530_v19, 0.0 }
 0x3f7   : > { %v2898_v26 = vrot.slane %v2897_v61, 2 }
 0x3f8   : > { %v2886_v36 = vmax.f32 %v2885_v48, %v2776_v13  ;;  %v2443_v53 = vpop.f32.mrf.mxu2 }
 0x3f9   : > { %v2899_v28 = vmax.f32 %v2897_v61, %v2898_v26  ;;  %v2444_v10 = vadd.f32 %v2443_v53, %v5450_v29 }
 0x3fa   : > { %v2887_v7 = vrot.slane %v2886_v36, 4  ;;  %v2623_v0 = vpop.f32.mrf.mxu0 }
 0x3fb   : > { %v2532_v54 = vpop.f32.mrf.mxu3  ;;  %v2900_v55 = vrot.slane %v2899_v28, 1  ;;  %v2712_v4 = vpop.f32.mrf.mxu1  ;;  %v2624_v45 = vadd.f32 %v2623_v0, %v5442_v59 }
 0x3fc   : > { %v2888_v42 = vmax.f32 %v2886_v36, %v2887_v7  ;;  %v2533_v9 = vadd.f32 %v2532_v54, %v2444_v10 }
 0x3fd   : > { %v2901_v60 = vmax.f32 %v2899_v28, %v2900_v55  ;;  %v2713_v50 = vadd.f32 %v2712_v4, %v2624_v45 }
 0x3fe   : > { %v2889_v51 = vrot.slane %v2888_v42, 2 }
 0x3ff   : > { %v5557_v31 = vsel %vm2962_vm4, %v2901_v60, %v2971_v20  ;;  %v2622_v20 = vadd.f32 %v2621_v2, %v5442_v59  ;;  %v2781_v6 = vmax.f32 %v2713_v50, 0.0 }
 0x400   : > { %v2890_v17 = vmax.f32 %v2888_v42, %v2889_v51  ;;  %v2445_v12 = vpop.f32.mrf.mxu2 }
 0x401   : > { %v2711_v25 = vadd.f32 %v2710_v5, %v2622_v20  ;;  %v2446_v16 = vadd.f32 %v2445_v12, %v5450_v29  ;;  %v2778_v5 = vmax.f32 %v2533_v9, 0.0 }
 0x402   : > { %v2891_v57 = vrot.slane %v2890_v17, 1  ;;  %v2626_v22 = vpop.f32.mrf.mxu0 }
 0x403   : > { %v2534_v44 = vpop.f32.mrf.mxu3  ;;  %v2715_v47 = vpop.f32.mrf.mxu1  ;;  %v2627_v3 = vadd.f32 %v2626_v22, %v5442_v59  ;;  %v2779_v33 = vmax.f32 %v2711_v25, 0.0 }
 0x404   : > { %v2892_v38 = vmax.f32 %v2890_v17, %v2891_v57  ;;  %v2535_v8 = vadd.f32 %v2534_v44, %v2446_v16 }
 0x405   : > { %v2716_v43 = vadd.f32 %v2715_v47, %v2627_v3  ;;  %v2911_v48 = vmax.f32 %v2779_v33, %v2781_v6 }
 0x406   : > { %v5559_v49 = vsel %vm2962_vm4, %v2892_v38, %v2961_v35  ;;  %v2780_v62 = vmax.f32 %v2535_v8, 0.0 }
 0x407   : > { %v2783_v41 = vmax.f32 %v2716_v43, 0.0 }
 0x408   : > { %v2448_v40 = vpop.f32.mrf.mxu2  ;;  %v2902_v7 = vmax.f32 %v2778_v5, %v2780_v62 }
 0x409   : > { %v2449_v30 = vadd.f32 %v2448_v40, %v5450_v29  ;;  %v2912_v14 = vmax.f32 %v2911_v48, %v2783_v41 }
 0x40a   : > { %v2628_v34 = vpop.f32.mrf.mxu0 }
 0x40b   : > { %v2537_v56 = vpop.f32.mrf.mxu3  ;;  %v2717_v27 = vpop.f32.mrf.mxu1  ;;  %v2629_v52 = vadd.f32 %v2628_v34, %v5442_v59 }
 0x40c   : > { %v2538_v18 = vadd.f32 %v2537_v56, %v2449_v30 }
 0x40d   : > { %v2718_v58 = vadd.f32 %v2717_v27, %v2629_v52 }
 0x40e   : > { %v2782_v61 = vmax.f32 %v2538_v18, 0.0 }
 0x40f   : > { %v2785_v23 = vmax.f32 %v2718_v58, 0.0 }
 0x410   : > { %v2450_v39 = vpop.f32.mrf.mxu2  ;;  %v2903_v55 = vmax.f32 %v2902_v7, %v2782_v61 }
 0x411   : > { %v2451_v1 = vadd.f32 %v2450_v39, %v5450_v29  ;;  %v2913_v13 = vmax.f32 %v2912_v14, %v2785_v23 }
 0x412   : > { %v2631_v24 = vpop.f32.mrf.mxu0 }
 0x413   : > { %v2539_v63 = vpop.f32.mrf.mxu3  ;;  %v2720_v21 = vpop.f32.mrf.mxu1  ;;  %v2632_v36 = vadd.f32 %v2631_v24, %v5442_v59  ;;  %v2914_v42 = vrot.slane %v2913_v13, 4 }
 0x414   : > { %v2540_v37 = vadd.f32 %v2539_v63, %v2451_v1 }
 0x415   : > { %v2721_v4 = vadd.f32 %v2720_v21, %v2632_v36  ;;  %v2915_v47 = vmax.f32 %v2913_v13, %v2914_v42 }
 0x416   : > { %v2784_v54 = vmax.f32 %v2540_v37, 0.0 }
 0x417   : > { %v2787_v56 = vmax.f32 %v2721_v4, 0.0  ;;  %v2916_v50 = vrot.slane %v2915_v47, 2 }
 0x418   : > { %v2453_v35 = vpop.f32.mrf.mxu2  ;;  %v2904_v17 = vmax.f32 %v2903_v55, %v2784_v54 }
 0x419   : > { %v2454_v57 = vadd.f32 %v2453_v35, %v5450_v29 }
 0x41a   : > { %v2633_v32 = vpop.f32.mrf.mxu0  ;;  %v2905_v63 = vrot.slane %v2904_v17, 4 }
 0x41b   : > { %v2542_v46 = vpop.f32.mrf.mxu3  ;;  %v2722_v15 = vpop.f32.mrf.mxu1  ;;  %v2634_v11 = vadd.f32 %v2633_v32, %v5442_v59  ;;  %v2917_v32 = vmax.f32 %v2915_v47, %v2916_v50 }
 0x41c   : > { %v2543_v24 = vadd.f32 %v2542_v46, %v2454_v57  ;;  %v2906_v43 = vmax.f32 %v2904_v17, %v2905_v63 }
 0x41d   : > { %v2723_v0 = vadd.f32 %v2722_v15, %v2634_v11  ;;  %v2918_v48 = vrot.slane %v2917_v32, 1 }
 0x41e   : > { %v2786_v10 = vmax.f32 %v2543_v24, 0.0  ;;  %v2907_v8 = vrot.slane %v2906_v43, 2 }
 0x41f   : > { %v2789_v44 = vmax.f32 %v2723_v0, 0.0 }
 0x420   : > { %v2455_v2 = vpop.f32.mrf.mxu2  ;;  %v2908_v62 = vmax.f32 %v2906_v43, %v2907_v8 }
 0x421   : > { %v2456_v60 = vadd.f32 %v2455_v2, %v5450_v29  ;;  %v2929_v21 = vmax.f32 %v2787_v56, %v2789_v44  ;;  %v2919_v2 = vmax.f32 %v2917_v32, %v2918_v48 }
 0x422   : > { %v2636_v26 = vpop.f32.mrf.mxu0 }
 0x423   : > { %v2544_v19 = vpop.f32.mrf.mxu3  ;;  %v2637_v53 = vadd.f32 %v2636_v26, %v5442_v59  ;;  %v2725_v28 = vpop.f32.mrf.mxu1  ;;  %v2973_v13 = vsel %vm2964_vm5, %v2919_v2, %v5557_v31 }
 0x424   : > { %v2545_v34 = vadd.f32 %v2544_v19, %v2456_v60  ;;  %v2909_v19 = vrot.slane %v2908_v62, 1 }
 0x425   : > { %v2726_v51 = vadd.f32 %v2725_v28, %v2637_v53 }
 0x426   : > { %v2788_v52 = vmax.f32 %v2545_v34, 0.0  ;;  %v2910_v53 = vmax.f32 %v2908_v62, %v2909_v19 }
 0x427   : > { %v2791_v27 = vmax.f32 %v2726_v51, 0.0 }
 0x428   : > { %v2458_v12 = vpop.f32.mrf.mxu2  ;;  %v2920_v15 = vmax.f32 %v2786_v10, %v2788_v52  ;;  %v2965_v54 = vsel %vm2964_vm5, %v2910_v53, %v5559_v49 }
 0x429   : > { %v2459_v22 = vadd.f32 %v2458_v12, %v5450_v29  ;;  %v2930_v25 = vmax.f32 %v2929_v21, %v2791_v27 }
 0x42a   : > { %v2638_v40 = vpop.f32.mrf.mxu0 }
 0x42b   : > { %v2547_v38 = vpop.f32.mrf.mxu3  ;;  %v2639_v39 = vadd.f32 %v2638_v40, %v5442_v59  ;;  %v2727_v45 = vpop.f32.mrf.mxu1 }
 0x42c   : > { %v2548_v20 = vadd.f32 %v2547_v38, %v2459_v22 }
 0x42d   : > { %v2728_v3 = vadd.f32 %v2727_v45, %v2639_v39 }
 0x42e   : > { %v2790_v6 = vmax.f32 %v2548_v20, 0.0 }
 0x42f   : > { %v2793_v16 = vmax.f32 %v2728_v3, 0.0 }
 0x430   : > { %v2460_v35 = vpop.f32.mrf.mxu2  ;;  %v2921_v41 = vmax.f32 %v2920_v15, %v2790_v6 }
 0x431   : > { %v2931_v30 = vmax.f32 %v2930_v25, %v2793_v16  ;;  %v2461_v58 = vadd.f32 %v2460_v35, %v5450_v29 }
 0x433   : > { %v2549_v59 = vpop.f32.mrf.mxu3  ;;  %v2932_v46 = vrot.slane %v2931_v30, 4 }
 0x434   : > { %v2550_v33 = vadd.f32 %v2549_v59, %v2461_v58 }
 0x435   : > { %v2933_v1 = vmax.f32 %v2931_v30, %v2932_v46 }
 0x436   : > { %v2792_v9 = vmax.f32 %v2550_v33, 0.0 }
 0x437   : > { %v2934_v18 = vrot.slane %v2933_v1, 2 }
 0x438   : > { %v2922_v23 = vmax.f32 %v2921_v41, %v2792_v9 }
 0x439   : > { %v2935_v14 = vmax.f32 %v2933_v1, %v2934_v18 }
 0x43a   : > { %v2923_v37 = vrot.slane %v2922_v23, 4 }
 0x43b   : > { %v2936_v29 = vrot.slane %v2935_v14, 1 }
 0x43c   : > { %v2924_v11 = vmax.f32 %v2922_v23, %v2923_v37 }
 0x43d   : > { %v2937_v5 = vmax.f32 %v2935_v14, %v2936_v29 }
 0x43e   : > { %v2925_v61 = vrot.slane %v2924_v11, 2 }
 0x43f   : > { %v2974_v36 = vsel %vm2966_vm6, %v2937_v5, %v2973_v13 }
 0x440   : > { %v2926_v26 = vmax.f32 %v2924_v11, %v2925_v61  ;;  %2978 = vst [vmem:[%s274_s8 + $0x8] sm:$0xff] %v2974_v36 }
 0x442   : > { %v2927_v28 = vrot.slane %v2926_v26, 1 }
 0x444   : > { %v2928_v7 = vmax.f32 %v2926_v26, %v2927_v28 }
 0x446   : > { %v2967_v31 = vsel %vm2966_vm6, %v2928_v7, %v2965_v54 }
 0x447   : > { %2977 = vst [vmem:[%s274_s8] sm:$0xff] %v2967_v31 }
 0x448   : > { %3951 = shalt.err (!%p3948_p3)
}
 0x449   : > { %3885 = dma.vmem_to_hbm [thread:$0]  (%p4066_p5), %s2994_s28, 256, %s2996_s9, %s2980_s13  }
 0x44a PF: > { %p3891_p4 = scmp.ge.s32.totalorder %s3986_s27, 2  ;;  %s3007_s16 = sand.u32 1, %s3974_s24  }
 0x44b   : > { %s3008_s22 = scalar_lea.sflag [#allocation3], %s3007_s16 }
 0x44c   : > { %p3888_p7 = pnand %p3891_p4, %p4070_p6 }
 0x44e   : > { %p3889_p8 = pneg %p3888_p7 }
 0x450   : > { %3969 = dma.done.wait (%p3889_p8), %s3008_s22, 256  }
 0x451   : > { %3971 = vsyncadd (%p3889_p8), %s3008_s22, 4294967040  ;;  %p17_p9 = scmp.ge.s32.totalorder %s4053_s30, 4   ;;  %s5635_s24 = smov %s3978_s25 }
 0x452   : > { %s5636_s25 = smov %s3982_s26  ;;  %s5637_s26 = smov %s4064_s10 }
 0x453   : > { %s5638_s27 = smov %s4053_s30  ;;  %19 = sbr.rel (!%p17_p9) target bundleno = 3 (0x3), region = 83 }
 0x458   :  { %3014 = vsyncpa [#allocation3], 1 }
 0x459   :  { %3016 = vsyncpa [#allocation3 + $0x1], 1 }

</bundles_post_ra>
